<compile_context>
chip_gen: v6e
topology: v6e:2x2x1
jax: 0.10.0
libtpu: 0.0.40
codegen_flags: <defaults>
</compile_context>

<pallas_src>
import functools

import jax
import jax.numpy as jnp
from jax.experimental import pallas as pl
from jax.experimental.pallas import tpu as pltpu

LANE = 128


def _round_up(v, m):
    return ((v + m - 1) // m) * m


# ----------------------------- Pallas kernels ------------------------------ #
def _conv_gemm_kernel(a_ref, b_ref, bias_ref, o_ref):
    # out = relu(A @ W + shift); A/W are bf16, accumulation + bias + ReLU in f32,
    # result stored bf16 (lane-dense 128-wide -> unmasked stores).
    # BN scale already folded into W's columns, conv bias + BN shift into `shift`.
    acc = jnp.dot(a_ref[...], b_ref[...], preferred_element_type=jnp.float32)
    o_ref[...] = jnp.maximum(acc + bias_ref[...], 0.0).astype(o_ref.dtype)


def conv_gemm_bias_relu(a, b, bias):
    """relu(a @ b + bias); a,b bf16, bias f32; b is (K, Np) with Np % 128 == 0."""
    M, K = a.shape
    K2, Np = b.shape
    assert K == K2 and Np % LANE == 0
    # At least 2 grid steps whenever there are enough rows (feeds both v7x
    # TensorCores via dimension_semantics="parallel"); capped at 2048 rows/step
    # (conv1: M=4050 -> 2 steps of ~2032; conv2-4 -> 2 steps each).
    if M <= 64:
        tm = M
    else:
        tm = min(2048, _round_up((M + 1) // 2, 8))
    grid_m = pl.cdiv(M, tm)   # ragged last block handled by Pallas masking
    return pl.pallas_call(
        _conv_gemm_kernel,
        out_shape=jax.ShapeDtypeStruct((M, Np), jnp.bfloat16),
        grid_spec=pltpu.PrefetchScalarGridSpec(
            num_scalar_prefetch=0,
            grid=(grid_m,),
            in_specs=[
                pl.BlockSpec((tm, K), lambda i: (i, 0)),   # A row tile (bf16)
                pl.BlockSpec((K, Np), lambda i: (0, 0)),   # folded conv+BN weights (bf16)
                pl.BlockSpec((1, Np), lambda i: (0, 0)),   # folded bias / BN shift (f32)
            ],
            out_specs=pl.BlockSpec((tm, Np), lambda i: (i, 0)),
        ),
        compiler_params=pltpu.CompilerParams(
            dimension_semantics=("parallel",),
            # Let XLA fuse the im2col-patches / channel-slice producer into the
            # A-operand input instead of a separate HBM round trip.
            allow_input_fusion=[True, False, False],
        ),
    )(a, b, bias)


def _fc_fused_kernel(x_ref, w1_ref, b1_ref, w2_ref, b2_ref, w3_ref, b3_ref,
                     o_ref):
    # Whole MLP (3136->192->64->out, lane-padded to 256/128/128) in one kernel:
    # intermediates stay in VMEM/vregs; bf16 matmul inputs, f32 accumulation.
    h = jnp.dot(x_ref[...], w1_ref[...], preferred_element_type=jnp.float32)
    h = jnp.maximum(h + b1_ref[...], 0.0).astype(jnp.bfloat16)
    h = jnp.dot(h, w2_ref[...], preferred_element_type=jnp.float32)
    h = jnp.maximum(h + b2_ref[...], 0.0).astype(jnp.bfloat16)
    h = jnp.dot(h, w3_ref[...], preferred_element_type=jnp.float32)
    o_ref[...] = (h + b3_ref[...]).astype(o_ref.dtype)


def fc_fused(x, fc):
    B, K = x.shape
    w1, b1, w2, b2, w3, b3 = fc["w1"], fc["b1"], fc["w2"], fc["b2"], fc["w3"], fc["b3"]
    n3 = w3.shape[1]
    # Weights/biases as whole-array VMEM operands: single resident copy, no
    # 2-deep double buffering for a grid of 1 (VMEM headroom, esp. v7x 64 MiB).
    vmem_full = pl.BlockSpec(memory_space=pltpu.MemorySpace.VMEM)
    return pl.pallas_call(
        _fc_fused_kernel,
        out_shape=jax.ShapeDtypeStruct((B, n3), jnp.float32),
        grid_spec=pltpu.PrefetchScalarGridSpec(
            num_scalar_prefetch=0,
            grid=(1,),
            in_specs=[
                pl.BlockSpec((B, K), lambda i: (0, 0)),    # x (bf16)
                vmem_full, vmem_full,                      # w1 (bf16), b1 (f32)
                vmem_full, vmem_full,                      # w2 (bf16), b2 (f32)
                vmem_full, vmem_full,                      # w3 (bf16), b3 (f32)
            ],
            out_specs=pl.BlockSpec((B, n3), lambda i: (0, 0)),
        ),
        compiler_params=pltpu.CompilerParams(
            dimension_semantics=("arbitrary",)),
    )(x, w1, b1, w2, b2, w3, b3)


# --------------------------- parameter init -------------------------------- #
def init_params(key, output_dim):
    """Deterministic synthetic params; PyTorch-like uniform(-1/sqrt(fan_in), ..)."""
    def uinit(k, shape, fan_in):
        bound = 1.0 / float(fan_in) ** 0.5
        return jax.random.uniform(k, shape, jnp.float32, -bound, bound)

    conv_cfg = [(3, 24, 5), (24, 36, 5), (36, 48, 5), (48, 64, 3)]
    fc_cfg = [(3136, 192), (192, 64), (64, output_dim)]
    keys = jax.random.split(key, 2 * (len(conv_cfg) + len(fc_cfg)))
    ki = iter(range(len(keys)))

    params = {"conv": [], "fc": []}
    for cin, cout, k in conv_cfg:
        fan_in = cin * k * k
        params["conv"].append({
            "w": uinit(keys[next(ki)], (cout, cin, k, k), fan_in),
            "b": uinit(keys[next(ki)], (cout,), fan_in),
            "gamma": jnp.ones((cout,), jnp.float32),
            "beta": jnp.zeros((cout,), jnp.float32),
            "mean": jnp.zeros((cout,), jnp.float32),
            "var": jnp.ones((cout,), jnp.float32),
        })
    for cin, cout in fc_cfg:
        params["fc"].append({
            "w": uinit(keys[next(ki)], (cout, cin), cin),
            "b": uinit(keys[next(ki)], (cout,), cin),
        })
    return params


def prepare_params(params, eps=1e-5):
    """One-time offline prep (NOT on the per-step forward path):
    fold BatchNorm(eval) + conv bias into the GEMM weights/shift (in f32, then
    cast weights to bf16 for the MXU), lane-pad all output dims to multiples of
    128, pre-transpose FC weights, and permute fc1's input rows from
    NCHW-flatten (c,h,w) to NHWC-flatten (h,w,c) order."""
    strides = (2, 2, 2, 1)
    prep = {"conv": []}
    for p, s in zip(params["conv"], strides):
        w, b = p["w"], p["b"]                              # w: (cout, cin, k, k)
        cout, cin, k, _ = w.shape
        scale = p["gamma"] / jnp.sqrt(p["var"] + eps)
        shift = p["beta"] + (b - p["mean"]) * scale
        # GEMM weight rows in (cin, kh, kw) order to match
        # lax.conv_general_dilated_patches feature ordering ('c' + 'HW').
        bmat = jnp.transpose(w, (1, 2, 3, 0)).reshape(cin * k * k, cout)
        bmat = bmat * scale[None, :]                       # fold BN scale (f32)
        npad = _round_up(cout, LANE)
        bmat = jnp.pad(bmat, ((0, 0), (0, npad - cout))).astype(jnp.bfloat16)
        shift = jnp.pad(shift, (0, npad - cout)).reshape(1, npad).astype(jnp.float32)
        prep["conv"].append({"w": bmat, "b": shift, "k": k, "s": s, "cout": cout})

    (w1, b1), (w2, b2), (w3, b3) = [(p["w"], p["b"]) for p in params["fc"]]
    d1, d_in = w1.shape                                    # 192, 3136
    d2 = w2.shape[0]                                       # 64
    out_dim = w3.shape[0]
    c4 = params["conv"][-1]["w"].shape[0]                  # 64 channels into fc1
    hw = int(round((d_in // c4) ** 0.5))                   # 7x7 spatial
    n1, n2, n3 = _round_up(d1, LANE), _round_up(d2, LANE), _round_up(out_dim, LANE)
    w1_hwc = jnp.transpose(w1.reshape(d1, c4, hw, hw),
                           (2, 3, 1, 0)).reshape(hw * hw * c4, d1)
    prep["fc"] = {
        "w1": jnp.pad(w1_hwc, ((0, 0), (0, n1 - d1))).astype(jnp.bfloat16),
        "b1": jnp.pad(b1, (0, n1 - d1)).reshape(1, n1),
        "w2": jnp.pad(w2.T, ((0, n1 - d1), (0, n2 - d2))).astype(jnp.bfloat16),
        "b2": jnp.pad(b2, (0, n2 - d2)).reshape(1, n2),
        "w3": jnp.pad(w3.T, ((0, n2 - d2), (0, n3 - out_dim))).astype(jnp.bfloat16),
        "b3": jnp.pad(b3, (0, n3 - out_dim)).reshape(1, n3),
        "out_dim": out_dim,
    }
    return prep


# ----------------------------- forward pass -------------------------------- #
def network_forward(prep, state_nchw):
    """state_nchw: (B, 3, 93, 93) float32 (PyTorch NCHW layout)."""
    # NCHW -> NHWC once and cast to bf16 once: all downstream per-layer DMA /
    # MXU traffic is bf16 (halves HBM bytes); accumulation stays f32 in-kernel.
    x = jnp.transpose(state_nchw, (0, 2, 3, 1)).astype(jnp.bfloat16)
    for p in prep["conv"]:
        n, h, w, c = x.shape
        k, s, cout = p["k"], p["s"], p["cout"]
        ho = (h - k) // s + 1
        wo = (w - k) // s + 1
        # one-op im2col (identity-kernel conv -> exact even in bf16);
        # feature order (cin, kh, kw) matches p["w"] row order
        patches = jax.lax.conv_general_dilated_patches(
            x, filter_shape=(k, k), window_strides=(s, s), padding="VALID",
            dimension_numbers=("NHWC", "HWIO", "NHWC"))
        a = patches.reshape(n * ho * wo, c * k * k)
        y = conv_gemm_bias_relu(a, p["w"], p["b"])         # (M, 128) bf16 lane-dense
        x = y.reshape(n, ho, wo, -1)[..., :cout]           # drop zero-padded chans
    n = x.shape[0]
    xf = x.reshape(n, -1)       # NHWC (h,w,c) flatten; fc1 rows pre-permuted to match
    out = fc_fused(xf, prep["fc"])                          # (B, 128) f32 lane-dense
    return out[:, :prep["fc"]["out_dim"]]


# ------------------------- pure-XLA reference ------------------------------ #
def reference_forward(params, state_nchw, eps=1e-5):
    """Plain-JAX f32 reference of the PyTorch module (eval-mode BatchNorm)."""
    hp = jax.lax.Precision.HIGHEST
    x = state_nchw
    strides = (2, 2, 2, 1)
    for p, s in zip(params["conv"], strides):
        x = jax.lax.conv_general_dilated(
            x, p["w"], window_strides=(s, s), padding="VALID",
            dimension_numbers=("NCHW", "OIHW", "NCHW"), precision=hp)
        x = x + p["b"][None, :, None, None]
        scale = (p["gamma"] / jnp.sqrt(p["var"] + eps))[None, :, None, None]
        x = (x - p["mean"][None, :, None, None]) * scale + p["beta"][None, :, None, None]
        x = jnp.maximum(x, 0.0)
    x = x.reshape(x.shape[0], -1)                          # nn.Flatten on NCHW
    for i, p in enumerate(params["fc"]):
        x = jnp.dot(x, p["w"].T, precision=hp) + p["b"]
        if i < len(params["fc"]) - 1:
            x = jnp.maximum(x, 0.0)
    return x


if __name__ == "__main__":
    key = jax.random.PRNGKey(0)
    pkey, xkey = jax.random.split(key)

    output_dim = 4
    batch = 2
    # 93x93 input -> 45 -> 21 -> 9 -> 7 spatial; 64*7*7 = 3136 matches Linear(3136, 192)
    state = jax.random.normal(xkey, (batch, 3, 93, 93), jnp.float32)

    params = init_params(pkey, output_dim)
    prep = prepare_params(params)

    fwd = jax.jit(functools.partial(network_forward, prep))
    out = jax.block_until_ready(fwd(state))
    assert out.shape == (batch, output_dim), out.shape
    assert bool(jnp.all(jnp.isfinite(out)))

    # correctness check vs a pure-XLA f32 reference of the PyTorch module;
    # tolerance widened vs rev 2 because MXU inputs are now bf16 (accumulation
    # stays f32, so the error remains well inside these bounds).
    ref = jax.block_until_ready(reference_forward(params, state))
    max_err = float(jnp.max(jnp.abs(out - ref)))
    assert bool(jnp.allclose(out, ref, rtol=5e-2, atol=5e-2)), max_err

    print("KERNEL_OK")
</pallas_src>

<mosaic_0001>
module attributes {stable_mosaic.version = 11 : i64} {
  func.func @_conv_gemm_kernel(%arg0: i32, %arg1: memref<2032x75xbf16, #tpu.memory_space<vmem>>, %arg2: memref<75x128xbf16, #tpu.memory_space<vmem>>, %arg3: memref<1x128xf32, #tpu.memory_space<vmem>>, %arg4: memref<2032x128xbf16, #tpu.memory_space<vmem>>) attributes {dimension_semantics = [#tpu.dimension_semantics<parallel>], iteration_bounds = array<i64: 2>, scalar_prefetch = 0 : i64, scratch_operands = 0 : i64, tpu.core_type = #tpu.core_type<tc>, window_params = [{transform_indices = @transform_0, window_bounds = array<i64: 2032, 75>}, {pipeline_mode = #tpu.pipeline_mode<synchronous>, transform_indices = @transform_1, window_bounds = array<i64: 75, 128>}, {pipeline_mode = #tpu.pipeline_mode<synchronous>, transform_indices = @transform_2, window_bounds = array<i64: 1, 128>}, {transform_indices = @transform_3, window_bounds = array<i64: 2032, 128>}]} {
    %c0 = arith.constant 0 : index
    %c0_0 = arith.constant 0 : index
    %0 = vector.load %arg1[%c0, %c0_0] : memref<2032x75xbf16, #tpu.memory_space<vmem>>, vector<2032x75xbf16>
    %c0_1 = arith.constant 0 : index
    %c0_2 = arith.constant 0 : index
    %1 = vector.load %arg2[%c0_1, %c0_2] : memref<75x128xbf16, #tpu.memory_space<vmem>>, vector<75x128xbf16>
    %cst = arith.constant dense<0.000000e+00> : vector<2032x128xf32>
    %2 = tpu.matmul %0, %1, %cst {dimension_numbers = #tpu.dot_dimension_numbers<[1], [0], [0], [1], [0, 0, 1, 1], [], []>} : vector<2032x75xbf16>, vector<75x128xbf16>, vector<2032x128xf32> -> vector<2032x128xf32>
    %c0_3 = arith.constant 0 : index
    %c0_4 = arith.constant 0 : index
    %3 = vector.load %arg3[%c0_3, %c0_4] : memref<1x128xf32, #tpu.memory_space<vmem>>, vector<1x128xf32>
    %4 = vector.broadcast %3 : vector<1x128xf32> to vector<2032x128xf32>
    %5 = arith.addf %2, %4 : vector<2032x128xf32>
    %cst_5 = arith.constant 0.000000e+00 : f32
    %6 = vector.broadcast %cst_5 : f32 to vector<2032x128xf32>
    %7 = arith.maximumf %5, %6 : vector<2032x128xf32>
    %8 = arith.truncf %7 : vector<2032x128xf32> to vector<2032x128xbf16>
    %c0_6 = arith.constant 0 : index
    %c0_7 = arith.constant 0 : index
    %9 = vector.load %arg4[%c0_6, %c0_7] : memref<2032x128xbf16, #tpu.memory_space<vmem>>, vector<2032x128xbf16>
    tpu.vector_store %arg4[%c0_6, %c0_7], %8 {strides = array<i32>} : memref<2032x128xbf16, #tpu.memory_space<vmem>>, vector<2032x128xbf16>,
    return
  }
  func.func @transform_0(%arg0: i32) -> (i32, i32) {
    %c0_i32 = arith.constant 0 : i32
    %c0_i32_0 = arith.constant 0 : i32
    return %arg0, %c0_i32 : i32, i32
  }
  func.func @transform_1(%arg0: i32) -> (i32, i32) {
    %c0_i32 = arith.constant 0 : i32
    %c0_i32_0 = arith.constant 0 : i32
    %c0_i32_1 = arith.constant 0 : i32
    return %c0_i32, %c0_i32_0 : i32, i32
  }
  func.func @transform_2(%arg0: i32) -> (i32, i32) {
    %c0_i32 = arith.constant 0 : i32
    %c0_i32_0 = arith.constant 0 : i32
    %c0_i32_1 = arith.constant 0 : i32
    return %c0_i32, %c0_i32_0 : i32, i32
  }
  func.func @transform_3(%arg0: i32) -> (i32, i32) {
    %c0_i32 = arith.constant 0 : i32
    %c0_i32_0 = arith.constant 0 : i32
    return %arg0, %c0_i32 : i32, i32
  }
}

module attributes {stable_mosaic.version = 11 : i64} {
  func.func @_conv_gemm_kernel(%arg0: i32, %arg1: memref<448x600xbf16, #tpu.memory_space<vmem>>, %arg2: memref<600x128xbf16, #tpu.memory_space<vmem>>, %arg3: memref<1x128xf32, #tpu.memory_space<vmem>>, %arg4: memref<448x128xbf16, #tpu.memory_space<vmem>>) attributes {dimension_semantics = [#tpu.dimension_semantics<parallel>], iteration_bounds = array<i64: 2>, scalar_prefetch = 0 : i64, scratch_operands = 0 : i64, tpu.core_type = #tpu.core_type<tc>, window_params = [{transform_indices = @transform_0, window_bounds = array<i64: 448, 600>}, {pipeline_mode = #tpu.pipeline_mode<synchronous>, transform_indices = @transform_1, window_bounds = array<i64: 600, 128>}, {pipeline_mode = #tpu.pipeline_mode<synchronous>, transform_indices = @transform_2, window_bounds = array<i64: 1, 128>}, {transform_indices = @transform_3, window_bounds = array<i64: 448, 128>}]} {
    %c0 = arith.constant 0 : index
    %c0_0 = arith.constant 0 : index
    %0 = vector.load %arg1[%c0, %c0_0] : memref<448x600xbf16, #tpu.memory_space<vmem>>, vector<448x600xbf16>
    %c0_1 = arith.constant 0 : index
    %c0_2 = arith.constant 0 : index
    %1 = vector.load %arg2[%c0_1, %c0_2] : memref<600x128xbf16, #tpu.memory_space<vmem>>, vector<600x128xbf16>
    %cst = arith.constant dense<0.000000e+00> : vector<448x128xf32>
    %2 = tpu.matmul %0, %1, %cst {dimension_numbers = #tpu.dot_dimension_numbers<[1], [0], [0], [1], [0, 0, 1, 1], [], []>} : vector<448x600xbf16>, vector<600x128xbf16>, vector<448x128xf32> -> vector<448x128xf32>
    %c0_3 = arith.constant 0 : index
    %c0_4 = arith.constant 0 : index
    %3 = vector.load %arg3[%c0_3, %c0_4] : memref<1x128xf32, #tpu.memory_space<vmem>>, vector<1x128xf32>
    %4 = vector.broadcast %3 : vector<1x128xf32> to vector<448x128xf32>
    %5 = arith.addf %2, %4 : vector<448x128xf32>
    %cst_5 = arith.constant 0.000000e+00 : f32
    %6 = vector.broadcast %cst_5 : f32 to vector<448x128xf32>
    %7 = arith.maximumf %5, %6 : vector<448x128xf32>
    %8 = arith.truncf %7 : vector<448x128xf32> to vector<448x128xbf16>
    %c0_6 = arith.constant 0 : index
    %c0_7 = arith.constant 0 : index
    %9 = vector.load %arg4[%c0_6, %c0_7] : memref<448x128xbf16, #tpu.memory_space<vmem>>, vector<448x128xbf16>
    tpu.vector_store %arg4[%c0_6, %c0_7], %8 {strides = array<i32>} : memref<448x128xbf16, #tpu.memory_space<vmem>>, vector<448x128xbf16>,
    return
  }
  func.func @transform_0(%arg0: i32) -> (i32, i32) {
    %c0_i32 = arith.constant 0 : i32
    %c0_i32_0 = arith.constant 0 : i32
    return %arg0, %c0_i32 : i32, i32
  }
  func.func @transform_1(%arg0: i32) -> (i32, i32) {
    %c0_i32 = arith.constant 0 : i32
    %c0_i32_0 = arith.constant 0 : i32
    %c0_i32_1 = arith.constant 0 : i32
    return %c0_i32, %c0_i32_0 : i32, i32
  }
  func.func @transform_2(%arg0: i32) -> (i32, i32) {
    %c0_i32 = arith.constant 0 : i32
    %c0_i32_0 = arith.constant 0 : i32
    %c0_i32_1 = arith.constant 0 : i32
    return %c0_i32, %c0_i32_0 : i32, i32
  }
  func.func @transform_3(%arg0: i32) -> (i32, i32) {
    %c0_i32 = arith.constant 0 : i32
    %c0_i32_0 = arith.constant 0 : i32
    return %arg0, %c0_i32 : i32, i32
  }
}

module attributes {stable_mosaic.version = 11 : i64} {
  func.func @_conv_gemm_kernel(%arg0: i32, %arg1: memref<88x900xbf16, #tpu.memory_space<vmem>>, %arg2: memref<900x128xbf16, #tpu.memory_space<vmem>>, %arg3: memref<1x128xf32, #tpu.memory_space<vmem>>, %arg4: memref<88x128xbf16, #tpu.memory_space<vmem>>) attributes {dimension_semantics = [#tpu.dimension_semantics<parallel>], iteration_bounds = array<i64: 2>, scalar_prefetch = 0 : i64, scratch_operands = 0 : i64, tpu.core_type = #tpu.core_type<tc>, window_params = [{transform_indices = @transform_0, window_bounds = array<i64: 88, 900>}, {pipeline_mode = #tpu.pipeline_mode<synchronous>, transform_indices = @transform_1, window_bounds = array<i64: 900, 128>}, {pipeline_mode = #tpu.pipeline_mode<synchronous>, transform_indices = @transform_2, window_bounds = array<i64: 1, 128>}, {transform_indices = @transform_3, window_bounds = array<i64: 88, 128>}]} {
    %c0 = arith.constant 0 : index
    %c0_0 = arith.constant 0 : index
    %0 = vector.load %arg1[%c0, %c0_0] : memref<88x900xbf16, #tpu.memory_space<vmem>>, vector<88x900xbf16>
    %c0_1 = arith.constant 0 : index
    %c0_2 = arith.constant 0 : index
    %1 = vector.load %arg2[%c0_1, %c0_2] : memref<900x128xbf16, #tpu.memory_space<vmem>>, vector<900x128xbf16>
    %cst = arith.constant dense<0.000000e+00> : vector<88x128xf32>
    %2 = tpu.matmul %0, %1, %cst {dimension_numbers = #tpu.dot_dimension_numbers<[1], [0], [0], [1], [0, 0, 1, 1], [], []>} : vector<88x900xbf16>, vector<900x128xbf16>, vector<88x128xf32> -> vector<88x128xf32>
    %c0_3 = arith.constant 0 : index
    %c0_4 = arith.constant 0 : index
    %3 = vector.load %arg3[%c0_3, %c0_4] : memref<1x128xf32, #tpu.memory_space<vmem>>, vector<1x128xf32>
    %4 = vector.broadcast %3 : vector<1x128xf32> to vector<88x128xf32>
    %5 = arith.addf %2, %4 : vector<88x128xf32>
    %cst_5 = arith.constant 0.000000e+00 : f32
    %6 = vector.broadcast %cst_5 : f32 to vector<88x128xf32>
    %7 = arith.maximumf %5, %6 : vector<88x128xf32>
    %8 = arith.truncf %7 : vector<88x128xf32> to vector<88x128xbf16>
    %c0_6 = arith.constant 0 : index
    %c0_7 = arith.constant 0 : index
    %9 = vector.load %arg4[%c0_6, %c0_7] : memref<88x128xbf16, #tpu.memory_space<vmem>>, vector<88x128xbf16>
    tpu.vector_store %arg4[%c0_6, %c0_7], %8 {strides = array<i32>} : memref<88x128xbf16, #tpu.memory_space<vmem>>, vector<88x128xbf16>,
    return
  }
  func.func @transform_0(%arg0: i32) -> (i32, i32) {
    %c0_i32 = arith.constant 0 : i32
    %c0_i32_0 = arith.constant 0 : i32
    return %arg0, %c0_i32 : i32, i32
  }
  func.func @transform_1(%arg0: i32) -> (i32, i32) {
    %c0_i32 = arith.constant 0 : i32
    %c0_i32_0 = arith.constant 0 : i32
    %c0_i32_1 = arith.constant 0 : i32
    return %c0_i32, %c0_i32_0 : i32, i32
  }
  func.func @transform_2(%arg0: i32) -> (i32, i32) {
    %c0_i32 = arith.constant 0 : i32
    %c0_i32_0 = arith.constant 0 : i32
    %c0_i32_1 = arith.constant 0 : i32
    return %c0_i32, %c0_i32_0 : i32, i32
  }
  func.func @transform_3(%arg0: i32) -> (i32, i32) {
    %c0_i32 = arith.constant 0 : i32
    %c0_i32_0 = arith.constant 0 : i32
    return %arg0, %c0_i32 : i32, i32
  }
}

module attributes {stable_mosaic.version = 11 : i64} {
  func.func @_conv_gemm_kernel(%arg0: i32, %arg1: memref<56x432xbf16, #tpu.memory_space<vmem>>, %arg2: memref<432x128xbf16, #tpu.memory_space<vmem>>, %arg3: memref<1x128xf32, #tpu.memory_space<vmem>>, %arg4: memref<56x128xbf16, #tpu.memory_space<vmem>>) attributes {dimension_semantics = [#tpu.dimension_semantics<parallel>], iteration_bounds = array<i64: 2>, scalar_prefetch = 0 : i64, scratch_operands = 0 : i64, tpu.core_type = #tpu.core_type<tc>, window_params = [{transform_indices = @transform_0, window_bounds = array<i64: 56, 432>}, {pipeline_mode = #tpu.pipeline_mode<synchronous>, transform_indices = @transform_1, window_bounds = array<i64: 432, 128>}, {pipeline_mode = #tpu.pipeline_mode<synchronous>, transform_indices = @transform_2, window_bounds = array<i64: 1, 128>}, {transform_indices = @transform_3, window_bounds = array<i64: 56, 128>}]} {
    %c0 = arith.constant 0 : index
    %c0_0 = arith.constant 0 : index
    %0 = vector.load %arg1[%c0, %c0_0] : memref<56x432xbf16, #tpu.memory_space<vmem>>, vector<56x432xbf16>
    %c0_1 = arith.constant 0 : index
    %c0_2 = arith.constant 0 : index
    %1 = vector.load %arg2[%c0_1, %c0_2] : memref<432x128xbf16, #tpu.memory_space<vmem>>, vector<432x128xbf16>
    %cst = arith.constant dense<0.000000e+00> : vector<56x128xf32>
    %2 = tpu.matmul %0, %1, %cst {dimension_numbers = #tpu.dot_dimension_numbers<[1], [0], [0], [1], [0, 0, 1, 1], [], []>} : vector<56x432xbf16>, vector<432x128xbf16>, vector<56x128xf32> -> vector<56x128xf32>
    %c0_3 = arith.constant 0 : index
    %c0_4 = arith.constant 0 : index
    %3 = vector.load %arg3[%c0_3, %c0_4] : memref<1x128xf32, #tpu.memory_space<vmem>>, vector<1x128xf32>
    %4 = vector.broadcast %3 : vector<1x128xf32> to vector<56x128xf32>
    %5 = arith.addf %2, %4 : vector<56x128xf32>
    %cst_5 = arith.constant 0.000000e+00 : f32
    %6 = vector.broadcast %cst_5 : f32 to vector<56x128xf32>
    %7 = arith.maximumf %5, %6 : vector<56x128xf32>
    %8 = arith.truncf %7 : vector<56x128xf32> to vector<56x128xbf16>
    %c0_6 = arith.constant 0 : index
    %c0_7 = arith.constant 0 : index
    %9 = vector.load %arg4[%c0_6, %c0_7] : memref<56x128xbf16, #tpu.memory_space<vmem>>, vector<56x128xbf16>
    tpu.vector_store %arg4[%c0_6, %c0_7], %8 {strides = array<i32>} : memref<56x128xbf16, #tpu.memory_space<vmem>>, vector<56x128xbf16>,
    return
  }
  func.func @transform_0(%arg0: i32) -> (i32, i32) {
    %c0_i32 = arith.constant 0 : i32
    %c0_i32_0 = arith.constant 0 : i32
    return %arg0, %c0_i32 : i32, i32
  }
  func.func @transform_1(%arg0: i32) -> (i32, i32) {
    %c0_i32 = arith.constant 0 : i32
    %c0_i32_0 = arith.constant 0 : i32
    %c0_i32_1 = arith.constant 0 : i32
    return %c0_i32, %c0_i32_0 : i32, i32
  }
  func.func @transform_2(%arg0: i32) -> (i32, i32) {
    %c0_i32 = arith.constant 0 : i32
    %c0_i32_0 = arith.constant 0 : i32
    %c0_i32_1 = arith.constant 0 : i32
    return %c0_i32, %c0_i32_0 : i32, i32
  }
  func.func @transform_3(%arg0: i32) -> (i32, i32) {
    %c0_i32 = arith.constant 0 : i32
    %c0_i32_0 = arith.constant 0 : i32
    return %arg0, %c0_i32 : i32, i32
  }
}

module attributes {stable_mosaic.version = 11 : i64} {
  func.func @_fc_fused_kernel(%arg0: i32, %arg1: memref<2x3136xbf16, #tpu.memory_space<vmem>>, %arg2: memref<3136x256xbf16, #tpu.memory_space<vmem>>, %arg3: memref<1x256xf32, #tpu.memory_space<vmem>>, %arg4: memref<256x128xbf16, #tpu.memory_space<vmem>>, %arg5: memref<1x128xf32, #tpu.memory_space<vmem>>, %arg6: memref<128x128xbf16, #tpu.memory_space<vmem>>, %arg7: memref<1x128xf32, #tpu.memory_space<vmem>>, %arg8: memref<2x128xf32, #tpu.memory_space<vmem>>) attributes {dimension_semantics = [#tpu.dimension_semantics<arbitrary>], iteration_bounds = array<i64: 1>, scalar_prefetch = 0 : i64, scratch_operands = 0 : i64, tpu.core_type = #tpu.core_type<tc>, window_params = [{pipeline_mode = #tpu.pipeline_mode<synchronous>, transform_indices = @transform_0, window_bounds = array<i64: 2, 3136>}, {pipeline_mode = #tpu.pipeline_mode<synchronous>, transform_indices = @transform_1, window_bounds = array<i64: 3136, 256>}, {pipeline_mode = #tpu.pipeline_mode<synchronous>, transform_indices = @transform_2, window_bounds = array<i64: 1, 256>}, {pipeline_mode = #tpu.pipeline_mode<synchronous>, transform_indices = @transform_3, window_bounds = array<i64: 256, 128>}, {pipeline_mode = #tpu.pipeline_mode<synchronous>, transform_indices = @transform_4, window_bounds = array<i64: 1, 128>}, {pipeline_mode = #tpu.pipeline_mode<synchronous>, transform_indices = @transform_5, window_bounds = array<i64: 128, 128>}, {pipeline_mode = #tpu.pipeline_mode<synchronous>, transform_indices = @transform_6, window_bounds = array<i64: 1, 128>}, {pipeline_mode = #tpu.pipeline_mode<synchronous>, transform_indices = @transform_7, window_bounds = array<i64: 2, 128>}]} {
    %c0 = arith.constant 0 : index
    %c0_0 = arith.constant 0 : index
    %0 = vector.load %arg1[%c0, %c0_0] : memref<2x3136xbf16, #tpu.memory_space<vmem>>, vector<2x3136xbf16>
    %c0_1 = arith.constant 0 : index
    %c0_2 = arith.constant 0 : index
    %1 = vector.load %arg2[%c0_1, %c0_2] : memref<3136x256xbf16, #tpu.memory_space<vmem>>, vector<3136x256xbf16>
    %cst = arith.constant dense<0.000000e+00> : vector<2x256xf32>
    %2 = tpu.matmul %0, %1, %cst {dimension_numbers = #tpu.dot_dimension_numbers<[1], [0], [0], [1], [0, 0, 1, 1], [], []>} : vector<2x3136xbf16>, vector<3136x256xbf16>, vector<2x256xf32> -> vector<2x256xf32>
    %c0_3 = arith.constant 0 : index
    %c0_4 = arith.constant 0 : index
    %3 = vector.load %arg3[%c0_3, %c0_4] : memref<1x256xf32, #tpu.memory_space<vmem>>, vector<1x256xf32>
    %4 = vector.broadcast %3 : vector<1x256xf32> to vector<2x256xf32>
    %5 = arith.addf %2, %4 : vector<2x256xf32>
    %cst_5 = arith.constant 0.000000e+00 : f32
    %6 = vector.broadcast %cst_5 : f32 to vector<2x256xf32>
    %7 = arith.maximumf %5, %6 : vector<2x256xf32>
    %8 = arith.truncf %7 : vector<2x256xf32> to vector<2x256xbf16>
    %c0_6 = arith.constant 0 : index
    %c0_7 = arith.constant 0 : index
    %9 = vector.load %arg4[%c0_6, %c0_7] : memref<256x128xbf16, #tpu.memory_space<vmem>>, vector<256x128xbf16>
    %cst_8 = arith.constant dense<0.000000e+00> : vector<2x128xf32>
    %10 = tpu.matmul %8, %9, %cst_8 {dimension_numbers = #tpu.dot_dimension_numbers<[1], [0], [0], [1], [0, 0, 1, 1], [], []>} : vector<2x256xbf16>, vector<256x128xbf16>, vector<2x128xf32> -> vector<2x128xf32>
    %c0_9 = arith.constant 0 : index
    %c0_10 = arith.constant 0 : index
    %11 = vector.load %arg5[%c0_9, %c0_10] : memref<1x128xf32, #tpu.memory_space<vmem>>, vector<1x128xf32>
    %12 = vector.broadcast %11 : vector<1x128xf32> to vector<2x128xf32>
    %13 = arith.addf %10, %12 : vector<2x128xf32>
    %cst_11 = arith.constant 0.000000e+00 : f32
    %14 = vector.broadcast %cst_11 : f32 to vector<2x128xf32>
    %15 = arith.maximumf %13, %14 : vector<2x128xf32>
    %16 = arith.truncf %15 : vector<2x128xf32> to vector<2x128xbf16>
    %c0_12 = arith.constant 0 : index
    %c0_13 = arith.constant 0 : index
    %17 = vector.load %arg6[%c0_12, %c0_13] : memref<128x128xbf16, #tpu.memory_space<vmem>>, vector<128x128xbf16>
    %cst_14 = arith.constant dense<0.000000e+00> : vector<2x128xf32>
    %18 = tpu.matmul %16, %17, %cst_14 {dimension_numbers = #tpu.dot_dimension_numbers<[1], [0], [0], [1], [0, 0, 1, 1], [], []>} : vector<2x128xbf16>, vector<128x128xbf16>, vector<2x128xf32> -> vector<2x128xf32>
    %c0_15 = arith.constant 0 : index
    %c0_16 = arith.constant 0 : index
    %19 = vector.load %arg7[%c0_15, %c0_16] : memref<1x128xf32, #tpu.memory_space<vmem>>, vector<1x128xf32>
    %20 = vector.broadcast %19 : vector<1x128xf32> to vector<2x128xf32>
    %21 = arith.addf %18, %20 : vector<2x128xf32>
    %c0_17 = arith.constant 0 : index
    %c0_18 = arith.constant 0 : index
    %22 = vector.load %arg8[%c0_17, %c0_18] : memref<2x128xf32, #tpu.memory_space<vmem>>, vector<2x128xf32>
    tpu.vector_store %arg8[%c0_17, %c0_18], %21 {strides = array<i32>} : memref<2x128xf32, #tpu.memory_space<vmem>>, vector<2x128xf32>,
    return
  }
  func.func @transform_0(%arg0: i32) -> (i32, i32) {
    %c0_i32 = arith.constant 0 : i32
    %c0_i32_0 = arith.constant 0 : i32
    %c0_i32_1 = arith.constant 0 : i32
    return %c0_i32, %c0_i32_0 : i32, i32
  }
  func.func @transform_1(%arg0: i32) -> (i32, i32) {
    %c0_i32 = arith.constant 0 : i32
    %c0_i32_0 = arith.constant 0 : i32
    %c0_i32_1 = arith.constant 0 : i32
    return %c0_i32, %c0_i32_0 : i32, i32
  }
  func.func @transform_2(%arg0: i32) -> (i32, i32) {
    %c0_i32 = arith.constant 0 : i32
    %c0_i32_0 = arith.constant 0 : i32
    %c0_i32_1 = arith.constant 0 : i32
    return %c0_i32, %c0_i32_0 : i32, i32
  }
  func.func @transform_3(%arg0: i32) -> (i32, i32) {
    %c0_i32 = arith.constant 0 : i32
    %c0_i32_0 = arith.constant 0 : i32
    %c0_i32_1 = arith.constant 0 : i32
    return %c0_i32, %c0_i32_0 : i32, i32
  }
  func.func @transform_4(%arg0: i32) -> (i32, i32) {
    %c0_i32 = arith.constant 0 : i32
    %c0_i32_0 = arith.constant 0 : i32
    %c0_i32_1 = arith.constant 0 : i32
    return %c0_i32, %c0_i32_0 : i32, i32
  }
  func.func @transform_5(%arg0: i32) -> (i32, i32) {
    %c0_i32 = arith.constant 0 : i32
    %c0_i32_0 = arith.constant 0 : i32
    %c0_i32_1 = arith.constant 0 : i32
    return %c0_i32, %c0_i32_0 : i32, i32
  }
  func.func @transform_6(%arg0: i32) -> (i32, i32) {
    %c0_i32 = arith.constant 0 : i32
    %c0_i32_0 = arith.constant 0 : i32
    %c0_i32_1 = arith.constant 0 : i32
    return %c0_i32, %c0_i32_0 : i32, i32
  }
  func.func @transform_7(%arg0: i32) -> (i32, i32) {
    %c0_i32 = arith.constant 0 : i32
    %c0_i32_0 = arith.constant 0 : i32
    %c0_i32_1 = arith.constant 0 : i32
    return %c0_i32, %c0_i32_0 : i32, i32
  }
}

</mosaic_0001>

<bundles_post_ra>
// kernel: network_forward.5
= control target key start
LH: loop header
LB: loop body
LE: loop exit
PB: predicated region body
PF: predicated region fallthrough
CT: control target
= control target key end

     0   :  { %s7107_s12 = smov 0   ;;  %s7109_s13 = smov 0   ;;  %s8277_s0 = inlined_call_operand.vmem [shape: bf16[4050,75], index: 0, kind: input, shape index: {}]   ;;  %s8278_s1 = inlined_call_operand.vmem [shape: bf16[75,128], index: 1, kind: input, shape index: {}]   ;;  %s8279_s2 = inlined_call_operand.vmem [shape: f32[1,128], index: 2, kind: input, shape index: {}]   ;;  %s8280_s3 = inlined_call_operand.vmem [shape: bf16[4050,128], index: 3, kind: output, shape index: {}]  }
   0x1   :  { %s7111_s14 = smov 0  }
   0x2 LB: > { %s7120_s15 = sadd.s32 4294967295, %s7050_s14   ;;  %s7122_s16 = sadd.s32 1, %s7050_s14   ;;  %s7050_s14 = sphi %s7111_s14, %s8287_s14   ;;  %s7046_s13 = sphi %s7109_s13, %s8286_s13   ;;  %s7042_s12 = sphi %s7107_s12, %s8285_s12  }
   0x3   : > { %s85_s17 = ssub.s32 %s7050_s14, %s7122_s16  ;;  %s88_s18 = sadd.s32 1, %s7046_s13 }
   0x4   : > { %p86_p0 = scmp.eq.s32.totalorder %s85_s17, 0  ;;  %p98_p1 = scmp.ne.s32.totalorder %s7046_s13, %s7042_s12 }
   0x5   : > { %p99_p2 = scmp.eq.s32.totalorder %s7120_s15, 1  ;;  %p4561_p3 = scmp.ge.s32.totalorder %s7050_s14, 1 }
   0x6   : > { %s7130_s19 = scalar_select %p86_p0, %s7046_s13, %s88_s18  }
   0x7   : > { %p7132_p4 = por %p99_p2, %p98_p1  ;;  %p146_p5 = scmp.lt.s32.totalorder %s7050_s14, 3 }
   0x9   : > { %p147_p6 = pnand %p4561_p3, %p146_p5 }
   0xa   : > { %s7144_s23 = smul.u32 (!%p147_p6), 254, %s7120_s15  ;;  %s170_s14 = sand.u32 (!%p147_p6), 1, %s7042_s12  }
   0xb   : > { %150 = sbr.rel (%p147_p6) target bundleno = 829 (0x33d), region = 32 }
   0xc   : > { %p178_p7 = scmp.lt.s32.totalorder (!%p147_p6), %s7144_s23, 506  ;;  %s6770_s17 = smul.u32 (!%p147_p6), 1016, %s170_s14 }
   0xe   : > { %s7394_s12 = scalar_lea.vmem (!%p147_p6), [#allocation2], %s6770_s17  }
  0x10   : > { %vm1510_vm0 = vcmask 1044480   ;;  %v7084_v0 = vmov 0.0   ;;  %v6862_v1 = vld [vmem:[%s8278_s1 + $0x20] sm:$0x3f]   ;;  %vm1511_vm1 = vcmask 1045504   ;;  %v7085_v2 = vmov 65535  }
  0x11   : > { %6242 = vmatprep.subr.bf16.mxu0 %v7084_v0  ;;  %6760 = vmatprep.subr.bf16.mxu1 %v7084_v0  ;;  %v1512_v3 = vsel %vm1510_vm0, 4294967295, %v7085_v2  ;;  %vm7086_vm2 = vmmov 0   ;;  %v6863_v6 = vld [vmem:[%s8278_s1 + $0x18] sm:$0xff]   ;;  %s179_s26 = scalar_select %p178_p7, %s7144_s23, 506  ;;  %v6864_v7 = vld [vmem:[%s8278_s1 + $0x10] sm:$0xff]   ;;  %v6865_v8 = vld [vmem:[%s8278_s1 + $0x8] sm:$0xff]  }
  0x12   : > { %v1513_v4 = vsel %vm1511_vm1, %v1512_v3, 0  ;;  %6252 = vmatprep.mubr.msk.bf16.mxu0 %vm7086_vm2, %v7084_v0  ;;  %6508 = vmatprep.mubr.msk.bf16.mxu1 %vm7086_vm2, %v7084_v0  ;;  %v6866_v9 = vld [vmem:[%s8278_s1] sm:$0xff]   ;;  %vm1128_vm3 = vcmask 613376   ;;  %s4098_s25 = ssub.s32 (%p7132_p4), 507, %s7144_s23 }
  0x13   : > { %v1515_v5 = vand.u32 %v6862_v1, %v1513_v4  ;;  %s4562_s29 = sshll.u32 %s179_s26, 2  ;;  %v7372_v60 = vld [vmem:[%s8279_s2] ss:$0 sm:$0xff]  ;;  %s5346_s26 = smul.u32 (%p7132_p4), 1016, %s7120_s15 }
  0x14   : > { %s7163_s5 = scalar_lea.vmem %s8277_s0, %s4562_s29  ;;  %p4099_p8 = scmp.lt.s32.totalorder (%p7132_p4), %s4098_s25, 254 }
  0x15   : > { %6243 = vmatpush3.bf16.msra.mxu0 %v1515_v5  ;;  %6765 = vmatpush3.bf16.msra.mxu1 %v1515_v5  ;;  %v6867_v10 = vld [vmem:[%s7163_s5] sm:$0xff]   ;;  %v6869_v12 = vld [vmem:[%s7163_s5 + $0x8] sm:$0xff]   ;;  %v6871_v14 = vld [vmem:[%s7163_s5 + $0x10] sm:$0xff]   ;;  %s8085_s29 = scalar_lea.vmem (%p7132_p4), %s8280_s3, %s5346_s26  }
  0x16   : > { %6244 = vmatprep.subr.bf16.mxu0 %v7084_v0  ;;  %6761 = vmatprep.subr.bf16.mxu1 %v7084_v0  ;;  %v6868_v11 = vld [vmem:[%s7163_s5 + $0x200] sm:$0xff]   ;;  %v6870_v13 = vld [vmem:[%s7163_s5 + $0x208] sm:$0xff]   ;;  %v6872_v15 = vld [vmem:[%s7163_s5 + $0x210] sm:$0xff]  }
  0x17   : > { %v6873_v16 = vld [vmem:[%s7163_s5 + $0x18] sm:$0xff]   ;;  %v6875_v18 = vld [vmem:[%s7163_s5 + $0x20] sm:$0xff]   ;;  %v6877_v20 = vld [vmem:[%s7163_s5 + $0x28] sm:$0xff]  }
  0x18   : > { %v6874_v17 = vld [vmem:[%s7163_s5 + $0x218] sm:$0xff]   ;;  %v6876_v19 = vld [vmem:[%s7163_s5 + $0x220] sm:$0xff]   ;;  %v6878_v21 = vld [vmem:[%s7163_s5 + $0x228] sm:$0xff]  }
  0x19   : > { %6245 = vmatpush3.bf16.msra.mxu0 %v6863_v6  ;;  %6766 = vmatpush3.bf16.msra.mxu1 %v6863_v6  ;;  %v6879_v22 = vld [vmem:[%s7163_s5 + $0x30] sm:$0xff]   ;;  %v6881_v24 = vld [vmem:[%s7163_s5 + $0x38] sm:$0xff]   ;;  %v6883_v26 = vld [vmem:[%s7163_s5 + $0x40] sm:$0xff]  }
  0x1a   : > { %6246 = vmatprep.subr.bf16.mxu0 %v7084_v0  ;;  %6762 = vmatprep.subr.bf16.mxu1 %v7084_v0  ;;  %v6880_v23 = vld [vmem:[%s7163_s5 + $0x230] sm:$0xff]   ;;  %v6882_v25 = vld [vmem:[%s7163_s5 + $0x238] sm:$0xff]   ;;  %v6884_v27 = vld [vmem:[%s7163_s5 + $0x240] sm:$0xff]  }
  0x1b   : > { %v6885_v28 = vld [vmem:[%s7163_s5 + $0x48] sm:$0xff]   ;;  %v6887_v30 = vld [vmem:[%s7163_s5 + $0x50] sm:$0xff]   ;;  %v6889_v32 = vld [vmem:[%s7163_s5 + $0x58] sm:$0xff]  }
  0x1c   : > { %v6886_v29 = vld [vmem:[%s7163_s5 + $0x248] sm:$0xff]   ;;  %v6888_v31 = vld [vmem:[%s7163_s5 + $0x250] sm:$0xff]   ;;  %v6890_v33 = vld [vmem:[%s7163_s5 + $0x258] sm:$0xff]  }
  0x1d   : > { %6247 = vmatpush3.bf16.msra.mxu0 %v6864_v7  ;;  %6767 = vmatpush3.bf16.msra.mxu1 %v6864_v7  ;;  %v6891_v34 = vld [vmem:[%s7163_s5 + $0x60] sm:$0xff]   ;;  %v6893_v36 = vld [vmem:[%s7163_s5 + $0x68] sm:$0xff]   ;;  %v6895_v38 = vld [vmem:[%s7163_s5 + $0x70] sm:$0xff]  }
  0x1e   : > { %6248 = vmatprep.subr.bf16.mxu0 %v7084_v0  ;;  %6763 = vmatprep.subr.bf16.mxu1 %v7084_v0  ;;  %v6892_v35 = vld [vmem:[%s7163_s5 + $0x260] sm:$0xff]   ;;  %v6894_v37 = vld [vmem:[%s7163_s5 + $0x268] sm:$0xff]   ;;  %v6896_v39 = vld [vmem:[%s7163_s5 + $0x270] sm:$0xff]  }
  0x1f   : > { %v6897_v40 = vld [vmem:[%s7163_s5 + $0x78] sm:$0xff]   ;;  %v6899_v42 = vld [vmem:[%s7163_s5 + $0x80] sm:$0xff]   ;;  %v6901_v44 = vld [vmem:[%s7163_s5 + $0x88] sm:$0xff]  }
  0x20   : > { %v6898_v41 = vld [vmem:[%s7163_s5 + $0x278] sm:$0xff]   ;;  %v6900_v43 = vld [vmem:[%s7163_s5 + $0x280] sm:$0xff]   ;;  %v6902_v45 = vld [vmem:[%s7163_s5 + $0x288] sm:$0xff]  }
  0x21   : > { %6249 = vmatpush3.bf16.msra.mxu0 %v6865_v8  ;;  %6768 = vmatpush3.bf16.msra.mxu1 %v6865_v8  ;;  %v6903_v46 = vld [vmem:[%s7163_s5 + $0x90] sm:$0xff]   ;;  %v6905_v48 = vld [vmem:[%s7163_s5 + $0x98] sm:$0xff]   ;;  %v6907_v50 = vld [vmem:[%s7163_s5 + $0xa0] sm:$0xff]  }
  0x22   : > { %6250 = vmatprep.subr.bf16.mxu0 %v7084_v0  ;;  %6764 = vmatprep.subr.bf16.mxu1 %v7084_v0  ;;  %v6904_v47 = vld [vmem:[%s7163_s5 + $0x290] sm:$0xff]   ;;  %v6906_v49 = vld [vmem:[%s7163_s5 + $0x298] sm:$0xff]   ;;  %v6908_v51 = vld [vmem:[%s7163_s5 + $0x2a0] sm:$0xff]  }
  0x23   : > { %v6909_v52 = vld [vmem:[%s7163_s5 + $0xa8] sm:$0xff]   ;;  %v6911_v54 = vld [vmem:[%s7163_s5 + $0xb0] sm:$0xff]   ;;  %v6913_v56 = vld [vmem:[%s7163_s5 + $0xb8] sm:$0xff]  }
  0x24   : > { %v6910_v53 = vld [vmem:[%s7163_s5 + $0x2a8] sm:$0xff]   ;;  %v6912_v55 = vld [vmem:[%s7163_s5 + $0x2b0] sm:$0xff]   ;;  %v6914_v57 = vld [vmem:[%s7163_s5 + $0x2b8] sm:$0xff]  }
  0x25   : > { %6251 = vmatpush3.bf16.msra.mxu0 %v6866_v9  ;;  %6769 = vmatpush3.bf16.msra.mxu1 %v6866_v9  ;;  %v6915_v58 = vld [vmem:[%s7163_s5 + $0xc0] sm:$0xff]   ;;  %v6917_v6 = vld [vmem:[%s7163_s5 + $0xc8] sm:$0xff]  }
  0x26   : > { %v6916_v59 = vld [vmem:[%s7163_s5 + $0x2c0] sm:$0xff]   ;;  %v6918_v7 = vld [vmem:[%s7163_s5 + $0x2c8] sm:$0xff]  }
  0x28   : > { %6253 = vmatmul.mubr.msk.bf16.vlgmr.msra.gmra.mxu0 %vm1128_vm3, %v6867_v10  ;;  %6509 = vmatmul.mubr.msk.bf16.vlgmr.msra.gmra.mxu1 %vm1128_vm3, %v6868_v11 }
  0x29   : > { %6256 = vmatprep.mubr.msk.bf16.mxu0 %vm7086_vm2, %v7084_v0  ;;  %6512 = vmatprep.mubr.msk.bf16.mxu1 %vm7086_vm2, %v7084_v0 }
  0x30   : > { %6257 = vmatmul.mubr.msk.bf16.gmra.mxu0 %vm1128_vm3, %v6869_v12  ;;  %6513 = vmatmul.mubr.msk.bf16.gmra.mxu1 %vm1128_vm3, %v6870_v13 }
  0x31   : > { %6260 = vmatprep.mubr.msk.bf16.mxu0 %vm7086_vm2, %v7084_v0  ;;  %6516 = vmatprep.mubr.msk.bf16.mxu1 %vm7086_vm2, %v7084_v0 }
  0x38   : > { %6261 = vmatmul.mubr.msk.bf16.gmra.mxu0 %vm1128_vm3, %v6871_v14  ;;  %6517 = vmatmul.mubr.msk.bf16.gmra.mxu1 %vm1128_vm3, %v6872_v15 }
  0x39   : > { %6264 = vmatprep.mubr.msk.bf16.mxu0 %vm7086_vm2, %v7084_v0  ;;  %6520 = vmatprep.mubr.msk.bf16.mxu1 %vm7086_vm2, %v7084_v0 }
  0x40   : > { %6265 = vmatmul.mubr.msk.bf16.gmra.mxu0 %vm1128_vm3, %v6873_v16  ;;  %6521 = vmatmul.mubr.msk.bf16.gmra.mxu1 %vm1128_vm3, %v6874_v17 }
  0x41   : > { %6268 = vmatprep.mubr.msk.bf16.mxu0 %vm7086_vm2, %v7084_v0  ;;  %6524 = vmatprep.mubr.msk.bf16.mxu1 %vm7086_vm2, %v7084_v0 }
  0x48   : > { %6269 = vmatmul.mubr.msk.bf16.gmra.mxu0 %vm1128_vm3, %v6875_v18  ;;  %6525 = vmatmul.mubr.msk.bf16.gmra.mxu1 %vm1128_vm3, %v6876_v19 }
  0x49   : > { %6272 = vmatprep.mubr.msk.bf16.mxu0 %vm7086_vm2, %v7084_v0  ;;  %6528 = vmatprep.mubr.msk.bf16.mxu1 %vm7086_vm2, %v7084_v0 }
  0x50   : > { %6273 = vmatmul.mubr.msk.bf16.gmra.mxu0 %vm1128_vm3, %v6877_v20  ;;  %6529 = vmatmul.mubr.msk.bf16.gmra.mxu1 %vm1128_vm3, %v6878_v21 }
  0x51   : > { %6276 = vmatprep.mubr.msk.bf16.mxu0 %vm7086_vm2, %v7084_v0  ;;  %6532 = vmatprep.mubr.msk.bf16.mxu1 %vm7086_vm2, %v7084_v0 }
  0x58   : > { %6277 = vmatmul.mubr.msk.bf16.gmra.mxu0 %vm1128_vm3, %v6879_v22  ;;  %6533 = vmatmul.mubr.msk.bf16.gmra.mxu1 %vm1128_vm3, %v6880_v23 }
  0x59   : > { %6280 = vmatprep.mubr.msk.bf16.mxu0 %vm7086_vm2, %v7084_v0  ;;  %6536 = vmatprep.mubr.msk.bf16.mxu1 %vm7086_vm2, %v7084_v0 }
  0x60   : > { %6281 = vmatmul.mubr.msk.bf16.gmra.mxu0 %vm1128_vm3, %v6881_v24  ;;  %6537 = vmatmul.mubr.msk.bf16.gmra.mxu1 %vm1128_vm3, %v6882_v25 }
  0x61   : > { %6284 = vmatprep.mubr.msk.bf16.mxu0 %vm7086_vm2, %v7084_v0  ;;  %6540 = vmatprep.mubr.msk.bf16.mxu1 %vm7086_vm2, %v7084_v0 }
  0x68   : > { %6285 = vmatmul.mubr.msk.bf16.gmra.mxu0 %vm1128_vm3, %v6883_v26  ;;  %6541 = vmatmul.mubr.msk.bf16.gmra.mxu1 %vm1128_vm3, %v6884_v27  ;;  %v6919_v26 = vld [vmem:[%s7163_s5 + $0xd0] sm:$0xff]  }
  0x69   : > { %6288 = vmatprep.mubr.msk.bf16.mxu0 %vm7086_vm2, %v7084_v0  ;;  %6544 = vmatprep.mubr.msk.bf16.mxu1 %vm7086_vm2, %v7084_v0  ;;  %v6920_v27 = vld [vmem:[%s7163_s5 + $0x2d0] sm:$0xff]  }
  0x70   : > { %6289 = vmatmul.mubr.msk.bf16.gmra.mxu0 %vm1128_vm3, %v6885_v28  ;;  %6545 = vmatmul.mubr.msk.bf16.gmra.mxu1 %vm1128_vm3, %v6886_v29 }
  0x71   : > { %6292 = vmatprep.mubr.msk.bf16.mxu0 %vm7086_vm2, %v7084_v0  ;;  %6548 = vmatprep.mubr.msk.bf16.mxu1 %vm7086_vm2, %v7084_v0 }
  0x78   : > { %6293 = vmatmul.mubr.msk.bf16.gmra.mxu0 %vm1128_vm3, %v6887_v30  ;;  %6549 = vmatmul.mubr.msk.bf16.gmra.mxu1 %vm1128_vm3, %v6888_v31 }
  0x79   : > { %6296 = vmatprep.mubr.msk.bf16.mxu0 %vm7086_vm2, %v7084_v0  ;;  %6552 = vmatprep.mubr.msk.bf16.mxu1 %vm7086_vm2, %v7084_v0 }
  0x80   : > { %6297 = vmatmul.mubr.msk.bf16.gmra.mxu0 %vm1128_vm3, %v6889_v32  ;;  %6553 = vmatmul.mubr.msk.bf16.gmra.mxu1 %vm1128_vm3, %v6890_v33 }
  0x81   : > { %6300 = vmatprep.mubr.msk.bf16.mxu0 %vm7086_vm2, %v7084_v0  ;;  %6556 = vmatprep.mubr.msk.bf16.mxu1 %vm7086_vm2, %v7084_v0 }
  0x88   : > { %6301 = vmatmul.mubr.msk.bf16.gmra.mxu0 %vm1128_vm3, %v6891_v34  ;;  %6557 = vmatmul.mubr.msk.bf16.gmra.mxu1 %vm1128_vm3, %v6892_v35 }
  0x89   : > { %6304 = vmatprep.mubr.msk.bf16.mxu0 %vm7086_vm2, %v7084_v0  ;;  %6560 = vmatprep.mubr.msk.bf16.mxu1 %vm7086_vm2, %v7084_v0 }
  0x90   : > { %6305 = vmatmul.mubr.msk.bf16.gmra.mxu0 %vm1128_vm3, %v6893_v36  ;;  %6561 = vmatmul.mubr.msk.bf16.gmra.mxu1 %vm1128_vm3, %v6894_v37 }
  0x91   : > { %6308 = vmatprep.mubr.msk.bf16.mxu0 %vm7086_vm2, %v7084_v0  ;;  %6564 = vmatprep.mubr.msk.bf16.mxu1 %vm7086_vm2, %v7084_v0 }
  0x98   : > { %6309 = vmatmul.mubr.msk.bf16.gmra.mxu0 %vm1128_vm3, %v6895_v38  ;;  %6565 = vmatmul.mubr.msk.bf16.gmra.mxu1 %vm1128_vm3, %v6896_v39 }
  0x99   : > { %6312 = vmatprep.mubr.msk.bf16.mxu0 %vm7086_vm2, %v7084_v0  ;;  %6568 = vmatprep.mubr.msk.bf16.mxu1 %vm7086_vm2, %v7084_v0 }
  0xa0   : > { %6313 = vmatmul.mubr.msk.bf16.gmra.mxu0 %vm1128_vm3, %v6897_v40  ;;  %6569 = vmatmul.mubr.msk.bf16.gmra.mxu1 %vm1128_vm3, %v6898_v41 }
  0xa1   : > { %6316 = vmatprep.mubr.msk.bf16.mxu0 %vm7086_vm2, %v7084_v0  ;;  %6572 = vmatprep.mubr.msk.bf16.mxu1 %vm7086_vm2, %v7084_v0 }
  0xa8   : > { %6317 = vmatmul.mubr.msk.bf16.gmra.mxu0 %vm1128_vm3, %v6899_v42  ;;  %6573 = vmatmul.mubr.msk.bf16.gmra.mxu1 %vm1128_vm3, %v6900_v43 }
  0xa9   : > { %6320 = vmatprep.mubr.msk.bf16.mxu0 %vm7086_vm2, %v7084_v0  ;;  %6576 = vmatprep.mubr.msk.bf16.mxu1 %vm7086_vm2, %v7084_v0 }
  0xb0   : > { %6321 = vmatmul.mubr.msk.bf16.gmra.mxu0 %vm1128_vm3, %v6901_v44  ;;  %6577 = vmatmul.mubr.msk.bf16.gmra.mxu1 %vm1128_vm3, %v6902_v45 }
  0xb1   : > { %6324 = vmatprep.mubr.msk.bf16.mxu0 %vm7086_vm2, %v7084_v0  ;;  %6580 = vmatprep.mubr.msk.bf16.mxu1 %vm7086_vm2, %v7084_v0 }
  0xb8   : > { %6325 = vmatmul.mubr.msk.bf16.gmra.mxu0 %vm1128_vm3, %v6903_v46  ;;  %6581 = vmatmul.mubr.msk.bf16.gmra.mxu1 %vm1128_vm3, %v6904_v47  ;;  %v6921_v46 = vld [vmem:[%s7163_s5 + $0xd8] sm:$0xff]  }
  0xb9   : > { %6328 = vmatprep.mubr.msk.bf16.mxu0 %vm7086_vm2, %v7084_v0  ;;  %6584 = vmatprep.mubr.msk.bf16.mxu1 %vm7086_vm2, %v7084_v0  ;;  %v6922_v47 = vld [vmem:[%s7163_s5 + $0x2d8] sm:$0xff]  }
  0xc0   : > { %6329 = vmatmul.mubr.msk.bf16.gmra.mxu0 %vm1128_vm3, %v6905_v48  ;;  %6585 = vmatmul.mubr.msk.bf16.gmra.mxu1 %vm1128_vm3, %v6906_v49 }
  0xc1   : > { %6332 = vmatprep.mubr.msk.bf16.mxu0 %vm7086_vm2, %v7084_v0  ;;  %6588 = vmatprep.mubr.msk.bf16.mxu1 %vm7086_vm2, %v7084_v0 }
  0xc8   : > { %6333 = vmatmul.mubr.msk.bf16.gmra.mxu0 %vm1128_vm3, %v6907_v50  ;;  %6589 = vmatmul.mubr.msk.bf16.gmra.mxu1 %vm1128_vm3, %v6908_v51 }
  0xc9   : > { %6336 = vmatprep.mubr.msk.bf16.mxu0 %vm7086_vm2, %v7084_v0  ;;  %6592 = vmatprep.mubr.msk.bf16.mxu1 %vm7086_vm2, %v7084_v0 }
  0xd0   : > { %6337 = vmatmul.mubr.msk.bf16.gmra.mxu0 %vm1128_vm3, %v6909_v52  ;;  %6593 = vmatmul.mubr.msk.bf16.gmra.mxu1 %vm1128_vm3, %v6910_v53 }
  0xd1   : > { %6340 = vmatprep.mubr.msk.bf16.mxu0 %vm7086_vm2, %v7084_v0  ;;  %6596 = vmatprep.mubr.msk.bf16.mxu1 %vm7086_vm2, %v7084_v0 }
  0xd8   : > { %6341 = vmatmul.mubr.msk.bf16.gmra.mxu0 %vm1128_vm3, %v6911_v54  ;;  %6597 = vmatmul.mubr.msk.bf16.gmra.mxu1 %vm1128_vm3, %v6912_v55 }
  0xd9   : > { %6344 = vmatprep.mubr.msk.bf16.mxu0 %vm7086_vm2, %v7084_v0  ;;  %6600 = vmatprep.mubr.msk.bf16.mxu1 %vm7086_vm2, %v7084_v0 }
  0xe0   : > { %6345 = vmatmul.mubr.msk.bf16.gmra.mxu0 %vm1128_vm3, %v6913_v56  ;;  %6601 = vmatmul.mubr.msk.bf16.gmra.mxu1 %vm1128_vm3, %v6914_v57 }
  0xe1   : > { %6348 = vmatprep.mubr.msk.bf16.mxu0 %vm7086_vm2, %v7084_v0  ;;  %6604 = vmatprep.mubr.msk.bf16.mxu1 %vm7086_vm2, %v7084_v0 }
  0xe8   : > { %v1551_v61 = vpop.f32.mrf.mxu0  ;;  %6349 = vmatmul.mubr.msk.bf16.gmra.mxu0 %vm1128_vm3, %v6915_v58  ;;  %v2063_v62 = vpop.f32.mrf.mxu1  ;;  %6605 = vmatmul.mubr.msk.bf16.gmra.mxu1 %vm1128_vm3, %v6916_v59 }
  0xe9   : > { %v2064_v63 = vadd.f32 %v7372_v60, %v2063_v62  ;;  %6352 = vmatprep.mubr.msk.bf16.mxu0 %vm7086_vm2, %v7084_v0  ;;  %6608 = vmatprep.mubr.msk.bf16.mxu1 %vm7086_vm2, %v7084_v0  ;;  %v1552_v3 = vadd.f32 %v7372_v60, %v1551_v61 }
  0xea   : > { %v6254_v1 = vpop.f32.mrf.mxu0  ;;  %v6510_v2 = vpop.f32.mrf.mxu1 }
  0xeb   : > { %v2694_v8 = vmax.f32 %v2064_v63, 0.0  ;;  %v2566_v13 = vmax.f32 %v1552_v3, 0.0 }
  0xec   : > { %v1554_v4 = vpop.f32.mrf.mxu0  ;;  %v2066_v5 = vpop.f32.mrf.mxu1 }
  0xed   : > { %v1555_v9 = vadd.f32 %v7372_v60, %v1554_v4  ;;  %v2067_v10 = vadd.f32 %v7372_v60, %v2066_v5  ;;  %v6923_v4 = vld [vmem:[%s7163_s5 + $0xe0] sm:$0xff]  }
  0xee   : > { %v6255_v11 = vpop.f32.mrf.mxu0  ;;  %v6511_v12 = vpop.f32.mrf.mxu1  ;;  %v6924_v5 = vld [vmem:[%s7163_s5 + $0x2e0] sm:$0xff]  }
  0xef   : > { %v2567_v14 = vmax.f32 %v1555_v9, 0.0  ;;  %v2695_v15 = vmax.f32 %v2067_v10, 0.0 }
  0xf0   : > { %v1559_v16 = vpop.f32.mrf.mxu0  ;;  %6353 = vmatmul.mubr.msk.bf16.gmra.mxu0 %vm1128_vm3, %v6917_v6  ;;  %v2071_v17 = vpop.f32.mrf.mxu1  ;;  %6609 = vmatmul.mubr.msk.bf16.gmra.mxu1 %vm1128_vm3, %v6918_v7 }
  0xf1   : > { %v5352_v18 = vpack.c.bf16 %v2567_v14, %v2566_v13  ;;  %v5672_v19 = vpack.c.bf16 %v2695_v15, %v2694_v8  ;;  %v2072_v20 = vadd.f32 %v7372_v60, %v2071_v17  ;;  %6356 = vmatprep.mubr.msk.bf16.mxu0 %vm7086_vm2, %v7084_v0  ;;  %6612 = vmatprep.mubr.msk.bf16.mxu1 %vm7086_vm2, %v7084_v0 }
  0xf2   : > { %v6258_v21 = vpop.f32.mrf.mxu0  ;;  %v6514_v22 = vpop.f32.mrf.mxu1  ;;  %v1560_v23 = vadd.f32 %v7372_v60, %v1559_v16 }
  0xf3   : > { %5353 = vst [vmem:[%s7394_s12] sm:$0xff] %v5352_v18   ;;  %6047 = vst [vmem:[%s7394_s12 + $0x200] sm:$0xff] %v5672_v19   ;;  %v2696_v28 = vmax.f32 %v2072_v20, 0.0 }
  0xf4   : > { %v1562_v24 = vpop.f32.mrf.mxu0  ;;  %v2074_v25 = vpop.f32.mrf.mxu1  ;;  %v2568_v33 = vmax.f32 %v1560_v23, 0.0 }
  0xf5   : > { %v1563_v29 = vadd.f32 %v7372_v60, %v1562_v24  ;;  %v2075_v30 = vadd.f32 %v7372_v60, %v2074_v25  ;;  %v6925_v24 = vld [vmem:[%s7163_s5 + $0xe8] sm:$0xff]  }
  0xf6   : > { %v6259_v31 = vpop.f32.mrf.mxu0  ;;  %v6515_v32 = vpop.f32.mrf.mxu1  ;;  %v6926_v25 = vld [vmem:[%s7163_s5 + $0x2e8] sm:$0xff]  }
  0xf7   : > { %v2569_v34 = vmax.f32 %v1563_v29, 0.0  ;;  %v2697_v35 = vmax.f32 %v2075_v30, 0.0 }
  0xf8   : > { %v1567_v36 = vpop.f32.mrf.mxu0  ;;  %6357 = vmatmul.mubr.msk.bf16.gmra.mxu0 %vm1128_vm3, %v6919_v26  ;;  %v2079_v37 = vpop.f32.mrf.mxu1  ;;  %6613 = vmatmul.mubr.msk.bf16.gmra.mxu1 %vm1128_vm3, %v6920_v27 }
  0xf9   : > { %v5357_v38 = vpack.c.bf16 %v2569_v34, %v2568_v33  ;;  %v5677_v39 = vpack.c.bf16 %v2697_v35, %v2696_v28  ;;  %v2080_v40 = vadd.f32 %v7372_v60, %v2079_v37  ;;  %6360 = vmatprep.mubr.msk.bf16.mxu0 %vm7086_vm2, %v7084_v0  ;;  %6616 = vmatprep.mubr.msk.bf16.mxu1 %vm7086_vm2, %v7084_v0 }
  0xfa   : > { %v6262_v41 = vpop.f32.mrf.mxu0  ;;  %v6518_v42 = vpop.f32.mrf.mxu1  ;;  %v1568_v43 = vadd.f32 %v7372_v60, %v1567_v36 }
  0xfb   : > { %5984 = vst [vmem:[%s7394_s12 + $0x8] sm:$0xff] %v5357_v38   ;;  %6048 = vst [vmem:[%s7394_s12 + $0x208] sm:$0xff] %v5677_v39   ;;  %v2698_v48 = vmax.f32 %v2080_v40, 0.0 }
  0xfc   : > { %v1570_v44 = vpop.f32.mrf.mxu0  ;;  %v2082_v45 = vpop.f32.mrf.mxu1  ;;  %v2570_v53 = vmax.f32 %v1568_v43, 0.0 }
  0xfd   : > { %v1571_v49 = vadd.f32 %v7372_v60, %v1570_v44  ;;  %v2083_v50 = vadd.f32 %v7372_v60, %v2082_v45  ;;  %v6927_v44 = vld [vmem:[%s7163_s5 + $0xf0] sm:$0xff]  }
  0xfe   : > { %v6263_v51 = vpop.f32.mrf.mxu0  ;;  %v6519_v52 = vpop.f32.mrf.mxu1  ;;  %v6928_v45 = vld [vmem:[%s7163_s5 + $0x2f0] sm:$0xff]  }
  0xff   : > { %v2571_v54 = vmax.f32 %v1571_v49, 0.0  ;;  %v2699_v55 = vmax.f32 %v2083_v50, 0.0 }
 0x100   : > { %v1575_v56 = vpop.f32.mrf.mxu0  ;;  %6361 = vmatmul.mubr.msk.bf16.gmra.mxu0 %vm1128_vm3, %v6921_v46  ;;  %v2087_v57 = vpop.f32.mrf.mxu1  ;;  %6617 = vmatmul.mubr.msk.bf16.gmra.mxu1 %vm1128_vm3, %v6922_v47 }
 0x101   : > { %v5362_v58 = vpack.c.bf16 %v2571_v54, %v2570_v53  ;;  %v5682_v59 = vpack.c.bf16 %v2699_v55, %v2698_v48  ;;  %v2088_v61 = vadd.f32 %v7372_v60, %v2087_v57  ;;  %6364 = vmatprep.mubr.msk.bf16.mxu0 %vm7086_vm2, %v7084_v0  ;;  %6620 = vmatprep.mubr.msk.bf16.mxu1 %vm7086_vm2, %v7084_v0 }
 0x102   : > { %v6266_v62 = vpop.f32.mrf.mxu0  ;;  %v6522_v63 = vpop.f32.mrf.mxu1  ;;  %v1576_v1 = vadd.f32 %v7372_v60, %v1575_v56 }
 0x103   : > { %5985 = vst [vmem:[%s7394_s12 + $0x10] sm:$0xff] %v5362_v58   ;;  %6049 = vst [vmem:[%s7394_s12 + $0x210] sm:$0xff] %v5682_v59   ;;  %v2700_v6 = vmax.f32 %v2088_v61, 0.0 }
 0x104   : > { %v1578_v2 = vpop.f32.mrf.mxu0  ;;  %v2090_v3 = vpop.f32.mrf.mxu1  ;;  %v2572_v11 = vmax.f32 %v1576_v1, 0.0 }
 0x105   : > { %v1579_v7 = vadd.f32 %v7372_v60, %v1578_v2  ;;  %v2091_v8 = vadd.f32 %v7372_v60, %v2090_v3  ;;  %v6929_v2 = vld [vmem:[%s7163_s5 + $0xf8] sm:$0xff]  }
 0x106   : > { %v6267_v9 = vpop.f32.mrf.mxu0  ;;  %v6523_v10 = vpop.f32.mrf.mxu1  ;;  %v6930_v3 = vld [vmem:[%s7163_s5 + $0x2f8] sm:$0xff]  }
 0x107   : > { %v2573_v12 = vmax.f32 %v1579_v7, 0.0  ;;  %v2701_v13 = vmax.f32 %v2091_v8, 0.0 }
 0x108   : > { %v1583_v14 = vpop.f32.mrf.mxu0  ;;  %6365 = vmatmul.mubr.msk.bf16.gmra.mxu0 %vm1128_vm3, %v6923_v4  ;;  %v2095_v15 = vpop.f32.mrf.mxu1  ;;  %6621 = vmatmul.mubr.msk.bf16.gmra.mxu1 %vm1128_vm3, %v6924_v5 }
 0x109   : > { %v5367_v16 = vpack.c.bf16 %v2573_v12, %v2572_v11  ;;  %v5687_v17 = vpack.c.bf16 %v2701_v13, %v2700_v6  ;;  %v2096_v18 = vadd.f32 %v7372_v60, %v2095_v15  ;;  %6368 = vmatprep.mubr.msk.bf16.mxu0 %vm7086_vm2, %v7084_v0  ;;  %6624 = vmatprep.mubr.msk.bf16.mxu1 %vm7086_vm2, %v7084_v0 }
 0x10a   : > { %v6270_v19 = vpop.f32.mrf.mxu0  ;;  %v6526_v20 = vpop.f32.mrf.mxu1  ;;  %v1584_v21 = vadd.f32 %v7372_v60, %v1583_v14 }
 0x10b   : > { %5986 = vst [vmem:[%s7394_s12 + $0x18] sm:$0xff] %v5367_v16   ;;  %6050 = vst [vmem:[%s7394_s12 + $0x218] sm:$0xff] %v5687_v17   ;;  %v2702_v26 = vmax.f32 %v2096_v18, 0.0 }
 0x10c   : > { %v1586_v22 = vpop.f32.mrf.mxu0  ;;  %v2098_v23 = vpop.f32.mrf.mxu1  ;;  %v2574_v31 = vmax.f32 %v1584_v21, 0.0 }
 0x10d   : > { %v1587_v27 = vadd.f32 %v7372_v60, %v1586_v22  ;;  %v2099_v28 = vadd.f32 %v7372_v60, %v2098_v23  ;;  %v6931_v22 = vld [vmem:[%s7163_s5 + $0x100] sm:$0xff]  }
 0x10e   : > { %v6271_v29 = vpop.f32.mrf.mxu0  ;;  %v6527_v30 = vpop.f32.mrf.mxu1  ;;  %v6932_v23 = vld [vmem:[%s7163_s5 + $0x300] sm:$0xff]  }
 0x10f   : > { %v2575_v32 = vmax.f32 %v1587_v27, 0.0  ;;  %v2703_v33 = vmax.f32 %v2099_v28, 0.0 }
 0x110   : > { %v1591_v34 = vpop.f32.mrf.mxu0  ;;  %6369 = vmatmul.mubr.msk.bf16.gmra.mxu0 %vm1128_vm3, %v6925_v24  ;;  %v2103_v35 = vpop.f32.mrf.mxu1  ;;  %6625 = vmatmul.mubr.msk.bf16.gmra.mxu1 %vm1128_vm3, %v6926_v25 }
 0x111   : > { %v5372_v36 = vpack.c.bf16 %v2575_v32, %v2574_v31  ;;  %v5692_v37 = vpack.c.bf16 %v2703_v33, %v2702_v26  ;;  %v2104_v38 = vadd.f32 %v7372_v60, %v2103_v35  ;;  %6372 = vmatprep.mubr.msk.bf16.mxu0 %vm7086_vm2, %v7084_v0  ;;  %6628 = vmatprep.mubr.msk.bf16.mxu1 %vm7086_vm2, %v7084_v0 }
 0x112   : > { %v6274_v39 = vpop.f32.mrf.mxu0  ;;  %v6530_v40 = vpop.f32.mrf.mxu1  ;;  %v1592_v41 = vadd.f32 %v7372_v60, %v1591_v34 }
 0x113   : > { %5987 = vst [vmem:[%s7394_s12 + $0x20] sm:$0xff] %v5372_v36   ;;  %6051 = vst [vmem:[%s7394_s12 + $0x220] sm:$0xff] %v5692_v37   ;;  %v2704_v46 = vmax.f32 %v2104_v38, 0.0 }
 0x114   : > { %v1594_v42 = vpop.f32.mrf.mxu0  ;;  %v2106_v43 = vpop.f32.mrf.mxu1  ;;  %v2576_v51 = vmax.f32 %v1592_v41, 0.0 }
 0x115   : > { %v1595_v47 = vadd.f32 %v7372_v60, %v1594_v42  ;;  %v2107_v48 = vadd.f32 %v7372_v60, %v2106_v43  ;;  %v6933_v42 = vld [vmem:[%s7163_s5 + $0x108] sm:$0xff]  }
 0x116   : > { %v6275_v49 = vpop.f32.mrf.mxu0  ;;  %v6531_v50 = vpop.f32.mrf.mxu1  ;;  %v6934_v43 = vld [vmem:[%s7163_s5 + $0x308] sm:$0xff]  }
 0x117   : > { %v2577_v52 = vmax.f32 %v1595_v47, 0.0  ;;  %v2705_v53 = vmax.f32 %v2107_v48, 0.0 }
 0x118   : > { %v1599_v54 = vpop.f32.mrf.mxu0  ;;  %6373 = vmatmul.mubr.msk.bf16.gmra.mxu0 %vm1128_vm3, %v6927_v44  ;;  %v2111_v55 = vpop.f32.mrf.mxu1  ;;  %6629 = vmatmul.mubr.msk.bf16.gmra.mxu1 %vm1128_vm3, %v6928_v45 }
 0x119   : > { %v5377_v56 = vpack.c.bf16 %v2577_v52, %v2576_v51  ;;  %v5697_v57 = vpack.c.bf16 %v2705_v53, %v2704_v46  ;;  %v2112_v58 = vadd.f32 %v7372_v60, %v2111_v55  ;;  %6376 = vmatprep.mubr.msk.bf16.mxu0 %vm7086_vm2, %v7084_v0  ;;  %6632 = vmatprep.mubr.msk.bf16.mxu1 %vm7086_vm2, %v7084_v0 }
 0x11a   : > { %v6278_v59 = vpop.f32.mrf.mxu0  ;;  %v6534_v61 = vpop.f32.mrf.mxu1  ;;  %v1600_v62 = vadd.f32 %v7372_v60, %v1599_v54 }
 0x11b   : > { %5988 = vst [vmem:[%s7394_s12 + $0x28] sm:$0xff] %v5377_v56   ;;  %6052 = vst [vmem:[%s7394_s12 + $0x228] sm:$0xff] %v5697_v57   ;;  %v2706_v4 = vmax.f32 %v2112_v58, 0.0 }
 0x11c   : > { %v1602_v63 = vpop.f32.mrf.mxu0  ;;  %v2114_v1 = vpop.f32.mrf.mxu1  ;;  %v2578_v9 = vmax.f32 %v1600_v62, 0.0 }
 0x11d   : > { %v1603_v5 = vadd.f32 %v7372_v60, %v1602_v63  ;;  %v2115_v6 = vadd.f32 %v7372_v60, %v2114_v1  ;;  %v6935_v63 = vld [vmem:[%s7163_s5 + $0x110] sm:$0xff]  }
 0x11e   : > { %v6279_v7 = vpop.f32.mrf.mxu0  ;;  %v6535_v8 = vpop.f32.mrf.mxu1  ;;  %v6936_v1 = vld [vmem:[%s7163_s5 + $0x310] sm:$0xff]  }
 0x11f   : > { %v2579_v10 = vmax.f32 %v1603_v5, 0.0  ;;  %v2707_v11 = vmax.f32 %v2115_v6, 0.0 }
 0x120   : > { %v1607_v12 = vpop.f32.mrf.mxu0  ;;  %6377 = vmatmul.mubr.msk.bf16.gmra.mxu0 %vm1128_vm3, %v6929_v2  ;;  %v2119_v13 = vpop.f32.mrf.mxu1  ;;  %6633 = vmatmul.mubr.msk.bf16.gmra.mxu1 %vm1128_vm3, %v6930_v3 }
 0x121   : > { %v5382_v14 = vpack.c.bf16 %v2579_v10, %v2578_v9  ;;  %v5702_v15 = vpack.c.bf16 %v2707_v11, %v2706_v4  ;;  %v2120_v16 = vadd.f32 %v7372_v60, %v2119_v13  ;;  %6380 = vmatprep.mubr.msk.bf16.mxu0 %vm7086_vm2, %v7084_v0  ;;  %6636 = vmatprep.mubr.msk.bf16.mxu1 %vm7086_vm2, %v7084_v0 }
 0x122   : > { %v6282_v17 = vpop.f32.mrf.mxu0  ;;  %v6538_v18 = vpop.f32.mrf.mxu1  ;;  %v1608_v19 = vadd.f32 %v7372_v60, %v1607_v12 }
 0x123   : > { %5989 = vst [vmem:[%s7394_s12 + $0x30] sm:$0xff] %v5382_v14   ;;  %6053 = vst [vmem:[%s7394_s12 + $0x230] sm:$0xff] %v5702_v15   ;;  %v2708_v24 = vmax.f32 %v2120_v16, 0.0 }
 0x124   : > { %v1610_v20 = vpop.f32.mrf.mxu0  ;;  %v2122_v21 = vpop.f32.mrf.mxu1  ;;  %v2580_v29 = vmax.f32 %v1608_v19, 0.0 }
 0x125   : > { %v1611_v25 = vadd.f32 %v7372_v60, %v1610_v20  ;;  %v2123_v26 = vadd.f32 %v7372_v60, %v2122_v21  ;;  %v6937_v20 = vld [vmem:[%s7163_s5 + $0x118] sm:$0xff]  }
 0x126   : > { %v6283_v27 = vpop.f32.mrf.mxu0  ;;  %v6539_v28 = vpop.f32.mrf.mxu1  ;;  %v6938_v21 = vld [vmem:[%s7163_s5 + $0x318] sm:$0xff]  }
 0x127   : > { %v2581_v30 = vmax.f32 %v1611_v25, 0.0  ;;  %v2709_v31 = vmax.f32 %v2123_v26, 0.0 }
 0x128   : > { %v1615_v32 = vpop.f32.mrf.mxu0  ;;  %6381 = vmatmul.mubr.msk.bf16.gmra.mxu0 %vm1128_vm3, %v6931_v22  ;;  %v2127_v33 = vpop.f32.mrf.mxu1  ;;  %6637 = vmatmul.mubr.msk.bf16.gmra.mxu1 %vm1128_vm3, %v6932_v23 }
 0x129   : > { %v5387_v34 = vpack.c.bf16 %v2581_v30, %v2580_v29  ;;  %v5707_v35 = vpack.c.bf16 %v2709_v31, %v2708_v24  ;;  %v2128_v36 = vadd.f32 %v7372_v60, %v2127_v33  ;;  %6384 = vmatprep.mubr.msk.bf16.mxu0 %vm7086_vm2, %v7084_v0  ;;  %6640 = vmatprep.mubr.msk.bf16.mxu1 %vm7086_vm2, %v7084_v0 }
 0x12a   : > { %v6286_v37 = vpop.f32.mrf.mxu0  ;;  %v6542_v38 = vpop.f32.mrf.mxu1  ;;  %v1616_v39 = vadd.f32 %v7372_v60, %v1615_v32 }
 0x12b   : > { %5990 = vst [vmem:[%s7394_s12 + $0x38] sm:$0xff] %v5387_v34   ;;  %6054 = vst [vmem:[%s7394_s12 + $0x238] sm:$0xff] %v5707_v35   ;;  %v2710_v44 = vmax.f32 %v2128_v36, 0.0 }
 0x12c   : > { %v1618_v40 = vpop.f32.mrf.mxu0  ;;  %v2130_v41 = vpop.f32.mrf.mxu1  ;;  %v2582_v49 = vmax.f32 %v1616_v39, 0.0 }
 0x12d   : > { %v1619_v45 = vadd.f32 %v7372_v60, %v1618_v40  ;;  %v2131_v46 = vadd.f32 %v7372_v60, %v2130_v41  ;;  %v6939_v40 = vld [vmem:[%s7163_s5 + $0x120] sm:$0xff]  }
 0x12e   : > { %v6287_v47 = vpop.f32.mrf.mxu0  ;;  %v6543_v48 = vpop.f32.mrf.mxu1  ;;  %v6940_v41 = vld [vmem:[%s7163_s5 + $0x320] sm:$0xff]  }
 0x12f   : > { %v2583_v50 = vmax.f32 %v1619_v45, 0.0  ;;  %v2711_v51 = vmax.f32 %v2131_v46, 0.0 }
 0x130   : > { %v1623_v52 = vpop.f32.mrf.mxu0  ;;  %6385 = vmatmul.mubr.msk.bf16.gmra.mxu0 %vm1128_vm3, %v6933_v42  ;;  %v2135_v53 = vpop.f32.mrf.mxu1  ;;  %6641 = vmatmul.mubr.msk.bf16.gmra.mxu1 %vm1128_vm3, %v6934_v43 }
 0x131   : > { %v5392_v54 = vpack.c.bf16 %v2583_v50, %v2582_v49  ;;  %v5712_v55 = vpack.c.bf16 %v2711_v51, %v2710_v44  ;;  %v2136_v56 = vadd.f32 %v7372_v60, %v2135_v53  ;;  %6388 = vmatprep.mubr.msk.bf16.mxu0 %vm7086_vm2, %v7084_v0  ;;  %6644 = vmatprep.mubr.msk.bf16.mxu1 %vm7086_vm2, %v7084_v0 }
 0x132   : > { %v6290_v57 = vpop.f32.mrf.mxu0  ;;  %v6546_v58 = vpop.f32.mrf.mxu1  ;;  %v1624_v59 = vadd.f32 %v7372_v60, %v1623_v52 }
 0x133   : > { %5991 = vst [vmem:[%s7394_s12 + $0x40] sm:$0xff] %v5392_v54   ;;  %6055 = vst [vmem:[%s7394_s12 + $0x240] sm:$0xff] %v5712_v55   ;;  %v2712_v2 = vmax.f32 %v2136_v56, 0.0 }
 0x134   : > { %v1626_v61 = vpop.f32.mrf.mxu0  ;;  %v2138_v62 = vpop.f32.mrf.mxu1  ;;  %v2584_v7 = vmax.f32 %v1624_v59, 0.0 }
 0x135   : > { %v1627_v3 = vadd.f32 %v7372_v60, %v1626_v61  ;;  %v2139_v4 = vadd.f32 %v7372_v60, %v2138_v62  ;;  %v6941_v61 = vld [vmem:[%s7163_s5 + $0x128] sm:$0xff]  }
 0x136   : > { %v6291_v5 = vpop.f32.mrf.mxu0  ;;  %v6547_v6 = vpop.f32.mrf.mxu1  ;;  %v6942_v62 = vld [vmem:[%s7163_s5 + $0x328] sm:$0xff]  }
 0x137   : > { %v2585_v8 = vmax.f32 %v1627_v3, 0.0  ;;  %v2713_v9 = vmax.f32 %v2139_v4, 0.0 }
 0x138   : > { %v1631_v10 = vpop.f32.mrf.mxu0  ;;  %6389 = vmatmul.mubr.msk.bf16.gmra.mxu0 %vm1128_vm3, %v6935_v63  ;;  %v2143_v11 = vpop.f32.mrf.mxu1  ;;  %6645 = vmatmul.mubr.msk.bf16.gmra.mxu1 %vm1128_vm3, %v6936_v1 }
 0x139   : > { %v5397_v12 = vpack.c.bf16 %v2585_v8, %v2584_v7  ;;  %v5717_v13 = vpack.c.bf16 %v2713_v9, %v2712_v2  ;;  %v2144_v14 = vadd.f32 %v7372_v60, %v2143_v11  ;;  %6392 = vmatprep.mubr.msk.bf16.mxu0 %vm7086_vm2, %v7084_v0  ;;  %6648 = vmatprep.mubr.msk.bf16.mxu1 %vm7086_vm2, %v7084_v0 }
 0x13a   : > { %v6294_v15 = vpop.f32.mrf.mxu0  ;;  %v6550_v16 = vpop.f32.mrf.mxu1  ;;  %v1632_v17 = vadd.f32 %v7372_v60, %v1631_v10 }
 0x13b   : > { %5992 = vst [vmem:[%s7394_s12 + $0x48] sm:$0xff] %v5397_v12   ;;  %6056 = vst [vmem:[%s7394_s12 + $0x248] sm:$0xff] %v5717_v13   ;;  %v2714_v22 = vmax.f32 %v2144_v14, 0.0 }
 0x13c   : > { %v1634_v18 = vpop.f32.mrf.mxu0  ;;  %v2146_v19 = vpop.f32.mrf.mxu1  ;;  %v2586_v27 = vmax.f32 %v1632_v17, 0.0 }
 0x13d   : > { %v1635_v23 = vadd.f32 %v7372_v60, %v1634_v18  ;;  %v2147_v24 = vadd.f32 %v7372_v60, %v2146_v19  ;;  %v6943_v18 = vld [vmem:[%s7163_s5 + $0x130] sm:$0xff]  }
 0x13e   : > { %v6295_v25 = vpop.f32.mrf.mxu0  ;;  %v6551_v26 = vpop.f32.mrf.mxu1  ;;  %v6944_v19 = vld [vmem:[%s7163_s5 + $0x330] sm:$0xff]  }
 0x13f   : > { %v2587_v28 = vmax.f32 %v1635_v23, 0.0  ;;  %v2715_v29 = vmax.f32 %v2147_v24, 0.0 }
 0x140   : > { %v1639_v30 = vpop.f32.mrf.mxu0  ;;  %6393 = vmatmul.mubr.msk.bf16.gmra.mxu0 %vm1128_vm3, %v6937_v20  ;;  %v2151_v31 = vpop.f32.mrf.mxu1  ;;  %6649 = vmatmul.mubr.msk.bf16.gmra.mxu1 %vm1128_vm3, %v6938_v21 }
 0x141   : > { %v5402_v32 = vpack.c.bf16 %v2587_v28, %v2586_v27  ;;  %v5722_v33 = vpack.c.bf16 %v2715_v29, %v2714_v22  ;;  %v2152_v34 = vadd.f32 %v7372_v60, %v2151_v31  ;;  %6396 = vmatprep.mubr.msk.bf16.mxu0 %vm7086_vm2, %v7084_v0  ;;  %6652 = vmatprep.mubr.msk.bf16.mxu1 %vm7086_vm2, %v7084_v0 }
 0x142   : > { %v6298_v35 = vpop.f32.mrf.mxu0  ;;  %v6554_v36 = vpop.f32.mrf.mxu1  ;;  %v1640_v37 = vadd.f32 %v7372_v60, %v1639_v30 }
 0x143   : > { %5993 = vst [vmem:[%s7394_s12 + $0x50] sm:$0xff] %v5402_v32   ;;  %6057 = vst [vmem:[%s7394_s12 + $0x250] sm:$0xff] %v5722_v33   ;;  %v2716_v42 = vmax.f32 %v2152_v34, 0.0 }
 0x144   : > { %v1642_v38 = vpop.f32.mrf.mxu0  ;;  %v2154_v39 = vpop.f32.mrf.mxu1  ;;  %v2588_v47 = vmax.f32 %v1640_v37, 0.0 }
 0x145   : > { %v1643_v43 = vadd.f32 %v7372_v60, %v1642_v38  ;;  %v2155_v44 = vadd.f32 %v7372_v60, %v2154_v39  ;;  %v6945_v38 = vld [vmem:[%s7163_s5 + $0x138] sm:$0xff]  }
 0x146   : > { %v6299_v45 = vpop.f32.mrf.mxu0  ;;  %v6555_v46 = vpop.f32.mrf.mxu1  ;;  %v6946_v39 = vld [vmem:[%s7163_s5 + $0x338] sm:$0xff]  }
 0x147   : > { %v2589_v48 = vmax.f32 %v1643_v43, 0.0  ;;  %v2717_v49 = vmax.f32 %v2155_v44, 0.0 }
 0x148   : > { %v1647_v50 = vpop.f32.mrf.mxu0  ;;  %6397 = vmatmul.mubr.msk.bf16.gmra.mxu0 %vm1128_vm3, %v6939_v40  ;;  %v2159_v51 = vpop.f32.mrf.mxu1  ;;  %6653 = vmatmul.mubr.msk.bf16.gmra.mxu1 %vm1128_vm3, %v6940_v41 }
 0x149   : > { %v5407_v52 = vpack.c.bf16 %v2589_v48, %v2588_v47  ;;  %v5727_v53 = vpack.c.bf16 %v2717_v49, %v2716_v42  ;;  %v2160_v54 = vadd.f32 %v7372_v60, %v2159_v51  ;;  %6400 = vmatprep.mubr.msk.bf16.mxu0 %vm7086_vm2, %v7084_v0  ;;  %6656 = vmatprep.mubr.msk.bf16.mxu1 %vm7086_vm2, %v7084_v0 }
 0x14a   : > { %v6302_v55 = vpop.f32.mrf.mxu0  ;;  %v6558_v56 = vpop.f32.mrf.mxu1  ;;  %v1648_v57 = vadd.f32 %v7372_v60, %v1647_v50 }
 0x14b   : > { %5994 = vst [vmem:[%s7394_s12 + $0x58] sm:$0xff] %v5407_v52   ;;  %6058 = vst [vmem:[%s7394_s12 + $0x258] sm:$0xff] %v5727_v53   ;;  %v2718_v63 = vmax.f32 %v2160_v54, 0.0 }
 0x14c   : > { %v1650_v58 = vpop.f32.mrf.mxu0  ;;  %v2162_v59 = vpop.f32.mrf.mxu1  ;;  %v2590_v5 = vmax.f32 %v1648_v57, 0.0 }
 0x14d   : > { %v1651_v1 = vadd.f32 %v7372_v60, %v1650_v58  ;;  %v2163_v2 = vadd.f32 %v7372_v60, %v2162_v59  ;;  %v6947_v58 = vld [vmem:[%s7163_s5 + $0x140] sm:$0xff]  }
 0x14e   : > { %v6303_v3 = vpop.f32.mrf.mxu0  ;;  %v6559_v4 = vpop.f32.mrf.mxu1  ;;  %v6948_v59 = vld [vmem:[%s7163_s5 + $0x340] sm:$0xff]  }
 0x14f   : > { %v2591_v6 = vmax.f32 %v1651_v1, 0.0  ;;  %v2719_v7 = vmax.f32 %v2163_v2, 0.0 }
 0x150   : > { %v1655_v8 = vpop.f32.mrf.mxu0  ;;  %6401 = vmatmul.mubr.msk.bf16.gmra.mxu0 %vm1128_vm3, %v6941_v61  ;;  %v2167_v9 = vpop.f32.mrf.mxu1  ;;  %6657 = vmatmul.mubr.msk.bf16.gmra.mxu1 %vm1128_vm3, %v6942_v62 }
 0x151   : > { %v5412_v10 = vpack.c.bf16 %v2591_v6, %v2590_v5  ;;  %v5732_v11 = vpack.c.bf16 %v2719_v7, %v2718_v63  ;;  %v2168_v12 = vadd.f32 %v7372_v60, %v2167_v9  ;;  %6404 = vmatprep.mubr.msk.bf16.mxu0 %vm7086_vm2, %v7084_v0  ;;  %6660 = vmatprep.mubr.msk.bf16.mxu1 %vm7086_vm2, %v7084_v0 }
 0x152   : > { %v6306_v13 = vpop.f32.mrf.mxu0  ;;  %v6562_v14 = vpop.f32.mrf.mxu1  ;;  %v1656_v15 = vadd.f32 %v7372_v60, %v1655_v8 }
 0x153   : > { %5995 = vst [vmem:[%s7394_s12 + $0x60] sm:$0xff] %v5412_v10   ;;  %6059 = vst [vmem:[%s7394_s12 + $0x260] sm:$0xff] %v5732_v11   ;;  %v2720_v20 = vmax.f32 %v2168_v12, 0.0 }
 0x154   : > { %v1658_v16 = vpop.f32.mrf.mxu0  ;;  %v2170_v17 = vpop.f32.mrf.mxu1  ;;  %v2592_v25 = vmax.f32 %v1656_v15, 0.0 }
 0x155   : > { %v1659_v21 = vadd.f32 %v7372_v60, %v1658_v16  ;;  %v2171_v22 = vadd.f32 %v7372_v60, %v2170_v17  ;;  %v6949_v16 = vld [vmem:[%s7163_s5 + $0x148] sm:$0xff]  }
 0x156   : > { %v6307_v23 = vpop.f32.mrf.mxu0  ;;  %v6563_v24 = vpop.f32.mrf.mxu1  ;;  %v6950_v17 = vld [vmem:[%s7163_s5 + $0x348] sm:$0xff]  }
 0x157   : > { %v2593_v26 = vmax.f32 %v1659_v21, 0.0  ;;  %v2721_v27 = vmax.f32 %v2171_v22, 0.0 }
 0x158   : > { %v1663_v28 = vpop.f32.mrf.mxu0  ;;  %6405 = vmatmul.mubr.msk.bf16.gmra.mxu0 %vm1128_vm3, %v6943_v18  ;;  %v2175_v29 = vpop.f32.mrf.mxu1  ;;  %6661 = vmatmul.mubr.msk.bf16.gmra.mxu1 %vm1128_vm3, %v6944_v19 }
 0x159   : > { %v5417_v30 = vpack.c.bf16 %v2593_v26, %v2592_v25  ;;  %v5737_v31 = vpack.c.bf16 %v2721_v27, %v2720_v20  ;;  %v2176_v32 = vadd.f32 %v7372_v60, %v2175_v29  ;;  %6408 = vmatprep.mubr.msk.bf16.mxu0 %vm7086_vm2, %v7084_v0  ;;  %6664 = vmatprep.mubr.msk.bf16.mxu1 %vm7086_vm2, %v7084_v0 }
 0x15a   : > { %v6310_v33 = vpop.f32.mrf.mxu0  ;;  %v6566_v34 = vpop.f32.mrf.mxu1  ;;  %v1664_v35 = vadd.f32 %v7372_v60, %v1663_v28 }
 0x15b   : > { %5996 = vst [vmem:[%s7394_s12 + $0x68] sm:$0xff] %v5417_v30   ;;  %6060 = vst [vmem:[%s7394_s12 + $0x268] sm:$0xff] %v5737_v31   ;;  %v2722_v40 = vmax.f32 %v2176_v32, 0.0 }
 0x15c   : > { %v1666_v36 = vpop.f32.mrf.mxu0  ;;  %v2178_v37 = vpop.f32.mrf.mxu1  ;;  %v2594_v45 = vmax.f32 %v1664_v35, 0.0 }
 0x15d   : > { %v1667_v41 = vadd.f32 %v7372_v60, %v1666_v36  ;;  %v2179_v42 = vadd.f32 %v7372_v60, %v2178_v37  ;;  %v6951_v36 = vld [vmem:[%s7163_s5 + $0x150] sm:$0xff]  }
 0x15e   : > { %v6311_v43 = vpop.f32.mrf.mxu0  ;;  %v6567_v44 = vpop.f32.mrf.mxu1  ;;  %v6952_v37 = vld [vmem:[%s7163_s5 + $0x350] sm:$0xff]  }
 0x15f   : > { %v2595_v46 = vmax.f32 %v1667_v41, 0.0  ;;  %v2723_v47 = vmax.f32 %v2179_v42, 0.0 }
 0x160   : > { %v1671_v48 = vpop.f32.mrf.mxu0  ;;  %6409 = vmatmul.mubr.msk.bf16.gmra.mxu0 %vm1128_vm3, %v6945_v38  ;;  %v2183_v49 = vpop.f32.mrf.mxu1  ;;  %6665 = vmatmul.mubr.msk.bf16.gmra.mxu1 %vm1128_vm3, %v6946_v39 }
 0x161   : > { %v5422_v50 = vpack.c.bf16 %v2595_v46, %v2594_v45  ;;  %v5742_v51 = vpack.c.bf16 %v2723_v47, %v2722_v40  ;;  %v2184_v52 = vadd.f32 %v7372_v60, %v2183_v49  ;;  %6412 = vmatprep.mubr.msk.bf16.mxu0 %vm7086_vm2, %v7084_v0  ;;  %6668 = vmatprep.mubr.msk.bf16.mxu1 %vm7086_vm2, %v7084_v0 }
 0x162   : > { %v6314_v53 = vpop.f32.mrf.mxu0  ;;  %v6570_v54 = vpop.f32.mrf.mxu1  ;;  %v1672_v55 = vadd.f32 %v7372_v60, %v1671_v48 }
 0x163   : > { %5997 = vst [vmem:[%s7394_s12 + $0x70] sm:$0xff] %v5422_v50   ;;  %6061 = vst [vmem:[%s7394_s12 + $0x270] sm:$0xff] %v5742_v51   ;;  %v2724_v61 = vmax.f32 %v2184_v52, 0.0 }
 0x164   : > { %v1674_v56 = vpop.f32.mrf.mxu0  ;;  %v2186_v57 = vpop.f32.mrf.mxu1  ;;  %v2596_v3 = vmax.f32 %v1672_v55, 0.0 }
 0x165   : > { %v1675_v62 = vadd.f32 %v7372_v60, %v1674_v56  ;;  %v2187_v63 = vadd.f32 %v7372_v60, %v2186_v57  ;;  %v6953_v56 = vld [vmem:[%s7163_s5 + $0x158] sm:$0xff]  }
 0x166   : > { %v6315_v1 = vpop.f32.mrf.mxu0  ;;  %v6571_v2 = vpop.f32.mrf.mxu1  ;;  %v6954_v57 = vld [vmem:[%s7163_s5 + $0x358] sm:$0xff]  }
 0x167   : > { %v2597_v4 = vmax.f32 %v1675_v62, 0.0  ;;  %v2725_v5 = vmax.f32 %v2187_v63, 0.0 }
 0x168   : > { %v1679_v6 = vpop.f32.mrf.mxu0  ;;  %6413 = vmatmul.mubr.msk.bf16.gmra.mxu0 %vm1128_vm3, %v6947_v58  ;;  %v2191_v7 = vpop.f32.mrf.mxu1  ;;  %6669 = vmatmul.mubr.msk.bf16.gmra.mxu1 %vm1128_vm3, %v6948_v59 }
 0x169   : > { %v5427_v8 = vpack.c.bf16 %v2597_v4, %v2596_v3  ;;  %v5747_v9 = vpack.c.bf16 %v2725_v5, %v2724_v61  ;;  %v2192_v10 = vadd.f32 %v7372_v60, %v2191_v7  ;;  %6416 = vmatprep.mubr.msk.bf16.mxu0 %vm7086_vm2, %v7084_v0  ;;  %6672 = vmatprep.mubr.msk.bf16.mxu1 %vm7086_vm2, %v7084_v0 }
 0x16a   : > { %v6318_v11 = vpop.f32.mrf.mxu0  ;;  %v6574_v12 = vpop.f32.mrf.mxu1  ;;  %v1680_v13 = vadd.f32 %v7372_v60, %v1679_v6 }
 0x16b   : > { %5998 = vst [vmem:[%s7394_s12 + $0x78] sm:$0xff] %v5427_v8   ;;  %6062 = vst [vmem:[%s7394_s12 + $0x278] sm:$0xff] %v5747_v9   ;;  %v2726_v18 = vmax.f32 %v2192_v10, 0.0 }
 0x16c   : > { %v1682_v14 = vpop.f32.mrf.mxu0  ;;  %v2194_v15 = vpop.f32.mrf.mxu1  ;;  %v2598_v23 = vmax.f32 %v1680_v13, 0.0 }
 0x16d   : > { %v1683_v19 = vadd.f32 %v7372_v60, %v1682_v14  ;;  %v2195_v20 = vadd.f32 %v7372_v60, %v2194_v15  ;;  %v6955_v14 = vld [vmem:[%s7163_s5 + $0x160] sm:$0xff]  }
 0x16e   : > { %v6319_v21 = vpop.f32.mrf.mxu0  ;;  %v6575_v22 = vpop.f32.mrf.mxu1  ;;  %v6956_v15 = vld [vmem:[%s7163_s5 + $0x360] sm:$0xff]  }
 0x16f   : > { %v2599_v24 = vmax.f32 %v1683_v19, 0.0  ;;  %v2727_v25 = vmax.f32 %v2195_v20, 0.0 }
 0x170   : > { %v1687_v26 = vpop.f32.mrf.mxu0  ;;  %6417 = vmatmul.mubr.msk.bf16.gmra.mxu0 %vm1128_vm3, %v6949_v16  ;;  %v2199_v27 = vpop.f32.mrf.mxu1  ;;  %6673 = vmatmul.mubr.msk.bf16.gmra.mxu1 %vm1128_vm3, %v6950_v17  ;;  %v7656_v17 = vld [vmem:[%s8279_s2] ss:$0 sm:$0xff] }
 0x171   : > { %v5432_v28 = vpack.c.bf16 %v2599_v24, %v2598_v23  ;;  %v5752_v29 = vpack.c.bf16 %v2727_v25, %v2726_v18  ;;  %v2200_v30 = vadd.f32 %v7372_v60, %v2199_v27  ;;  %6420 = vmatprep.mubr.msk.bf16.mxu0 %vm7086_vm2, %v7084_v0  ;;  %6676 = vmatprep.mubr.msk.bf16.mxu1 %vm7086_vm2, %v7084_v0 }
 0x172   : > { %v6322_v31 = vpop.f32.mrf.mxu0  ;;  %v6578_v32 = vpop.f32.mrf.mxu1  ;;  %v1688_v33 = vadd.f32 %v7372_v60, %v1687_v26 }
 0x173   : > { %5999 = vst [vmem:[%s7394_s12 + $0x80] sm:$0xff] %v5432_v28   ;;  %6063 = vst [vmem:[%s7394_s12 + $0x280] sm:$0xff] %v5752_v29   ;;  %v2728_v38 = vmax.f32 %v2200_v30, 0.0 }
 0x174   : > { %v1690_v34 = vpop.f32.mrf.mxu0  ;;  %v2202_v35 = vpop.f32.mrf.mxu1  ;;  %v2600_v43 = vmax.f32 %v1688_v33, 0.0 }
 0x175   : > { %v1691_v39 = vadd.f32 %v7372_v60, %v1690_v34  ;;  %v2203_v40 = vadd.f32 %v7372_v60, %v2202_v35  ;;  %v6957_v34 = vld [vmem:[%s7163_s5 + $0x168] sm:$0xff]  }
 0x176   : > { %v6323_v41 = vpop.f32.mrf.mxu0  ;;  %v6579_v42 = vpop.f32.mrf.mxu1  ;;  %v6958_v35 = vld [vmem:[%s7163_s5 + $0x368] sm:$0xff]  }
 0x177   : > { %v2601_v44 = vmax.f32 %v1691_v39, 0.0  ;;  %v2729_v45 = vmax.f32 %v2203_v40, 0.0 }
 0x178   : > { %v1695_v46 = vpop.f32.mrf.mxu0  ;;  %6421 = vmatmul.mubr.msk.bf16.gmra.mxu0 %vm1128_vm3, %v6951_v36  ;;  %v2207_v47 = vpop.f32.mrf.mxu1  ;;  %6677 = vmatmul.mubr.msk.bf16.gmra.mxu1 %vm1128_vm3, %v6952_v37 }
 0x179   : > { %v5437_v48 = vpack.c.bf16 %v2601_v44, %v2600_v43  ;;  %v5757_v49 = vpack.c.bf16 %v2729_v45, %v2728_v38  ;;  %v2208_v50 = vadd.f32 %v7372_v60, %v2207_v47  ;;  %6424 = vmatprep.mubr.msk.bf16.mxu0 %vm7086_vm2, %v7084_v0  ;;  %6680 = vmatprep.mubr.msk.bf16.mxu1 %vm7086_vm2, %v7084_v0 }
 0x17a   : > { %v6326_v51 = vpop.f32.mrf.mxu0  ;;  %v6582_v52 = vpop.f32.mrf.mxu1  ;;  %v1696_v53 = vadd.f32 %v7372_v60, %v1695_v46 }
 0x17b   : > { %6000 = vst [vmem:[%s7394_s12 + $0x88] sm:$0xff] %v5437_v48   ;;  %6064 = vst [vmem:[%s7394_s12 + $0x288] sm:$0xff] %v5757_v49   ;;  %v2730_v58 = vmax.f32 %v2208_v50, 0.0 }
 0x17c   : > { %v1698_v54 = vpop.f32.mrf.mxu0  ;;  %v2210_v55 = vpop.f32.mrf.mxu1  ;;  %v2602_v1 = vmax.f32 %v1696_v53, 0.0 }
 0x17d   : > { %v1699_v59 = vadd.f32 %v7372_v60, %v1698_v54  ;;  %v2211_v61 = vadd.f32 %v7372_v60, %v2210_v55  ;;  %v6959_v54 = vld [vmem:[%s7163_s5 + $0x170] sm:$0xff]  }
 0x17e   : > { %v6327_v62 = vpop.f32.mrf.mxu0  ;;  %v6583_v63 = vpop.f32.mrf.mxu1  ;;  %v6960_v55 = vld [vmem:[%s7163_s5 + $0x370] sm:$0xff]  }
 0x17f   : > { %v2603_v2 = vmax.f32 %v1699_v59, 0.0  ;;  %v2731_v3 = vmax.f32 %v2211_v61, 0.0 }
 0x180   : > { %v1703_v4 = vpop.f32.mrf.mxu0  ;;  %6425 = vmatmul.mubr.msk.bf16.gmra.mxu0 %vm1128_vm3, %v6953_v56  ;;  %v2215_v5 = vpop.f32.mrf.mxu1  ;;  %6681 = vmatmul.mubr.msk.bf16.gmra.mxu1 %vm1128_vm3, %v6954_v57 }
 0x181   : > { %v5442_v6 = vpack.c.bf16 %v2603_v2, %v2602_v1  ;;  %v5762_v7 = vpack.c.bf16 %v2731_v3, %v2730_v58  ;;  %v2216_v8 = vadd.f32 %v7372_v60, %v2215_v5  ;;  %6428 = vmatprep.mubr.msk.bf16.mxu0 %vm7086_vm2, %v7084_v0  ;;  %6684 = vmatprep.mubr.msk.bf16.mxu1 %vm7086_vm2, %v7084_v0 }
 0x182   : > { %v6330_v9 = vpop.f32.mrf.mxu0  ;;  %v6586_v10 = vpop.f32.mrf.mxu1  ;;  %v1704_v11 = vadd.f32 %v7372_v60, %v1703_v4 }
 0x183   : > { %6001 = vst [vmem:[%s7394_s12 + $0x90] sm:$0xff] %v5442_v6   ;;  %6065 = vst [vmem:[%s7394_s12 + $0x290] sm:$0xff] %v5762_v7   ;;  %v2732_v16 = vmax.f32 %v2216_v8, 0.0 }
 0x184   : > { %v1706_v12 = vpop.f32.mrf.mxu0  ;;  %v2218_v13 = vpop.f32.mrf.mxu1  ;;  %v2604_v22 = vmax.f32 %v1704_v11, 0.0 }
 0x185   : > { %v1707_v18 = vadd.f32 %v7656_v17, %v1706_v12  ;;  %v2219_v19 = vadd.f32 %v7656_v17, %v2218_v13  ;;  %v6961_v12 = vld [vmem:[%s7163_s5 + $0x178] sm:$0xff]  }
 0x186   : > { %v6331_v20 = vpop.f32.mrf.mxu0  ;;  %v6587_v21 = vpop.f32.mrf.mxu1  ;;  %v6962_v13 = vld [vmem:[%s7163_s5 + $0x378] sm:$0xff]  }
 0x187   : > { %v2605_v60 = vmax.f32 %v1707_v18, 0.0  ;;  %v2733_v23 = vmax.f32 %v2219_v19, 0.0 }
 0x188   : > { %v1711_v24 = vpop.f32.mrf.mxu0  ;;  %6429 = vmatmul.mubr.msk.bf16.gmra.mxu0 %vm1128_vm3, %v6955_v14  ;;  %v2223_v25 = vpop.f32.mrf.mxu1  ;;  %6685 = vmatmul.mubr.msk.bf16.gmra.mxu1 %vm1128_vm3, %v6956_v15 }
 0x189   : > { %v5447_v26 = vpack.c.bf16 %v2605_v60, %v2604_v22  ;;  %v5767_v27 = vpack.c.bf16 %v2733_v23, %v2732_v16  ;;  %v2224_v28 = vadd.f32 %v7656_v17, %v2223_v25  ;;  %6432 = vmatprep.mubr.msk.bf16.mxu0 %vm7086_vm2, %v7084_v0  ;;  %6688 = vmatprep.mubr.msk.bf16.mxu1 %vm7086_vm2, %v7084_v0 }
 0x18a   : > { %v6334_v29 = vpop.f32.mrf.mxu0  ;;  %v6590_v30 = vpop.f32.mrf.mxu1  ;;  %v1712_v31 = vadd.f32 %v7656_v17, %v1711_v24 }
 0x18b   : > { %6002 = vst [vmem:[%s7394_s12 + $0x98] sm:$0xff] %v5447_v26   ;;  %6066 = vst [vmem:[%s7394_s12 + $0x298] sm:$0xff] %v5767_v27   ;;  %v2734_v36 = vmax.f32 %v2224_v28, 0.0 }
 0x18c   : > { %v1714_v32 = vpop.f32.mrf.mxu0  ;;  %v2226_v33 = vpop.f32.mrf.mxu1  ;;  %v2606_v41 = vmax.f32 %v1712_v31, 0.0 }
 0x18d   : > { %v1715_v37 = vadd.f32 %v7656_v17, %v1714_v32  ;;  %v2227_v38 = vadd.f32 %v7656_v17, %v2226_v33  ;;  %v6963_v32 = vld [vmem:[%s7163_s5 + $0x180] sm:$0xff]  }
 0x18e   : > { %v6335_v39 = vpop.f32.mrf.mxu0  ;;  %v6591_v40 = vpop.f32.mrf.mxu1  ;;  %v6964_v33 = vld [vmem:[%s7163_s5 + $0x380] sm:$0xff]  }
 0x18f   : > { %v2607_v42 = vmax.f32 %v1715_v37, 0.0  ;;  %v2735_v43 = vmax.f32 %v2227_v38, 0.0 }
 0x190   : > { %v1719_v44 = vpop.f32.mrf.mxu0  ;;  %6433 = vmatmul.mubr.msk.bf16.gmra.mxu0 %vm1128_vm3, %v6957_v34  ;;  %v2231_v45 = vpop.f32.mrf.mxu1  ;;  %6689 = vmatmul.mubr.msk.bf16.gmra.mxu1 %vm1128_vm3, %v6958_v35 }
 0x191   : > { %v5452_v46 = vpack.c.bf16 %v2607_v42, %v2606_v41  ;;  %v5772_v47 = vpack.c.bf16 %v2735_v43, %v2734_v36  ;;  %v2232_v48 = vadd.f32 %v7656_v17, %v2231_v45  ;;  %6436 = vmatprep.mubr.msk.bf16.mxu0 %vm7086_vm2, %v7084_v0  ;;  %6692 = vmatprep.mubr.msk.bf16.mxu1 %vm7086_vm2, %v7084_v0 }
 0x192   : > { %v6338_v49 = vpop.f32.mrf.mxu0  ;;  %v6594_v50 = vpop.f32.mrf.mxu1  ;;  %v1720_v51 = vadd.f32 %v7656_v17, %v1719_v44 }
 0x193   : > { %6003 = vst [vmem:[%s7394_s12 + $0xa0] sm:$0xff] %v5452_v46   ;;  %6067 = vst [vmem:[%s7394_s12 + $0x2a0] sm:$0xff] %v5772_v47   ;;  %v2736_v56 = vmax.f32 %v2232_v48, 0.0 }
 0x194   : > { %v1722_v52 = vpop.f32.mrf.mxu0  ;;  %v2234_v53 = vpop.f32.mrf.mxu1  ;;  %v2608_v62 = vmax.f32 %v1720_v51, 0.0 }
 0x195   : > { %v1723_v57 = vadd.f32 %v7656_v17, %v1722_v52  ;;  %v2235_v58 = vadd.f32 %v7656_v17, %v2234_v53  ;;  %v6965_v52 = vld [vmem:[%s7163_s5 + $0x188] sm:$0xff]  }
 0x196   : > { %v6339_v59 = vpop.f32.mrf.mxu0  ;;  %v6595_v61 = vpop.f32.mrf.mxu1  ;;  %v6966_v53 = vld [vmem:[%s7163_s5 + $0x388] sm:$0xff]  }
 0x197   : > { %v2609_v63 = vmax.f32 %v1723_v57, 0.0  ;;  %v2737_v1 = vmax.f32 %v2235_v58, 0.0 }
 0x198   : > { %v1727_v2 = vpop.f32.mrf.mxu0  ;;  %6437 = vmatmul.mubr.msk.bf16.gmra.mxu0 %vm1128_vm3, %v6959_v54  ;;  %v2239_v3 = vpop.f32.mrf.mxu1  ;;  %6693 = vmatmul.mubr.msk.bf16.gmra.mxu1 %vm1128_vm3, %v6960_v55 }
 0x199   : > { %v5457_v4 = vpack.c.bf16 %v2609_v63, %v2608_v62  ;;  %v5777_v5 = vpack.c.bf16 %v2737_v1, %v2736_v56  ;;  %v2240_v6 = vadd.f32 %v7656_v17, %v2239_v3  ;;  %6440 = vmatprep.mubr.msk.bf16.mxu0 %vm7086_vm2, %v7084_v0  ;;  %6696 = vmatprep.mubr.msk.bf16.mxu1 %vm7086_vm2, %v7084_v0 }
 0x19a   : > { %v6342_v7 = vpop.f32.mrf.mxu0  ;;  %v6598_v8 = vpop.f32.mrf.mxu1  ;;  %v1728_v9 = vadd.f32 %v7656_v17, %v1727_v2 }
 0x19b   : > { %6004 = vst [vmem:[%s7394_s12 + $0xa8] sm:$0xff] %v5457_v4   ;;  %6068 = vst [vmem:[%s7394_s12 + $0x2a8] sm:$0xff] %v5777_v5   ;;  %v2738_v14 = vmax.f32 %v2240_v6, 0.0 }
 0x19c   : > { %v1730_v10 = vpop.f32.mrf.mxu0  ;;  %v2242_v11 = vpop.f32.mrf.mxu1  ;;  %v2610_v20 = vmax.f32 %v1728_v9, 0.0 }
 0x19d   : > { %v1731_v15 = vadd.f32 %v7656_v17, %v1730_v10  ;;  %v2243_v16 = vadd.f32 %v7656_v17, %v2242_v11  ;;  %v6967_v10 = vld [vmem:[%s7163_s5 + $0x190] sm:$0xff]  }
 0x19e   : > { %v6343_v18 = vpop.f32.mrf.mxu0  ;;  %v6599_v19 = vpop.f32.mrf.mxu1  ;;  %v6968_v11 = vld [vmem:[%s7163_s5 + $0x390] sm:$0xff]  }
 0x19f   : > { %v2611_v21 = vmax.f32 %v1731_v15, 0.0  ;;  %v2739_v22 = vmax.f32 %v2243_v16, 0.0 }
 0x1a0   : > { %v1735_v60 = vpop.f32.mrf.mxu0  ;;  %6441 = vmatmul.mubr.msk.bf16.gmra.mxu0 %vm1128_vm3, %v6961_v12  ;;  %v2247_v23 = vpop.f32.mrf.mxu1  ;;  %6697 = vmatmul.mubr.msk.bf16.gmra.mxu1 %vm1128_vm3, %v6962_v13 }
 0x1a1   : > { %v5462_v24 = vpack.c.bf16 %v2611_v21, %v2610_v20  ;;  %v5782_v25 = vpack.c.bf16 %v2739_v22, %v2738_v14  ;;  %v2248_v26 = vadd.f32 %v7656_v17, %v2247_v23  ;;  %6444 = vmatprep.mubr.msk.bf16.mxu0 %vm7086_vm2, %v7084_v0  ;;  %6700 = vmatprep.mubr.msk.bf16.mxu1 %vm7086_vm2, %v7084_v0 }
 0x1a2   : > { %v6346_v27 = vpop.f32.mrf.mxu0  ;;  %v6602_v28 = vpop.f32.mrf.mxu1  ;;  %v1736_v29 = vadd.f32 %v7656_v17, %v1735_v60 }
 0x1a3   : > { %6005 = vst [vmem:[%s7394_s12 + $0xb0] sm:$0xff] %v5462_v24   ;;  %6069 = vst [vmem:[%s7394_s12 + $0x2b0] sm:$0xff] %v5782_v25   ;;  %v2740_v34 = vmax.f32 %v2248_v26, 0.0 }
 0x1a4   : > { %v1738_v30 = vpop.f32.mrf.mxu0  ;;  %v2250_v31 = vpop.f32.mrf.mxu1  ;;  %v2612_v39 = vmax.f32 %v1736_v29, 0.0 }
 0x1a5   : > { %v1739_v35 = vadd.f32 %v7656_v17, %v1738_v30  ;;  %v2251_v36 = vadd.f32 %v7656_v17, %v2250_v31  ;;  %v6969_v30 = vld [vmem:[%s7163_s5 + $0x198] sm:$0xff]  }
 0x1a6   : > { %v6347_v37 = vpop.f32.mrf.mxu0  ;;  %v6603_v38 = vpop.f32.mrf.mxu1  ;;  %v6970_v31 = vld [vmem:[%s7163_s5 + $0x398] sm:$0xff]  }
 0x1a7   : > { %v2613_v40 = vmax.f32 %v1739_v35, 0.0  ;;  %v2741_v41 = vmax.f32 %v2251_v36, 0.0 }
 0x1a8   : > { %v1743_v42 = vpop.f32.mrf.mxu0  ;;  %6445 = vmatmul.mubr.msk.bf16.gmra.mxu0 %vm1128_vm3, %v6963_v32  ;;  %v2255_v43 = vpop.f32.mrf.mxu1  ;;  %6701 = vmatmul.mubr.msk.bf16.gmra.mxu1 %vm1128_vm3, %v6964_v33 }
 0x1a9   : > { %v5467_v44 = vpack.c.bf16 %v2613_v40, %v2612_v39  ;;  %v5787_v45 = vpack.c.bf16 %v2741_v41, %v2740_v34  ;;  %v2256_v46 = vadd.f32 %v7656_v17, %v2255_v43  ;;  %6448 = vmatprep.mubr.msk.bf16.mxu0 %vm7086_vm2, %v7084_v0  ;;  %6704 = vmatprep.mubr.msk.bf16.mxu1 %vm7086_vm2, %v7084_v0 }
 0x1aa   : > { %v6350_v47 = vpop.f32.mrf.mxu0  ;;  %v6606_v48 = vpop.f32.mrf.mxu1  ;;  %v1744_v49 = vadd.f32 %v7656_v17, %v1743_v42 }
 0x1ab   : > { %6006 = vst [vmem:[%s7394_s12 + $0xb8] sm:$0xff] %v5467_v44   ;;  %6070 = vst [vmem:[%s7394_s12 + $0x2b8] sm:$0xff] %v5787_v45   ;;  %v2742_v54 = vmax.f32 %v2256_v46, 0.0 }
 0x1ac   : > { %v1746_v50 = vpop.f32.mrf.mxu0  ;;  %v2258_v51 = vpop.f32.mrf.mxu1  ;;  %v2614_v59 = vmax.f32 %v1744_v49, 0.0 }
 0x1ad   : > { %v1747_v55 = vadd.f32 %v7656_v17, %v1746_v50  ;;  %v2259_v56 = vadd.f32 %v7656_v17, %v2258_v51  ;;  %v6971_v50 = vld [vmem:[%s7163_s5 + $0x1a0] sm:$0xff]  }
 0x1ae   : > { %v6351_v57 = vpop.f32.mrf.mxu0  ;;  %v6607_v58 = vpop.f32.mrf.mxu1  ;;  %v6972_v51 = vld [vmem:[%s7163_s5 + $0x3a0] sm:$0xff]  }
 0x1af   : > { %v2615_v61 = vmax.f32 %v1747_v55, 0.0  ;;  %v2743_v62 = vmax.f32 %v2259_v56, 0.0 }
 0x1b0   : > { %v1751_v63 = vpop.f32.mrf.mxu0  ;;  %6449 = vmatmul.mubr.msk.bf16.gmra.mxu0 %vm1128_vm3, %v6965_v52  ;;  %v2263_v1 = vpop.f32.mrf.mxu1  ;;  %6705 = vmatmul.mubr.msk.bf16.gmra.mxu1 %vm1128_vm3, %v6966_v53 }
 0x1b1   : > { %v5472_v2 = vpack.c.bf16 %v2615_v61, %v2614_v59  ;;  %v5792_v3 = vpack.c.bf16 %v2743_v62, %v2742_v54  ;;  %v2264_v4 = vadd.f32 %v7656_v17, %v2263_v1  ;;  %6452 = vmatprep.mubr.msk.bf16.mxu0 %vm7086_vm2, %v7084_v0  ;;  %6708 = vmatprep.mubr.msk.bf16.mxu1 %vm7086_vm2, %v7084_v0 }
 0x1b2   : > { %v6354_v5 = vpop.f32.mrf.mxu0  ;;  %v6610_v6 = vpop.f32.mrf.mxu1  ;;  %v1752_v7 = vadd.f32 %v7656_v17, %v1751_v63 }
 0x1b3   : > { %6007 = vst [vmem:[%s7394_s12 + $0xc0] sm:$0xff] %v5472_v2   ;;  %6071 = vst [vmem:[%s7394_s12 + $0x2c0] sm:$0xff] %v5792_v3   ;;  %v2744_v12 = vmax.f32 %v2264_v4, 0.0 }
 0x1b4   : > { %v1754_v8 = vpop.f32.mrf.mxu0  ;;  %v2266_v9 = vpop.f32.mrf.mxu1  ;;  %v2616_v18 = vmax.f32 %v1752_v7, 0.0 }
 0x1b5   : > { %v1755_v13 = vadd.f32 %v7656_v17, %v1754_v8  ;;  %v2267_v14 = vadd.f32 %v7656_v17, %v2266_v9  ;;  %v6973_v8 = vld [vmem:[%s7163_s5 + $0x1a8] sm:$0xff]  }
 0x1b6   : > { %v6355_v15 = vpop.f32.mrf.mxu0  ;;  %v6611_v16 = vpop.f32.mrf.mxu1  ;;  %v6974_v9 = vld [vmem:[%s7163_s5 + $0x3a8] sm:$0xff]  }
 0x1b7   : > { %v2617_v19 = vmax.f32 %v1755_v13, 0.0  ;;  %v2745_v20 = vmax.f32 %v2267_v14, 0.0 }
 0x1b8   : > { %v1759_v21 = vpop.f32.mrf.mxu0  ;;  %6453 = vmatmul.mubr.msk.bf16.gmra.mxu0 %vm1128_vm3, %v6967_v10  ;;  %v2271_v22 = vpop.f32.mrf.mxu1  ;;  %6709 = vmatmul.mubr.msk.bf16.gmra.mxu1 %vm1128_vm3, %v6968_v11 }
 0x1b9   : > { %v5477_v60 = vpack.c.bf16 %v2617_v19, %v2616_v18  ;;  %v5797_v23 = vpack.c.bf16 %v2745_v20, %v2744_v12  ;;  %v2272_v24 = vadd.f32 %v7656_v17, %v2271_v22  ;;  %6456 = vmatprep.mubr.msk.bf16.mxu0 %vm7086_vm2, %v7084_v0  ;;  %6712 = vmatprep.mubr.msk.bf16.mxu1 %vm7086_vm2, %v7084_v0 }
 0x1ba   : > { %v6358_v25 = vpop.f32.mrf.mxu0  ;;  %v6614_v26 = vpop.f32.mrf.mxu1  ;;  %v1760_v27 = vadd.f32 %v7656_v17, %v1759_v21 }
 0x1bb   : > { %6008 = vst [vmem:[%s7394_s12 + $0xc8] sm:$0xff] %v5477_v60   ;;  %6072 = vst [vmem:[%s7394_s12 + $0x2c8] sm:$0xff] %v5797_v23   ;;  %v2746_v32 = vmax.f32 %v2272_v24, 0.0 }
 0x1bc   : > { %v1762_v28 = vpop.f32.mrf.mxu0  ;;  %v2274_v29 = vpop.f32.mrf.mxu1  ;;  %v2618_v37 = vmax.f32 %v1760_v27, 0.0 }
 0x1bd   : > { %v1763_v33 = vadd.f32 %v7656_v17, %v1762_v28  ;;  %v2275_v34 = vadd.f32 %v7656_v17, %v2274_v29  ;;  %v6975_v28 = vld [vmem:[%s7163_s5 + $0x1b0] sm:$0xff]  }
 0x1be   : > { %v6359_v35 = vpop.f32.mrf.mxu0  ;;  %v6615_v36 = vpop.f32.mrf.mxu1  ;;  %v6976_v29 = vld [vmem:[%s7163_s5 + $0x3b0] sm:$0xff]  }
 0x1bf   : > { %v2619_v38 = vmax.f32 %v1763_v33, 0.0  ;;  %v2747_v39 = vmax.f32 %v2275_v34, 0.0 }
 0x1c0   : > { %v1767_v40 = vpop.f32.mrf.mxu0  ;;  %6457 = vmatmul.mubr.msk.bf16.gmra.mxu0 %vm1128_vm3, %v6969_v30  ;;  %v2279_v41 = vpop.f32.mrf.mxu1  ;;  %6713 = vmatmul.mubr.msk.bf16.gmra.mxu1 %vm1128_vm3, %v6970_v31 }
 0x1c1   : > { %v5482_v42 = vpack.c.bf16 %v2619_v38, %v2618_v37  ;;  %v5802_v43 = vpack.c.bf16 %v2747_v39, %v2746_v32  ;;  %v2280_v44 = vadd.f32 %v7656_v17, %v2279_v41  ;;  %6460 = vmatprep.mubr.msk.bf16.mxu0 %vm7086_vm2, %v7084_v0  ;;  %6716 = vmatprep.mubr.msk.bf16.mxu1 %vm7086_vm2, %v7084_v0 }
 0x1c2   : > { %v6362_v45 = vpop.f32.mrf.mxu0  ;;  %v6618_v46 = vpop.f32.mrf.mxu1  ;;  %v1768_v47 = vadd.f32 %v7656_v17, %v1767_v40 }
 0x1c3   : > { %6009 = vst [vmem:[%s7394_s12 + $0xd0] sm:$0xff] %v5482_v42   ;;  %6073 = vst [vmem:[%s7394_s12 + $0x2d0] sm:$0xff] %v5802_v43   ;;  %v2748_v52 = vmax.f32 %v2280_v44, 0.0 }
 0x1c4   : > { %v1770_v48 = vpop.f32.mrf.mxu0  ;;  %v2282_v49 = vpop.f32.mrf.mxu1  ;;  %v2620_v57 = vmax.f32 %v1768_v47, 0.0 }
 0x1c5   : > { %v1771_v53 = vadd.f32 %v7656_v17, %v1770_v48  ;;  %v2283_v54 = vadd.f32 %v7656_v17, %v2282_v49  ;;  %v6977_v48 = vld [vmem:[%s7163_s5 + $0x1b8] sm:$0xff]  }
 0x1c6   : > { %v6363_v55 = vpop.f32.mrf.mxu0  ;;  %v6619_v56 = vpop.f32.mrf.mxu1  ;;  %v6978_v49 = vld [vmem:[%s7163_s5 + $0x3b8] sm:$0xff]  }
 0x1c7   : > { %v2621_v58 = vmax.f32 %v1771_v53, 0.0  ;;  %v2749_v59 = vmax.f32 %v2283_v54, 0.0 }
 0x1c8   : > { %v1775_v61 = vpop.f32.mrf.mxu0  ;;  %6461 = vmatmul.mubr.msk.bf16.gmra.mxu0 %vm1128_vm3, %v6971_v50  ;;  %v2287_v62 = vpop.f32.mrf.mxu1  ;;  %6717 = vmatmul.mubr.msk.bf16.gmra.mxu1 %vm1128_vm3, %v6972_v51 }
 0x1c9   : > { %v5487_v63 = vpack.c.bf16 %v2621_v58, %v2620_v57  ;;  %v5807_v1 = vpack.c.bf16 %v2749_v59, %v2748_v52  ;;  %v2288_v2 = vadd.f32 %v7656_v17, %v2287_v62  ;;  %6464 = vmatprep.mubr.msk.bf16.mxu0 %vm7086_vm2, %v7084_v0  ;;  %6720 = vmatprep.mubr.msk.bf16.mxu1 %vm7086_vm2, %v7084_v0 }
 0x1ca   : > { %v6366_v3 = vpop.f32.mrf.mxu0  ;;  %v6622_v4 = vpop.f32.mrf.mxu1  ;;  %v1776_v5 = vadd.f32 %v7656_v17, %v1775_v61 }
 0x1cb   : > { %6010 = vst [vmem:[%s7394_s12 + $0xd8] sm:$0xff] %v5487_v63   ;;  %6074 = vst [vmem:[%s7394_s12 + $0x2d8] sm:$0xff] %v5807_v1   ;;  %v2750_v10 = vmax.f32 %v2288_v2, 0.0 }
 0x1cc   : > { %v1778_v6 = vpop.f32.mrf.mxu0  ;;  %v2290_v7 = vpop.f32.mrf.mxu1  ;;  %v2622_v15 = vmax.f32 %v1776_v5, 0.0 }
 0x1cd   : > { %v1779_v11 = vadd.f32 %v7656_v17, %v1778_v6  ;;  %v2291_v12 = vadd.f32 %v7656_v17, %v2290_v7  ;;  %v6979_v6 = vld [vmem:[%s7163_s5 + $0x1c0] sm:$0xff]  }
 0x1ce   : > { %v6367_v13 = vpop.f32.mrf.mxu0  ;;  %v6623_v14 = vpop.f32.mrf.mxu1  ;;  %v6980_v7 = vld [vmem:[%s7163_s5 + $0x3c0] sm:$0xff]  }
 0x1cf   : > { %v2623_v16 = vmax.f32 %v1779_v11, 0.0  ;;  %v2751_v18 = vmax.f32 %v2291_v12, 0.0 }
 0x1d0   : > { %v1783_v19 = vpop.f32.mrf.mxu0  ;;  %6465 = vmatmul.mubr.msk.bf16.gmra.mxu0 %vm1128_vm3, %v6973_v8  ;;  %v2295_v20 = vpop.f32.mrf.mxu1  ;;  %6721 = vmatmul.mubr.msk.bf16.gmra.mxu1 %vm1128_vm3, %v6974_v9 }
 0x1d1   : > { %v5492_v21 = vpack.c.bf16 %v2623_v16, %v2622_v15  ;;  %v5812_v22 = vpack.c.bf16 %v2751_v18, %v2750_v10  ;;  %v2296_v60 = vadd.f32 %v7656_v17, %v2295_v20  ;;  %6468 = vmatprep.mubr.msk.bf16.mxu0 %vm7086_vm2, %v7084_v0  ;;  %6724 = vmatprep.mubr.msk.bf16.mxu1 %vm7086_vm2, %v7084_v0 }
 0x1d2   : > { %v6370_v23 = vpop.f32.mrf.mxu0  ;;  %v6626_v24 = vpop.f32.mrf.mxu1  ;;  %v1784_v25 = vadd.f32 %v7656_v17, %v1783_v19 }
 0x1d3   : > { %6011 = vst [vmem:[%s7394_s12 + $0xe0] sm:$0xff] %v5492_v21   ;;  %6075 = vst [vmem:[%s7394_s12 + $0x2e0] sm:$0xff] %v5812_v22   ;;  %v2752_v30 = vmax.f32 %v2296_v60, 0.0 }
 0x1d4   : > { %v1786_v26 = vpop.f32.mrf.mxu0  ;;  %v2298_v27 = vpop.f32.mrf.mxu1  ;;  %v2624_v35 = vmax.f32 %v1784_v25, 0.0 }
 0x1d5   : > { %v1787_v31 = vadd.f32 %v7656_v17, %v1786_v26  ;;  %v2299_v32 = vadd.f32 %v7656_v17, %v2298_v27  ;;  %v6981_v26 = vld [vmem:[%s7163_s5 + $0x1c8] sm:$0xff]  }
 0x1d6   : > { %v6371_v33 = vpop.f32.mrf.mxu0  ;;  %v6627_v34 = vpop.f32.mrf.mxu1  ;;  %v6982_v27 = vld [vmem:[%s7163_s5 + $0x3c8] sm:$0xff]  }
 0x1d7   : > { %v2625_v36 = vmax.f32 %v1787_v31, 0.0  ;;  %v2753_v37 = vmax.f32 %v2299_v32, 0.0 }
 0x1d8   : > { %v1791_v38 = vpop.f32.mrf.mxu0  ;;  %6469 = vmatmul.mubr.msk.bf16.gmra.mxu0 %vm1128_vm3, %v6975_v28  ;;  %v2303_v39 = vpop.f32.mrf.mxu1  ;;  %6725 = vmatmul.mubr.msk.bf16.gmra.mxu1 %vm1128_vm3, %v6976_v29 }
 0x1d9   : > { %v5497_v40 = vpack.c.bf16 %v2625_v36, %v2624_v35  ;;  %v5817_v41 = vpack.c.bf16 %v2753_v37, %v2752_v30  ;;  %v2304_v42 = vadd.f32 %v7656_v17, %v2303_v39  ;;  %6472 = vmatprep.mubr.msk.bf16.mxu0 %vm7086_vm2, %v7084_v0  ;;  %6728 = vmatprep.mubr.msk.bf16.mxu1 %vm7086_vm2, %v7084_v0 }
 0x1da   : > { %v6374_v43 = vpop.f32.mrf.mxu0  ;;  %v6630_v44 = vpop.f32.mrf.mxu1  ;;  %v1792_v45 = vadd.f32 %v7656_v17, %v1791_v38 }
 0x1db   : > { %6012 = vst [vmem:[%s7394_s12 + $0xe8] sm:$0xff] %v5497_v40   ;;  %6076 = vst [vmem:[%s7394_s12 + $0x2e8] sm:$0xff] %v5817_v41   ;;  %v2754_v50 = vmax.f32 %v2304_v42, 0.0 }
 0x1dc   : > { %v1794_v46 = vpop.f32.mrf.mxu0  ;;  %v2306_v47 = vpop.f32.mrf.mxu1  ;;  %v2626_v55 = vmax.f32 %v1792_v45, 0.0 }
 0x1dd   : > { %v1795_v51 = vadd.f32 %v7656_v17, %v1794_v46  ;;  %v2307_v52 = vadd.f32 %v7656_v17, %v2306_v47  ;;  %v6983_v46 = vld [vmem:[%s7163_s5 + $0x1d0] sm:$0xff]  }
 0x1de   : > { %v6375_v53 = vpop.f32.mrf.mxu0  ;;  %v6631_v54 = vpop.f32.mrf.mxu1  ;;  %v6984_v47 = vld [vmem:[%s7163_s5 + $0x3d0] sm:$0xff]  }
 0x1df   : > { %v2627_v56 = vmax.f32 %v1795_v51, 0.0  ;;  %v2755_v57 = vmax.f32 %v2307_v52, 0.0 }
 0x1e0   : > { %v1799_v58 = vpop.f32.mrf.mxu0  ;;  %6473 = vmatmul.mubr.msk.bf16.gmra.mxu0 %vm1128_vm3, %v6977_v48  ;;  %v2311_v59 = vpop.f32.mrf.mxu1  ;;  %6729 = vmatmul.mubr.msk.bf16.gmra.mxu1 %vm1128_vm3, %v6978_v49 }
 0x1e1   : > { %v5502_v61 = vpack.c.bf16 %v2627_v56, %v2626_v55  ;;  %v5822_v62 = vpack.c.bf16 %v2755_v57, %v2754_v50  ;;  %v2312_v63 = vadd.f32 %v7656_v17, %v2311_v59  ;;  %6476 = vmatprep.mubr.msk.bf16.mxu0 %vm7086_vm2, %v7084_v0  ;;  %6732 = vmatprep.mubr.msk.bf16.mxu1 %vm7086_vm2, %v7084_v0 }
 0x1e2   : > { %v6378_v1 = vpop.f32.mrf.mxu0  ;;  %v6634_v2 = vpop.f32.mrf.mxu1  ;;  %v1800_v3 = vadd.f32 %v7656_v17, %v1799_v58 }
 0x1e3   : > { %6013 = vst [vmem:[%s7394_s12 + $0xf0] sm:$0xff] %v5502_v61   ;;  %6077 = vst [vmem:[%s7394_s12 + $0x2f0] sm:$0xff] %v5822_v62   ;;  %v2756_v8 = vmax.f32 %v2312_v63, 0.0 }
 0x1e4   : > { %v1802_v4 = vpop.f32.mrf.mxu0  ;;  %v2314_v5 = vpop.f32.mrf.mxu1  ;;  %v2628_v13 = vmax.f32 %v1800_v3, 0.0 }
 0x1e5   : > { %v1803_v9 = vadd.f32 %v7656_v17, %v1802_v4  ;;  %v2315_v10 = vadd.f32 %v7656_v17, %v2314_v5  ;;  %v6985_v4 = vld [vmem:[%s7163_s5 + $0x1d8] sm:$0xff]  }
 0x1e6   : > { %v6379_v11 = vpop.f32.mrf.mxu0  ;;  %v6635_v12 = vpop.f32.mrf.mxu1  ;;  %v6986_v5 = vld [vmem:[%s7163_s5 + $0x3d8] sm:$0xff]  }
 0x1e7   : > { %v2629_v14 = vmax.f32 %v1803_v9, 0.0  ;;  %v2757_v15 = vmax.f32 %v2315_v10, 0.0 }
 0x1e8   : > { %v1807_v16 = vpop.f32.mrf.mxu0  ;;  %6477 = vmatmul.mubr.msk.bf16.gmra.mxu0 %vm1128_vm3, %v6979_v6  ;;  %v2319_v18 = vpop.f32.mrf.mxu1  ;;  %6733 = vmatmul.mubr.msk.bf16.gmra.mxu1 %vm1128_vm3, %v6980_v7 }
 0x1e9   : > { %v5507_v19 = vpack.c.bf16 %v2629_v14, %v2628_v13  ;;  %v5827_v20 = vpack.c.bf16 %v2757_v15, %v2756_v8  ;;  %v2320_v21 = vadd.f32 %v7656_v17, %v2319_v18  ;;  %6480 = vmatprep.mubr.msk.bf16.mxu0 %vm7086_vm2, %v7084_v0  ;;  %6736 = vmatprep.mubr.msk.bf16.mxu1 %vm7086_vm2, %v7084_v0 }
 0x1ea   : > { %v6382_v22 = vpop.f32.mrf.mxu0  ;;  %v6638_v60 = vpop.f32.mrf.mxu1  ;;  %v1808_v23 = vadd.f32 %v7656_v17, %v1807_v16 }
 0x1eb   : > { %6014 = vst [vmem:[%s7394_s12 + $0xf8] sm:$0xff] %v5507_v19   ;;  %6078 = vst [vmem:[%s7394_s12 + $0x2f8] sm:$0xff] %v5827_v20   ;;  %v2758_v28 = vmax.f32 %v2320_v21, 0.0 }
 0x1ec   : > { %v1810_v24 = vpop.f32.mrf.mxu0  ;;  %v2322_v25 = vpop.f32.mrf.mxu1  ;;  %v2630_v33 = vmax.f32 %v1808_v23, 0.0 }
 0x1ed   : > { %v1811_v29 = vadd.f32 %v7656_v17, %v1810_v24  ;;  %v2323_v30 = vadd.f32 %v7656_v17, %v2322_v25  ;;  %v6987_v24 = vld [vmem:[%s7163_s5 + $0x1e0] sm:$0xff]  }
 0x1ee   : > { %v6383_v31 = vpop.f32.mrf.mxu0  ;;  %v6639_v32 = vpop.f32.mrf.mxu1  ;;  %v6988_v25 = vld [vmem:[%s7163_s5 + $0x3e0] sm:$0xff]  }
 0x1ef   : > { %v2631_v34 = vmax.f32 %v1811_v29, 0.0  ;;  %v2759_v35 = vmax.f32 %v2323_v30, 0.0 }
 0x1f0   : > { %v1815_v36 = vpop.f32.mrf.mxu0  ;;  %6481 = vmatmul.mubr.msk.bf16.gmra.mxu0 %vm1128_vm3, %v6981_v26  ;;  %v2327_v37 = vpop.f32.mrf.mxu1  ;;  %6737 = vmatmul.mubr.msk.bf16.gmra.mxu1 %vm1128_vm3, %v6982_v27 }
 0x1f1   : > { %v5512_v38 = vpack.c.bf16 %v2631_v34, %v2630_v33  ;;  %v5832_v39 = vpack.c.bf16 %v2759_v35, %v2758_v28  ;;  %v2328_v40 = vadd.f32 %v7656_v17, %v2327_v37  ;;  %6484 = vmatprep.mubr.msk.bf16.mxu0 %vm7086_vm2, %v7084_v0  ;;  %6740 = vmatprep.mubr.msk.bf16.mxu1 %vm7086_vm2, %v7084_v0 }
 0x1f2   : > { %v6386_v41 = vpop.f32.mrf.mxu0  ;;  %v6642_v42 = vpop.f32.mrf.mxu1  ;;  %v1816_v43 = vadd.f32 %v7656_v17, %v1815_v36 }
 0x1f3   : > { %6015 = vst [vmem:[%s7394_s12 + $0x100] sm:$0xff] %v5512_v38   ;;  %6079 = vst [vmem:[%s7394_s12 + $0x300] sm:$0xff] %v5832_v39   ;;  %v2760_v48 = vmax.f32 %v2328_v40, 0.0 }
 0x1f4   : > { %v1818_v44 = vpop.f32.mrf.mxu0  ;;  %v2330_v45 = vpop.f32.mrf.mxu1  ;;  %v2632_v53 = vmax.f32 %v1816_v43, 0.0 }
 0x1f5   : > { %v1819_v49 = vadd.f32 %v7656_v17, %v1818_v44  ;;  %v2331_v50 = vadd.f32 %v7656_v17, %v2330_v45  ;;  %v6989_v44 = vld [vmem:[%s7163_s5 + $0x1e8] sm:$0xff]  }
 0x1f6   : > { %v6387_v51 = vpop.f32.mrf.mxu0  ;;  %v6643_v52 = vpop.f32.mrf.mxu1  ;;  %v6990_v45 = vld [vmem:[%s7163_s5 + $0x3e8] sm:$0xff]  }
 0x1f7   : > { %v2633_v54 = vmax.f32 %v1819_v49, 0.0  ;;  %v2761_v55 = vmax.f32 %v2331_v50, 0.0 }
 0x1f8   : > { %v1823_v56 = vpop.f32.mrf.mxu0  ;;  %6485 = vmatmul.mubr.msk.bf16.gmra.mxu0 %vm1128_vm3, %v6983_v46  ;;  %v2335_v57 = vpop.f32.mrf.mxu1  ;;  %6741 = vmatmul.mubr.msk.bf16.gmra.mxu1 %vm1128_vm3, %v6984_v47 }
 0x1f9   : > { %v5517_v58 = vpack.c.bf16 %v2633_v54, %v2632_v53  ;;  %v5837_v59 = vpack.c.bf16 %v2761_v55, %v2760_v48  ;;  %v2336_v61 = vadd.f32 %v7656_v17, %v2335_v57  ;;  %6488 = vmatprep.mubr.msk.bf16.mxu0 %vm7086_vm2, %v7084_v0  ;;  %6744 = vmatprep.mubr.msk.bf16.mxu1 %vm7086_vm2, %v7084_v0 }
 0x1fa   : > { %v6390_v62 = vpop.f32.mrf.mxu0  ;;  %v6646_v63 = vpop.f32.mrf.mxu1  ;;  %v1824_v1 = vadd.f32 %v7656_v17, %v1823_v56 }
 0x1fb   : > { %6016 = vst [vmem:[%s7394_s12 + $0x108] sm:$0xff] %v5517_v58   ;;  %6080 = vst [vmem:[%s7394_s12 + $0x308] sm:$0xff] %v5837_v59   ;;  %v2762_v6 = vmax.f32 %v2336_v61, 0.0 }
 0x1fc   : > { %v1826_v2 = vpop.f32.mrf.mxu0  ;;  %v2338_v3 = vpop.f32.mrf.mxu1  ;;  %v2634_v11 = vmax.f32 %v1824_v1, 0.0 }
 0x1fd   : > { %v1827_v7 = vadd.f32 %v7656_v17, %v1826_v2  ;;  %v2339_v8 = vadd.f32 %v7656_v17, %v2338_v3  ;;  %v6991_v2 = vld [vmem:[%s7163_s5 + $0x1f0] sm:$0xff]  }
 0x1fe   : > { %v6391_v9 = vpop.f32.mrf.mxu0  ;;  %v6647_v10 = vpop.f32.mrf.mxu1  ;;  %v6992_v3 = vld [vmem:[%s7163_s5 + $0x3f0] sm:$0xff]  }
 0x1ff   : > { %v2635_v12 = vmax.f32 %v1827_v7, 0.0  ;;  %v2763_v13 = vmax.f32 %v2339_v8, 0.0 }
 0x200   : > { %v1831_v14 = vpop.f32.mrf.mxu0  ;;  %6489 = vmatmul.mubr.msk.bf16.gmra.mxu0 %vm1128_vm3, %v6985_v4  ;;  %v2343_v15 = vpop.f32.mrf.mxu1  ;;  %6745 = vmatmul.mubr.msk.bf16.gmra.mxu1 %vm1128_vm3, %v6986_v5 }
 0x201   : > { %v5522_v16 = vpack.c.bf16 %v2635_v12, %v2634_v11  ;;  %v5842_v18 = vpack.c.bf16 %v2763_v13, %v2762_v6  ;;  %v2344_v19 = vadd.f32 %v7656_v17, %v2343_v15  ;;  %6492 = vmatprep.mubr.msk.bf16.mxu0 %vm7086_vm2, %v7084_v0  ;;  %6748 = vmatprep.mubr.msk.bf16.mxu1 %vm7086_vm2, %v7084_v0 }
 0x202   : > { %v6394_v20 = vpop.f32.mrf.mxu0  ;;  %v6650_v21 = vpop.f32.mrf.mxu1  ;;  %v1832_v22 = vadd.f32 %v7656_v17, %v1831_v14 }
 0x203   : > { %6017 = vst [vmem:[%s7394_s12 + $0x110] sm:$0xff] %v5522_v16   ;;  %6081 = vst [vmem:[%s7394_s12 + $0x310] sm:$0xff] %v5842_v18   ;;  %v2764_v26 = vmax.f32 %v2344_v19, 0.0 }
 0x204   : > { %v1834_v60 = vpop.f32.mrf.mxu0  ;;  %v2346_v23 = vpop.f32.mrf.mxu1  ;;  %v2636_v31 = vmax.f32 %v1832_v22, 0.0 }
 0x205   : > { %v1835_v27 = vadd.f32 %v7656_v17, %v1834_v60  ;;  %v2347_v28 = vadd.f32 %v7656_v17, %v2346_v23  ;;  %v6993_v60 = vld [vmem:[%s7163_s5 + $0x1f8] sm:$0xff]  }
 0x206   : > { %v6395_v29 = vpop.f32.mrf.mxu0  ;;  %v6651_v30 = vpop.f32.mrf.mxu1 }
 0x207   : > { %v2637_v32 = vmax.f32 %v1835_v27, 0.0  ;;  %v2765_v33 = vmax.f32 %v2347_v28, 0.0 }
 0x208   : > { %v1839_v34 = vpop.f32.mrf.mxu0  ;;  %6493 = vmatmul.mubr.msk.bf16.gmra.mxu0 %vm1128_vm3, %v6987_v24  ;;  %v2351_v35 = vpop.f32.mrf.mxu1  ;;  %6749 = vmatmul.mubr.msk.bf16.gmra.mxu1 %vm1128_vm3, %v6988_v25 }
 0x209   : > { %v5527_v36 = vpack.c.bf16 %v2637_v32, %v2636_v31  ;;  %v5847_v37 = vpack.c.bf16 %v2765_v33, %v2764_v26  ;;  %v2352_v38 = vadd.f32 %v7656_v17, %v2351_v35  ;;  %6496 = vmatprep.mubr.msk.bf16.mxu0 %vm7086_vm2, %v7084_v0  ;;  %6752 = vmatprep.mubr.msk.bf16.mxu1 %vm7086_vm2, %v7084_v0 }
 0x20a   : > { %v6398_v39 = vpop.f32.mrf.mxu0  ;;  %v6654_v40 = vpop.f32.mrf.mxu1  ;;  %v1840_v41 = vadd.f32 %v7656_v17, %v1839_v34 }
 0x20b   : > { %6018 = vst [vmem:[%s7394_s12 + $0x118] sm:$0xff] %v5527_v36   ;;  %6082 = vst [vmem:[%s7394_s12 + $0x318] sm:$0xff] %v5847_v37   ;;  %v2766_v46 = vmax.f32 %v2352_v38, 0.0 }
 0x20c   : > { %v1842_v42 = vpop.f32.mrf.mxu0  ;;  %v2354_v43 = vpop.f32.mrf.mxu1  ;;  %v2638_v51 = vmax.f32 %v1840_v41, 0.0  ;;  %v7931_v41 = vld [vmem:[%s8279_s2] ss:$0 sm:$0xff] }
 0x20d   : > { %v1843_v47 = vadd.f32 %v7656_v17, %v1842_v42  ;;  %v2355_v48 = vadd.f32 %v7656_v17, %v2354_v43 }
 0x20e   : > { %v6399_v49 = vpop.f32.mrf.mxu0  ;;  %v6655_v50 = vpop.f32.mrf.mxu1 }
 0x20f   : > { %v2639_v52 = vmax.f32 %v1843_v47, 0.0  ;;  %v2767_v53 = vmax.f32 %v2355_v48, 0.0 }
 0x210   : > { %v1847_v54 = vpop.f32.mrf.mxu0  ;;  %6497 = vmatmul.mubr.msk.bf16.gmra.mxu0 %vm1128_vm3, %v6989_v44  ;;  %v2359_v55 = vpop.f32.mrf.mxu1  ;;  %6753 = vmatmul.mubr.msk.bf16.gmra.mxu1 %vm1128_vm3, %v6990_v45 }
 0x211   : > { %v5532_v56 = vpack.c.bf16 %v2639_v52, %v2638_v51  ;;  %v5852_v57 = vpack.c.bf16 %v2767_v53, %v2766_v46  ;;  %v2360_v58 = vadd.f32 %v7656_v17, %v2359_v55  ;;  %6500 = vmatprep.mubr.msk.bf16.mxu0 %vm7086_vm2, %v7084_v0  ;;  %6756 = vmatprep.mubr.msk.bf16.mxu1 %vm7086_vm2, %v7084_v0 }
 0x212   : > { %v6402_v59 = vpop.f32.mrf.mxu0  ;;  %v6658_v61 = vpop.f32.mrf.mxu1  ;;  %v1848_v62 = vadd.f32 %v7656_v17, %v1847_v54 }
 0x213   : > { %6019 = vst [vmem:[%s7394_s12 + $0x120] sm:$0xff] %v5532_v56   ;;  %6083 = vst [vmem:[%s7394_s12 + $0x320] sm:$0xff] %v5852_v57   ;;  %v2768_v4 = vmax.f32 %v2360_v58, 0.0 }
 0x214   : > { %v1850_v63 = vpop.f32.mrf.mxu0  ;;  %v2362_v1 = vpop.f32.mrf.mxu1  ;;  %v2640_v9 = vmax.f32 %v1848_v62, 0.0 }
 0x215   : > { %v1851_v5 = vadd.f32 %v7656_v17, %v1850_v63  ;;  %v2363_v6 = vadd.f32 %v7656_v17, %v2362_v1 }
 0x216   : > { %v6403_v7 = vpop.f32.mrf.mxu0  ;;  %v6659_v8 = vpop.f32.mrf.mxu1 }
 0x217   : > { %v2641_v10 = vmax.f32 %v1851_v5, 0.0  ;;  %v2769_v11 = vmax.f32 %v2363_v6, 0.0 }
 0x218   : > { %v1855_v12 = vpop.f32.mrf.mxu0  ;;  %6501 = vmatmul.mubr.msk.bf16.gmra.mxu0 %vm1128_vm3, %v6991_v2  ;;  %v2367_v13 = vpop.f32.mrf.mxu1  ;;  %6757 = vmatmul.mubr.msk.bf16.gmra.mxu1 %vm1128_vm3, %v6992_v3 }
 0x219   : > { %v5537_v14 = vpack.c.bf16 %v2641_v10, %v2640_v9  ;;  %v5857_v15 = vpack.c.bf16 %v2769_v11, %v2768_v4  ;;  %v2368_v16 = vadd.f32 %v7656_v17, %v2367_v13  ;;  %6504 = vmatprep.mubr.msk.bf16.mxu0 %vm7086_vm2, %v7084_v0  ;;  %v1856_v20 = vadd.f32 %v7656_v17, %v1855_v12 }
 0x21a   : > { %v6406_v18 = vpop.f32.mrf.mxu0  ;;  %v6662_v19 = vpop.f32.mrf.mxu1 }
 0x21b   : > { %6020 = vst [vmem:[%s7394_s12 + $0x128] sm:$0xff] %v5537_v14   ;;  %6084 = vst [vmem:[%s7394_s12 + $0x328] sm:$0xff] %v5857_v15   ;;  %v2770_v23 = vmax.f32 %v2368_v16, 0.0  ;;  %v2642_v28 = vmax.f32 %v1856_v20, 0.0 }
 0x21c   : > { %v1858_v21 = vpop.f32.mrf.mxu0  ;;  %v2370_v22 = vpop.f32.mrf.mxu1 }
 0x21d   : > { %v1859_v24 = vadd.f32 %v7656_v17, %v1858_v21  ;;  %v2371_v25 = vadd.f32 %v7656_v17, %v2370_v22 }
 0x21e   : > { %v6407_v26 = vpop.f32.mrf.mxu0  ;;  %v6663_v27 = vpop.f32.mrf.mxu1 }
 0x21f   : > { %v2643_v0 = vmax.f32 %v1859_v24, 0.0  ;;  %v2771_v29 = vmax.f32 %v2371_v25, 0.0 }
 0x220   : > { %v1863_v30 = vpop.f32.mrf.mxu0  ;;  %6505 = vmatmul.mubr.msk.bf16.gmra.mxu0 %vm1128_vm3, %v6993_v60  ;;  %v2375_v31 = vpop.f32.mrf.mxu1 }
 0x221   : > { %v5542_v32 = vpack.c.bf16 %v2643_v0, %v2642_v28  ;;  %v5862_v33 = vpack.c.bf16 %v2771_v29, %v2770_v23  ;;  %v2376_v34 = vadd.f32 %v7656_v17, %v2375_v31  ;;  %v1864_v37 = vadd.f32 %v7656_v17, %v1863_v30 }
 0x222   : > { %v6410_v35 = vpop.f32.mrf.mxu0  ;;  %v6666_v36 = vpop.f32.mrf.mxu1 }
 0x223   : > { %6021 = vst [vmem:[%s7394_s12 + $0x130] sm:$0xff] %v5542_v32   ;;  %6085 = vst [vmem:[%s7394_s12 + $0x330] sm:$0xff] %v5862_v33   ;;  %v2772_v40 = vmax.f32 %v2376_v34, 0.0  ;;  %v2644_v46 = vmax.f32 %v1864_v37, 0.0 }
 0x224   : > { %v1866_v38 = vpop.f32.mrf.mxu0  ;;  %v2378_v39 = vpop.f32.mrf.mxu1 }
 0x225   : > { %v1867_v42 = vadd.f32 %v7931_v41, %v1866_v38  ;;  %v2379_v43 = vadd.f32 %v7931_v41, %v2378_v39 }
 0x226   : > { %v6411_v44 = vpop.f32.mrf.mxu0  ;;  %v6667_v45 = vpop.f32.mrf.mxu1 }
 0x227   : > { %v2645_v47 = vmax.f32 %v1867_v42, 0.0  ;;  %v2773_v48 = vmax.f32 %v2379_v43, 0.0 }
 0x228   : > { %v1871_v17 = vpop.f32.mrf.mxu0  ;;  %v2383_v49 = vpop.f32.mrf.mxu1 }
 0x229   : > { %v5547_v50 = vpack.c.bf16 %v2645_v47, %v2644_v46  ;;  %v5867_v51 = vpack.c.bf16 %v2773_v48, %v2772_v40  ;;  %v2384_v52 = vadd.f32 %v7931_v41, %v2383_v49  ;;  %v1872_v55 = vadd.f32 %v7931_v41, %v1871_v17 }
 0x22a   : > { %v6414_v53 = vpop.f32.mrf.mxu0  ;;  %v6670_v54 = vpop.f32.mrf.mxu1 }
 0x22b   : > { %6022 = vst [vmem:[%s7394_s12 + $0x138] sm:$0xff] %v5547_v50   ;;  %6086 = vst [vmem:[%s7394_s12 + $0x338] sm:$0xff] %v5867_v51   ;;  %v2774_v58 = vmax.f32 %v2384_v52, 0.0  ;;  %v2646_v1 = vmax.f32 %v1872_v55, 0.0 }
 0x22c   : > { %v1874_v56 = vpop.f32.mrf.mxu0  ;;  %v2386_v57 = vpop.f32.mrf.mxu1 }
 0x22d   : > { %v1875_v59 = vadd.f32 %v7931_v41, %v1874_v56  ;;  %v2387_v61 = vadd.f32 %v7931_v41, %v2386_v57 }
 0x22e   : > { %v6415_v62 = vpop.f32.mrf.mxu0  ;;  %v6671_v63 = vpop.f32.mrf.mxu1 }
 0x22f   : > { %v2647_v2 = vmax.f32 %v1875_v59, 0.0  ;;  %v2775_v3 = vmax.f32 %v2387_v61, 0.0 }
 0x230   : > { %v1879_v4 = vpop.f32.mrf.mxu0  ;;  %v2391_v5 = vpop.f32.mrf.mxu1 }
 0x231   : > { %v5552_v6 = vpack.c.bf16 %v2647_v2, %v2646_v1  ;;  %v5872_v7 = vpack.c.bf16 %v2775_v3, %v2774_v58  ;;  %v2392_v8 = vadd.f32 %v7931_v41, %v2391_v5  ;;  %v1880_v11 = vadd.f32 %v7931_v41, %v1879_v4 }
 0x232   : > { %v6418_v9 = vpop.f32.mrf.mxu0  ;;  %v6674_v10 = vpop.f32.mrf.mxu1 }
 0x233   : > { %6023 = vst [vmem:[%s7394_s12 + $0x140] sm:$0xff] %v5552_v6   ;;  %6087 = vst [vmem:[%s7394_s12 + $0x340] sm:$0xff] %v5872_v7   ;;  %v2776_v14 = vmax.f32 %v2392_v8, 0.0  ;;  %v2648_v20 = vmax.f32 %v1880_v11, 0.0 }
 0x234   : > { %v1882_v12 = vpop.f32.mrf.mxu0  ;;  %v2394_v13 = vpop.f32.mrf.mxu1 }
 0x235   : > { %v1883_v15 = vadd.f32 %v7931_v41, %v1882_v12  ;;  %v2395_v16 = vadd.f32 %v7931_v41, %v2394_v13 }
 0x236   : > { %v6419_v18 = vpop.f32.mrf.mxu0  ;;  %v6675_v19 = vpop.f32.mrf.mxu1 }
 0x237   : > { %v2649_v21 = vmax.f32 %v1883_v15, 0.0  ;;  %v2777_v22 = vmax.f32 %v2395_v16, 0.0 }
 0x238   : > { %v1887_v60 = vpop.f32.mrf.mxu0  ;;  %v2399_v23 = vpop.f32.mrf.mxu1 }
 0x239   : > { %v5557_v24 = vpack.c.bf16 %v2649_v21, %v2648_v20  ;;  %v5877_v25 = vpack.c.bf16 %v2777_v22, %v2776_v14  ;;  %v2400_v26 = vadd.f32 %v7931_v41, %v2399_v23  ;;  %v1888_v0 = vadd.f32 %v7931_v41, %v1887_v60 }
 0x23a   : > { %v6422_v27 = vpop.f32.mrf.mxu0  ;;  %v6678_v28 = vpop.f32.mrf.mxu1 }
 0x23b   : > { %6024 = vst [vmem:[%s7394_s12 + $0x148] sm:$0xff] %v5557_v24   ;;  %6088 = vst [vmem:[%s7394_s12 + $0x348] sm:$0xff] %v5877_v25   ;;  %v2778_v31 = vmax.f32 %v2400_v26, 0.0  ;;  %v2650_v36 = vmax.f32 %v1888_v0, 0.0 }
 0x23c   : > { %v1890_v29 = vpop.f32.mrf.mxu0  ;;  %v2402_v30 = vpop.f32.mrf.mxu1 }
 0x23d   : > { %v1891_v32 = vadd.f32 %v7931_v41, %v1890_v29  ;;  %v2403_v33 = vadd.f32 %v7931_v41, %v2402_v30 }
 0x23e   : > { %v6423_v34 = vpop.f32.mrf.mxu0  ;;  %v6679_v35 = vpop.f32.mrf.mxu1 }
 0x23f   : > { %v2651_v37 = vmax.f32 %v1891_v32, 0.0  ;;  %v2779_v38 = vmax.f32 %v2403_v33, 0.0 }
 0x240   : > { %v1895_v39 = vpop.f32.mrf.mxu0  ;;  %v2407_v40 = vpop.f32.mrf.mxu1 }
 0x241   : > { %v5562_v42 = vpack.c.bf16 %v2651_v37, %v2650_v36  ;;  %v5882_v43 = vpack.c.bf16 %v2779_v38, %v2778_v31  ;;  %v2408_v44 = vadd.f32 %v7931_v41, %v2407_v40  ;;  %v1896_v47 = vadd.f32 %v7931_v41, %v1895_v39 }
 0x242   : > { %v6426_v45 = vpop.f32.mrf.mxu0  ;;  %v6682_v46 = vpop.f32.mrf.mxu1 }
 0x243   : > { %6025 = vst [vmem:[%s7394_s12 + $0x150] sm:$0xff] %v5562_v42   ;;  %6089 = vst [vmem:[%s7394_s12 + $0x350] sm:$0xff] %v5882_v43   ;;  %v2780_v49 = vmax.f32 %v2408_v44, 0.0  ;;  %v2652_v54 = vmax.f32 %v1896_v47, 0.0 }
 0x244   : > { %v1898_v48 = vpop.f32.mrf.mxu0  ;;  %v2410_v17 = vpop.f32.mrf.mxu1 }
 0x245   : > { %v1899_v50 = vadd.f32 %v7931_v41, %v1898_v48  ;;  %v2411_v51 = vadd.f32 %v7931_v41, %v2410_v17 }
 0x246   : > { %v6427_v52 = vpop.f32.mrf.mxu0  ;;  %v6683_v53 = vpop.f32.mrf.mxu1 }
 0x247   : > { %v2653_v55 = vmax.f32 %v1899_v50, 0.0  ;;  %v2781_v56 = vmax.f32 %v2411_v51, 0.0 }
 0x248   : > { %v1903_v57 = vpop.f32.mrf.mxu0  ;;  %v2415_v58 = vpop.f32.mrf.mxu1 }
 0x249   : > { %v5567_v59 = vpack.c.bf16 %v2653_v55, %v2652_v54  ;;  %v5887_v61 = vpack.c.bf16 %v2781_v56, %v2780_v49  ;;  %v2416_v62 = vadd.f32 %v7931_v41, %v2415_v58  ;;  %v1904_v2 = vadd.f32 %v7931_v41, %v1903_v57 }
 0x24a   : > { %v6430_v63 = vpop.f32.mrf.mxu0  ;;  %v6686_v1 = vpop.f32.mrf.mxu1 }
 0x24b   : > { %6026 = vst [vmem:[%s7394_s12 + $0x158] sm:$0xff] %v5567_v59   ;;  %6090 = vst [vmem:[%s7394_s12 + $0x358] sm:$0xff] %v5887_v61   ;;  %v2782_v5 = vmax.f32 %v2416_v62, 0.0  ;;  %v2654_v10 = vmax.f32 %v1904_v2, 0.0 }
 0x24c   : > { %v1906_v3 = vpop.f32.mrf.mxu0  ;;  %v2418_v4 = vpop.f32.mrf.mxu1 }
 0x24d   : > { %v1907_v6 = vadd.f32 %v7931_v41, %v1906_v3  ;;  %v2419_v7 = vadd.f32 %v7931_v41, %v2418_v4 }
 0x24e   : > { %v6431_v8 = vpop.f32.mrf.mxu0  ;;  %v6687_v9 = vpop.f32.mrf.mxu1 }
 0x24f   : > { %v2655_v11 = vmax.f32 %v1907_v6, 0.0  ;;  %v2783_v12 = vmax.f32 %v2419_v7, 0.0 }
 0x250   : > { %v1911_v13 = vpop.f32.mrf.mxu0  ;;  %v2423_v14 = vpop.f32.mrf.mxu1 }
 0x251   : > { %v5572_v15 = vpack.c.bf16 %v2655_v11, %v2654_v10  ;;  %v5892_v16 = vpack.c.bf16 %v2783_v12, %v2782_v5  ;;  %v2424_v18 = vadd.f32 %v7931_v41, %v2423_v14  ;;  %v1912_v21 = vadd.f32 %v7931_v41, %v1911_v13 }
 0x252   : > { %v6434_v19 = vpop.f32.mrf.mxu0  ;;  %v6690_v20 = vpop.f32.mrf.mxu1 }
 0x253   : > { %6027 = vst [vmem:[%s7394_s12 + $0x160] sm:$0xff] %v5572_v15   ;;  %6091 = vst [vmem:[%s7394_s12 + $0x360] sm:$0xff] %v5892_v16   ;;  %v2784_v23 = vmax.f32 %v2424_v18, 0.0  ;;  %v2656_v28 = vmax.f32 %v1912_v21, 0.0 }
 0x254   : > { %v1914_v22 = vpop.f32.mrf.mxu0  ;;  %v2426_v60 = vpop.f32.mrf.mxu1 }
 0x255   : > { %v1915_v24 = vadd.f32 %v7931_v41, %v1914_v22  ;;  %v2427_v25 = vadd.f32 %v7931_v41, %v2426_v60 }
 0x256   : > { %v6435_v26 = vpop.f32.mrf.mxu0  ;;  %v6691_v27 = vpop.f32.mrf.mxu1 }
 0x257   : > { %v2657_v0 = vmax.f32 %v1915_v24, 0.0  ;;  %v2785_v29 = vmax.f32 %v2427_v25, 0.0 }
 0x258   : > { %v1919_v30 = vpop.f32.mrf.mxu0  ;;  %v2431_v31 = vpop.f32.mrf.mxu1 }
 0x259   : > { %v5577_v32 = vpack.c.bf16 %v2657_v0, %v2656_v28  ;;  %v5897_v33 = vpack.c.bf16 %v2785_v29, %v2784_v23  ;;  %v2432_v34 = vadd.f32 %v7931_v41, %v2431_v31  ;;  %v1920_v37 = vadd.f32 %v7931_v41, %v1919_v30 }
 0x25a   : > { %v6438_v35 = vpop.f32.mrf.mxu0  ;;  %v6694_v36 = vpop.f32.mrf.mxu1 }
 0x25b   : > { %6028 = vst [vmem:[%s7394_s12 + $0x168] sm:$0xff] %v5577_v32   ;;  %6092 = vst [vmem:[%s7394_s12 + $0x368] sm:$0xff] %v5897_v33   ;;  %v2786_v40 = vmax.f32 %v2432_v34, 0.0  ;;  %v2658_v46 = vmax.f32 %v1920_v37, 0.0 }
 0x25c   : > { %v1922_v38 = vpop.f32.mrf.mxu0  ;;  %v2434_v39 = vpop.f32.mrf.mxu1 }
 0x25d   : > { %v1923_v42 = vadd.f32 %v7931_v41, %v1922_v38  ;;  %v2435_v43 = vadd.f32 %v7931_v41, %v2434_v39 }
 0x25e   : > { %v6439_v44 = vpop.f32.mrf.mxu0  ;;  %v6695_v45 = vpop.f32.mrf.mxu1 }
 0x25f   : > { %v2659_v47 = vmax.f32 %v1923_v42, 0.0  ;;  %v2787_v48 = vmax.f32 %v2435_v43, 0.0 }
 0x260   : > { %v1927_v17 = vpop.f32.mrf.mxu0  ;;  %v2439_v49 = vpop.f32.mrf.mxu1 }
 0x261   : > { %v5582_v50 = vpack.c.bf16 %v2659_v47, %v2658_v46  ;;  %v5902_v51 = vpack.c.bf16 %v2787_v48, %v2786_v40  ;;  %v2440_v52 = vadd.f32 %v7931_v41, %v2439_v49  ;;  %v1928_v55 = vadd.f32 %v7931_v41, %v1927_v17 }
 0x262   : > { %v6442_v53 = vpop.f32.mrf.mxu0  ;;  %v6698_v54 = vpop.f32.mrf.mxu1 }
 0x263   : > { %6029 = vst [vmem:[%s7394_s12 + $0x170] sm:$0xff] %v5582_v50   ;;  %6093 = vst [vmem:[%s7394_s12 + $0x370] sm:$0xff] %v5902_v51   ;;  %v2788_v58 = vmax.f32 %v2440_v52, 0.0  ;;  %v2660_v1 = vmax.f32 %v1928_v55, 0.0 }
 0x264   : > { %v1930_v56 = vpop.f32.mrf.mxu0  ;;  %v2442_v57 = vpop.f32.mrf.mxu1 }
 0x265   : > { %v1931_v59 = vadd.f32 %v7931_v41, %v1930_v56  ;;  %v2443_v61 = vadd.f32 %v7931_v41, %v2442_v57 }
 0x266   : > { %v6443_v62 = vpop.f32.mrf.mxu0  ;;  %v6699_v63 = vpop.f32.mrf.mxu1 }
 0x267   : > { %v2661_v2 = vmax.f32 %v1931_v59, 0.0  ;;  %v2789_v3 = vmax.f32 %v2443_v61, 0.0 }
 0x268   : > { %v1935_v4 = vpop.f32.mrf.mxu0  ;;  %v2447_v5 = vpop.f32.mrf.mxu1 }
 0x269   : > { %v5587_v6 = vpack.c.bf16 %v2661_v2, %v2660_v1  ;;  %v5907_v7 = vpack.c.bf16 %v2789_v3, %v2788_v58  ;;  %v2448_v8 = vadd.f32 %v7931_v41, %v2447_v5  ;;  %v1936_v11 = vadd.f32 %v7931_v41, %v1935_v4 }
 0x26a   : > { %v6446_v9 = vpop.f32.mrf.mxu0  ;;  %v6702_v10 = vpop.f32.mrf.mxu1 }
 0x26b   : > { %6030 = vst [vmem:[%s7394_s12 + $0x178] sm:$0xff] %v5587_v6   ;;  %6094 = vst [vmem:[%s7394_s12 + $0x378] sm:$0xff] %v5907_v7   ;;  %v2790_v14 = vmax.f32 %v2448_v8, 0.0  ;;  %v2662_v20 = vmax.f32 %v1936_v11, 0.0 }
 0x26c   : > { %v1938_v12 = vpop.f32.mrf.mxu0  ;;  %v2450_v13 = vpop.f32.mrf.mxu1 }
 0x26d   : > { %v1939_v15 = vadd.f32 %v7931_v41, %v1938_v12  ;;  %v2451_v16 = vadd.f32 %v7931_v41, %v2450_v13 }
 0x26e   : > { %v6447_v18 = vpop.f32.mrf.mxu0  ;;  %v6703_v19 = vpop.f32.mrf.mxu1 }
 0x26f   : > { %v2663_v21 = vmax.f32 %v1939_v15, 0.0  ;;  %v2791_v22 = vmax.f32 %v2451_v16, 0.0 }
 0x270   : > { %v1943_v60 = vpop.f32.mrf.mxu0  ;;  %v2455_v23 = vpop.f32.mrf.mxu1 }
 0x271   : > { %v5592_v24 = vpack.c.bf16 %v2663_v21, %v2662_v20  ;;  %v5912_v25 = vpack.c.bf16 %v2791_v22, %v2790_v14  ;;  %v2456_v26 = vadd.f32 %v7931_v41, %v2455_v23  ;;  %v1944_v0 = vadd.f32 %v7931_v41, %v1943_v60 }
 0x272   : > { %v6450_v27 = vpop.f32.mrf.mxu0  ;;  %v6706_v28 = vpop.f32.mrf.mxu1 }
 0x273   : > { %6031 = vst [vmem:[%s7394_s12 + $0x180] sm:$0xff] %v5592_v24   ;;  %6095 = vst [vmem:[%s7394_s12 + $0x380] sm:$0xff] %v5912_v25   ;;  %v2792_v31 = vmax.f32 %v2456_v26, 0.0  ;;  %v2664_v36 = vmax.f32 %v1944_v0, 0.0 }
 0x274   : > { %v1946_v29 = vpop.f32.mrf.mxu0  ;;  %v2458_v30 = vpop.f32.mrf.mxu1 }
 0x275   : > { %v1947_v32 = vadd.f32 %v7931_v41, %v1946_v29  ;;  %v2459_v33 = vadd.f32 %v7931_v41, %v2458_v30 }
 0x276   : > { %v6451_v34 = vpop.f32.mrf.mxu0  ;;  %v6707_v35 = vpop.f32.mrf.mxu1 }
 0x277   : > { %v2665_v37 = vmax.f32 %v1947_v32, 0.0  ;;  %v2793_v38 = vmax.f32 %v2459_v33, 0.0 }
 0x278   : > { %v1951_v39 = vpop.f32.mrf.mxu0  ;;  %v2463_v40 = vpop.f32.mrf.mxu1 }
 0x279   : > { %v5597_v42 = vpack.c.bf16 %v2665_v37, %v2664_v36  ;;  %v5917_v43 = vpack.c.bf16 %v2793_v38, %v2792_v31  ;;  %v2464_v44 = vadd.f32 %v7931_v41, %v2463_v40  ;;  %v1952_v47 = vadd.f32 %v7931_v41, %v1951_v39 }
 0x27a   : > { %v6454_v45 = vpop.f32.mrf.mxu0  ;;  %v6710_v46 = vpop.f32.mrf.mxu1 }
 0x27b   : > { %6032 = vst [vmem:[%s7394_s12 + $0x188] sm:$0xff] %v5597_v42   ;;  %6096 = vst [vmem:[%s7394_s12 + $0x388] sm:$0xff] %v5917_v43   ;;  %v2794_v49 = vmax.f32 %v2464_v44, 0.0  ;;  %v2666_v54 = vmax.f32 %v1952_v47, 0.0 }
 0x27c   : > { %v1954_v48 = vpop.f32.mrf.mxu0  ;;  %v2466_v17 = vpop.f32.mrf.mxu1 }
 0x27d   : > { %v1955_v50 = vadd.f32 %v7931_v41, %v1954_v48  ;;  %v2467_v51 = vadd.f32 %v7931_v41, %v2466_v17 }
 0x27e   : > { %v6455_v52 = vpop.f32.mrf.mxu0  ;;  %v6711_v53 = vpop.f32.mrf.mxu1 }
 0x27f   : > { %v2667_v55 = vmax.f32 %v1955_v50, 0.0  ;;  %v2795_v56 = vmax.f32 %v2467_v51, 0.0 }
 0x280   : > { %v1959_v57 = vpop.f32.mrf.mxu0  ;;  %v2471_v58 = vpop.f32.mrf.mxu1 }
 0x281   : > { %v5602_v59 = vpack.c.bf16 %v2667_v55, %v2666_v54  ;;  %v5922_v61 = vpack.c.bf16 %v2795_v56, %v2794_v49  ;;  %v2472_v62 = vadd.f32 %v7931_v41, %v2471_v58  ;;  %v1960_v2 = vadd.f32 %v7931_v41, %v1959_v57 }
 0x282   : > { %v6458_v63 = vpop.f32.mrf.mxu0  ;;  %v6714_v1 = vpop.f32.mrf.mxu1 }
 0x283   : > { %6033 = vst [vmem:[%s7394_s12 + $0x190] sm:$0xff] %v5602_v59   ;;  %6097 = vst [vmem:[%s7394_s12 + $0x390] sm:$0xff] %v5922_v61   ;;  %v2796_v5 = vmax.f32 %v2472_v62, 0.0  ;;  %v2668_v10 = vmax.f32 %v1960_v2, 0.0 }
 0x284   : > { %v1962_v3 = vpop.f32.mrf.mxu0  ;;  %v2474_v4 = vpop.f32.mrf.mxu1 }
 0x285   : > { %v1963_v6 = vadd.f32 %v7931_v41, %v1962_v3  ;;  %v2475_v7 = vadd.f32 %v7931_v41, %v2474_v4 }
 0x286   : > { %v6459_v8 = vpop.f32.mrf.mxu0  ;;  %v6715_v9 = vpop.f32.mrf.mxu1 }
 0x287   : > { %v2669_v11 = vmax.f32 %v1963_v6, 0.0  ;;  %v2797_v12 = vmax.f32 %v2475_v7, 0.0 }
 0x288   : > { %v1967_v13 = vpop.f32.mrf.mxu0  ;;  %v2479_v14 = vpop.f32.mrf.mxu1 }
 0x289   : > { %v5607_v15 = vpack.c.bf16 %v2669_v11, %v2668_v10  ;;  %v5927_v16 = vpack.c.bf16 %v2797_v12, %v2796_v5  ;;  %v2480_v18 = vadd.f32 %v7931_v41, %v2479_v14  ;;  %v1968_v21 = vadd.f32 %v7931_v41, %v1967_v13 }
 0x28a   : > { %v6462_v19 = vpop.f32.mrf.mxu0  ;;  %v6718_v20 = vpop.f32.mrf.mxu1 }
 0x28b   : > { %6034 = vst [vmem:[%s7394_s12 + $0x198] sm:$0xff] %v5607_v15   ;;  %6098 = vst [vmem:[%s7394_s12 + $0x398] sm:$0xff] %v5927_v16   ;;  %v2798_v23 = vmax.f32 %v2480_v18, 0.0  ;;  %v2670_v28 = vmax.f32 %v1968_v21, 0.0 }
 0x28c   : > { %v1970_v22 = vpop.f32.mrf.mxu0  ;;  %v2482_v60 = vpop.f32.mrf.mxu1 }
 0x28d   : > { %v1971_v24 = vadd.f32 %v7931_v41, %v1970_v22  ;;  %v2483_v25 = vadd.f32 %v7931_v41, %v2482_v60 }
 0x28e   : > { %v6463_v26 = vpop.f32.mrf.mxu0  ;;  %v6719_v27 = vpop.f32.mrf.mxu1 }
 0x28f   : > { %v2671_v0 = vmax.f32 %v1971_v24, 0.0  ;;  %v2799_v29 = vmax.f32 %v2483_v25, 0.0 }
 0x290   : > { %v1975_v30 = vpop.f32.mrf.mxu0  ;;  %v2487_v31 = vpop.f32.mrf.mxu1 }
 0x291   : > { %v5612_v32 = vpack.c.bf16 %v2671_v0, %v2670_v28  ;;  %v5932_v33 = vpack.c.bf16 %v2799_v29, %v2798_v23  ;;  %v2488_v34 = vadd.f32 %v7931_v41, %v2487_v31  ;;  %v1976_v37 = vadd.f32 %v7931_v41, %v1975_v30 }
 0x292   : > { %v6466_v35 = vpop.f32.mrf.mxu0  ;;  %v6722_v36 = vpop.f32.mrf.mxu1 }
 0x293   : > { %6035 = vst [vmem:[%s7394_s12 + $0x1a0] sm:$0xff] %v5612_v32   ;;  %6099 = vst [vmem:[%s7394_s12 + $0x3a0] sm:$0xff] %v5932_v33   ;;  %v2800_v40 = vmax.f32 %v2488_v34, 0.0  ;;  %v2672_v46 = vmax.f32 %v1976_v37, 0.0 }
 0x294   : > { %v1978_v38 = vpop.f32.mrf.mxu0  ;;  %v2490_v39 = vpop.f32.mrf.mxu1 }
 0x295   : > { %v1979_v42 = vadd.f32 %v7931_v41, %v1978_v38  ;;  %v2491_v43 = vadd.f32 %v7931_v41, %v2490_v39 }
 0x296   : > { %v6467_v44 = vpop.f32.mrf.mxu0  ;;  %v6723_v45 = vpop.f32.mrf.mxu1 }
 0x297   : > { %v2673_v47 = vmax.f32 %v1979_v42, 0.0  ;;  %v2801_v48 = vmax.f32 %v2491_v43, 0.0 }
 0x298   : > { %v1983_v17 = vpop.f32.mrf.mxu0  ;;  %v2495_v49 = vpop.f32.mrf.mxu1 }
 0x299   : > { %v5617_v50 = vpack.c.bf16 %v2673_v47, %v2672_v46  ;;  %v5937_v51 = vpack.c.bf16 %v2801_v48, %v2800_v40  ;;  %v2496_v52 = vadd.f32 %v7931_v41, %v2495_v49  ;;  %v1984_v55 = vadd.f32 %v7931_v41, %v1983_v17 }
 0x29a   : > { %v6470_v53 = vpop.f32.mrf.mxu0  ;;  %v6726_v54 = vpop.f32.mrf.mxu1 }
 0x29b   : > { %6036 = vst [vmem:[%s7394_s12 + $0x1a8] sm:$0xff] %v5617_v50   ;;  %6100 = vst [vmem:[%s7394_s12 + $0x3a8] sm:$0xff] %v5937_v51   ;;  %v2802_v58 = vmax.f32 %v2496_v52, 0.0  ;;  %v2674_v1 = vmax.f32 %v1984_v55, 0.0 }
 0x29c   : > { %v1986_v56 = vpop.f32.mrf.mxu0  ;;  %v2498_v57 = vpop.f32.mrf.mxu1 }
 0x29d   : > { %v1987_v59 = vadd.f32 %v7931_v41, %v1986_v56  ;;  %v2499_v61 = vadd.f32 %v7931_v41, %v2498_v57 }
 0x29e   : > { %v6471_v62 = vpop.f32.mrf.mxu0  ;;  %v6727_v63 = vpop.f32.mrf.mxu1 }
 0x29f   : > { %v2675_v2 = vmax.f32 %v1987_v59, 0.0  ;;  %v2803_v3 = vmax.f32 %v2499_v61, 0.0 }
 0x2a0   : > { %v1991_v4 = vpop.f32.mrf.mxu0  ;;  %v2503_v5 = vpop.f32.mrf.mxu1 }
 0x2a1   : > { %v5622_v6 = vpack.c.bf16 %v2675_v2, %v2674_v1  ;;  %v5942_v7 = vpack.c.bf16 %v2803_v3, %v2802_v58  ;;  %v2504_v8 = vadd.f32 %v7931_v41, %v2503_v5  ;;  %v1992_v11 = vadd.f32 %v7931_v41, %v1991_v4 }
 0x2a2   : > { %v6474_v9 = vpop.f32.mrf.mxu0  ;;  %v6730_v10 = vpop.f32.mrf.mxu1 }
 0x2a3   : > { %6037 = vst [vmem:[%s7394_s12 + $0x1b0] sm:$0xff] %v5622_v6   ;;  %6101 = vst [vmem:[%s7394_s12 + $0x3b0] sm:$0xff] %v5942_v7   ;;  %v2804_v14 = vmax.f32 %v2504_v8, 0.0  ;;  %v2676_v20 = vmax.f32 %v1992_v11, 0.0 }
 0x2a4   : > { %v1994_v12 = vpop.f32.mrf.mxu0  ;;  %v2506_v13 = vpop.f32.mrf.mxu1 }
 0x2a5   : > { %v1995_v15 = vadd.f32 %v7931_v41, %v1994_v12  ;;  %v2507_v16 = vadd.f32 %v7931_v41, %v2506_v13 }
 0x2a6   : > { %v6475_v18 = vpop.f32.mrf.mxu0  ;;  %v6731_v19 = vpop.f32.mrf.mxu1 }
 0x2a7   : > { %v2677_v21 = vmax.f32 %v1995_v15, 0.0  ;;  %v2805_v22 = vmax.f32 %v2507_v16, 0.0 }
 0x2a8   : > { %v1999_v60 = vpop.f32.mrf.mxu0  ;;  %v2511_v23 = vpop.f32.mrf.mxu1 }
 0x2a9   : > { %v5627_v24 = vpack.c.bf16 %v2677_v21, %v2676_v20  ;;  %v5947_v25 = vpack.c.bf16 %v2805_v22, %v2804_v14  ;;  %v2512_v26 = vadd.f32 %v7931_v41, %v2511_v23  ;;  %v2000_v0 = vadd.f32 %v7931_v41, %v1999_v60 }
 0x2aa   : > { %v6478_v27 = vpop.f32.mrf.mxu0  ;;  %v6734_v28 = vpop.f32.mrf.mxu1 }
 0x2ab   : > { %6038 = vst [vmem:[%s7394_s12 + $0x1b8] sm:$0xff] %v5627_v24   ;;  %6102 = vst [vmem:[%s7394_s12 + $0x3b8] sm:$0xff] %v5947_v25   ;;  %v2806_v31 = vmax.f32 %v2512_v26, 0.0  ;;  %v2678_v36 = vmax.f32 %v2000_v0, 0.0 }
 0x2ac   : > { %v2002_v29 = vpop.f32.mrf.mxu0  ;;  %v2514_v30 = vpop.f32.mrf.mxu1 }
 0x2ad   : > { %v2003_v32 = vadd.f32 %v7931_v41, %v2002_v29  ;;  %v2515_v33 = vadd.f32 %v7931_v41, %v2514_v30 }
 0x2ae   : > { %v6479_v34 = vpop.f32.mrf.mxu0  ;;  %v6735_v35 = vpop.f32.mrf.mxu1 }
 0x2af   : > { %v2679_v37 = vmax.f32 %v2003_v32, 0.0  ;;  %v2807_v38 = vmax.f32 %v2515_v33, 0.0 }
 0x2b0   : > { %v2007_v39 = vpop.f32.mrf.mxu0  ;;  %v2519_v40 = vpop.f32.mrf.mxu1 }
 0x2b1   : > { %v5632_v42 = vpack.c.bf16 %v2679_v37, %v2678_v36  ;;  %v5952_v43 = vpack.c.bf16 %v2807_v38, %v2806_v31  ;;  %v2520_v44 = vadd.f32 %v7931_v41, %v2519_v40  ;;  %v2008_v47 = vadd.f32 %v7931_v41, %v2007_v39 }
 0x2b2   : > { %v6482_v45 = vpop.f32.mrf.mxu0  ;;  %v6738_v46 = vpop.f32.mrf.mxu1 }
 0x2b3   : > { %6039 = vst [vmem:[%s7394_s12 + $0x1c0] sm:$0xff] %v5632_v42   ;;  %6103 = vst [vmem:[%s7394_s12 + $0x3c0] sm:$0xff] %v5952_v43   ;;  %v2808_v49 = vmax.f32 %v2520_v44, 0.0  ;;  %v2680_v54 = vmax.f32 %v2008_v47, 0.0 }
 0x2b4   : > { %v2010_v48 = vpop.f32.mrf.mxu0  ;;  %v2522_v17 = vpop.f32.mrf.mxu1 }
 0x2b5   : > { %v2011_v50 = vadd.f32 %v7931_v41, %v2010_v48  ;;  %v2523_v51 = vadd.f32 %v7931_v41, %v2522_v17 }
 0x2b6   : > { %v6483_v52 = vpop.f32.mrf.mxu0  ;;  %v6739_v53 = vpop.f32.mrf.mxu1 }
 0x2b7   : > { %v2681_v55 = vmax.f32 %v2011_v50, 0.0  ;;  %v2809_v56 = vmax.f32 %v2523_v51, 0.0 }
 0x2b8   : > { %v2015_v57 = vpop.f32.mrf.mxu0  ;;  %v2527_v58 = vpop.f32.mrf.mxu1 }
 0x2b9   : > { %v5637_v59 = vpack.c.bf16 %v2681_v55, %v2680_v54  ;;  %v5957_v61 = vpack.c.bf16 %v2809_v56, %v2808_v49  ;;  %v2528_v62 = vadd.f32 %v7931_v41, %v2527_v58  ;;  %v2016_v2 = vadd.f32 %v7931_v41, %v2015_v57 }
 0x2ba   : > { %v6486_v63 = vpop.f32.mrf.mxu0  ;;  %v6742_v1 = vpop.f32.mrf.mxu1 }
 0x2bb   : > { %6040 = vst [vmem:[%s7394_s12 + $0x1c8] sm:$0xff] %v5637_v59   ;;  %6104 = vst [vmem:[%s7394_s12 + $0x3c8] sm:$0xff] %v5957_v61   ;;  %v2810_v5 = vmax.f32 %v2528_v62, 0.0  ;;  %v2682_v10 = vmax.f32 %v2016_v2, 0.0 }
 0x2bc   : > { %v2018_v3 = vpop.f32.mrf.mxu0  ;;  %v2530_v4 = vpop.f32.mrf.mxu1 }
 0x2bd   : > { %v2019_v6 = vadd.f32 %v7931_v41, %v2018_v3  ;;  %v2531_v7 = vadd.f32 %v7931_v41, %v2530_v4 }
 0x2be   : > { %v6487_v8 = vpop.f32.mrf.mxu0  ;;  %v6743_v9 = vpop.f32.mrf.mxu1 }
 0x2bf   : > { %v2683_v11 = vmax.f32 %v2019_v6, 0.0  ;;  %v2811_v12 = vmax.f32 %v2531_v7, 0.0 }
 0x2c0   : > { %v2023_v13 = vpop.f32.mrf.mxu0  ;;  %v2535_v14 = vpop.f32.mrf.mxu1 }
 0x2c1   : > { %v5642_v15 = vpack.c.bf16 %v2683_v11, %v2682_v10  ;;  %v5962_v16 = vpack.c.bf16 %v2811_v12, %v2810_v5  ;;  %v2536_v18 = vadd.f32 %v7931_v41, %v2535_v14  ;;  %v2024_v21 = vadd.f32 %v7931_v41, %v2023_v13 }
 0x2c2   : > { %v6490_v19 = vpop.f32.mrf.mxu0  ;;  %v6746_v20 = vpop.f32.mrf.mxu1 }
 0x2c3   : > { %6041 = vst [vmem:[%s7394_s12 + $0x1d0] sm:$0xff] %v5642_v15   ;;  %6105 = vst [vmem:[%s7394_s12 + $0x3d0] sm:$0xff] %v5962_v16   ;;  %v2812_v23 = vmax.f32 %v2536_v18, 0.0  ;;  %v2684_v28 = vmax.f32 %v2024_v21, 0.0 }
 0x2c4   : > { %v2026_v22 = vpop.f32.mrf.mxu0  ;;  %v2538_v60 = vpop.f32.mrf.mxu1 }
 0x2c5   : > { %v2027_v24 = vadd.f32 %v7931_v41, %v2026_v22  ;;  %v2539_v25 = vadd.f32 %v7931_v41, %v2538_v60 }
 0x2c6   : > { %v6491_v26 = vpop.f32.mrf.mxu0  ;;  %v6747_v27 = vpop.f32.mrf.mxu1 }
 0x2c7   : > { %v2685_v0 = vmax.f32 %v2027_v24, 0.0  ;;  %v2813_v29 = vmax.f32 %v2539_v25, 0.0 }
 0x2c8   : > { %v2031_v30 = vpop.f32.mrf.mxu0  ;;  %v2543_v31 = vpop.f32.mrf.mxu1 }
 0x2c9   : > { %v5647_v32 = vpack.c.bf16 %v2685_v0, %v2684_v28  ;;  %v5967_v33 = vpack.c.bf16 %v2813_v29, %v2812_v23  ;;  %v2544_v34 = vadd.f32 %v7931_v41, %v2543_v31  ;;  %v2032_v37 = vadd.f32 %v7931_v41, %v2031_v30 }
 0x2ca   : > { %v6494_v35 = vpop.f32.mrf.mxu0  ;;  %v6750_v36 = vpop.f32.mrf.mxu1 }
 0x2cb   : > { %6042 = vst [vmem:[%s7394_s12 + $0x1d8] sm:$0xff] %v5647_v32   ;;  %6106 = vst [vmem:[%s7394_s12 + $0x3d8] sm:$0xff] %v5967_v33   ;;  %v2814_v40 = vmax.f32 %v2544_v34, 0.0  ;;  %v2686_v46 = vmax.f32 %v2032_v37, 0.0 }
 0x2cc   : > { %v2034_v38 = vpop.f32.mrf.mxu0  ;;  %v2546_v39 = vpop.f32.mrf.mxu1 }
 0x2cd   : > { %v2035_v42 = vadd.f32 %v7931_v41, %v2034_v38  ;;  %v2547_v43 = vadd.f32 %v7931_v41, %v2546_v39 }
 0x2ce   : > { %v6495_v44 = vpop.f32.mrf.mxu0  ;;  %v6751_v45 = vpop.f32.mrf.mxu1 }
 0x2cf   : > { %v2687_v47 = vmax.f32 %v2035_v42, 0.0  ;;  %v2815_v48 = vmax.f32 %v2547_v43, 0.0 }
 0x2d0   : > { %v2039_v17 = vpop.f32.mrf.mxu0  ;;  %v2551_v49 = vpop.f32.mrf.mxu1 }
 0x2d1   : > { %v5652_v50 = vpack.c.bf16 %v2687_v47, %v2686_v46  ;;  %v5972_v51 = vpack.c.bf16 %v2815_v48, %v2814_v40  ;;  %v2552_v52 = vadd.f32 %v7931_v41, %v2551_v49  ;;  %v2040_v55 = vadd.f32 %v7931_v41, %v2039_v17 }
 0x2d2   : > { %v6498_v53 = vpop.f32.mrf.mxu0  ;;  %v6754_v54 = vpop.f32.mrf.mxu1 }
 0x2d3   : > { %6043 = vst [vmem:[%s7394_s12 + $0x1e0] sm:$0xff] %v5652_v50   ;;  %6107 = vst [vmem:[%s7394_s12 + $0x3e0] sm:$0xff] %v5972_v51   ;;  %v2816_v58 = vmax.f32 %v2552_v52, 0.0  ;;  %v2688_v1 = vmax.f32 %v2040_v55, 0.0 }
 0x2d4   : > { %v2042_v56 = vpop.f32.mrf.mxu0  ;;  %v2554_v57 = vpop.f32.mrf.mxu1 }
 0x2d5   : > { %v2043_v59 = vadd.f32 %v7931_v41, %v2042_v56  ;;  %v2555_v61 = vadd.f32 %v7931_v41, %v2554_v57 }
 0x2d6   : > { %v6499_v62 = vpop.f32.mrf.mxu0  ;;  %v6755_v63 = vpop.f32.mrf.mxu1 }
 0x2d7   : > { %v2689_v2 = vmax.f32 %v2043_v59, 0.0  ;;  %v2817_v3 = vmax.f32 %v2555_v61, 0.0 }
 0x2d8   : > { %v2047_v4 = vpop.f32.mrf.mxu0  ;;  %v2559_v5 = vpop.f32.mrf.mxu1 }
 0x2d9   : > { %v5657_v6 = vpack.c.bf16 %v2689_v2, %v2688_v1  ;;  %v5977_v7 = vpack.c.bf16 %v2817_v3, %v2816_v58  ;;  %v2560_v8 = vadd.f32 %v7931_v41, %v2559_v5  ;;  %v2048_v11 = vadd.f32 %v7931_v41, %v2047_v4 }
 0x2da   : > { %v6502_v9 = vpop.f32.mrf.mxu0  ;;  %v6758_v10 = vpop.f32.mrf.mxu1 }
 0x2db   : > { %6044 = vst [vmem:[%s7394_s12 + $0x1e8] sm:$0xff] %v5657_v6   ;;  %6108 = vst [vmem:[%s7394_s12 + $0x3e8] sm:$0xff] %v5977_v7   ;;  %v2818_v14 = vmax.f32 %v2560_v8, 0.0  ;;  %v2690_v20 = vmax.f32 %v2048_v11, 0.0 }
 0x2dc   : > { %v2050_v12 = vpop.f32.mrf.mxu0  ;;  %v2562_v13 = vpop.f32.mrf.mxu1 }
 0x2dd   : > { %v2051_v15 = vadd.f32 %v7931_v41, %v2050_v12  ;;  %v2563_v16 = vadd.f32 %v7931_v41, %v2562_v13 }
 0x2de   : > { %v6503_v18 = vpop.f32.mrf.mxu0  ;;  %v6759_v19 = vpop.f32.mrf.mxu1 }
 0x2df   : > { %v2691_v21 = vmax.f32 %v2051_v15, 0.0  ;;  %v2819_v22 = vmax.f32 %v2563_v16, 0.0 }
 0x2e0   : > { %v2055_v60 = vpop.f32.mrf.mxu0 }
 0x2e1   : > { %v5662_v23 = vpack.c.bf16 %v2691_v21, %v2690_v20  ;;  %v5982_v24 = vpack.c.bf16 %v2819_v22, %v2818_v14  ;;  %v2056_v26 = vadd.f32 %v7931_v41, %v2055_v60 }
 0x2e2   : > { %v6506_v25 = vpop.f32.mrf.mxu0 }
 0x2e3   : > { %6045 = vst [vmem:[%s7394_s12 + $0x1f0] sm:$0xff] %v5662_v23   ;;  %6109 = vst [vmem:[%s7394_s12 + $0x3f0] sm:$0xff] %v5982_v24   ;;  %v2692_v29 = vmax.f32 %v2056_v26, 0.0 }
 0x2e4   : > { %v2058_v27 = vpop.f32.mrf.mxu0 }
 0x2e5   : > { %v2059_v28 = vadd.f32 %v7931_v41, %v2058_v27 }
 0x2e6   : > { %v6507_v0 = vpop.f32.mrf.mxu0 }
 0x2e7   : > { %v2693_v30 = vmax.f32 %v2059_v28, 0.0  ;;  %4096 = sbr.rel (!%p7132_p4) target bundleno = 829 (0x33d), region = 36 }
 0x2e9   : > { %v5667_v31 = vpack.c.bf16 %v2693_v30, %v2692_v29 }
 0x2eb   : > { %6046 = vst [vmem:[%s7394_s12 + $0x1f8] sm:$0xff] %v5667_v31  }
 0x2ec   : > { %s8289_s25 = smov (!%p4099_p8, %s4098_s25), 254 }
 0x2ed   : > { %s5077_s30 = sshll.u32 %s8289_s25, 6 }
 0x2ee   : > { %p5080_p9 = scmp.eq.s32.totalorder %s5077_s30, 0 }
 0x2ef   : > { %s8091_s4 = sshrl.u32 (!%p5080_p9), %s8289_s25, 6 }
 0x2f0   : > { %4107 = sbr.rel (%p5080_p9) target bundleno = 829 (0x33d), region = 40  ;;  %p5081_p10 = scmp.le.s32.totalorder (!%p5080_p9), %s8091_s4, 0 }
 0x2f5   : > { %4514 = sbr.rel (%p5081_p10) target bundleno = 812 (0x32c), region = 112  ;;  %s8282_s15 = smov (!%p5081_p10), %s8085_s29 }
 0x2f6   : > { %s8283_s20 = smov (!%p5081_p10), %s7394_s12  ;;  %s8100_s23 = smov (!%p5081_p10), 0  }
 0x2f7   : > { %s8102_s5 = smov (!%p5081_p10), 0  }
 0x2fa LB: >> { %v4124_v41 = vld [vmem:[%s7058_s20] sm:$0xf]  ;;  %v4126_v32 = vld [vmem:[%s7058_s20 + $0x4] sm:$0xf]  ;;  %v4128_v33 = vld [vmem:[%s7058_s20 + $0x8] sm:$0xf]  ;;  %s7066_s5 = sphi %s8102_s5, %s4118_s5   ;;  %s7062_s23 = sphi %s8100_s23, %s8284_s23   ;;  %s7058_s20 = sphi %s8283_s20, %s4257_s20   ;;  %s7054_s15 = sphi %s8282_s15, %s4258_s15  }
 0x2fb   : >> { %4125 = vst [vmem:[%s7054_s15] sm:$0xf] %v4124_v41  ;;  %4127 = vst [vmem:[%s7054_s15 + $0x4] sm:$0xf] %v4126_v32  ;;  %v4130_v34 = vld [vmem:[%s7058_s20 + $0xc] sm:$0xf]  ;;  %s4252_s6 = sadd.s32 1, %s7062_s23 }
 0x2fc   : >> { %4129 = vst [vmem:[%s7054_s15 + $0x8] sm:$0xf] %v4128_v33  ;;  %v4132_v35 = vld [vmem:[%s7058_s20 + $0x10] sm:$0xf]  ;;  %v4134_v36 = vld [vmem:[%s7058_s20 + $0x14] sm:$0xf]  ;;  %p4253_p11 = scmp.ge.s32.totalorder %s4252_s6, %s8091_s4 }
 0x2fd   : >> { %4131 = vst [vmem:[%s7054_s15 + $0xc] sm:$0xf] %v4130_v34  ;;  %4133 = vst [vmem:[%s7054_s15 + $0x10] sm:$0xf] %v4132_v35  ;;  %v4136_v37 = vld [vmem:[%s7058_s20 + $0x18] sm:$0xf] }
 0x2fe   : >> { %4135 = vst [vmem:[%s7054_s15 + $0x14] sm:$0xf] %v4134_v36  ;;  %v4138_v38 = vld [vmem:[%s7058_s20 + $0x1c] sm:$0xf]  ;;  %v4140_v39 = vld [vmem:[%s7058_s20 + $0x20] sm:$0xf] }
 0x2ff   : >> { %4137 = vst [vmem:[%s7054_s15 + $0x18] sm:$0xf] %v4136_v37  ;;  %4139 = vst [vmem:[%s7054_s15 + $0x1c] sm:$0xf] %v4138_v38  ;;  %v4142_v40 = vld [vmem:[%s7058_s20 + $0x24] sm:$0xf] }
 0x300   : >> { %4141 = vst [vmem:[%s7054_s15 + $0x20] sm:$0xf] %v4140_v39  ;;  %v4144_v42 = vld [vmem:[%s7058_s20 + $0x28] sm:$0xf]  ;;  %v4146_v43 = vld [vmem:[%s7058_s20 + $0x2c] sm:$0xf] }
 0x301   : >> { %4143 = vst [vmem:[%s7054_s15 + $0x24] sm:$0xf] %v4142_v40  ;;  %4145 = vst [vmem:[%s7054_s15 + $0x28] sm:$0xf] %v4144_v42  ;;  %v4148_v44 = vld [vmem:[%s7058_s20 + $0x30] sm:$0xf] }
 0x302   : >> { %4147 = vst [vmem:[%s7054_s15 + $0x2c] sm:$0xf] %v4146_v43  ;;  %v4150_v45 = vld [vmem:[%s7058_s20 + $0x34] sm:$0xf]  ;;  %v4152_v46 = vld [vmem:[%s7058_s20 + $0x38] sm:$0xf] }
 0x303   : >> { %4149 = vst [vmem:[%s7054_s15 + $0x30] sm:$0xf] %v4148_v44  ;;  %4151 = vst [vmem:[%s7054_s15 + $0x34] sm:$0xf] %v4150_v45  ;;  %v4154_v47 = vld [vmem:[%s7058_s20 + $0x3c] sm:$0xf] }
 0x304   : >> { %4153 = vst [vmem:[%s7054_s15 + $0x38] sm:$0xf] %v4152_v46  ;;  %v4156_v48 = vld [vmem:[%s7058_s20 + $0x40] sm:$0xf]  ;;  %v4158_v17 = vld [vmem:[%s7058_s20 + $0x44] sm:$0xf] }
 0x305   : >> { %4155 = vst [vmem:[%s7054_s15 + $0x3c] sm:$0xf] %v4154_v47  ;;  %4157 = vst [vmem:[%s7054_s15 + $0x40] sm:$0xf] %v4156_v48  ;;  %v4160_v49 = vld [vmem:[%s7058_s20 + $0x48] sm:$0xf] }
 0x306   : >> { %4159 = vst [vmem:[%s7054_s15 + $0x44] sm:$0xf] %v4158_v17  ;;  %v4162_v50 = vld [vmem:[%s7058_s20 + $0x4c] sm:$0xf]  ;;  %v4164_v51 = vld [vmem:[%s7058_s20 + $0x50] sm:$0xf] }
 0x307   : >> { %4161 = vst [vmem:[%s7054_s15 + $0x48] sm:$0xf] %v4160_v49  ;;  %4163 = vst [vmem:[%s7054_s15 + $0x4c] sm:$0xf] %v4162_v50  ;;  %v4166_v52 = vld [vmem:[%s7058_s20 + $0x54] sm:$0xf] }
 0x308   : >> { %4165 = vst [vmem:[%s7054_s15 + $0x50] sm:$0xf] %v4164_v51  ;;  %v4168_v53 = vld [vmem:[%s7058_s20 + $0x58] sm:$0xf]  ;;  %v4170_v54 = vld [vmem:[%s7058_s20 + $0x5c] sm:$0xf] }
 0x309   : >> { %4167 = vst [vmem:[%s7054_s15 + $0x54] sm:$0xf] %v4166_v52  ;;  %4169 = vst [vmem:[%s7054_s15 + $0x58] sm:$0xf] %v4168_v53  ;;  %v4172_v55 = vld [vmem:[%s7058_s20 + $0x60] sm:$0xf] }
 0x30a   : >> { %4171 = vst [vmem:[%s7054_s15 + $0x5c] sm:$0xf] %v4170_v54  ;;  %v4174_v56 = vld [vmem:[%s7058_s20 + $0x64] sm:$0xf]  ;;  %v4176_v57 = vld [vmem:[%s7058_s20 + $0x68] sm:$0xf] }
 0x30b   : >> { %4173 = vst [vmem:[%s7054_s15 + $0x60] sm:$0xf] %v4172_v55  ;;  %4175 = vst [vmem:[%s7054_s15 + $0x64] sm:$0xf] %v4174_v56  ;;  %v4178_v58 = vld [vmem:[%s7058_s20 + $0x6c] sm:$0xf] }
 0x30c   : >> { %4177 = vst [vmem:[%s7054_s15 + $0x68] sm:$0xf] %v4176_v57  ;;  %v4180_v59 = vld [vmem:[%s7058_s20 + $0x70] sm:$0xf]  ;;  %v4182_v61 = vld [vmem:[%s7058_s20 + $0x74] sm:$0xf] }
 0x30d   : >> { %4179 = vst [vmem:[%s7054_s15 + $0x6c] sm:$0xf] %v4178_v58  ;;  %4181 = vst [vmem:[%s7054_s15 + $0x70] sm:$0xf] %v4180_v59  ;;  %v4184_v62 = vld [vmem:[%s7058_s20 + $0x78] sm:$0xf] }
 0x30e   : >> { %4183 = vst [vmem:[%s7054_s15 + $0x74] sm:$0xf] %v4182_v61  ;;  %v4186_v63 = vld [vmem:[%s7058_s20 + $0x7c] sm:$0xf]  ;;  %v4188_v1 = vld [vmem:[%s7058_s20 + $0x80] sm:$0xf] }
 0x30f   : >> { %4185 = vst [vmem:[%s7054_s15 + $0x78] sm:$0xf] %v4184_v62  ;;  %4187 = vst [vmem:[%s7054_s15 + $0x7c] sm:$0xf] %v4186_v63  ;;  %v4190_v2 = vld [vmem:[%s7058_s20 + $0x84] sm:$0xf] }
 0x310   : >> { %4189 = vst [vmem:[%s7054_s15 + $0x80] sm:$0xf] %v4188_v1  ;;  %v4192_v3 = vld [vmem:[%s7058_s20 + $0x88] sm:$0xf]  ;;  %v4194_v4 = vld [vmem:[%s7058_s20 + $0x8c] sm:$0xf] }
 0x311   : >> { %4191 = vst [vmem:[%s7054_s15 + $0x84] sm:$0xf] %v4190_v2  ;;  %4193 = vst [vmem:[%s7054_s15 + $0x88] sm:$0xf] %v4192_v3  ;;  %v4196_v5 = vld [vmem:[%s7058_s20 + $0x90] sm:$0xf] }
 0x312   : >> { %4195 = vst [vmem:[%s7054_s15 + $0x8c] sm:$0xf] %v4194_v4  ;;  %v4198_v6 = vld [vmem:[%s7058_s20 + $0x94] sm:$0xf]  ;;  %v4200_v7 = vld [vmem:[%s7058_s20 + $0x98] sm:$0xf] }
 0x313   : >> { %4197 = vst [vmem:[%s7054_s15 + $0x90] sm:$0xf] %v4196_v5  ;;  %4199 = vst [vmem:[%s7054_s15 + $0x94] sm:$0xf] %v4198_v6  ;;  %v4202_v8 = vld [vmem:[%s7058_s20 + $0x9c] sm:$0xf] }
 0x314   : >> { %4201 = vst [vmem:[%s7054_s15 + $0x98] sm:$0xf] %v4200_v7  ;;  %v4204_v9 = vld [vmem:[%s7058_s20 + $0xa0] sm:$0xf]  ;;  %v4206_v10 = vld [vmem:[%s7058_s20 + $0xa4] sm:$0xf] }
 0x315   : >> { %4203 = vst [vmem:[%s7054_s15 + $0x9c] sm:$0xf] %v4202_v8  ;;  %4205 = vst [vmem:[%s7054_s15 + $0xa0] sm:$0xf] %v4204_v9  ;;  %v4208_v11 = vld [vmem:[%s7058_s20 + $0xa8] sm:$0xf] }
 0x316   : >> { %4207 = vst [vmem:[%s7054_s15 + $0xa4] sm:$0xf] %v4206_v10  ;;  %v4210_v12 = vld [vmem:[%s7058_s20 + $0xac] sm:$0xf]  ;;  %v4212_v13 = vld [vmem:[%s7058_s20 + $0xb0] sm:$0xf] }
 0x317   : >> { %4209 = vst [vmem:[%s7054_s15 + $0xa8] sm:$0xf] %v4208_v11  ;;  %4211 = vst [vmem:[%s7054_s15 + $0xac] sm:$0xf] %v4210_v12  ;;  %v4214_v14 = vld [vmem:[%s7058_s20 + $0xb4] sm:$0xf] }
 0x318   : >> { %4213 = vst [vmem:[%s7054_s15 + $0xb0] sm:$0xf] %v4212_v13  ;;  %v4216_v15 = vld [vmem:[%s7058_s20 + $0xb8] sm:$0xf]  ;;  %v4218_v16 = vld [vmem:[%s7058_s20 + $0xbc] sm:$0xf] }
 0x319   : >> { %4215 = vst [vmem:[%s7054_s15 + $0xb4] sm:$0xf] %v4214_v14  ;;  %4217 = vst [vmem:[%s7054_s15 + $0xb8] sm:$0xf] %v4216_v15  ;;  %v4220_v18 = vld [vmem:[%s7058_s20 + $0xc0] sm:$0xf] }
 0x31a   : >> { %4219 = vst [vmem:[%s7054_s15 + $0xbc] sm:$0xf] %v4218_v16  ;;  %v4222_v19 = vld [vmem:[%s7058_s20 + $0xc4] sm:$0xf]  ;;  %v4224_v20 = vld [vmem:[%s7058_s20 + $0xc8] sm:$0xf] }
 0x31b   : >> { %4221 = vst [vmem:[%s7054_s15 + $0xc0] sm:$0xf] %v4220_v18  ;;  %4223 = vst [vmem:[%s7054_s15 + $0xc4] sm:$0xf] %v4222_v19  ;;  %v4226_v21 = vld [vmem:[%s7058_s20 + $0xcc] sm:$0xf] }
 0x31c   : >> { %4225 = vst [vmem:[%s7054_s15 + $0xc8] sm:$0xf] %v4224_v20  ;;  %v4228_v22 = vld [vmem:[%s7058_s20 + $0xd0] sm:$0xf]  ;;  %v4230_v60 = vld [vmem:[%s7058_s20 + $0xd4] sm:$0xf] }
 0x31d   : >> { %4227 = vst [vmem:[%s7054_s15 + $0xcc] sm:$0xf] %v4226_v21  ;;  %4229 = vst [vmem:[%s7054_s15 + $0xd0] sm:$0xf] %v4228_v22  ;;  %v4232_v23 = vld [vmem:[%s7058_s20 + $0xd8] sm:$0xf] }
 0x31e   : >> { %4231 = vst [vmem:[%s7054_s15 + $0xd4] sm:$0xf] %v4230_v60  ;;  %v4234_v24 = vld [vmem:[%s7058_s20 + $0xdc] sm:$0xf]  ;;  %v4236_v25 = vld [vmem:[%s7058_s20 + $0xe0] sm:$0xf] }
 0x31f   : >> { %4233 = vst [vmem:[%s7054_s15 + $0xd8] sm:$0xf] %v4232_v23  ;;  %4235 = vst [vmem:[%s7054_s15 + $0xdc] sm:$0xf] %v4234_v24  ;;  %v4238_v26 = vld [vmem:[%s7058_s20 + $0xe4] sm:$0xf] }
 0x320   : >> { %4237 = vst [vmem:[%s7054_s15 + $0xe0] sm:$0xf] %v4236_v25  ;;  %v4240_v27 = vld [vmem:[%s7058_s20 + $0xe8] sm:$0xf]  ;;  %v4242_v28 = vld [vmem:[%s7058_s20 + $0xec] sm:$0xf] }
 0x321   : >> { %4239 = vst [vmem:[%s7054_s15 + $0xe4] sm:$0xf] %v4238_v26  ;;  %4241 = vst [vmem:[%s7054_s15 + $0xe8] sm:$0xf] %v4240_v27  ;;  %v4244_v0 = vld [vmem:[%s7058_s20 + $0xf0] sm:$0xf] }
 0x322   : >> { %4243 = vst [vmem:[%s7054_s15 + $0xec] sm:$0xf] %v4242_v28  ;;  %v4246_v29 = vld [vmem:[%s7058_s20 + $0xf4] sm:$0xf]  ;;  %v4248_v30 = vld [vmem:[%s7058_s20 + $0xf8] sm:$0xf] }
 0x323   : >> { %4245 = vst [vmem:[%s7054_s15 + $0xf0] sm:$0xf] %v4244_v0  ;;  %4247 = vst [vmem:[%s7054_s15 + $0xf4] sm:$0xf] %v4246_v29  ;;  %v4250_v31 = vld [vmem:[%s7058_s20 + $0xfc] sm:$0xf] }
 0x324   : >> { %4249 = vst [vmem:[%s7054_s15 + $0xf8] sm:$0xf] %v4248_v30  ;;  %4251 = vst [vmem:[%s7054_s15 + $0xfc] sm:$0xf] %v4250_v31  ;;  %s8291_s6 = smov (%p4253_p11, %s4252_s6), 0  ;;  %s4118_s5 = sadd.s32 1, %s7066_s5  }
 0x325   : >> { %s5082_s7 = sshll.u32 %s8291_s6, 8  ;;  %p4117_p12 = scmp.ge.s32.totalorder %s4118_s5, %s8091_s4 }
 0x326   : >> { %s4257_s20 = scalar_lea.vmem %s7394_s12, %s5082_s7 [#allocation2]   ;;  %s4258_s15 = scalar_lea.vmem %s8085_s29, %s5082_s7  }
 0x327   : >> { %s8284_s23 = smov %s8291_s6  ;;  %4120 = sbr.rel (!%p4117_p12) target bundleno = 762 (0x2fa), region = 118 }
 0x32c PF: > { %s8259_s8 = sand.u32 63, %s8289_s25   ;;  %s5347_s9 = sshll.u32 %s8091_s4, 8 }
 0x32d   : > { %s4263_s10 = scalar_lea.vmem %s7394_s12, %s5347_s9 [#allocation2]   ;;  %s4265_s11 = scalar_lea.vmem %s8085_s29, %s5347_s9  }
 0x32e   : > { %p5087_p13 = scmp.le.s32.totalorder %s8259_s8, 0 }
 0x32f   : > { %s7068_s14 = smov (!%p5087_p13), %s4265_s11   ;;  %s7072_s17 = smov (!%p5087_p13), %s4263_s10  }
 0x330   : > { %4528 = sbr.rel (%p5087_p13) target bundleno = 829 (0x33d), region = 123  ;;  %s7076_s18 = smov (!%p5087_p13), 0  }
 0x331   : > { %s7080_s21 = smov (!%p5087_p13), 0  }
 0x335 LB: >> { %v4275_v41 = vld [vmem:[%s7074_s17] sm:$0xf]  ;;  %s4277_s22 = sadd.s32 1, %s7078_s18  ;;  %s4269_s21 = sadd.s32 1, %s7082_s21   ;;  %s7082_s21 = sphi %s7080_s21, %s4269_s21   ;;  %s7078_s18 = sphi %s7076_s18, %s7077_s18   ;;  %s7074_s17 = sphi %s7072_s17, %s4282_s17   ;;  %s7070_s14 = sphi %s7068_s14, %s4283_s14  }
 0x336   : >> { %4276 = vst [vmem:[%s7070_s14] sm:$0xf] %v4275_v41  ;;  %p4278_p0 = scmp.ge.s32.totalorder %s4277_s22, %s8259_s8  ;;  %p4268_p1 = scmp.ge.s32.totalorder %s4269_s21, %s8259_s8 }
 0x338   : >> { %s8293_s22 = smov (%p4278_p0, %s4277_s22), 0  ;;  %4271 = sbr.rel (!%p4268_p1) target bundleno = 821 (0x335), region = 129 }
 0x339   : >> { %s5088_s12 = sshll.u32 %s8293_s22, 2  ;;  %s7077_s18 = smov %s8293_s22  }
 0x33a   : >> { %s4282_s17 = scalar_lea.vmem %s4263_s10, %s5088_s12 [#allocation2]   ;;  %s4283_s14 = scalar_lea.vmem %s4265_s11, %s5088_s12  }
 0x33d PF: > { %p10_p2 = scmp.ge.s32.totalorder %s7122_s16, 4   ;;  %s8285_s12 = smov %s7046_s13 }
 0x33e   : > { %s8286_s13 = smov %s7130_s19  ;;  %s8287_s14 = smov %s7122_s16 }
 0x33f   :  { %12 = sbr.rel (!%p10_p2) target bundleno = 2 (0x2), region = 140 }

// kernel: network_forward.6
= control target key start
LH: loop header
LB: loop body
LE: loop exit
PB: predicated region body
PF: predicated region fallthrough
CT: control target
= control target key end

     0   :  { %s4070_s12 = smov 0   ;;  %s4072_s13 = smov 0   ;;  %s4872_s0 = inlined_call_operand.vmem [shape: bf16[882,600], index: 0, kind: input, shape index: {}]   ;;  %s4873_s1 = inlined_call_operand.vmem [shape: bf16[600,128], index: 1, kind: input, shape index: {}]   ;;  %s4874_s2 = inlined_call_operand.vmem [shape: f32[1,128], index: 2, kind: input, shape index: {}]   ;;  %s4875_s3 = inlined_call_operand.vmem [shape: bf16[882,128], index: 3, kind: output, shape index: {}]  }
   0x1   :  { %s4074_s14 = smov 0  }
   0x2 LB: > { %s4083_s15 = sadd.s32 4294967295, %s4015_s14   ;;  %s4085_s16 = sadd.s32 1, %s4015_s14   ;;  %s4015_s14 = sphi %s4074_s14, %s4912_s14   ;;  %s4011_s13 = sphi %s4072_s13, %s4911_s13   ;;  %s4007_s12 = sphi %s4070_s12, %s4910_s12  }
   0x3   : > { %s85_s17 = ssub.s32 %s4015_s14, %s4085_s16  ;;  %s88_s18 = sadd.s32 1, %s4011_s13 }
   0x4   : > { %p86_p0 = scmp.eq.s32.totalorder %s85_s17, 0  ;;  %p98_p1 = scmp.ne.s32.totalorder %s4011_s13, %s4007_s12 }
   0x5   : > { %p99_p2 = scmp.eq.s32.totalorder %s4083_s15, 1  ;;  %p3013_p3 = scmp.ge.s32.totalorder %s4015_s14, 1 }
   0x6   : > { %s4093_s19 = scalar_select %p86_p0, %s4011_s13, %s88_s18  }
   0x7   : > { %p4095_p4 = por %p99_p2, %p98_p1  ;;  %p149_p5 = scmp.lt.s32.totalorder %s4015_s14, 3 }
   0x9   : > { %p150_p6 = pnand %p3013_p3, %p149_p5 }
   0xb   : > { %153 = sbr.rel (%p150_p6) target bundleno = 650 (0x28a), region = 32 }
  0x10   : > { %v3722_v0 = vld [vmem:[%s4873_s1 + $0x38] sm:$0xff]   ;;  %v4049_v1 = vmov 0   ;;  %v3724_v3 = vld [vmem:[%s4873_s1 + $0x30] sm:$0xff]   ;;  %v3726_v5 = vld [vmem:[%s4873_s1 + $0x28] sm:$0xff]   ;;  %s4135_s14 = smul.u32 56, %s4083_s15  ;;  %vm1461_vm0 = vcmask 1043456  }
  0x11   : > { %1465 = vmatprep.subr.bf16.mxu0 %v4049_v1  ;;  %1722 = vmatprep.subr.bf16.mxu1 %v4049_v1  ;;  %v3723_v2 = vld [vmem:[%s4873_s1 + $0xb8] sm:$0xff]   ;;  %v3725_v4 = vld [vmem:[%s4873_s1 + $0xb0] sm:$0xff]   ;;  %v3727_v6 = vld [vmem:[%s4873_s1 + $0xa8] sm:$0xff]   ;;  %vm1376_vm1 = vcmask 719872   ;;  %s3346_s30 = smul.u32 (%p4095_p4), 224, %s4083_s15 }
  0x12   : > { %1466 = vmatpush1.bf16.msra.mxu0 %v3722_v0  ;;  %1723 = vmatpush1.bf16.msra.mxu1 %v3723_v2  ;;  %v3728_v7 = vld [vmem:[%s4873_s1 + $0x20] sm:$0xff]   ;;  %v3730_v9 = vld [vmem:[%s4873_s1 + $0x18] sm:$0xff]   ;;  %v3732_v11 = vld [vmem:[%s4873_s1 + $0x10] sm:$0xff]   ;;  %p184_p7 = scmp.lt.s32.totalorder %s4135_s14, 110  ;;  %s2580_s29 = ssub.s32 (%p4095_p4), 111, %s4135_s14 }
  0x13   : > { %1467 = vmatprep.subr.bf16.mxu0 %v4049_v1  ;;  %1724 = vmatprep.subr.bf16.mxu1 %v4049_v1  ;;  %v3729_v8 = vld [vmem:[%s4873_s1 + $0xa0] sm:$0xff]   ;;  %v3731_v10 = vld [vmem:[%s4873_s1 + $0x98] sm:$0xff]   ;;  %v3733_v12 = vld [vmem:[%s4873_s1 + $0x90] sm:$0xff]   ;;  %p2581_p8 = scmp.lt.s32.totalorder (%p4095_p4), %s2580_s29, 56  ;;  %s4701_s6 = scalar_lea.vmem (%p4095_p4), %s4875_s3, %s3346_s30  }
  0x14   : > { %v3734_v13 = vld [vmem:[%s4873_s1 + $0x8] sm:$0xff]   ;;  %s185_s27 = scalar_select %p184_p7, %s4135_s14, 110  ;;  %v3736_v15 = vld [vmem:[%s4873_s1] sm:$0xff]   ;;  %v3738_v17 = vld [vmem:[%s4873_s1 + $0x78] sm:$0xff]  }
  0x15   : > { %v3735_v14 = vld [vmem:[%s4873_s1 + $0x88] sm:$0xff]   ;;  %v3737_v16 = vld [vmem:[%s4873_s1 + $0x80] sm:$0xff]   ;;  %v3739_v18 = vld [vmem:[%s4873_s1 + $0xf8] sm:$0xff]  }
  0x16   : > { %1468 = vmatpush1.bf16.msra.mxu0 %v3724_v3  ;;  %1725 = vmatpush1.bf16.msra.mxu1 %v3725_v4  ;;  %s3631_s5 = smul.u32 20, %s185_s27  ;;  %v3740_v20 = vld [vmem:[%s4873_s1 + $0x70] sm:$0xff]   ;;  %v3742_v23 = vld [vmem:[%s4873_s1 + $0x68] sm:$0xff]   ;;  %v3744_v25 = vld [vmem:[%s4873_s1 + $0x60] sm:$0xff]  }
  0x17   : > { %1469 = vmatprep.subr.bf16.mxu0 %v4049_v1  ;;  %1726 = vmatprep.subr.bf16.mxu1 %v4049_v1  ;;  %v3741_v22 = vld [vmem:[%s4873_s1 + $0xf0] sm:$0xff]   ;;  %v3743_v24 = vld [vmem:[%s4873_s1 + $0xe8] sm:$0xff]   ;;  %v3745_v26 = vld [vmem:[%s4873_s1 + $0xe0] sm:$0xff]  }
  0x18   : > { %s4174_s17 = scalar_lea.vmem %s4872_s0, %s3631_s5  ;;  %v3746_v27 = vld [vmem:[%s4873_s1 + $0x58] sm:$0xff]   ;;  %v3748_v29 = vld [vmem:[%s4873_s1 + $0x50] sm:$0xff]   ;;  %v3750_v31 = vld [vmem:[%s4873_s1 + $0x48] sm:$0xff]  }
  0x19   : > { %v3756_v19 = vld [vmem:[%s4174_s17 + $0x4] ss:$20 sps:$4 sm:$0xff]   ;;  %v3759_v21 = vld [vmem:[%s4174_s17 + $0xc] ss:$20 sps:$4 sm:$0xff]   ;;  %v3749_v30 = vld [vmem:[%s4873_s1 + $0xd0] sm:$0xff]  }
  0x1a   : > { %1470 = vmatpush1.bf16.msra.mxu0 %v3726_v5  ;;  %1727 = vmatpush1.bf16.msra.mxu1 %v3727_v6  ;;  %v3747_v28 = vld [vmem:[%s4873_s1 + $0xd8] sm:$0xff]   ;;  %v3751_v32 = vld [vmem:[%s4873_s1 + $0xc8] sm:$0xff]   ;;  %v3752_v33 = vld [vmem:[%s4873_s1 + $0x40] sm:$0xff]  }
  0x1b   : > { %1471 = vmatprep.subr.bf16.mxu0 %v4049_v1  ;;  %1728 = vmatprep.subr.bf16.mxu1 %v4049_v1  ;;  %v3753_v34 = vld [vmem:[%s4873_s1 + $0xc0] sm:$0xff]   ;;  %v3760_v35 = vld [vmem:[%s4873_s1 + $0x128] ss:$0 sps:$4 sm:$0xff]   ;;  %v3816_v42 = vld [vmem:[%s4873_s1 + $0x118] sm:$0xff]  }
  0x1c   : > { %1497 = vmatprep.mubr.bf16.mxu0 %v3756_v19  ;;  %1754 = vmatprep.mubr.bf16.mxu1 %v3759_v21  ;;  %v3754_v36 = vld [vmem:[%s4174_s17] ss:$20 sps:$4 sm:$0xff]   ;;  %v3757_v37 = vld [vmem:[%s4174_s17 + $0x8] ss:$20 sps:$4 sm:$0xff]   ;;  %v1463_v38 = vsel %vm1461_vm0, %v3760_v35, 0 }
  0x1d   : > { %v3761_v39 = vld [vmem:[%s4174_s17 + $0x2c] ss:$20 sps:$4 sm:$0xff]   ;;  %v3763_v40 = vld [vmem:[%s4174_s17 + $0x34] ss:$20 sps:$4 sm:$0xff]   ;;  %v3766_v44 = vld [vmem:[%s4174_s17 + $0x30] ss:$20 sps:$4 sm:$0xff]  }
  0x1e   : > { %1472 = vmatpush1.bf16.msra.mxu0 %v3728_v7  ;;  %1729 = vmatpush1.bf16.msra.mxu1 %v3729_v8  ;;  %v3785_v41 = vld [vmem:[%s4873_s1 + $0x120] sm:$0xff]   ;;  %v3765_v43 = vld [vmem:[%s4174_s17 + $0x28] ss:$20 sps:$4 sm:$0xff]   ;;  %v3847_v47 = vld [vmem:[%s4873_s1 + $0x110] sm:$0xff]  }
  0x1f   : > { %1473 = vmatprep.subr.bf16.mxu0 %v4049_v1  ;;  %1730 = vmatprep.subr.bf16.mxu1 %v4049_v1  ;;  %v3767_v45 = vld [vmem:[%s4174_s17 + $0x54] ss:$20 sps:$4 sm:$0xff]   ;;  %v3769_v46 = vld [vmem:[%s4174_s17 + $0x5c] ss:$20 sps:$4 sm:$0xff]   ;;  %v3772_v49 = vld [vmem:[%s4174_s17 + $0x58] ss:$20 sps:$4 sm:$0xff]  }
  0x20   : > { %v3771_v48 = vld [vmem:[%s4174_s17 + $0x50] ss:$20 sps:$4 sm:$0xff]   ;;  %v3777_v52 = vld [vmem:[%s4174_s17 + $0x78] ss:$20 sps:$4 sm:$0xff]   ;;  %v3778_v53 = vld [vmem:[%s4174_s17 + $0x80] ss:$20 sps:$4 sm:$0xff]  }
  0x21   : > { %v3773_v50 = vld [vmem:[%s4174_s17 + $0x7c] ss:$20 sps:$4 sm:$0xff]   ;;  %v3775_v51 = vld [vmem:[%s4174_s17 + $0x84] ss:$20 sps:$4 sm:$0xff]   ;;  %v3781_v55 = vld [vmem:[%s4174_s17 + $0xac] ss:$20 sps:$4 sm:$0xff]  }
  0x22   : > { %1474 = vmatpush1.bf16.msra.mxu0 %v3730_v9  ;;  %1731 = vmatpush1.bf16.msra.mxu1 %v3731_v10  ;;  %v3779_v54 = vld [vmem:[%s4174_s17 + $0xa4] ss:$20 sps:$4 sm:$0xff]   ;;  %v3872_v56 = vld [vmem:[%s4873_s1 + $0x108] sm:$0xff]   ;;  %v3783_v57 = vld [vmem:[%s4174_s17 + $0xa0] ss:$20 sps:$4 sm:$0xff]  }
  0x23   : > { %1475 = vmatprep.subr.bf16.mxu0 %v4049_v1  ;;  %1732 = vmatprep.subr.bf16.mxu1 %v4049_v1  ;;  %v3784_v58 = vld [vmem:[%s4174_s17 + $0xa8] ss:$20 sps:$4 sm:$0xff]   ;;  %v3786_v59 = vld [vmem:[%s4174_s17 + $0xcc] ss:$20 sps:$4 sm:$0xff]   ;;  %v3791_v62 = vld [vmem:[%s4174_s17 + $0xd0] ss:$20 sps:$4 sm:$0xff]  }
  0x24   : > { %v3788_v60 = vld [vmem:[%s4174_s17 + $0xd4] ss:$20 sps:$4 sm:$0xff]   ;;  %v3794_v0 = vld [vmem:[%s4174_s17 + $0xfc] ss:$20 sps:$4 sm:$0xff]   ;;  %v3797_v2 = vld [vmem:[%s4174_s17 + $0xf8] ss:$20 sps:$4 sm:$0xff]  }
  0x25   : > { %v3790_v61 = vld [vmem:[%s4174_s17 + $0xc8] ss:$20 sps:$4 sm:$0xff]   ;;  %v3800_v4 = vld [vmem:[%s4174_s17 + $0x124] ss:$20 sps:$4 sm:$0xff]   ;;  %v3803_v6 = vld [vmem:[%s4174_s17 + $0x120] ss:$20 sps:$4 sm:$0xff]  }
  0x26   : > { %1476 = vmatpush1.bf16.msra.mxu0 %v3732_v11  ;;  %1733 = vmatpush1.bf16.msra.mxu1 %v3733_v12  ;;  %v3792_v63 = vld [vmem:[%s4174_s17 + $0xf4] ss:$20 sps:$4 sm:$0xff]   ;;  %v3798_v3 = vld [vmem:[%s4174_s17 + $0x11c] ss:$20 sps:$4 sm:$0xff]   ;;  %v3802_v5 = vld [vmem:[%s4174_s17 + $0x118] ss:$20 sps:$4 sm:$0xff]  }
  0x27   : > { %1477 = vmatprep.subr.bf16.mxu0 %v4049_v1  ;;  %1734 = vmatprep.subr.bf16.mxu1 %v4049_v1  ;;  %v3804_v7 = vld [vmem:[%s4174_s17 + $0x144] ss:$20 sps:$4 sm:$0xff]   ;;  %v3806_v8 = vld [vmem:[%s4174_s17 + $0x14c] ss:$20 sps:$4 sm:$0xff]   ;;  %v3809_v11 = vld [vmem:[%s4174_s17 + $0x148] ss:$20 sps:$4 sm:$0xff]  }
  0x28   : > { %v3903_v9 = vld [vmem:[%s4873_s1 + $0x100] sm:$0xff]   ;;  %v3822_v19 = vld [vmem:[%s4174_s17 + $0x198] ss:$20 sps:$4 sm:$0xff]  }
  0x29   : > { %v3808_v10 = vld [vmem:[%s4174_s17 + $0x140] ss:$20 sps:$4 sm:$0xff]   ;;  %v3825_v21 = vld [vmem:[%s4174_s17 + $0x1c4] ss:$20 sps:$4 sm:$0xff]  }
  0x2a   : > { %1478 = vmatpush1.bf16.msra.mxu0 %v3734_v13  ;;  %1735 = vmatpush1.bf16.msra.mxu1 %v3735_v14  ;;  %v3810_v12 = vld [vmem:[%s4174_s17 + $0x16c] ss:$20 sps:$4 sm:$0xff]   ;;  %v3812_v13 = vld [vmem:[%s4174_s17 + $0x174] ss:$20 sps:$4 sm:$0xff]  }
  0x2b   : > { %1479 = vmatprep.subr.bf16.mxu0 %v4049_v1  ;;  %1736 = vmatprep.subr.bf16.mxu1 %v4049_v1  ;;  %v3814_v14 = vld [vmem:[%s4174_s17 + $0x168] ss:$20 sps:$4 sm:$0xff]  }
  0x2e   : > { %1480 = vmatpush1.bf16.msra.mxu0 %v3736_v15  ;;  %1737 = vmatpush1.bf16.msra.mxu1 %v3737_v16  ;;  %v3815_v15 = vld [vmem:[%s4174_s17 + $0x170] ss:$20 sps:$4 sm:$0xff]   ;;  %v3817_v16 = vld [vmem:[%s4174_s17 + $0x194] ss:$20 sps:$4 sm:$0xff]  }
  0x2f   : > { %1481 = vmatprep.subr.bf16.mxu0 %v4049_v1  ;;  %1738 = vmatprep.subr.bf16.mxu1 %v4049_v1 }
  0x32   : > { %1482 = vmatpush2.bf16.msra.mxu0 %v3738_v17  ;;  %1739 = vmatpush2.bf16.msra.mxu1 %v3739_v18  ;;  %v3819_v17 = vld [vmem:[%s4174_s17 + $0x19c] ss:$20 sps:$4 sm:$0xff]  }
  0x33   : > { %1483 = vmatprep.subr.bf16.mxu0 %v4049_v1  ;;  %1740 = vmatprep.subr.bf16.mxu1 %v4049_v1  ;;  %v3821_v18 = vld [vmem:[%s4174_s17 + $0x190] ss:$20 sps:$4 sm:$0xff]  }
  0x36   : > { %1484 = vmatpush2.bf16.msra.mxu0 %v3740_v20  ;;  %1741 = vmatpush2.bf16.msra.mxu1 %v3741_v22  ;;  %v3823_v20 = vld [vmem:[%s4174_s17 + $0x1bc] ss:$20 sps:$4 sm:$0xff]   ;;  %v3827_v22 = vld [vmem:[%s4174_s17 + $0x1b8] ss:$20 sps:$4 sm:$0xff]  }
  0x37   : > { %1485 = vmatprep.subr.bf16.mxu0 %v4049_v1  ;;  %1742 = vmatprep.subr.bf16.mxu1 %v4049_v1 }
  0x3a   : > { %1486 = vmatpush2.bf16.msra.mxu0 %v3742_v23  ;;  %1743 = vmatpush2.bf16.msra.mxu1 %v3743_v24  ;;  %v3828_v23 = vld [vmem:[%s4174_s17 + $0x1c0] ss:$20 sps:$4 sm:$0xff]   ;;  %v3829_v24 = vld [vmem:[%s4174_s17 + $0x1e4] ss:$20 sps:$4 sm:$0xff]  }
  0x3b   : > { %1487 = vmatprep.subr.bf16.mxu0 %v4049_v1  ;;  %1744 = vmatprep.subr.bf16.mxu1 %v4049_v1 }
  0x3e   : > { %1488 = vmatpush2.bf16.msra.mxu0 %v3744_v25  ;;  %1745 = vmatpush2.bf16.msra.mxu1 %v3745_v26  ;;  %v3831_v25 = vld [vmem:[%s4174_s17 + $0x1ec] ss:$20 sps:$4 sm:$0xff]  }
  0x3f   : > { %1489 = vmatprep.subr.bf16.mxu0 %v4049_v1  ;;  %1746 = vmatprep.subr.bf16.mxu1 %v4049_v1  ;;  %v3833_v26 = vld [vmem:[%s4174_s17 + $0x1e0] ss:$20 sps:$4 sm:$0xff]  }
  0x42   : > { %1490 = vmatpush2.bf16.msra.mxu0 %v3746_v27  ;;  %1747 = vmatpush2.bf16.msra.mxu1 %v3747_v28  ;;  %v3834_v27 = vld [vmem:[%s4174_s17 + $0x1e8] ss:$20 sps:$4 sm:$0xff]   ;;  %v3835_v28 = vld [vmem:[%s4174_s17 + $0x20c] ss:$20 sps:$4 sm:$0xff]  }
  0x43   : > { %1491 = vmatprep.subr.bf16.mxu0 %v4049_v1  ;;  %1748 = vmatprep.subr.bf16.mxu1 %v4049_v1 }
  0x46   : > { %1492 = vmatpush2.bf16.msra.mxu0 %v3748_v29  ;;  %1749 = vmatpush2.bf16.msra.mxu1 %v3749_v30  ;;  %v3837_v29 = vld [vmem:[%s4174_s17 + $0x214] ss:$20 sps:$4 sm:$0xff]  }
  0x47   : > { %1493 = vmatprep.subr.bf16.mxu0 %v4049_v1  ;;  %1750 = vmatprep.subr.bf16.mxu1 %v4049_v1  ;;  %v3839_v30 = vld [vmem:[%s4174_s17 + $0x208] ss:$20 sps:$4 sm:$0xff]  }
  0x4a   : > { %1494 = vmatpush2.bf16.msra.mxu0 %v3750_v31  ;;  %1751 = vmatpush2.bf16.msra.mxu1 %v3751_v32  ;;  %v3840_v31 = vld [vmem:[%s4174_s17 + $0x210] ss:$20 sps:$4 sm:$0xff]   ;;  %v3841_v32 = vld [vmem:[%s4174_s17 + $0x234] ss:$20 sps:$4 sm:$0xff]  }
  0x4b   : > { %1495 = vmatprep.subr.bf16.mxu0 %v4049_v1  ;;  %1752 = vmatprep.subr.bf16.mxu1 %v4049_v1  ;;  %v3796_v1 = vld [vmem:[%s4174_s17 + $0xf0] ss:$20 sps:$4 sm:$0xff]  }
  0x4e   : > { %1496 = vmatpush2.bf16.msra.mxu0 %v3752_v33  ;;  %1753 = vmatpush2.bf16.msra.mxu1 %v3753_v34  ;;  %v3843_v33 = vld [vmem:[%s4174_s17 + $0x23c] ss:$20 sps:$4 sm:$0xff]  }
  0x4f   : > { %3628 = vmatprep.subr.msk.bf16.mxu0 %vm1461_vm0, %v3760_v35  ;;  %3629 = vmatprep.subr.msk.bf16.mxu1 %vm1461_vm0, %v3760_v35  ;;  %v3845_v34 = vld [vmem:[%s4174_s17 + $0x230] ss:$20 sps:$4 sm:$0xff]   ;;  %v3846_v35 = vld [vmem:[%s4174_s17 + $0x238] ss:$20 sps:$4 sm:$0xff]  }
  0x51   : > { %1498 = vmatmul.mubr.bf16.vlgmr.msra.gmra.mxu0 %v3754_v36  ;;  %1755 = vmatmul.mubr.bf16.vlgmr.msra.gmra.mxu1 %v3757_v37  ;;  %v3848_v36 = vld [vmem:[%s4174_s17 + $0x25c] ss:$20 sps:$4 sm:$0xff]   ;;  %v3850_v37 = vld [vmem:[%s4174_s17 + $0x264] ss:$20 sps:$4 sm:$0xff]  }
  0x52   : > { %3549 = vmatpush3.bf16.msra.mxu0 %v1463_v38  ;;  %3622 = vmatpush3.bf16.msra.mxu1 %v1463_v38  ;;  %v3852_v38 = vld [vmem:[%s4174_s17 + $0x258] ss:$20 sps:$4 sm:$0xff]  }
  0x53   : > { %1505 = vmatprep.mubr.bf16.mxu0 %v3761_v39  ;;  %1762 = vmatprep.mubr.bf16.mxu1 %v3763_v40  ;;  %v3853_v39 = vld [vmem:[%s4174_s17 + $0x260] ss:$20 sps:$4 sm:$0xff]   ;;  %v3854_v40 = vld [vmem:[%s4174_s17 + $0x284] ss:$20 sps:$4 sm:$0xff]  }
  0x54   : > { %3550 = vmatprep.subr.bf16.mxu0 %v3785_v41  ;;  %3617 = vmatprep.subr.bf16.mxu1 %v3785_v41 }
  0x56   : > { %3551 = vmatpush3.bf16.msra.mxu0 %v3785_v41  ;;  %3623 = vmatpush3.bf16.msra.mxu1 %v3785_v41  ;;  %v3856_v41 = vld [vmem:[%s4174_s17 + $0x28c] ss:$20 sps:$4 sm:$0xff]  }
  0x57   : > { %3552 = vmatprep.subr.bf16.mxu0 %v3816_v42  ;;  %3618 = vmatprep.subr.bf16.mxu1 %v3816_v42 }
  0x59   : > { %1506 = vmatmul.mubr.bf16.gmra.mxu0 %v3765_v43  ;;  %1763 = vmatmul.mubr.bf16.gmra.mxu1 %v3766_v44  ;;  %v3859_v43 = vld [vmem:[%s4174_s17 + $0x288] ss:$20 sps:$4 sm:$0xff]   ;;  %v3860_v44 = vld [vmem:[%s4174_s17 + $0x2ac] ss:$20 sps:$4 sm:$0xff]  }
  0x5a   : > { %1513 = vmatprep.mubr.bf16.mxu0 %v3767_v45  ;;  %1770 = vmatprep.mubr.bf16.mxu1 %v3769_v46  ;;  %v3862_v45 = vld [vmem:[%s4174_s17 + $0x2b4] ss:$20 sps:$4 sm:$0xff]  }
  0x5b   : > { %3553 = vmatpush3.bf16.msra.mxu0 %v3816_v42  ;;  %3624 = vmatpush3.bf16.msra.mxu1 %v3816_v42  ;;  %v3858_v42 = vld [vmem:[%s4174_s17 + $0x280] ss:$20 sps:$4 sm:$0xff]   ;;  %v3864_v46 = vld [vmem:[%s4174_s17 + $0x2a8] ss:$20 sps:$4 sm:$0xff]  }
  0x5c   : > { %3554 = vmatprep.subr.bf16.mxu0 %v3847_v47  ;;  %3619 = vmatprep.subr.bf16.mxu1 %v3847_v47 }
  0x5f   : > { %3555 = vmatpush3.bf16.msra.mxu0 %v3847_v47  ;;  %3625 = vmatpush3.bf16.msra.mxu1 %v3847_v47  ;;  %v3865_v47 = vld [vmem:[%s4174_s17 + $0x2b0] ss:$20 sps:$4 sm:$0xff]  }
  0x60   : > { %3556 = vmatprep.subr.bf16.mxu0 %v3872_v56  ;;  %3620 = vmatprep.subr.bf16.mxu1 %v3872_v56 }
  0x61   : > { %1514 = vmatmul.mubr.bf16.gmra.mxu0 %v3771_v48  ;;  %1771 = vmatmul.mubr.bf16.gmra.mxu1 %v3772_v49  ;;  %v3866_v48 = vld [vmem:[%s4174_s17 + $0x2d4] ss:$20 sps:$4 sm:$0xff]   ;;  %v3868_v49 = vld [vmem:[%s4174_s17 + $0x2dc] ss:$20 sps:$4 sm:$0xff]  }
  0x62   : > { %1521 = vmatprep.mubr.bf16.mxu0 %v3773_v50  ;;  %1778 = vmatprep.mubr.bf16.mxu1 %v3775_v51  ;;  %v3870_v50 = vld [vmem:[%s4174_s17 + $0x2d0] ss:$20 sps:$4 sm:$0xff]   ;;  %v3871_v51 = vld [vmem:[%s4174_s17 + $0x2d8] ss:$20 sps:$4 sm:$0xff]  }
  0x63   : > { %3557 = vmatpush3.bf16.msra.mxu0 %v3872_v56  ;;  %3626 = vmatpush3.bf16.msra.mxu1 %v3872_v56  ;;  %v3879_v56 = vld [vmem:[%s4174_s17 + $0x324] ss:$20 sps:$4 sm:$0xff]  }
  0x64   : > { %3558 = vmatprep.subr.bf16.mxu0 %v3903_v9  ;;  %3621 = vmatprep.subr.bf16.mxu1 %v3903_v9 }
  0x67   : > { %3559 = vmatpush3.bf16.msra.mxu0 %v3903_v9  ;;  %3627 = vmatpush3.bf16.msra.mxu1 %v3903_v9  ;;  %v3906_v9 = vld [vmem:[%s4174_s17 + $0x3cc] ss:$20 sps:$4 sm:$0xff]  }
  0x69   : > { %1522 = vmatmul.mubr.bf16.gmra.mxu0 %v3777_v52  ;;  %1779 = vmatmul.mubr.bf16.gmra.mxu1 %v3778_v53  ;;  %v3873_v52 = vld [vmem:[%s4174_s17 + $0x2fc] ss:$20 sps:$4 sm:$0xff]   ;;  %v3875_v53 = vld [vmem:[%s4174_s17 + $0x304] ss:$20 sps:$4 sm:$0xff]  }
  0x6a   : > { %1529 = vmatprep.mubr.bf16.mxu0 %v3779_v54  ;;  %1786 = vmatprep.mubr.bf16.mxu1 %v3781_v55  ;;  %v3877_v54 = vld [vmem:[%s4174_s17 + $0x2f8] ss:$20 sps:$4 sm:$0xff]   ;;  %v3878_v55 = vld [vmem:[%s4174_s17 + $0x300] ss:$20 sps:$4 sm:$0xff]  }
  0x71   : > { %1530 = vmatmul.mubr.bf16.gmra.mxu0 %v3783_v57  ;;  %1787 = vmatmul.mubr.bf16.gmra.mxu1 %v3784_v58  ;;  %v3881_v57 = vld [vmem:[%s4174_s17 + $0x32c] ss:$20 sps:$4 sm:$0xff]  }
  0x72   : > { %1537 = vmatprep.mubr.bf16.mxu0 %v3786_v59  ;;  %1794 = vmatprep.mubr.bf16.mxu1 %v3788_v60  ;;  %v3883_v58 = vld [vmem:[%s4174_s17 + $0x320] ss:$20 sps:$4 sm:$0xff]   ;;  %v3884_v59 = vld [vmem:[%s4174_s17 + $0x328] ss:$20 sps:$4 sm:$0xff]  }
  0x73   : > { %v3885_v60 = vld [vmem:[%s4174_s17 + $0x34c] ss:$20 sps:$4 sm:$0xff]  }
  0x79   : > { %1538 = vmatmul.mubr.bf16.gmra.mxu0 %v3790_v61  ;;  %1795 = vmatmul.mubr.bf16.gmra.mxu1 %v3791_v62  ;;  %v3887_v61 = vld [vmem:[%s4174_s17 + $0x354] ss:$20 sps:$4 sm:$0xff]  }
  0x7a   : > { %1545 = vmatprep.mubr.bf16.mxu0 %v3792_v63  ;;  %1802 = vmatprep.mubr.bf16.mxu1 %v3794_v0  ;;  %v3889_v62 = vld [vmem:[%s4174_s17 + $0x348] ss:$20 sps:$4 sm:$0xff]   ;;  %v3890_v63 = vld [vmem:[%s4174_s17 + $0x350] ss:$20 sps:$4 sm:$0xff]  }
  0x7b   : > { %v3891_v0 = vld [vmem:[%s4174_s17 + $0x374] ss:$20 sps:$4 sm:$0xff]  }
  0x81   : > { %1546 = vmatmul.mubr.bf16.gmra.mxu0 %v3796_v1  ;;  %1803 = vmatmul.mubr.bf16.gmra.mxu1 %v3797_v2  ;;  %v3893_v1 = vld [vmem:[%s4174_s17 + $0x37c] ss:$20 sps:$4 sm:$0xff]  }
  0x82   : > { %1553 = vmatprep.mubr.bf16.mxu0 %v3798_v3  ;;  %1810 = vmatprep.mubr.bf16.mxu1 %v3800_v4  ;;  %v3895_v2 = vld [vmem:[%s4174_s17 + $0x370] ss:$20 sps:$4 sm:$0xff]   ;;  %v3896_v3 = vld [vmem:[%s4174_s17 + $0x378] ss:$20 sps:$4 sm:$0xff]  }
  0x83   : > { %v3897_v4 = vld [vmem:[%s4174_s17 + $0x39c] ss:$20 sps:$4 sm:$0xff]  }
  0x89   : > { %1554 = vmatmul.mubr.bf16.gmra.mxu0 %v3802_v5  ;;  %1811 = vmatmul.mubr.bf16.gmra.mxu1 %v3803_v6  ;;  %v3899_v5 = vld [vmem:[%s4174_s17 + $0x3a4] ss:$20 sps:$4 sm:$0xff]  }
  0x8a   : > { %1561 = vmatprep.mubr.bf16.mxu0 %v3804_v7  ;;  %1818 = vmatprep.mubr.bf16.mxu1 %v3806_v8  ;;  %v3901_v6 = vld [vmem:[%s4174_s17 + $0x398] ss:$20 sps:$4 sm:$0xff]   ;;  %v3902_v7 = vld [vmem:[%s4174_s17 + $0x3a0] ss:$20 sps:$4 sm:$0xff]  }
  0x8b   : > { %v3904_v8 = vld [vmem:[%s4174_s17 + $0x3c4] ss:$20 sps:$4 sm:$0xff]  }
  0x91   : > { %1562 = vmatmul.mubr.bf16.gmra.mxu0 %v3808_v10  ;;  %1819 = vmatmul.mubr.bf16.gmra.mxu1 %v3809_v11  ;;  %v3908_v10 = vld [vmem:[%s4174_s17 + $0x3c0] ss:$20 sps:$4 sm:$0xff]   ;;  %v3909_v11 = vld [vmem:[%s4174_s17 + $0x3c8] ss:$20 sps:$4 sm:$0xff]  }
  0x92   : > { %1569 = vmatprep.mubr.bf16.mxu0 %v3810_v12  ;;  %1826 = vmatprep.mubr.bf16.mxu1 %v3812_v13  ;;  %v3910_v12 = vld [vmem:[%s4174_s17 + $0x3ec] ss:$20 sps:$4 sm:$0xff]  }
  0x93   : > { %v4359_v13 = vld [vmem:[%s4874_s2] ss:$0 sm:$0xff] }
  0x99   : > { %1570 = vmatmul.mubr.bf16.gmra.mxu0 %v3814_v14  ;;  %1827 = vmatmul.mubr.bf16.gmra.mxu1 %v3815_v15  ;;  %v3912_v14 = vld [vmem:[%s4174_s17 + $0x3f4] ss:$20 sps:$4 sm:$0xff]  }
  0x9a   : > { %1577 = vmatprep.mubr.bf16.mxu0 %v3817_v16  ;;  %1834 = vmatprep.mubr.bf16.mxu1 %v3819_v17 }
  0xa1   : > { %1578 = vmatmul.mubr.bf16.gmra.mxu0 %v3821_v18  ;;  %1835 = vmatmul.mubr.bf16.gmra.mxu1 %v3822_v19 }
  0xa2   : > { %1585 = vmatprep.mubr.bf16.mxu0 %v3823_v20  ;;  %1842 = vmatprep.mubr.bf16.mxu1 %v3825_v21 }
  0xa9   : > { %1586 = vmatmul.mubr.bf16.gmra.mxu0 %v3827_v22  ;;  %1843 = vmatmul.mubr.bf16.gmra.mxu1 %v3828_v23  ;;  %v3914_v22 = vld [vmem:[%s4174_s17 + $0x3e8] ss:$20 sps:$4 sm:$0xff]  }
  0xaa   : > { %1593 = vmatprep.mubr.bf16.mxu0 %v3829_v24  ;;  %1850 = vmatprep.mubr.bf16.mxu1 %v3831_v25  ;;  %v3915_v25 = vld [vmem:[%s4174_s17 + $0x3f0] ss:$20 sps:$4 sm:$0xff]  }
  0xb1   : > { %1594 = vmatmul.mubr.bf16.gmra.mxu0 %v3833_v26  ;;  %1851 = vmatmul.mubr.bf16.gmra.mxu1 %v3834_v27  ;;  %v3916_v26 = vld [vmem:[%s4174_s17 + $0x414] ss:$20 sps:$4 sm:$0xff]  }
  0xb2   : > { %1601 = vmatprep.mubr.bf16.mxu0 %v3835_v28  ;;  %1858 = vmatprep.mubr.bf16.mxu1 %v3837_v29  ;;  %v3918_v28 = vld [vmem:[%s4174_s17 + $0x41c] ss:$20 sps:$4 sm:$0xff]  }
  0xb9   : > { %1602 = vmatmul.mubr.bf16.gmra.mxu0 %v3839_v30  ;;  %1859 = vmatmul.mubr.bf16.gmra.mxu1 %v3840_v31 }
  0xba   : > { %1609 = vmatprep.mubr.bf16.mxu0 %v3841_v32  ;;  %1866 = vmatprep.mubr.bf16.mxu1 %v3843_v33 }
  0xc1   : > { %1610 = vmatmul.mubr.bf16.gmra.mxu0 %v3845_v34  ;;  %1867 = vmatmul.mubr.bf16.gmra.mxu1 %v3846_v35 }
  0xc2   : > { %1617 = vmatprep.mubr.bf16.mxu0 %v3848_v36  ;;  %1874 = vmatprep.mubr.bf16.mxu1 %v3850_v37 }
  0xc9   : > { %1618 = vmatmul.mubr.bf16.gmra.mxu0 %v3852_v38  ;;  %1875 = vmatmul.mubr.bf16.gmra.mxu1 %v3853_v39  ;;  %v3920_v38 = vld [vmem:[%s4174_s17 + $0x410] ss:$20 sps:$4 sm:$0xff]  }
  0xca   : > { %1625 = vmatprep.mubr.bf16.mxu0 %v3854_v40  ;;  %1882 = vmatprep.mubr.bf16.mxu1 %v3856_v41  ;;  %v3921_v41 = vld [vmem:[%s4174_s17 + $0x418] ss:$20 sps:$4 sm:$0xff]  }
  0xd1   : > { %1626 = vmatmul.mubr.bf16.gmra.mxu0 %v3858_v42  ;;  %1883 = vmatmul.mubr.bf16.gmra.mxu1 %v3859_v43  ;;  %v3922_v42 = vld [vmem:[%s4174_s17 + $0x43c] ss:$20 sps:$4 sm:$0xff]  }
  0xd2   : > { %1633 = vmatprep.mubr.bf16.mxu0 %v3860_v44  ;;  %1890 = vmatprep.mubr.bf16.mxu1 %v3862_v45  ;;  %v3924_v44 = vld [vmem:[%s4174_s17 + $0x444] ss:$20 sps:$4 sm:$0xff]  }
  0xd9   : > { %1634 = vmatmul.mubr.bf16.gmra.mxu0 %v3864_v46  ;;  %1891 = vmatmul.mubr.bf16.gmra.mxu1 %v3865_v47 }
  0xda   : > { %1641 = vmatprep.mubr.bf16.mxu0 %v3866_v48  ;;  %1898 = vmatprep.mubr.bf16.mxu1 %v3868_v49 }
  0xe1   : > { %1642 = vmatmul.mubr.bf16.gmra.mxu0 %v3870_v50  ;;  %1899 = vmatmul.mubr.bf16.gmra.mxu1 %v3871_v51 }
  0xe2   : > { %1649 = vmatprep.mubr.bf16.mxu0 %v3873_v52  ;;  %1906 = vmatprep.mubr.bf16.mxu1 %v3875_v53 }
  0xe9   : > { %1650 = vmatmul.mubr.bf16.gmra.mxu0 %v3877_v54  ;;  %1907 = vmatmul.mubr.bf16.gmra.mxu1 %v3878_v55  ;;  %v3926_v54 = vld [vmem:[%s4174_s17 + $0x438] ss:$20 sps:$4 sm:$0xff]  }
  0xea   : > { %1657 = vmatprep.mubr.bf16.mxu0 %v3879_v56  ;;  %1914 = vmatprep.mubr.bf16.mxu1 %v3881_v57  ;;  %v3927_v57 = vld [vmem:[%s4174_s17 + $0x440] ss:$20 sps:$4 sm:$0xff]  }
  0xf1   : > { %1658 = vmatmul.mubr.bf16.gmra.mxu0 %v3883_v58  ;;  %1915 = vmatmul.mubr.bf16.gmra.mxu1 %v3884_v59  ;;  %v3928_v58 = vld [vmem:[%s4174_s17 + $0x10] ss:$20 sps:$4 sm:$0xff]  }
  0xf2   : > { %1665 = vmatprep.mubr.bf16.mxu0 %v3885_v60  ;;  %1922 = vmatprep.mubr.bf16.mxu1 %v3887_v61  ;;  %v3929_v60 = vld [vmem:[%s4174_s17 + $0x240] ss:$20 sps:$4 sm:$0xff]  }
  0xf9   : > { %1666 = vmatmul.mubr.bf16.gmra.mxu0 %v3889_v62  ;;  %1923 = vmatmul.mubr.bf16.gmra.mxu1 %v3890_v63 }
  0xfa   : > { %1673 = vmatprep.mubr.bf16.mxu0 %v3891_v0  ;;  %1930 = vmatprep.mubr.bf16.mxu1 %v3893_v1 }
 0x101   : > { %1674 = vmatmul.mubr.bf16.gmra.mxu0 %v3895_v2  ;;  %1931 = vmatmul.mubr.bf16.gmra.mxu1 %v3896_v3 }
 0x102   : > { %1681 = vmatprep.mubr.bf16.mxu0 %v3897_v4  ;;  %1938 = vmatprep.mubr.bf16.mxu1 %v3899_v5 }
 0x109   : > { %1682 = vmatmul.mubr.bf16.gmra.mxu0 %v3901_v6  ;;  %1939 = vmatmul.mubr.bf16.gmra.mxu1 %v3902_v7  ;;  %v3930_v6 = vld [vmem:[%s4174_s17 + $0x38] ss:$20 sps:$4 sm:$0xff]  }
 0x10a   : > { %1689 = vmatprep.mubr.bf16.mxu0 %v3904_v8  ;;  %1946 = vmatprep.mubr.bf16.mxu1 %v3906_v9  ;;  %v3931_v9 = vld [vmem:[%s4174_s17 + $0x268] ss:$20 sps:$4 sm:$0xff]  }
 0x111   : > { %v1499_v15 = vpop.f32.mrf.mxu0  ;;  %1690 = vmatmul.mubr.bf16.gmra.mxu0 %v3908_v10  ;;  %v1756_v17 = vpop.f32.mrf.mxu1  ;;  %1947 = vmatmul.mubr.bf16.gmra.mxu1 %v3909_v11  ;;  %v3932_v10 = vld [vmem:[%s4174_s17 + $0x60] ss:$20 sps:$4 sm:$0xff]  }
 0x112   : > { %v1500_v16 = vadd.f32 %v4359_v13, %v1499_v15  ;;  %1697 = vmatprep.mubr.bf16.mxu0 %v3910_v12  ;;  %1954 = vmatprep.mubr.bf16.mxu1 %v3912_v14  ;;  %v3933_v12 = vld [vmem:[%s4174_s17 + $0x290] ss:$20 sps:$4 sm:$0xff]  }
 0x113   : > { %v1501_v18 = vpop.f32.mrf.mxu0  ;;  %v1758_v20 = vpop.f32.mrf.mxu1 }
 0x114   : > { %v4363_v19 = vadd.f32 %v1756_v17, %v1500_v16 }
 0x115   : > { %v1502_v21 = vpop.f32.mrf.mxu0  ;;  %v1759_v24 = vpop.f32.mrf.mxu1 }
 0x116   : > { %v1503_v23 = vadd.f32 %v4359_v13, %v1502_v21 }
 0x117   : > { %v1504_v27 = vpop.f32.mrf.mxu0  ;;  %v1761_v30 = vpop.f32.mrf.mxu1 }
 0x118   : > { %v4370_v29 = vadd.f32 %v1759_v24, %v1503_v23  ;;  %v3934_v24 = vld [vmem:[%s4174_s17 + $0x88] ss:$20 sps:$4 sm:$0xff]   ;;  %v3935_v27 = vld [vmem:[%s4174_s17 + $0x2b8] ss:$20 sps:$4 sm:$0xff]  }
 0x119   : > { %v1507_v31 = vpop.f32.mrf.mxu0  ;;  %1698 = vmatmul.mubr.bf16.gmra.mxu0 %v3914_v22  ;;  %v1764_v33 = vpop.f32.mrf.mxu1  ;;  %1955 = vmatmul.mubr.bf16.gmra.mxu1 %v3915_v25 }
 0x11a   : > { %v1508_v32 = vadd.f32 %v4359_v13, %v1507_v31  ;;  %1705 = vmatprep.mubr.bf16.mxu0 %v3916_v26  ;;  %1962 = vmatprep.mubr.bf16.mxu1 %v3918_v28  ;;  %v3936_v28 = vld [vmem:[%s4174_s17 + $0xb0] ss:$20 sps:$4 sm:$0xff]   ;;  %v3937_v31 = vld [vmem:[%s4174_s17 + $0x2e0] ss:$20 sps:$4 sm:$0xff]  }
 0x11b   : > { %v1509_v34 = vpop.f32.mrf.mxu0  ;;  %v1766_v36 = vpop.f32.mrf.mxu1 }
 0x11c   : > { %v4373_v35 = vadd.f32 %v1764_v33, %v1508_v32 }
 0x11d   : > { %v1510_v37 = vpop.f32.mrf.mxu0  ;;  %v1767_v40 = vpop.f32.mrf.mxu1 }
 0x11e   : > { %v1511_v39 = vadd.f32 %v4359_v13, %v1510_v37 }
 0x11f   : > { %v1512_v43 = vpop.f32.mrf.mxu0  ;;  %v1769_v46 = vpop.f32.mrf.mxu1 }
 0x120   : > { %v4380_v45 = vadd.f32 %v1767_v40, %v1511_v39  ;;  %v3939_v46 = vld [vmem:[%s4174_s17 + $0x308] ss:$20 sps:$4 sm:$0xff]  }
 0x121   : > { %v1515_v47 = vpop.f32.mrf.mxu0  ;;  %1706 = vmatmul.mubr.bf16.gmra.mxu0 %v3920_v38  ;;  %v1772_v49 = vpop.f32.mrf.mxu1  ;;  %1963 = vmatmul.mubr.bf16.gmra.mxu1 %v3921_v41 }
 0x122   : > { %v1516_v48 = vadd.f32 %v4359_v13, %v1515_v47  ;;  %1713 = vmatprep.mubr.bf16.mxu0 %v3922_v42  ;;  %1970 = vmatprep.mubr.bf16.mxu1 %v3924_v44  ;;  %v3938_v42 = vld [vmem:[%s4174_s17 + $0xd8] ss:$20 sps:$4 sm:$0xff]   ;;  %v3940_v47 = vld [vmem:[%s4174_s17 + $0x100] ss:$20 sps:$4 sm:$0xff]  }
 0x123   : > { %v1517_v50 = vpop.f32.mrf.mxu0  ;;  %v1774_v52 = vpop.f32.mrf.mxu1 }
 0x124   : > { %v4383_v51 = vadd.f32 %v1772_v49, %v1516_v48  ;;  %v3941_v49 = vld [vmem:[%s4174_s17 + $0x330] ss:$20 sps:$4 sm:$0xff]  }
 0x125   : > { %v1518_v53 = vpop.f32.mrf.mxu0  ;;  %v1775_v56 = vpop.f32.mrf.mxu1 }
 0x126   : > { %v1519_v55 = vadd.f32 %v4359_v13, %v1518_v53 }
 0x127   : > { %v1520_v59 = vpop.f32.mrf.mxu0  ;;  %v1777_v62 = vpop.f32.mrf.mxu1 }
 0x128   : > { %v4390_v61 = vadd.f32 %v1775_v56, %v1519_v55 }
 0x129   : > { %v1523_v63 = vpop.f32.mrf.mxu0  ;;  %1714 = vmatmul.mubr.bf16.gmra.mxu0 %v3926_v54  ;;  %v1780_v1 = vpop.f32.mrf.mxu1  ;;  %1971 = vmatmul.mubr.bf16.gmra.mxu1 %v3927_v57 }
 0x12a   : > { %v1524_v0 = vadd.f32 %v4359_v13, %v1523_v63  ;;  %3560 = vmatprep.mubr.msk.bf16.mxu0 %vm1376_vm1, %v3928_v58  ;;  %3588 = vmatprep.mubr.msk.bf16.mxu1 %vm1376_vm1, %v3929_v60  ;;  %v3942_v60 = vld [vmem:[%s4174_s17 + $0x128] ss:$20 sps:$4 sm:$0xff]  }
 0x12b   : > { %v1525_v2 = vpop.f32.mrf.mxu0  ;;  %v1782_v4 = vpop.f32.mrf.mxu1 }
 0x12c   : > { %v4395_v3 = vadd.f32 %v1780_v1, %v1524_v0  ;;  %v3943_v0 = vld [vmem:[%s4174_s17 + $0x358] ss:$20 sps:$4 sm:$0xff]   ;;  %v3944_v1 = vld [vmem:[%s4174_s17 + $0x150] ss:$20 sps:$4 sm:$0xff]   ;;  %v3945_v4 = vld [vmem:[%s4174_s17 + $0x380] ss:$20 sps:$4 sm:$0xff]  }
 0x12d   : > { %v1526_v5 = vpop.f32.mrf.mxu0  ;;  %v1783_v8 = vpop.f32.mrf.mxu1 }
 0x12e   : > { %v1527_v7 = vadd.f32 %v4359_v13, %v1526_v5 }
 0x12f   : > { %v1528_v11 = vpop.f32.mrf.mxu0  ;;  %v1785_v15 = vpop.f32.mrf.mxu1 }
 0x130   : > { %v4402_v14 = vadd.f32 %v1783_v8, %v1527_v7 }
 0x131   : > { %v1531_v16 = vpop.f32.mrf.mxu0  ;;  %3561 = vmatmul.mubr.msk.bf16.vlgmr.msra.gmra.mxu0 %vm1376_vm1, %v3930_v6  ;;  %v1788_v18 = vpop.f32.mrf.mxu1  ;;  %3589 = vmatmul.mubr.msk.bf16.vlgmr.msra.gmra.mxu1 %vm1376_vm1, %v3931_v9 }
 0x132   : > { %v1532_v17 = vadd.f32 %v4359_v13, %v1531_v16  ;;  %3564 = vmatprep.mubr.msk.bf16.mxu0 %vm1376_vm1, %v3932_v10  ;;  %3592 = vmatprep.mubr.msk.bf16.mxu1 %vm1376_vm1, %v3933_v12  ;;  %v3946_v16 = vld [vmem:[%s4174_s17 + $0x178] ss:$20 sps:$4 sm:$0xff]  }
 0x133   : > { %v1533_v20 = vpop.f32.mrf.mxu0  ;;  %v1790_v22 = vpop.f32.mrf.mxu1 }
 0x134   : > { %v4409_v21 = vadd.f32 %v1788_v18, %v1532_v17  ;;  %v3947_v20 = vld [vmem:[%s4174_s17 + $0x3a8] ss:$20 sps:$4 sm:$0xff]   ;;  %v3948_v22 = vld [vmem:[%s4174_s17 + $0x1a0] ss:$20 sps:$4 sm:$0xff]  }
 0x135   : > { %v1534_v23 = vpop.f32.mrf.mxu0  ;;  %v1791_v26 = vpop.f32.mrf.mxu1 }
 0x136   : > { %v1535_v25 = vadd.f32 %v4359_v13, %v1534_v23 }
 0x137   : > { %v1536_v30 = vpop.f32.mrf.mxu0  ;;  %v1793_v33 = vpop.f32.mrf.mxu1 }
 0x138   : > { %v4416_v32 = vadd.f32 %v1791_v26, %v1535_v25 }
 0x139   : > { %v1539_v34 = vpop.f32.mrf.mxu0  ;;  %3565 = vmatmul.mubr.msk.bf16.gmra.mxu0 %vm1376_vm1, %v3934_v24  ;;  %v1796_v37 = vpop.f32.mrf.mxu1  ;;  %3593 = vmatmul.mubr.msk.bf16.gmra.mxu1 %vm1376_vm1, %v3935_v27  ;;  %v3949_v24 = vld [vmem:[%s4174_s17 + $0x3d0] ss:$20 sps:$4 sm:$0xff]  }
 0x13a   : > { %v1540_v36 = vadd.f32 %v4359_v13, %v1539_v34  ;;  %3568 = vmatprep.mubr.msk.bf16.mxu0 %vm1376_vm1, %v3936_v28  ;;  %3596 = vmatprep.mubr.msk.bf16.mxu1 %vm1376_vm1, %v3937_v31 }
 0x13b   : > { %v1541_v38 = vpop.f32.mrf.mxu0  ;;  %v1798_v40 = vpop.f32.mrf.mxu1 }
 0x13c   : > { %v4423_v39 = vadd.f32 %v1796_v37, %v1540_v36  ;;  %v3950_v37 = vld [vmem:[%s4174_s17 + $0x1c8] ss:$20 sps:$4 sm:$0xff]  }
 0x13d   : > { %v1542_v41 = vpop.f32.mrf.mxu0  ;;  %v1799_v44 = vpop.f32.mrf.mxu1 }
 0x13e   : > { %v1543_v43 = vadd.f32 %v4359_v13, %v1542_v41  ;;  %v3951_v41 = vld [vmem:[%s4174_s17 + $0x3f8] ss:$20 sps:$4 sm:$0xff]  }
 0x13f   : > { %v1544_v48 = vpop.f32.mrf.mxu0  ;;  %v1801_v52 = vpop.f32.mrf.mxu1 }
 0x140   : > { %v4430_v50 = vadd.f32 %v1799_v44, %v1543_v43  ;;  %v3953_v44 = vld [vmem:[%s4174_s17 + $0x420] ss:$20 sps:$4 sm:$0xff]  }
 0x141   : > { %v1547_v53 = vpop.f32.mrf.mxu0  ;;  %3569 = vmatmul.mubr.msk.bf16.gmra.mxu0 %vm1376_vm1, %v3938_v42  ;;  %v1804_v55 = vpop.f32.mrf.mxu1  ;;  %3597 = vmatmul.mubr.msk.bf16.gmra.mxu1 %vm1376_vm1, %v3939_v46  ;;  %v3952_v42 = vld [vmem:[%s4174_s17 + $0x1f0] ss:$20 sps:$4 sm:$0xff]  }
 0x142   : > { %v1548_v54 = vadd.f32 %v4359_v13, %v1547_v53  ;;  %3572 = vmatprep.mubr.msk.bf16.mxu0 %vm1376_vm1, %v3940_v47  ;;  %3600 = vmatprep.mubr.msk.bf16.mxu1 %vm1376_vm1, %v3941_v49 }
 0x143   : > { %v1549_v56 = vpop.f32.mrf.mxu0  ;;  %v1806_v58 = vpop.f32.mrf.mxu1 }
 0x144   : > { %v4437_v57 = vadd.f32 %v1804_v55, %v1548_v54  ;;  %v3954_v58 = vld [vmem:[%s4174_s17 + $0x218] ss:$20 sps:$4 sm:$0xff]  }
 0x145   : > { %v1550_v59 = vpop.f32.mrf.mxu0  ;;  %v1807_v63 = vpop.f32.mrf.mxu1 }
 0x146   : > { %v1551_v62 = vadd.f32 %v4359_v13, %v1550_v59 }
 0x147   : > { %v1552_v2 = vpop.f32.mrf.mxu0  ;;  %v1809_v6 = vpop.f32.mrf.mxu1 }
 0x148   : > { %v4444_v5 = vadd.f32 %v1807_v63, %v1551_v62  ;;  %v3955_v62 = vld [vmem:[%s4174_s17 + $0x448] ss:$20 sps:$4 sm:$0xff]   ;;  %s175_s17 = sand.u32 1, %s4007_s12  }
 0x149   : > { %v1555_v7 = vpop.f32.mrf.mxu0  ;;  %3573 = vmatmul.mubr.msk.bf16.gmra.mxu0 %vm1376_vm1, %v3942_v60  ;;  %v1812_v9 = vpop.f32.mrf.mxu1  ;;  %3601 = vmatmul.mubr.msk.bf16.gmra.mxu1 %vm1376_vm1, %v3943_v0  ;;  %s3630_s26 = smul.u32 224, %s175_s17 }
 0x14a   : > { %v1556_v8 = vadd.f32 %v4359_v13, %v1555_v7  ;;  %3576 = vmatprep.mubr.msk.bf16.mxu0 %vm1376_vm1, %v3944_v1  ;;  %3604 = vmatprep.mubr.msk.bf16.mxu1 %vm1376_vm1, %v3945_v4 }
 0x14b   : > { %v1557_v10 = vpop.f32.mrf.mxu0  ;;  %v1814_v12 = vpop.f32.mrf.mxu1  ;;  %s4609_s12 = scalar_lea.vmem [#allocation2], %s3630_s26  }
 0x14c   : > { %v4451_v11 = vadd.f32 %v1812_v9, %v1556_v8 }
 0x14d   : > { %v1558_v15 = vpop.f32.mrf.mxu0  ;;  %v1815_v18 = vpop.f32.mrf.mxu1 }
 0x14e   : > { %v1559_v17 = vadd.f32 %v4359_v13, %v1558_v15 }
 0x14f   : > { %v1560_v23 = vpop.f32.mrf.mxu0  ;;  %v1817_v26 = vpop.f32.mrf.mxu1 }
 0x150   : > { %v4458_v25 = vadd.f32 %v1815_v18, %v1559_v17 }
 0x151   : > { %v1563_v27 = vpop.f32.mrf.mxu0  ;;  %3577 = vmatmul.mubr.msk.bf16.gmra.mxu0 %vm1376_vm1, %v3946_v16  ;;  %v1820_v30 = vpop.f32.mrf.mxu1  ;;  %3605 = vmatmul.mubr.msk.bf16.gmra.mxu1 %vm1376_vm1, %v3947_v20 }
 0x152   : > { %v1564_v28 = vadd.f32 %v4359_v13, %v1563_v27  ;;  %3580 = vmatprep.mubr.msk.bf16.mxu0 %vm1376_vm1, %v3948_v22  ;;  %3608 = vmatprep.mubr.msk.bf16.mxu1 %vm1376_vm1, %v3949_v24 }
 0x153   : > { %v1565_v31 = vpop.f32.mrf.mxu0  ;;  %v1822_v34 = vpop.f32.mrf.mxu1 }
 0x154   : > { %v4465_v33 = vadd.f32 %v1820_v30, %v1564_v28 }
 0x155   : > { %v1566_v36 = vpop.f32.mrf.mxu0  ;;  %v1823_v40 = vpop.f32.mrf.mxu1 }
 0x156   : > { %v1567_v38 = vadd.f32 %v4359_v13, %v1566_v36 }
 0x157   : > { %v1568_v43 = vpop.f32.mrf.mxu0  ;;  %v1825_v47 = vpop.f32.mrf.mxu1 }
 0x158   : > { %v4472_v46 = vadd.f32 %v1823_v40, %v1567_v38 }
 0x159   : > { %v1571_v48 = vpop.f32.mrf.mxu0  ;;  %3581 = vmatmul.mubr.msk.bf16.gmra.mxu0 %vm1376_vm1, %v3950_v37  ;;  %v1828_v52 = vpop.f32.mrf.mxu1  ;;  %3609 = vmatmul.mubr.msk.bf16.gmra.mxu1 %vm1376_vm1, %v3951_v41 }
 0x15a   : > { %v1572_v49 = vadd.f32 %v4359_v13, %v1571_v48  ;;  %3584 = vmatprep.mubr.msk.bf16.mxu0 %vm1376_vm1, %v3952_v42  ;;  %3612 = vmatprep.mubr.msk.bf16.mxu1 %vm1376_vm1, %v3953_v44 }
 0x15b   : > { %v1573_v53 = vpop.f32.mrf.mxu0  ;;  %v1830_v55 = vpop.f32.mrf.mxu1 }
 0x15c   : > { %v4479_v54 = vadd.f32 %v1828_v52, %v1572_v49 }
 0x15d   : > { %v1574_v56 = vpop.f32.mrf.mxu0  ;;  %v1831_v60 = vpop.f32.mrf.mxu1 }
 0x15e   : > { %v1575_v59 = vadd.f32 %v4359_v13, %v1574_v56 }
 0x15f   : > { %v1576_v63 = vpop.f32.mrf.mxu0  ;;  %v1833_v1 = vpop.f32.mrf.mxu1 }
 0x160   : > { %v4484_v0 = vadd.f32 %v1831_v60, %v1575_v59 }
 0x161   : > { %v1579_v2 = vpop.f32.mrf.mxu0  ;;  %3585 = vmatmul.mubr.msk.bf16.gmra.mxu0 %vm1376_vm1, %v3954_v58  ;;  %v1836_v6 = vpop.f32.mrf.mxu1  ;;  %3613 = vmatmul.mubr.msk.bf16.gmra.mxu1 %vm1376_vm1, %v3955_v62 }
 0x162   : > { %v1580_v4 = vadd.f32 %v4359_v13, %v1579_v2 }
 0x163   : > { %v1581_v7 = vpop.f32.mrf.mxu0  ;;  %v1838_v9 = vpop.f32.mrf.mxu1 }
 0x164   : > { %v4489_v8 = vadd.f32 %v1836_v6, %v1580_v4 }
 0x165   : > { %v1582_v10 = vpop.f32.mrf.mxu0  ;;  %v1839_v15 = vpop.f32.mrf.mxu1 }
 0x166   : > { %v1583_v12 = vadd.f32 %v4359_v13, %v1582_v10 }
 0x167   : > { %v1584_v16 = vpop.f32.mrf.mxu0  ;;  %v1841_v18 = vpop.f32.mrf.mxu1 }
 0x168   : > { %v4492_v17 = vadd.f32 %v1839_v15, %v1583_v12 }
 0x169   : > { %v1587_v20 = vpop.f32.mrf.mxu0  ;;  %v1844_v23 = vpop.f32.mrf.mxu1 }
 0x16a   : > { %4877 = vst [vmem:[#allocation3_spill] sm:$0xff] %v4492_v17  ;;  %v1588_v22 = vadd.f32 %v4359_v13, %v1587_v20 }
 0x16b   : > { %v1589_v24 = vpop.f32.mrf.mxu0  ;;  %v1846_v27 = vpop.f32.mrf.mxu1 }
 0x16c   : > { %v4495_v26 = vadd.f32 %v1844_v23, %v1588_v22 }
 0x16d   : > { %v1590_v28 = vpop.f32.mrf.mxu0  ;;  %v1847_v31 = vpop.f32.mrf.mxu1 }
 0x16e   : > { %v1591_v30 = vadd.f32 %v4359_v13, %v1590_v28 }
 0x16f   : > { %v1592_v34 = vpop.f32.mrf.mxu0  ;;  %v1849_v37 = vpop.f32.mrf.mxu1 }
 0x170   : > { %v4498_v36 = vadd.f32 %v1847_v31, %v1591_v30 }
 0x171   : > { %v1595_v38 = vpop.f32.mrf.mxu0  ;;  %v1852_v41 = vpop.f32.mrf.mxu1 }
 0x172   : > { %4878 = vst [vmem:[#allocation4_spill] sm:$0xff] %v4498_v36  ;;  %v1596_v40 = vadd.f32 %v4359_v13, %v1595_v38 }
 0x173   : > { %v1597_v42 = vpop.f32.mrf.mxu0  ;;  %v1854_v44 = vpop.f32.mrf.mxu1 }
 0x174   : > { %v4501_v43 = vadd.f32 %v1852_v41, %v1596_v40 }
 0x175   : > { %v1598_v47 = vpop.f32.mrf.mxu0  ;;  %v1855_v49 = vpop.f32.mrf.mxu1 }
 0x176   : > { %4879 = vst [vmem:[#allocation5_spill] sm:$0xff] %v4501_v43  ;;  %v1599_v48 = vadd.f32 %v4359_v13, %v1598_v47 }
 0x177   : > { %v1600_v52 = vpop.f32.mrf.mxu0  ;;  %v1857_v55 = vpop.f32.mrf.mxu1 }
 0x178   : > { %v4504_v53 = vadd.f32 %v1855_v49, %v1599_v48 }
 0x179   : > { %v1603_v56 = vpop.f32.mrf.mxu0  ;;  %v1860_v59 = vpop.f32.mrf.mxu1 }
 0x17a   : > { %4880 = vst [vmem:[#allocation6_spill] sm:$0xff] %v4504_v53  ;;  %v1604_v58 = vadd.f32 %v4359_v13, %v1603_v56 }
 0x17b   : > { %v1605_v60 = vpop.f32.mrf.mxu0  ;;  %v1862_v63 = vpop.f32.mrf.mxu1 }
 0x17c   : > { %v4507_v62 = vadd.f32 %v1860_v59, %v1604_v58 }
 0x17d   : > { %v1606_v1 = vpop.f32.mrf.mxu0  ;;  %v1863_v4 = vpop.f32.mrf.mxu1 }
 0x17e   : > { %4881 = vst [vmem:[#allocation7_spill] sm:$0xff] %v4507_v62  ;;  %v1607_v2 = vadd.f32 %v4359_v13, %v1606_v1 }
 0x17f   : > { %v1608_v6 = vpop.f32.mrf.mxu0  ;;  %v1865_v9 = vpop.f32.mrf.mxu1 }
 0x180   : > { %v4510_v7 = vadd.f32 %v1863_v4, %v1607_v2 }
 0x181   : > { %v1611_v10 = vpop.f32.mrf.mxu0  ;;  %v1868_v15 = vpop.f32.mrf.mxu1 }
 0x182   : > { %4882 = vst [vmem:[#allocation8_spill] sm:$0xff] %v4510_v7  ;;  %v1612_v12 = vadd.f32 %v4359_v13, %v1611_v10 }
 0x183   : > { %v1613_v16 = vpop.f32.mrf.mxu0  ;;  %v1870_v20 = vpop.f32.mrf.mxu1 }
 0x184   : > { %v4513_v18 = vadd.f32 %v1868_v15, %v1612_v12 }
 0x185   : > { %v1614_v22 = vpop.f32.mrf.mxu0  ;;  %v1871_v24 = vpop.f32.mrf.mxu1 }
 0x186   : > { %v1615_v23 = vadd.f32 %v4359_v13, %v1614_v22 }
 0x187   : > { %v1616_v27 = vpop.f32.mrf.mxu0  ;;  %v1873_v30 = vpop.f32.mrf.mxu1 }
 0x188   : > { %v4516_v28 = vadd.f32 %v1871_v24, %v1615_v23 }
 0x189   : > { %v1619_v31 = vpop.f32.mrf.mxu0  ;;  %v1876_v37 = vpop.f32.mrf.mxu1 }
 0x18a   : > { %v1620_v34 = vadd.f32 %v4359_v13, %v1619_v31 }
 0x18b   : > { %v1621_v38 = vpop.f32.mrf.mxu0  ;;  %v1878_v41 = vpop.f32.mrf.mxu1 }
 0x18c   : > { %v4519_v40 = vadd.f32 %v1876_v37, %v1620_v34 }
 0x18d   : > { %v1622_v42 = vpop.f32.mrf.mxu0  ;;  %v1879_v47 = vpop.f32.mrf.mxu1 }
 0x18e   : > { %v1623_v44 = vadd.f32 %v4359_v13, %v1622_v42 }
 0x18f   : > { %v1624_v48 = vpop.f32.mrf.mxu0  ;;  %v1881_v52 = vpop.f32.mrf.mxu1 }
 0x190   : > { %v4522_v49 = vadd.f32 %v1879_v47, %v1623_v44 }
 0x191   : > { %v1627_v55 = vpop.f32.mrf.mxu0  ;;  %v1884_v58 = vpop.f32.mrf.mxu1 }
 0x192   : > { %v1628_v56 = vadd.f32 %v4359_v13, %v1627_v55 }
 0x193   : > { %v1629_v59 = vpop.f32.mrf.mxu0  ;;  %v1886_v63 = vpop.f32.mrf.mxu1 }
 0x194   : > { %v4525_v60 = vadd.f32 %v1884_v58, %v1628_v56 }
 0x195   : > { %v1630_v1 = vpop.f32.mrf.mxu0  ;;  %v1887_v4 = vpop.f32.mrf.mxu1 }
 0x196   : > { %v1631_v2 = vadd.f32 %v4359_v13, %v1630_v1 }
 0x197   : > { %v1632_v6 = vpop.f32.mrf.mxu0  ;;  %v1889_v10 = vpop.f32.mrf.mxu1 }
 0x198   : > { %v4528_v9 = vadd.f32 %v1887_v4, %v1631_v2 }
 0x199   : > { %v1635_v12 = vpop.f32.mrf.mxu0  ;;  %v1892_v16 = vpop.f32.mrf.mxu1 }
 0x19a   : > { %v1636_v15 = vadd.f32 %v4359_v13, %v1635_v12 }
 0x19b   : > { %v1637_v20 = vpop.f32.mrf.mxu0  ;;  %v1894_v23 = vpop.f32.mrf.mxu1 }
 0x19c   : > { %v4531_v22 = vadd.f32 %v1892_v16, %v1636_v15 }
 0x19d   : > { %v1638_v24 = vpop.f32.mrf.mxu0  ;;  %v1895_v30 = vpop.f32.mrf.mxu1 }
 0x19e   : > { %v1639_v27 = vadd.f32 %v4359_v13, %v1638_v24 }
 0x19f   : > { %v1640_v31 = vpop.f32.mrf.mxu0  ;;  %v1897_v37 = vpop.f32.mrf.mxu1 }
 0x1a0   : > { %v4534_v34 = vadd.f32 %v1895_v30, %v1639_v27 }
 0x1a1   : > { %v1643_v38 = vpop.f32.mrf.mxu0  ;;  %v1900_v42 = vpop.f32.mrf.mxu1 }
 0x1a2   : > { %v1644_v41 = vadd.f32 %v4359_v13, %v1643_v38 }
 0x1a3   : > { %v1645_v44 = vpop.f32.mrf.mxu0  ;;  %v1902_v48 = vpop.f32.mrf.mxu1 }
 0x1a4   : > { %v4537_v47 = vadd.f32 %v1900_v42, %v1644_v41 }
 0x1a5   : > { %v1646_v52 = vpop.f32.mrf.mxu0  ;;  %v1903_v56 = vpop.f32.mrf.mxu1 }
 0x1a6   : > { %v1647_v55 = vadd.f32 %v4359_v13, %v1646_v52 }
 0x1a7   : > { %v1648_v58 = vpop.f32.mrf.mxu0  ;;  %v1905_v63 = vpop.f32.mrf.mxu1 }
 0x1a8   : > { %v4540_v59 = vadd.f32 %v1903_v56, %v1647_v55 }
 0x1a9   : > { %v1651_v1 = vpop.f32.mrf.mxu0  ;;  %v1908_v4 = vpop.f32.mrf.mxu1 }
 0x1aa   : > { %v1652_v2 = vadd.f32 %v4359_v13, %v1651_v1 }
 0x1ab   : > { %v1653_v6 = vpop.f32.mrf.mxu0  ;;  %v1910_v12 = vpop.f32.mrf.mxu1 }
 0x1ac   : > { %v4543_v10 = vadd.f32 %v1908_v4, %v1652_v2 }
 0x1ad   : > { %v1654_v15 = vpop.f32.mrf.mxu0  ;;  %v1911_v20 = vpop.f32.mrf.mxu1 }
 0x1ae   : > { %v1655_v16 = vadd.f32 %v4359_v13, %v1654_v15 }
 0x1af   : > { %v1656_v23 = vpop.f32.mrf.mxu0  ;;  %v1913_v27 = vpop.f32.mrf.mxu1 }
 0x1b0   : > { %v4546_v24 = vadd.f32 %v1911_v20, %v1655_v16 }
 0x1b1   : > { %v1659_v30 = vpop.f32.mrf.mxu0  ;;  %v1916_v37 = vpop.f32.mrf.mxu1 }
 0x1b2   : > { %v1660_v31 = vadd.f32 %v4359_v13, %v1659_v30 }
 0x1b3   : > { %v1661_v38 = vpop.f32.mrf.mxu0  ;;  %v1918_v42 = vpop.f32.mrf.mxu1 }
 0x1b4   : > { %v4549_v41 = vadd.f32 %v1916_v37, %v1660_v31 }
 0x1b5   : > { %v1662_v44 = vpop.f32.mrf.mxu0  ;;  %v1919_v52 = vpop.f32.mrf.mxu1 }
 0x1b6   : > { %v1663_v48 = vadd.f32 %v4359_v13, %v1662_v44 }
 0x1b7   : > { %v1664_v55 = vpop.f32.mrf.mxu0  ;;  %v1921_v58 = vpop.f32.mrf.mxu1 }
 0x1b8   : > { %v4552_v56 = vadd.f32 %v1919_v52, %v1663_v48 }
 0x1b9   : > { %v1667_v63 = vpop.f32.mrf.mxu0  ;;  %v1924_v2 = vpop.f32.mrf.mxu1 }
 0x1ba   : > { %v1668_v1 = vadd.f32 %v4359_v13, %v1667_v63 }
 0x1bb   : > { %v1669_v4 = vpop.f32.mrf.mxu0  ;;  %v1926_v12 = vpop.f32.mrf.mxu1 }
 0x1bc   : > { %v4555_v6 = vadd.f32 %v1924_v2, %v1668_v1 }
 0x1bd   : > { %v1670_v15 = vpop.f32.mrf.mxu0  ;;  %v1927_v20 = vpop.f32.mrf.mxu1 }
 0x1be   : > { %v1671_v16 = vadd.f32 %v4359_v13, %v1670_v15 }
 0x1bf   : > { %v1672_v23 = vpop.f32.mrf.mxu0  ;;  %v1929_v30 = vpop.f32.mrf.mxu1 }
 0x1c0   : > { %v4558_v27 = vadd.f32 %v1927_v20, %v1671_v16 }
 0x1c1   : > { %v1675_v31 = vpop.f32.mrf.mxu0  ;;  %v1932_v38 = vpop.f32.mrf.mxu1 }
 0x1c2   : > { %v1676_v37 = vadd.f32 %v4359_v13, %v1675_v31 }
 0x1c3   : > { %v1677_v42 = vpop.f32.mrf.mxu0  ;;  %v1934_v48 = vpop.f32.mrf.mxu1 }
 0x1c4   : > { %v4561_v44 = vadd.f32 %v1932_v38, %v1676_v37 }
 0x1c5   : > { %v1678_v52 = vpop.f32.mrf.mxu0  ;;  %v1935_v58 = vpop.f32.mrf.mxu1 }
 0x1c6   : > { %v1679_v55 = vadd.f32 %v4359_v13, %v1678_v52 }
 0x1c7   : > { %v1680_v63 = vpop.f32.mrf.mxu0  ;;  %v1937_v2 = vpop.f32.mrf.mxu1 }
 0x1c8   : > { %v4564_v1 = vadd.f32 %v1935_v58, %v1679_v55 }
 0x1c9   : > { %v1683_v4 = vpop.f32.mrf.mxu0  ;;  %v1940_v15 = vpop.f32.mrf.mxu1 }
 0x1ca   : > { %v1684_v12 = vadd.f32 %v4359_v13, %v1683_v4 }
 0x1cb   : > { %v1685_v16 = vpop.f32.mrf.mxu0  ;;  %v1942_v23 = vpop.f32.mrf.mxu1 }
 0x1cc   : > { %v4567_v20 = vadd.f32 %v1940_v15, %v1684_v12 }
 0x1cd   : > { %v1686_v30 = vpop.f32.mrf.mxu0  ;;  %v1943_v37 = vpop.f32.mrf.mxu1 }
 0x1ce   : > { %v1687_v31 = vadd.f32 %v4359_v13, %v1686_v30 }
 0x1cf   : > { %v1688_v38 = vpop.f32.mrf.mxu0  ;;  %v1945_v48 = vpop.f32.mrf.mxu1 }
 0x1d0   : > { %v4570_v42 = vadd.f32 %v1943_v37, %v1687_v31 }
 0x1d1   : > { %v1691_v52 = vpop.f32.mrf.mxu0  ;;  %v1948_v58 = vpop.f32.mrf.mxu1 }
 0x1d2   : > { %v1692_v55 = vadd.f32 %v4359_v13, %v1691_v52 }
 0x1d3   : > { %v1693_v63 = vpop.f32.mrf.mxu0  ;;  %v1950_v4 = vpop.f32.mrf.mxu1 }
 0x1d4   : > { %v4573_v2 = vadd.f32 %v1948_v58, %v1692_v55 }
 0x1d5   : > { %v1694_v16 = vpop.f32.mrf.mxu0  ;;  %v1951_v15 = vpop.f32.mrf.mxu1 }
 0x1d6   : > { %4883 = vst [vmem:[#allocation9_spill] sm:$0xff] %v4573_v2  ;;  %v1695_v12 = vadd.f32 %v4359_v13, %v1694_v16 }
 0x1d7   : > { %v1696_v23 = vpop.f32.mrf.mxu0  ;;  %v1953_v30 = vpop.f32.mrf.mxu1 }
 0x1d8   : > { %v4576_v53 = vadd.f32 %v1951_v15, %v1695_v12 }
 0x1d9   : > { %v1699_v38 = vpop.f32.mrf.mxu0  ;;  %v1956_v37 = vpop.f32.mrf.mxu1 }
 0x1da   : > { %4884 = vst [vmem:[#allocation10_spill] sm:$0xff] %v4576_v53  ;;  %v1700_v31 = vadd.f32 %v4359_v13, %v1699_v38 }
 0x1db   : > { %v1701_v48 = vpop.f32.mrf.mxu0  ;;  %v1958_v52 = vpop.f32.mrf.mxu1 }
 0x1dc   : > { %v4579_v7 = vadd.f32 %v1956_v37, %v1700_v31 }
 0x1dd   : > { %v4581_v63 = vpop.f32.mrf.mxu0  ;;  %v4583_v55 = vpop.f32.mrf.mxu1 }
 0x1df   : > { %v1704_v58 = vpop.f32.mrf.mxu0  ;;  %v1961_v4 = vpop.f32.mrf.mxu1 }
 0x1e1   : > { %v1707_v16 = vpop.f32.mrf.mxu0  ;;  %v1964_v12 = vpop.f32.mrf.mxu1 }
 0x1e2   : > { %v1708_v23 = vadd.f32 %v4359_v13, %v1707_v16 }
 0x1e3   : > { %v1709_v15 = vpop.f32.mrf.mxu0  ;;  %v1966_v38 = vpop.f32.mrf.mxu1 }
 0x1e4   : > { %v4586_v30 = vadd.f32 %v1964_v12, %v1708_v23 }
 0x1e5   : > { %v4588_v43 = vpop.f32.mrf.mxu0  ;;  %v4590_v31 = vpop.f32.mrf.mxu1 }
 0x1e6   : > { %4885 = vst [vmem:[#allocation11_spill] sm:$0xff] %v4586_v30  ;;  %4886 = vst [vmem:[#allocation12_spill] sm:$0xff] %v4588_v43 }
 0x1e7   : > { %4887 = vst [vmem:[#allocation13_spill] sm:$0xff] %v4590_v31  ;;  %v1712_v37 = vpop.f32.mrf.mxu0  ;;  %v1969_v48 = vpop.f32.mrf.mxu1 }
 0x1e9   : > { %v4592_v52 = vpop.f32.mrf.mxu0  ;;  %v4594_v62 = vpop.f32.mrf.mxu1 }
 0x1ea   : > { %4888 = vst [vmem:[#allocation14_spill] sm:$0xff] %v4592_v52  ;;  %4889 = vst [vmem:[#allocation15_spill] sm:$0xff] %v4594_v62 }
 0x1eb   : > { %v1717_v58 = vpop.f32.mrf.mxu0  ;;  %v1974_v4 = vpop.f32.mrf.mxu1 }
 0x1ed   : > { %v4596_v53 = vpop.f32.mrf.mxu0  ;;  %v4598_v13 = vpop.f32.mrf.mxu1 }
 0x1ee   : > { %4890 = vst [vmem:[#allocation16_spill] sm:$0xff] %v4596_v53  ;;  %4891 = vst [vmem:[#allocation17_spill] sm:$0xff] %v4598_v13 }
 0x1ef   : > { %v1720_v16 = vpop.f32.mrf.mxu0  ;;  %v1977_v23 = vpop.f32.mrf.mxu1 }
 0x1f1   : > { %v3562_v12 = vpop.f32.mrf.mxu0  ;;  %v3590_v15 = vpop.f32.mrf.mxu1 }
 0x1f2   : > { %v2022_v30 = vadd.f32 %v3562_v12, %v4373_v35  ;;  %v2134_v48 = vadd.f32 %v3590_v15, %v4519_v40 }
 0x1f3   : > { %v2013_v38 = vpop.f32.mrf.mxu0  ;;  %v2125_v37 = vpop.f32.mrf.mxu1 }
 0x1f4   : > { %v2014_v58 = vadd.f32 %v2013_v38, %v4363_v19  ;;  %v2126_v13 = vadd.f32 %v2125_v37, %v4513_v18  ;;  %v2238_v43 = vmax.f32 %v2022_v30, 0.0  ;;  %v2266_v12 = vmax.f32 %v2134_v48, 0.0 }
 0x1f5   : > { %v3563_v31 = vpop.f32.mrf.mxu0  ;;  %v3591_v62 = vpop.f32.mrf.mxu1 }
 0x1f6   : > { %v2025_v4 = vadd.f32 %v3563_v31, %v4380_v45  ;;  %v2137_v16 = vadd.f32 %v3591_v62, %v4522_v49  ;;  %v2236_v52 = vmax.f32 %v2014_v58, 0.0  ;;  %v2264_v31 = vmax.f32 %v2126_v13, 0.0 }
 0x1f7   : > { %v2016_v23 = vpop.f32.mrf.mxu0  ;;  %v2128_v35 = vpop.f32.mrf.mxu1 }
 0x1f8   : > { %v2239_v53 = vmax.f32 %v2025_v4, 0.0  ;;  %v2017_v17 = vadd.f32 %v2016_v23, %v4370_v29  ;;  %v2267_v2 = vmax.f32 %v2137_v16, 0.0  ;;  %v2129_v40 = vadd.f32 %v2128_v35, %v4516_v28 }
 0x1f9   : > { %v3566_v15 = vpop.f32.mrf.mxu0  ;;  %v3594_v45 = vpop.f32.mrf.mxu1 }
 0x1fa   : > { %v3355_v19 = vpack.c.bf16 %v2239_v53, %v2238_v43  ;;  %v2237_v38 = vmax.f32 %v2017_v17, 0.0  ;;  %v3425_v36 = vpack.c.bf16 %v2267_v2, %v2266_v12  ;;  %v2265_v18 = vmax.f32 %v2129_v40, 0.0 }
 0x1fb   : > { %v2029_v37 = vpop.f32.mrf.mxu0  ;;  %v2038_v62 = vadd.f32 %v3566_v15, %v4395_v3  ;;  %v2141_v28 = vpop.f32.mrf.mxu1  ;;  %v2150_v17 = vadd.f32 %v3594_v45, %v4531_v22 }
 0x1fc   : > { %3487 = vst [vmem:[%s4609_s12 + $0x8] sm:$0xff] %v3355_v19   ;;  %v3350_v29 = vpack.c.bf16 %v2237_v38, %v2236_v52  ;;  %3501 = vst [vmem:[%s4609_s12 + $0x78] sm:$0xff] %v3425_v36   ;;  %v3420_v49 = vpack.c.bf16 %v2265_v18, %v2264_v31  ;;  %v2030_v53 = vadd.f32 %v2029_v37, %v4383_v51 }
 0x1fd   : > { %v3567_v43 = vpop.f32.mrf.mxu0  ;;  %v3595_v30 = vpop.f32.mrf.mxu1  ;;  %v2142_v13 = vadd.f32 %v2141_v28, %v4525_v60  ;;  %v2242_v58 = vmax.f32 %v2038_v62, 0.0  ;;  %v2270_v22 = vmax.f32 %v2150_v17, 0.0 }
 0x1fe   : > { %3351 = vst [vmem:[%s4609_s12] sm:$0xff] %v3350_v29   ;;  %v2041_v2 = vadd.f32 %v3567_v43, %v4402_v14  ;;  %3500 = vst [vmem:[%s4609_s12 + $0x70] sm:$0xff] %v3420_v49   ;;  %v2153_v48 = vadd.f32 %v3595_v30, %v4534_v34  ;;  %v2240_v14 = vmax.f32 %v2030_v53, 0.0 }
 0x1ff   : > { %v2032_v52 = vpop.f32.mrf.mxu0  ;;  %v2144_v4 = vpop.f32.mrf.mxu1  ;;  %v2268_v40 = vmax.f32 %v2142_v13, 0.0 }
 0x200   : > { %v2243_v3 = vmax.f32 %v2041_v2, 0.0  ;;  %v2033_v36 = vadd.f32 %v2032_v52, %v4390_v61  ;;  %v2271_v16 = vmax.f32 %v2153_v48, 0.0  ;;  %v2145_v51 = vadd.f32 %v2144_v4, %v4528_v9 }
 0x201   : > { %v3570_v23 = vpop.f32.mrf.mxu0  ;;  %v3598_v60 = vpop.f32.mrf.mxu1 }
 0x202   : > { %v3365_v35 = vpack.c.bf16 %v2243_v3, %v2242_v58  ;;  %v2241_v12 = vmax.f32 %v2033_v36, 0.0  ;;  %v3435_v34 = vpack.c.bf16 %v2271_v16, %v2270_v22  ;;  %v2269_v15 = vmax.f32 %v2145_v51, 0.0 }
 0x203   : > { %v2045_v19 = vpop.f32.mrf.mxu0  ;;  %v2054_v61 = vadd.f32 %v3570_v23, %v4423_v39  ;;  %v2157_v45 = vpop.f32.mrf.mxu1  ;;  %v2166_v9 = vadd.f32 %v3598_v60, %v4543_v10 }
 0x204   : > { %3489 = vst [vmem:[%s4609_s12 + $0x18] sm:$0xff] %v3365_v35   ;;  %v3360_v38 = vpack.c.bf16 %v2241_v12, %v2240_v14  ;;  %3503 = vst [vmem:[%s4609_s12 + $0x88] sm:$0xff] %v3435_v34   ;;  %v3430_v31 = vpack.c.bf16 %v2269_v15, %v2268_v40  ;;  %v2046_v37 = vadd.f32 %v2045_v19, %v4409_v21 }
 0x205   : > { %v3571_v18 = vpop.f32.mrf.mxu0  ;;  %v3599_v62 = vpop.f32.mrf.mxu1  ;;  %v2158_v28 = vadd.f32 %v2157_v45, %v4537_v47  ;;  %v2246_v43 = vmax.f32 %v2054_v61, 0.0  ;;  %v2274_v10 = vmax.f32 %v2166_v9, 0.0 }
 0x206   : > { %3488 = vst [vmem:[%s4609_s12 + $0x10] sm:$0xff] %v3360_v38   ;;  %v2057_v29 = vadd.f32 %v3571_v18, %v4430_v50  ;;  %3502 = vst [vmem:[%s4609_s12 + $0x80] sm:$0xff] %v3430_v31   ;;  %v2169_v49 = vadd.f32 %v3599_v62, %v4546_v24  ;;  %v2244_v50 = vmax.f32 %v2046_v37, 0.0 }
 0x207   : > { %v2048_v17 = vpop.f32.mrf.mxu0  ;;  %v2160_v2 = vpop.f32.mrf.mxu1  ;;  %v2272_v58 = vmax.f32 %v2158_v28, 0.0 }
 0x208   : > { %v2247_v39 = vmax.f32 %v2057_v29, 0.0  ;;  %v2049_v53 = vadd.f32 %v2048_v17, %v4416_v32  ;;  %v2275_v30 = vmax.f32 %v2169_v49, 0.0  ;;  %v2161_v21 = vadd.f32 %v2160_v2, %v4540_v59 }
 0x209   : > { %v3574_v13 = vpop.f32.mrf.mxu0  ;;  %v3602_v47 = vpop.f32.mrf.mxu1 }
 0x20a   : > { %v3375_v48 = vpack.c.bf16 %v2247_v39, %v2246_v43  ;;  %v2245_v52 = vmax.f32 %v2049_v53, 0.0  ;;  %v3445_v24 = vpack.c.bf16 %v2275_v30, %v2274_v10  ;;  %v2273_v3 = vmax.f32 %v2161_v21, 0.0 }
 0x20b   : > { %v2061_v36 = vpop.f32.mrf.mxu0  ;;  %v2070_v32 = vadd.f32 %v3574_v13, %v4451_v11  ;;  %v2173_v22 = vpop.f32.mrf.mxu1  ;;  %v2182_v59 = vadd.f32 %v3602_v47, %v4555_v6 }
 0x20c   : > { %3491 = vst [vmem:[%s4609_s12 + $0x28] sm:$0xff] %v3375_v48   ;;  %v3370_v4 = vpack.c.bf16 %v2245_v52, %v2244_v50  ;;  %3505 = vst [vmem:[%s4609_s12 + $0x98] sm:$0xff] %v3445_v24   ;;  %v3440_v16 = vpack.c.bf16 %v2273_v3, %v2272_v58  ;;  %v2062_v23 = vadd.f32 %v2061_v36, %v4437_v57 }
 0x20d   : > { %v3575_v51 = vpop.f32.mrf.mxu0  ;;  %v3603_v35 = vpop.f32.mrf.mxu1  ;;  %v2174_v12 = vadd.f32 %v2173_v22, %v4549_v41  ;;  %v2250_v34 = vmax.f32 %v2070_v32, 0.0  ;;  %v2278_v6 = vmax.f32 %v2182_v59, 0.0 }
 0x20e   : > { %3490 = vst [vmem:[%s4609_s12 + $0x20] sm:$0xff] %v3370_v4   ;;  %v2073_v14 = vadd.f32 %v3575_v51, %v4458_v25  ;;  %3504 = vst [vmem:[%s4609_s12 + $0x90] sm:$0xff] %v3440_v16   ;;  %v2185_v60 = vadd.f32 %v3603_v35, %v4558_v27  ;;  %v2248_v25 = vmax.f32 %v2062_v23, 0.0  ;;  %v4892_v23 = vld [vmem:[#allocation4_spill] sm:$0xff] }
 0x20f   : > { %v2064_v40 = vpop.f32.mrf.mxu0  ;;  %v2176_v19 = vpop.f32.mrf.mxu1  ;;  %v2276_v9 = vmax.f32 %v2174_v12, 0.0  ;;  %v4893_v12 = vld [vmem:[#allocation14_spill] sm:$0xff] }
 0x210   : > { %v2251_v11 = vmax.f32 %v2073_v14, 0.0  ;;  %v2065_v15 = vadd.f32 %v2064_v40, %v4444_v5  ;;  %v2279_v38 = vmax.f32 %v2185_v60, 0.0  ;;  %v2177_v57 = vadd.f32 %v2176_v19, %v4552_v56  ;;  %v4894_v40 = vld [vmem:[#allocation9_spill] sm:$0xff]  ;;  %v4895_v19 = vld [vmem:[#allocation3_spill] sm:$0xff] }
 0x211   : > { %v3578_v61 = vpop.f32.mrf.mxu0  ;;  %v3606_v41 = vpop.f32.mrf.mxu1 }
 0x212   : > { %v3385_v45 = vpack.c.bf16 %v2251_v11, %v2250_v34  ;;  %v2249_v31 = vmax.f32 %v2065_v15, 0.0  ;;  %v3455_v27 = vpack.c.bf16 %v2279_v38, %v2278_v6  ;;  %v2277_v18 = vmax.f32 %v2177_v57, 0.0 }
 0x213   : > { %v2077_v37 = vpop.f32.mrf.mxu0  ;;  %v2086_v5 = vadd.f32 %v3578_v61, %v4479_v54  ;;  %v2189_v62 = vpop.f32.mrf.mxu1  ;;  %v2198_v56 = vadd.f32 %v3606_v41, %v4567_v20  ;;  %v3956_v20 = vld [vmem:[%s4874_s2] ss:$0 sm:$0xff]  ;;  %v4898_v41 = vld [vmem:[#allocation12_spill] sm:$0xff] }
 0x214   : > { %3493 = vst [vmem:[%s4609_s12 + $0x38] sm:$0xff] %v3385_v45   ;;  %v3380_v29 = vpack.c.bf16 %v2249_v31, %v2248_v25  ;;  %3507 = vst [vmem:[%s4609_s12 + $0xa8] sm:$0xff] %v3455_v27   ;;  %v3450_v28 = vpack.c.bf16 %v2277_v18, %v2276_v9  ;;  %v2078_v17 = vadd.f32 %v2077_v37, %v4465_v33  ;;  %v4897_v25 = vld [vmem:[#allocation10_spill] sm:$0xff] }
 0x215   : > { %v3579_v49 = vpop.f32.mrf.mxu0  ;;  %v3607_v39 = vpop.f32.mrf.mxu1  ;;  %v2190_v53 = vadd.f32 %v2189_v62, %v4561_v44  ;;  %v2254_v30 = vmax.f32 %v2086_v5, 0.0  ;;  %v1703_v33 = vadd.f32 %v3956_v20, %v4581_v63  ;;  %v1716_v60 = vadd.f32 %v3956_v20, %v4893_v12  ;;  %v4899_v5 = vld [vmem:[#allocation15_spill] sm:$0xff] }
 0x216   : > { %3492 = vst [vmem:[%s4609_s12 + $0x30] sm:$0xff] %v3380_v29   ;;  %v2089_v43 = vadd.f32 %v3579_v49, %v4484_v0  ;;  %3506 = vst [vmem:[%s4609_s12 + $0xa0] sm:$0xff] %v3450_v28   ;;  %v2201_v2 = vadd.f32 %v3607_v39, %v4570_v42  ;;  %v2282_v0 = vmax.f32 %v2198_v56, 0.0  ;;  %v2252_v42 = vmax.f32 %v2078_v17, 0.0  ;;  %v4900_v39 = vld [vmem:[#allocation7_spill] sm:$0xff] }
 0x217   : > { %v2080_v10 = vpop.f32.mrf.mxu0  ;;  %v2192_v13 = vpop.f32.mrf.mxu1  ;;  %v1960_v22 = vadd.f32 %v4583_v55, %v1703_v33  ;;  %v1711_v9 = vadd.f32 %v3956_v20, %v4898_v41  ;;  %v1973_v62 = vadd.f32 %v4899_v5, %v1716_v60 }
 0x218   : > { %v2255_v54 = vmax.f32 %v2089_v43, 0.0  ;;  %v2081_v21 = vadd.f32 %v2080_v10, %v4472_v46  ;;  %v2283_v50 = vmax.f32 %v2201_v2, 0.0  ;;  %v2193_v44 = vadd.f32 %v2192_v13, %v4564_v1  ;;  %v4901_v10 = vld [vmem:[#allocation17_spill] sm:$0xff] }
 0x219   : > { %v3582_v48 = vpop.f32.mrf.mxu0  ;;  %v3610_v58 = vpop.f32.mrf.mxu1  ;;  %v2280_v46 = vmax.f32 %v2190_v53, 0.0 }
 0x21a   : > { %v3395_v52 = vpack.c.bf16 %v2255_v54, %v2254_v30  ;;  %v2253_v47 = vmax.f32 %v2081_v21, 0.0  ;;  %v3465_v24 = vpack.c.bf16 %v2283_v50, %v2282_v0  ;;  %v2281_v3 = vmax.f32 %v2193_v44, 0.0  ;;  %v4903_v0 = vld [vmem:[#allocation8_spill] sm:$0xff] }
 0x21b   : > { %v2093_v36 = vpop.f32.mrf.mxu0  ;;  %v2102_v63 = vadd.f32 %v3582_v48, %v4495_v26  ;;  %v2205_v32 = vpop.f32.mrf.mxu1  ;;  %v2214_v16 = vadd.f32 %v3610_v58, %v4579_v7  ;;  %v4896_v7 = vld [vmem:[#allocation16_spill] sm:$0xff]  ;;  %v4904_v48 = vld [vmem:[#allocation13_spill] sm:$0xff] }
 0x21c   : > { %3495 = vst [vmem:[%s4609_s12 + $0x48] sm:$0xff] %v3395_v52   ;;  %v3390_v4 = vpack.c.bf16 %v2253_v47, %v2252_v42  ;;  %3509 = vst [vmem:[%s4609_s12 + $0xb8] sm:$0xff] %v3465_v24   ;;  %v3460_v1 = vpack.c.bf16 %v2281_v3, %v2280_v46  ;;  %v2094_v51 = vadd.f32 %v2093_v36, %v4489_v8  ;;  %v4905_v52 = vld [vmem:[#allocation11_spill] sm:$0xff]  ;;  %v4906_v36 = vld [vmem:[#allocation6_spill] sm:$0xff] }
 0x21d   : > { %v3583_v59 = vpop.f32.mrf.mxu0  ;;  %v3611_v35 = vpop.f32.mrf.mxu1  ;;  %v2206_v34 = vadd.f32 %v2205_v32, %v4894_v40  ;;  %v2258_v15 = vmax.f32 %v2102_v63, 0.0  ;;  %v1719_v57 = vadd.f32 %v3956_v20, %v4896_v7  ;;  %v2286_v61 = vmax.f32 %v2214_v16, 0.0  ;;  %v4902_v20 = vld [vmem:[#allocation5_spill] sm:$0xff] }
 0x21e   : > { %3494 = vst [vmem:[%s4609_s12 + $0x40] sm:$0xff] %v3390_v4   ;;  %v2105_v14 = vadd.f32 %v3583_v59, %v4892_v23  ;;  %3508 = vst [vmem:[%s4609_s12 + $0xb0] sm:$0xff] %v3460_v1   ;;  %v2217_v26 = vadd.f32 %v3611_v35, %v1960_v22  ;;  %v2256_v27 = vmax.f32 %v2094_v51, 0.0  ;;  %v1968_v42 = vadd.f32 %v4904_v48, %v1711_v9 }
 0x21f   : > { %v2096_v11 = vpop.f32.mrf.mxu0  ;;  %v2208_v38 = vpop.f32.mrf.mxu1  ;;  %v2284_v28 = vmax.f32 %v2206_v34, 0.0  ;;  %v1976_v30 = vadd.f32 %v4901_v10, %v1719_v57 }
 0x220   : > { %v2259_v55 = vmax.f32 %v2105_v14, 0.0  ;;  %v2097_v6 = vadd.f32 %v2096_v11, %v4895_v19  ;;  %v2287_v8 = vmax.f32 %v2217_v26, 0.0  ;;  %v2209_v45 = vadd.f32 %v2208_v38, %v4897_v25 }
 0x221   : > { %v3586_v31 = vpop.f32.mrf.mxu0  ;;  %v3614_v29 = vpop.f32.mrf.mxu1 }
 0x222   : > { %v3405_v18 = vpack.c.bf16 %v2259_v55, %v2258_v15  ;;  %v2257_v37 = vmax.f32 %v2097_v6, 0.0  ;;  %v3475_v56 = vpack.c.bf16 %v2287_v8, %v2286_v61  ;;  %v2285_v49 = vmax.f32 %v2209_v45, 0.0 }
 0x223   : > { %v2109_v17 = vpop.f32.mrf.mxu0  ;;  %v2118_v53 = vadd.f32 %v3586_v31, %v4900_v39  ;;  %v2221_v2 = vpop.f32.mrf.mxu1  ;;  %v2230_v21 = vadd.f32 %v3614_v29, %v1973_v62 }
 0x224   : > { %3497 = vst [vmem:[%s4609_s12 + $0x58] sm:$0xff] %v3405_v18   ;;  %v3400_v43 = vpack.c.bf16 %v2257_v37, %v2256_v27  ;;  %3511 = vst [vmem:[%s4609_s12 + $0xc8] sm:$0xff] %v3475_v56   ;;  %v3470_v54 = vpack.c.bf16 %v2285_v49, %v2284_v28  ;;  %v2110_v33 = vadd.f32 %v2109_v17, %v4902_v20 }
 0x225   : > { %v3587_v13 = vpop.f32.mrf.mxu0  ;;  %v3615_v44 = vpop.f32.mrf.mxu1  ;;  %v2222_v47 = vadd.f32 %v2221_v2, %v4905_v52  ;;  %v2262_v24 = vmax.f32 %v2118_v53, 0.0  ;;  %v2290_v32 = vmax.f32 %v2230_v21, 0.0 }
 0x226   : > { %3496 = vst [vmem:[%s4609_s12 + $0x50] sm:$0xff] %v3400_v43   ;;  %v2121_v50 = vadd.f32 %v3587_v13, %v4903_v0  ;;  %3510 = vst [vmem:[%s4609_s12 + $0xc0] sm:$0xff] %v3470_v54   ;;  %v2233_v58 = vadd.f32 %v3615_v44, %v1976_v30  ;;  %v2260_v16 = vmax.f32 %v2110_v33, 0.0 }
 0x227   : > { %v2112_v46 = vpop.f32.mrf.mxu0  ;;  %v2224_v63 = vpop.f32.mrf.mxu1  ;;  %v2288_v23 = vmax.f32 %v2222_v47, 0.0 }
 0x228   : > { %v2263_v3 = vmax.f32 %v2121_v50, 0.0  ;;  %v2113_v4 = vadd.f32 %v2112_v46, %v4906_v36  ;;  %v2291_v22 = vmax.f32 %v2233_v58, 0.0  ;;  %v2225_v1 = vadd.f32 %v2224_v63, %v1968_v42 }
 0x22a   : > { %v3415_v59 = vpack.c.bf16 %v2263_v3, %v2262_v24  ;;  %v2261_v51 = vmax.f32 %v2113_v4, 0.0  ;;  %v3485_v14 = vpack.c.bf16 %v2291_v22, %v2290_v32  ;;  %v2289_v35 = vmax.f32 %v2225_v1, 0.0  ;;  %2578 = sbr.rel (!%p4095_p4) target bundleno = 650 (0x28a), region = 36 }
 0x22c   : > { %3499 = vst [vmem:[%s4609_s12 + $0x68] sm:$0xff] %v3415_v59   ;;  %v3410_v12 = vpack.c.bf16 %v2261_v51, %v2260_v16  ;;  %3513 = vst [vmem:[%s4609_s12 + $0xd8] sm:$0xff] %v3485_v14   ;;  %v3480_v60 = vpack.c.bf16 %v2289_v35, %v2288_v23 }
 0x22e   : > { %3498 = vst [vmem:[%s4609_s12 + $0x60] sm:$0xff] %v3410_v12   ;;  %3512 = vst [vmem:[%s4609_s12 + $0xd0] sm:$0xff] %v3480_v60  }
 0x22f   : > { %s4914_s29 = smov (!%p2581_p8, %s2580_s29), 56 }
 0x230   : > { %s3278_s7 = sshll.u32 %s4914_s29, 6 }
 0x231   : > { %p3281_p9 = scmp.eq.s32.totalorder %s3278_s7, 0 }
 0x232   : > { %3957 = sdivrem.u32 (!%p3281_p9), %s4914_s29, 56 }
 0x233   : > { %2589 = sbr.rel (%p3281_p9) target bundleno = 650 (0x28a), region = 40 }
 0x23b   : > { %s4707_s20 = spop.drf %3957 }
 0x23c   : > { %p3282_p10 = scmp.le.s32.totalorder %s4707_s20, 0 }
 0x23d   : > { %s4907_s15 = smov (!%p3282_p10), %s4701_s6  ;;  %s4908_s14 = smov (!%p3282_p10), %s4609_s12 }
 0x23e   : > { %2966 = sbr.rel (%p3282_p10) target bundleno = 625 (0x271), region = 112  ;;  %s4716_s8 = smov (!%p3282_p10), 0  }
 0x23f   : > { %s4718_s9 = smov (!%p3282_p10), 0  }
 0x243 LB: >> { %v2607_v40 = vld [vmem:[%s4023_s14] sm:$0xf]  ;;  %v2609_v34 = vld [vmem:[%s4023_s14 + $0x4] sm:$0xf]  ;;  %v2611_v26 = vld [vmem:[%s4023_s14 + $0x8] sm:$0xf]  ;;  %s4031_s9 = sphi %s4718_s9, %s2601_s9   ;;  %s4027_s8 = sphi %s4716_s8, %s4909_s8   ;;  %s4023_s14 = sphi %s4908_s14, %s2724_s14   ;;  %s4019_s15 = sphi %s4907_s15, %s2725_s15  }
 0x244   : >> { %2608 = vst [vmem:[%s4019_s15] sm:$0xf] %v2607_v40  ;;  %2610 = vst [vmem:[%s4019_s15 + $0x4] sm:$0xf] %v2609_v34  ;;  %v2613_v11 = vld [vmem:[%s4023_s14 + $0xc] sm:$0xf]  ;;  %s2719_s10 = sadd.s32 1, %s4027_s8 }
 0x245   : >> { %2612 = vst [vmem:[%s4019_s15 + $0x8] sm:$0xf] %v2611_v26  ;;  %v2615_v15 = vld [vmem:[%s4023_s14 + $0x10] sm:$0xf]  ;;  %v2617_v55 = vld [vmem:[%s4023_s14 + $0x14] sm:$0xf]  ;;  %p2720_p11 = scmp.ge.s32.totalorder %s2719_s10, %s4707_s20 }
 0x246   : >> { %2614 = vst [vmem:[%s4019_s15 + $0xc] sm:$0xf] %v2613_v11  ;;  %2616 = vst [vmem:[%s4019_s15 + $0x10] sm:$0xf] %v2615_v15  ;;  %v2619_v19 = vld [vmem:[%s4023_s14 + $0x18] sm:$0xf] }
 0x247   : >> { %2618 = vst [vmem:[%s4019_s15 + $0x14] sm:$0xf] %v2617_v55  ;;  %v2621_v6 = vld [vmem:[%s4023_s14 + $0x1c] sm:$0xf]  ;;  %v2623_v38 = vld [vmem:[%s4023_s14 + $0x20] sm:$0xf] }
 0x248   : >> { %2620 = vst [vmem:[%s4019_s15 + $0x18] sm:$0xf] %v2619_v19  ;;  %2622 = vst [vmem:[%s4019_s15 + $0x1c] sm:$0xf] %v2621_v6  ;;  %v2625_v7 = vld [vmem:[%s4023_s14 + $0x24] sm:$0xf] }
 0x249   : >> { %2624 = vst [vmem:[%s4019_s15 + $0x20] sm:$0xf] %v2623_v38  ;;  %v2627_v57 = vld [vmem:[%s4023_s14 + $0x28] sm:$0xf]  ;;  %v2629_v61 = vld [vmem:[%s4023_s14 + $0x2c] sm:$0xf] }
 0x24a   : >> { %2626 = vst [vmem:[%s4019_s15 + $0x24] sm:$0xf] %v2625_v7  ;;  %2628 = vst [vmem:[%s4019_s15 + $0x28] sm:$0xf] %v2627_v57  ;;  %v2631_v8 = vld [vmem:[%s4023_s14 + $0x30] sm:$0xf] }
 0x24b   : >> { %2630 = vst [vmem:[%s4019_s15 + $0x2c] sm:$0xf] %v2629_v61  ;;  %v2633_v25 = vld [vmem:[%s4023_s14 + $0x34] sm:$0xf]  ;;  %v2635_v45 = vld [vmem:[%s4023_s14 + $0x38] sm:$0xf] }
 0x24c   : >> { %2632 = vst [vmem:[%s4019_s15 + $0x30] sm:$0xf] %v2631_v8  ;;  %2634 = vst [vmem:[%s4019_s15 + $0x34] sm:$0xf] %v2633_v25  ;;  %v2637_v31 = vld [vmem:[%s4023_s14 + $0x3c] sm:$0xf] }
 0x24d   : >> { %2636 = vst [vmem:[%s4019_s15 + $0x38] sm:$0xf] %v2635_v45  ;;  %v2639_v41 = vld [vmem:[%s4023_s14 + $0x40] sm:$0xf]  ;;  %v2641_v9 = vld [vmem:[%s4023_s14 + $0x44] sm:$0xf] }
 0x24e   : >> { %2638 = vst [vmem:[%s4019_s15 + $0x3c] sm:$0xf] %v2637_v31  ;;  %2640 = vst [vmem:[%s4019_s15 + $0x40] sm:$0xf] %v2639_v41  ;;  %v2643_v27 = vld [vmem:[%s4023_s14 + $0x48] sm:$0xf] }
 0x24f   : >> { %2642 = vst [vmem:[%s4019_s15 + $0x44] sm:$0xf] %v2641_v9  ;;  %v2645_v18 = vld [vmem:[%s4023_s14 + $0x4c] sm:$0xf]  ;;  %v2647_v37 = vld [vmem:[%s4023_s14 + $0x50] sm:$0xf] }
 0x250   : >> { %2644 = vst [vmem:[%s4019_s15 + $0x48] sm:$0xf] %v2643_v27  ;;  %2646 = vst [vmem:[%s4019_s15 + $0x4c] sm:$0xf] %v2645_v18  ;;  %v2649_v29 = vld [vmem:[%s4023_s14 + $0x54] sm:$0xf] }
 0x251   : >> { %2648 = vst [vmem:[%s4019_s15 + $0x50] sm:$0xf] %v2647_v37  ;;  %v2651_v5 = vld [vmem:[%s4023_s14 + $0x58] sm:$0xf]  ;;  %v2653_v62 = vld [vmem:[%s4023_s14 + $0x5c] sm:$0xf] }
 0x252   : >> { %2650 = vst [vmem:[%s4019_s15 + $0x54] sm:$0xf] %v2649_v29  ;;  %2652 = vst [vmem:[%s4019_s15 + $0x58] sm:$0xf] %v2651_v5  ;;  %v2655_v28 = vld [vmem:[%s4023_s14 + $0x60] sm:$0xf] }
 0x253   : >> { %2654 = vst [vmem:[%s4019_s15 + $0x5c] sm:$0xf] %v2653_v62  ;;  %v2657_v56 = vld [vmem:[%s4023_s14 + $0x64] sm:$0xf]  ;;  %v2659_v49 = vld [vmem:[%s4023_s14 + $0x68] sm:$0xf] }
 0x254   : >> { %2656 = vst [vmem:[%s4019_s15 + $0x60] sm:$0xf] %v2655_v28  ;;  %2658 = vst [vmem:[%s4019_s15 + $0x64] sm:$0xf] %v2657_v56  ;;  %v2661_v17 = vld [vmem:[%s4023_s14 + $0x6c] sm:$0xf] }
 0x255   : >> { %2660 = vst [vmem:[%s4019_s15 + $0x68] sm:$0xf] %v2659_v49  ;;  %v2663_v43 = vld [vmem:[%s4023_s14 + $0x70] sm:$0xf]  ;;  %v2665_v39 = vld [vmem:[%s4023_s14 + $0x74] sm:$0xf] }
 0x256   : >> { %2662 = vst [vmem:[%s4019_s15 + $0x6c] sm:$0xf] %v2661_v17  ;;  %2664 = vst [vmem:[%s4019_s15 + $0x70] sm:$0xf] %v2663_v43  ;;  %v2667_v53 = vld [vmem:[%s4023_s14 + $0x78] sm:$0xf] }
 0x257   : >> { %2666 = vst [vmem:[%s4019_s15 + $0x74] sm:$0xf] %v2665_v39  ;;  %v2669_v2 = vld [vmem:[%s4023_s14 + $0x7c] sm:$0xf]  ;;  %v2671_v10 = vld [vmem:[%s4023_s14 + $0x80] sm:$0xf] }
 0x258   : >> { %2668 = vst [vmem:[%s4019_s15 + $0x78] sm:$0xf] %v2667_v53  ;;  %2670 = vst [vmem:[%s4019_s15 + $0x7c] sm:$0xf] %v2669_v2  ;;  %v2673_v30 = vld [vmem:[%s4023_s14 + $0x84] sm:$0xf] }
 0x259   : >> { %2672 = vst [vmem:[%s4019_s15 + $0x80] sm:$0xf] %v2671_v10  ;;  %v2675_v54 = vld [vmem:[%s4023_s14 + $0x88] sm:$0xf]  ;;  %v2677_v21 = vld [vmem:[%s4023_s14 + $0x8c] sm:$0xf] }
 0x25a   : >> { %2674 = vst [vmem:[%s4019_s15 + $0x84] sm:$0xf] %v2673_v30  ;;  %2676 = vst [vmem:[%s4019_s15 + $0x88] sm:$0xf] %v2675_v54  ;;  %v2679_v13 = vld [vmem:[%s4023_s14 + $0x90] sm:$0xf] }
 0x25b   : >> { %2678 = vst [vmem:[%s4019_s15 + $0x8c] sm:$0xf] %v2677_v21  ;;  %v2681_v20 = vld [vmem:[%s4023_s14 + $0x94] sm:$0xf]  ;;  %v2683_v33 = vld [vmem:[%s4023_s14 + $0x98] sm:$0xf] }
 0x25c   : >> { %2680 = vst [vmem:[%s4019_s15 + $0x90] sm:$0xf] %v2679_v13  ;;  %2682 = vst [vmem:[%s4019_s15 + $0x94] sm:$0xf] %v2681_v20  ;;  %v2685_v0 = vld [vmem:[%s4023_s14 + $0x9c] sm:$0xf] }
 0x25d   : >> { %2684 = vst [vmem:[%s4019_s15 + $0x98] sm:$0xf] %v2683_v33  ;;  %v2687_v50 = vld [vmem:[%s4023_s14 + $0xa0] sm:$0xf]  ;;  %v2689_v44 = vld [vmem:[%s4023_s14 + $0xa4] sm:$0xf] }
 0x25e   : >> { %2686 = vst [vmem:[%s4019_s15 + $0x9c] sm:$0xf] %v2685_v0  ;;  %2688 = vst [vmem:[%s4019_s15 + $0xa0] sm:$0xf] %v2687_v50  ;;  %v2691_v48 = vld [vmem:[%s4023_s14 + $0xa8] sm:$0xf] }
 0x25f   : >> { %2690 = vst [vmem:[%s4019_s15 + $0xa4] sm:$0xf] %v2689_v44  ;;  %v2693_v42 = vld [vmem:[%s4023_s14 + $0xac] sm:$0xf]  ;;  %v2695_v52 = vld [vmem:[%s4023_s14 + $0xb0] sm:$0xf] }
 0x260   : >> { %2692 = vst [vmem:[%s4019_s15 + $0xa8] sm:$0xf] %v2691_v48  ;;  %2694 = vst [vmem:[%s4019_s15 + $0xac] sm:$0xf] %v2693_v42  ;;  %v2697_v47 = vld [vmem:[%s4023_s14 + $0xb4] sm:$0xf] }
 0x261   : >> { %2696 = vst [vmem:[%s4019_s15 + $0xb0] sm:$0xf] %v2695_v52  ;;  %v2699_v58 = vld [vmem:[%s4023_s14 + $0xb8] sm:$0xf]  ;;  %v2701_v46 = vld [vmem:[%s4023_s14 + $0xbc] sm:$0xf] }
 0x262   : >> { %2698 = vst [vmem:[%s4019_s15 + $0xb4] sm:$0xf] %v2697_v47  ;;  %2700 = vst [vmem:[%s4019_s15 + $0xb8] sm:$0xf] %v2699_v58  ;;  %v2703_v24 = vld [vmem:[%s4023_s14 + $0xc0] sm:$0xf] }
 0x263   : >> { %2702 = vst [vmem:[%s4019_s15 + $0xbc] sm:$0xf] %v2701_v46  ;;  %v2705_v3 = vld [vmem:[%s4023_s14 + $0xc4] sm:$0xf]  ;;  %v2707_v36 = vld [vmem:[%s4023_s14 + $0xc8] sm:$0xf] }
 0x264   : >> { %2704 = vst [vmem:[%s4019_s15 + $0xc0] sm:$0xf] %v2703_v24  ;;  %2706 = vst [vmem:[%s4019_s15 + $0xc4] sm:$0xf] %v2705_v3  ;;  %v2709_v4 = vld [vmem:[%s4023_s14 + $0xcc] sm:$0xf] }
 0x265   : >> { %2708 = vst [vmem:[%s4019_s15 + $0xc8] sm:$0xf] %v2707_v36  ;;  %v2711_v63 = vld [vmem:[%s4023_s14 + $0xd0] sm:$0xf]  ;;  %v2713_v32 = vld [vmem:[%s4023_s14 + $0xd4] sm:$0xf] }
 0x266   : >> { %2710 = vst [vmem:[%s4019_s15 + $0xcc] sm:$0xf] %v2709_v4  ;;  %2712 = vst [vmem:[%s4019_s15 + $0xd0] sm:$0xf] %v2711_v63  ;;  %v2715_v22 = vld [vmem:[%s4023_s14 + $0xd8] sm:$0xf] }
 0x267   : >> { %2714 = vst [vmem:[%s4019_s15 + $0xd4] sm:$0xf] %v2713_v32  ;;  %v2717_v1 = vld [vmem:[%s4023_s14 + $0xdc] sm:$0xf]  ;;  %2716 = vst [vmem:[%s4019_s15 + $0xd8] sm:$0xf] %v2715_v22 }
 0x268   : >> { %2718 = vst [vmem:[%s4019_s15 + $0xdc] sm:$0xf] %v2717_v1  ;;  %s4916_s10 = smov (%p2720_p11, %s2719_s10), 0  ;;  %s2601_s9 = sadd.s32 1, %s4031_s9  }
 0x269   : >> { %s2722_s11 = smul.u32 224, %s4916_s10  ;;  %p2600_p12 = scmp.ge.s32.totalorder %s2601_s9, %s4707_s20 }
 0x26a   : >> { %s4909_s8 = smov %s4916_s10 }
 0x26b   : >> { %s2724_s14 = scalar_lea.vmem %s4609_s12, %s2722_s11 [#allocation2]   ;;  %s2725_s15 = scalar_lea.vmem %s4701_s6, %s2722_s11  }
 0x26c   : > { %2603 = sbr.rel (!%p2600_p12) target bundleno = 579 (0x243), region = 118 }
 0x271 PF: > { %3959 = sdivrem.u32 %s4914_s29, 56 }
 0x272   : > { %s3283_s18 = smul.u32 224, %s4707_s20 }
 0x274   : > { %s2730_s21 = scalar_lea.vmem %s4609_s12, %s3283_s18 [#allocation2]   ;;  %s2732_s22 = scalar_lea.vmem %s4701_s6, %s3283_s18  }
 0x27a   : > { %s3960_s23 = spop.drf %3959 }
 0x27b   : > { %p3285_p13 = scmp.le.s32.totalorder %s3960_s23, 0 }
 0x27c   : > { %s4033_s24 = smov (!%p3285_p13), %s2732_s22   ;;  %s4037_s25 = smov (!%p3285_p13), %s2730_s21  }
 0x27d   : > { %2980 = sbr.rel (%p3285_p13) target bundleno = 650 (0x28a), region = 123  ;;  %s4041_s17 = smov (!%p3285_p13), 0  }
 0x27e   : > { %s4045_s26 = smov (!%p3285_p13), 0  }
 0x282 LB: >> { %v2742_v16 = vld [vmem:[%s4039_s25] sm:$0xf]  ;;  %s2744_s27 = sadd.s32 1, %s4043_s17  ;;  %s2736_s26 = sadd.s32 1, %s4047_s26   ;;  %s4047_s26 = sphi %s4045_s26, %s2736_s26   ;;  %s4043_s17 = sphi %s4041_s17, %s4042_s17   ;;  %s4039_s25 = sphi %s4037_s25, %s2749_s25   ;;  %s4035_s24 = sphi %s4033_s24, %s2750_s24  }
 0x283   : >> { %2743 = vst [vmem:[%s4035_s24] sm:$0xf] %v2742_v16  ;;  %p2745_p0 = scmp.ge.s32.totalorder %s2744_s27, %s3960_s23  ;;  %p2735_p1 = scmp.ge.s32.totalorder %s2736_s26, %s3960_s23 }
 0x285   : >> { %s4918_s27 = smov (%p2745_p0, %s2744_s27), 0  ;;  %2738 = sbr.rel (!%p2735_p1) target bundleno = 642 (0x282), region = 129 }
 0x286   : >> { %s3286_s12 = sshll.u32 %s4918_s27, 2  ;;  %s4042_s17 = smov %s4918_s27  }
 0x287   : >> { %s2749_s25 = scalar_lea.vmem %s2730_s21, %s3286_s12 [#allocation2]   ;;  %s2750_s24 = scalar_lea.vmem %s2732_s22, %s3286_s12  }
 0x28a PF: > { %p10_p2 = scmp.ge.s32.totalorder %s4085_s16, 4   ;;  %s4910_s12 = smov %s4011_s13 }
 0x28b   : > { %s4911_s13 = smov %s4093_s19  ;;  %s4912_s14 = smov %s4085_s16 }
 0x28c   :  { %12 = sbr.rel (!%p10_p2) target bundleno = 2 (0x2), region = 140 }

// kernel: network_forward.7
= control target key start
LH: loop header
LB: loop body
LE: loop exit
PB: predicated region body
PF: predicated region fallthrough
CT: control target
= control target key end

     0   :  { %s2202_s12 = smov 0   ;;  %s2204_s13 = smov 0   ;;  %s2645_s0 = inlined_call_operand.vmem [shape: bf16[162,900], index: 0, kind: input, shape index: {}]   ;;  %s2646_s1 = inlined_call_operand.vmem [shape: bf16[900,128], index: 1, kind: input, shape index: {}]   ;;  %s2647_s2 = inlined_call_operand.vmem [shape: f32[1,128], index: 2, kind: input, shape index: {}]   ;;  %s2648_s3 = inlined_call_operand.vmem [shape: bf16[162,128], index: 3, kind: output, shape index: {}]  }
   0x1   :  { %s2206_s14 = smov 0  }
   0x2 LB: > { %s2215_s15 = sadd.s32 4294967295, %s2147_s14   ;;  %s2217_s16 = sadd.s32 1, %s2147_s14   ;;  %s2147_s14 = sphi %s2206_s14, %s2655_s14   ;;  %s2143_s13 = sphi %s2204_s13, %s2654_s13   ;;  %s2139_s12 = sphi %s2202_s12, %s2653_s12  }
   0x3   : > { %s85_s17 = ssub.s32 %s2147_s14, %s2217_s16  ;;  %s88_s18 = sadd.s32 1, %s2143_s13 }
   0x4   : > { %p86_p0 = scmp.eq.s32.totalorder %s85_s17, 0  ;;  %p98_p1 = scmp.ne.s32.totalorder %s2143_s13, %s2139_s12 }
   0x5   : > { %p99_p2 = scmp.eq.s32.totalorder %s2215_s15, 1  ;;  %p1597_p3 = scmp.ge.s32.totalorder %s2147_s14, 1 }
   0x6   : > { %s2225_s19 = scalar_select %p86_p0, %s2143_s13, %s88_s18  }
   0x7   : > { %p2227_p4 = por %p99_p2, %p98_p1  ;;  %p149_p5 = scmp.lt.s32.totalorder %s2147_s14, 3 }
   0x9   : > { %p150_p6 = pnand %p1597_p3, %p149_p5 }
   0xa   : > { %s2277_s30 = smul.u32 (!%p150_p6), 11, %s2215_s15  ;;  %s175_s22 = sand.u32 (!%p150_p6), 1, %s2139_s12  }
   0xb   : > { %153 = sbr.rel (%p150_p6) target bundleno = 404 (0x194), region = 32 }
   0xc   : > { %p184_p7 = scmp.lt.s32.totalorder (!%p150_p6), %s2277_s30, 20  ;;  %s1933_s23 = smul.u32 (!%p150_p6), 44, %s175_s22 }
   0xe   : > { %s2550_s12 = scalar_lea.vmem (!%p150_p6), [#allocation2], %s1933_s23  }
  0x10   : > { %v2024_v0 = vld [vmem:[%s2646_s1 + $0x78] sm:$0xff]   ;;  %v2028_v4 = vld [vmem:[%s2646_s1 + $0x70] sm:$0xff]   ;;  %v2032_v8 = vld [vmem:[%s2646_s1 + $0x68] sm:$0xff]   ;;  %s185_s26 = scalar_select %p184_p7, %s2277_s30, 20  ;;  %v2181_v41 = vmov 0   ;;  %vm945_vm0 = vcmask 1041408  }
  0x11   : > { %v2025_v1 = vld [vmem:[%s2646_s1 + $0x38] sm:$0xff]   ;;  %1777 = vmatprep.subr.bf16.mxu0 %v2024_v0  ;;  %v2029_v5 = vld [vmem:[%s2646_s1 + $0x30] sm:$0xff]   ;;  %v2033_v9 = vld [vmem:[%s2646_s1 + $0x28] sm:$0xff]   ;;  %vm926_vm1 = vcmask 31744   ;;  %s1344_s25 = ssub.s32 (%p2227_p4), 21, %s2277_s30 }
  0x12   : > { %v2026_v2 = vld [vmem:[%s2646_s1 + $0xf8] sm:$0xff]   ;;  %1778 = vmatpush3.bf16.msra.mxu0 %v2025_v1  ;;  %v2030_v6 = vld [vmem:[%s2646_s1 + $0xf0] sm:$0xff]   ;;  %v2034_v10 = vld [vmem:[%s2646_s1 + $0xe8] sm:$0xff]   ;;  %s1735_s9 = sshll.u32 %s185_s26, 5  ;;  %s1747_s26 = smul.u32 (%p2227_p4), 44, %s2215_s15 }
  0x13   : > { %v2027_v3 = vld [vmem:[%s2646_s1 + $0xb8] sm:$0xff]   ;;  %1829 = vmatprep.subr.bf16.mxu1 %v2026_v2  ;;  %1779 = vmatprep.subr.bf16.mxu0 %v2028_v4  ;;  %v2031_v7 = vld [vmem:[%s2646_s1 + $0xb0] sm:$0xff]   ;;  %v2035_v11 = vld [vmem:[%s2646_s1 + $0xa8] sm:$0xff]   ;;  %s2329_s24 = scalar_lea.vmem %s2645_s0, %s1735_s9  ;;  %p1345_p8 = scmp.lt.s32.totalorder (%p2227_p4), %s1344_s25, 11 }
  0x14   : > { %1830 = vmatpush3.bf16.msra.mxu1 %v2027_v3  ;;  %v2036_v12 = vld [vmem:[%s2646_s1 + $0x60] sm:$0xff]   ;;  %v2040_v16 = vld [vmem:[%s2646_s1 + $0x58] sm:$0xff]   ;;  %v2044_v20 = vld [vmem:[%s2646_s1 + $0x50] sm:$0xff]   ;;  %s2593_s29 = scalar_lea.vmem (%p2227_p4), %s2648_s3, %s1747_s26  }
  0x15   : > { %1831 = vmatprep.subr.bf16.mxu1 %v2030_v6  ;;  %v2037_v13 = vld [vmem:[%s2646_s1 + $0x20] sm:$0xff]   ;;  %v2041_v17 = vld [vmem:[%s2646_s1 + $0x18] sm:$0xff]   ;;  %v2045_v21 = vld [vmem:[%s2646_s1 + $0x10] sm:$0xff]  }
  0x16   : > { %1780 = vmatpush3.bf16.msra.mxu0 %v2029_v5  ;;  %v2038_v14 = vld [vmem:[%s2646_s1 + $0xe0] sm:$0xff]   ;;  %v2042_v18 = vld [vmem:[%s2646_s1 + $0xd8] sm:$0xff]   ;;  %v2046_v22 = vld [vmem:[%s2646_s1 + $0xd0] sm:$0xff]  }
  0x17   : > { %1781 = vmatprep.subr.bf16.mxu0 %v2032_v8  ;;  %v2039_v15 = vld [vmem:[%s2646_s1 + $0xa0] sm:$0xff]   ;;  %v2043_v19 = vld [vmem:[%s2646_s1 + $0x98] sm:$0xff]   ;;  %v2047_v23 = vld [vmem:[%s2646_s1 + $0x90] sm:$0xff]  }
  0x18   : > { %1832 = vmatpush3.bf16.msra.mxu1 %v2031_v7  ;;  %v2048_v24 = vld [vmem:[%s2646_s1 + $0x48] sm:$0xff]   ;;  %v2052_v28 = vld [vmem:[%s2646_s1 + $0x40] sm:$0xff]   ;;  %v2056_v40 = vld [vmem:[%s2646_s1 + $0x178] sm:$0xff]  }
  0x19   : > { %1833 = vmatprep.subr.bf16.mxu1 %v2034_v10  ;;  %v2049_v25 = vld [vmem:[%s2646_s1 + $0x8] sm:$0xff]   ;;  %v2053_v29 = vld [vmem:[%s2646_s1] sm:$0xff]   ;;  %v2057_v42 = vld [vmem:[%s2646_s1 + $0x138] sm:$0xff]  }
  0x1a   : > { %1782 = vmatpush3.bf16.msra.mxu0 %v2033_v9  ;;  %v2050_v26 = vld [vmem:[%s2646_s1 + $0xc8] sm:$0xff]   ;;  %v2054_v30 = vld [vmem:[%s2646_s1 + $0xc0] sm:$0xff]   ;;  %v2058_v43 = vld [vmem:[%s2646_s1 + $0x170] sm:$0xff]  }
  0x1b   : > { %1783 = vmatprep.subr.bf16.mxu0 %v2036_v12  ;;  %v2051_v27 = vld [vmem:[%s2646_s1 + $0x88] sm:$0xff]   ;;  %v2055_v31 = vld [vmem:[%s2646_s1 + $0x80] sm:$0xff]   ;;  %v2059_v47 = vld [vmem:[%s2646_s1 + $0x130] sm:$0xff]  }
  0x1c   : > { %1834 = vmatpush3.bf16.msra.mxu1 %v2035_v11  ;;  %v201_v32 = vld [vmem:[%s2329_s24] sm:$0xff]  ;;  %v202_v34 = vld [vmem:[%s2329_s24 + $0x8] sm:$0xff]  ;;  %v2060_v48 = vld [vmem:[%s2646_s1 + $0x1b8] sm:$0xff]  }
  0x1d   : > { %1835 = vmatprep.subr.bf16.mxu1 %v2038_v14  ;;  %v205_v33 = vld [vmem:[%s2329_s24 + $0x20] sm:$0xff]  ;;  %v206_v37 = vld [vmem:[%s2329_s24 + $0x28] sm:$0xff]  ;;  %v2063_v56 = vld [vmem:[%s2646_s1 + $0x1b0] sm:$0xff]  }
  0x1e   : > { %1784 = vmatpush3.bf16.msra.mxu0 %v2037_v13  ;;  %v1601_v35 = vcombine.low %v201_v32, %v205_v33  ;;  %v1602_v36 = vcombine.high %v201_v32, %v205_v33  ;;  %v1603_v38 = vcombine.low %v202_v34, %v206_v37  ;;  %v1604_v39 = vcombine.high %v202_v34, %v206_v37  ;;  %v209_v44 = vld [vmem:[%s2329_s24 + $0x40] sm:$0xff]  ;;  %v210_v49 = vld [vmem:[%s2329_s24 + $0x48] sm:$0xff]  ;;  %v2068_v11 = vld [vmem:[%s2646_s1 + $0x158] sm:$0xff]  }
  0x1f   : > { %1785 = vmatprep.subr.bf16.mxu0 %v2040_v16  ;;  %v213_v45 = vld [vmem:[%s2329_s24 + $0x60] sm:$0xff]  ;;  %v214_v50 = vld [vmem:[%s2329_s24 + $0x68] sm:$0xff]  ;;  %v2069_v12 = vld [vmem:[%s2646_s1 + $0x118] sm:$0xff]  }
  0x20   : > { %1836 = vmatpush3.bf16.msra.mxu1 %v2039_v15  ;;  %981 = vmatprep.mubr.bf16.mxu0 %v1602_v36  ;;  %v1610_v46 = vcombine.high %v209_v44, %v213_v45  ;;  %v1609_v51 = vcombine.low %v209_v44, %v213_v45  ;;  %v1612_v52 = vcombine.high %v210_v49, %v214_v50  ;;  %v2061_v53 = vld [vmem:[%s2646_s1 + $0x168] sm:$0xff]   ;;  %v217_v57 = vld [vmem:[%s2329_s24 + $0x80] sm:$0xff]  ;;  %v2070_v13 = vld [vmem:[%s2646_s1 + $0x198] sm:$0xff]  }
  0x21   : > { %1837 = vmatprep.subr.bf16.mxu1 %v2042_v18  ;;  %1061 = vmatprep.mubr.bf16.mxu1 %v1604_v39  ;;  %v1611_v54 = vcombine.low %v210_v49, %v214_v50  ;;  %v2062_v55 = vld [vmem:[%s2646_s1 + $0x128] sm:$0xff]   ;;  %v221_v58 = vld [vmem:[%s2329_s24 + $0xa0] sm:$0xff]  ;;  %v2071_v14 = vld [vmem:[%s2646_s1 + $0x150] sm:$0xff]  }
  0x22   : > { %1786 = vmatpush3.bf16.msra.mxu0 %v2041_v17  ;;  %v218_v59 = vld [vmem:[%s2329_s24 + $0x88] sm:$0xff]  ;;  %v1618_v61 = vcombine.high %v217_v57, %v221_v58  ;;  %v2064_v63 = vld [vmem:[%s2646_s1 + $0x160] sm:$0xff]   ;;  %v1617_v4 = vcombine.low %v217_v57, %v221_v58  ;;  %v2072_v17 = vld [vmem:[%s2646_s1 + $0x110] sm:$0xff]  }
  0x23   : > { %1787 = vmatprep.subr.bf16.mxu0 %v2044_v20  ;;  %v222_v60 = vld [vmem:[%s2329_s24 + $0xa8] sm:$0xff]  ;;  %v2066_v1 = vld [vmem:[%s2646_s1 + $0x120] sm:$0xff]   ;;  %v203_v39 = vld [vmem:[%s2329_s24 + $0x10] sm:$0xff] }
  0x24   : > { %1838 = vmatpush3.bf16.msra.mxu1 %v2043_v19  ;;  %v1620_v62 = vcombine.high %v218_v59, %v222_v60  ;;  %v2065_v0 = vld [vmem:[%s2646_s1 + $0x1a8] sm:$0xff]   ;;  %v225_v2 = vld [vmem:[%s2329_s24 + $0xc0] sm:$0xff]  ;;  %v1619_v7 = vcombine.low %v218_v59, %v222_v60  ;;  %v212_v49 = vld [vmem:[%s2329_s24 + $0x58] sm:$0xff] }
  0x25   : > { %1839 = vmatprep.subr.bf16.mxu1 %v2046_v22  ;;  %v229_v3 = vld [vmem:[%s2329_s24 + $0xe0] sm:$0xff]  ;;  %v226_v6 = vld [vmem:[%s2329_s24 + $0xc8] sm:$0xff]  ;;  %v216_v50 = vld [vmem:[%s2329_s24 + $0x78] sm:$0xff] }
  0x26   : > { %1788 = vmatpush3.bf16.msra.mxu0 %v2045_v21  ;;  %v2067_v5 = vld [vmem:[%s2646_s1 + $0x1a0] sm:$0xff]   ;;  %v1626_v8 = vcombine.high %v225_v2, %v229_v3  ;;  %v230_v9 = vld [vmem:[%s2329_s24 + $0xe8] sm:$0xff]  ;;  %v1625_v20 = vcombine.low %v225_v2, %v229_v3  ;;  %v2073_v21 = vld [vmem:[%s2646_s1 + $0x190] sm:$0xff]   ;;  %v1615_v60 = vcombine.low %v212_v49, %v216_v50 }
  0x27   : > { %1789 = vmatprep.subr.bf16.mxu0 %v2048_v24  ;;  %v1628_v10 = vcombine.high %v226_v6, %v230_v9  ;;  %v233_v15 = vld [vmem:[%s2329_s24 + $0x100] sm:$0xff]  ;;  %v234_v18 = vld [vmem:[%s2329_s24 + $0x108] sm:$0xff]  ;;  %v1627_v22 = vcombine.low %v226_v6, %v230_v9  ;;  %v220_v57 = vld [vmem:[%s2329_s24 + $0x98] sm:$0xff] }
  0x28   : > { %1840 = vmatpush3.bf16.msra.mxu1 %v2047_v23  ;;  %v237_v16 = vld [vmem:[%s2329_s24 + $0x120] sm:$0xff]  ;;  %v238_v19 = vld [vmem:[%s2329_s24 + $0x128] sm:$0xff]  ;;  %v224_v58 = vld [vmem:[%s2329_s24 + $0xb8] sm:$0xff] }
  0x29   : > { %1841 = vmatprep.subr.bf16.mxu1 %v2050_v26  ;;  %v1634_v23 = vcombine.high %v233_v15, %v237_v16  ;;  %v1636_v24 = vcombine.high %v234_v18, %v238_v19  ;;  %v2075_v26 = vld [vmem:[%s2646_s1 + $0x108] sm:$0xff]   ;;  %v1633_v32 = vcombine.low %v233_v15, %v237_v16  ;;  %v2082_v33 = vld [vmem:[%s2646_s1 + $0x180] sm:$0xff]   ;;  %v1635_v34 = vcombine.low %v234_v18, %v238_v19  ;;  %v232_v2 = vld [vmem:[%s2329_s24 + $0xf8] sm:$0xff] }
  0x2a   : > { %1790 = vmatpush3.bf16.msra.mxu0 %v2049_v25  ;;  %v2074_v25 = vld [vmem:[%s2646_s1 + $0x148] sm:$0xff]   ;;  %v2084_v36 = vld [vmem:[%s2646_s1 + $0x1c0] ss:$0 sps:$4 sm:$0x33]   ;;  %v236_v9 = vld [vmem:[%s2329_s24 + $0x118] sm:$0xff] }
  0x2b   : > { %1791 = vmatprep.subr.bf16.mxu0 %v2052_v28  ;;  %v2081_v28 = vld [vmem:[%s2646_s1 + $0x140] sm:$0xff]   ;;  %v243_v15 = vld [vmem:[%s2329_s24 + $0x150] sm:$0xff]  ;;  %v244_v16 = vld [vmem:[%s2329_s24 + $0x158] sm:$0xff] }
  0x2c   : > { %1842 = vmatpush3.bf16.msra.mxu1 %v2051_v27  ;;  %v2076_v27 = vld [vmem:[%s2646_s1 + $0x188] sm:$0xff]   ;;  %v1646_v19 = vcombine.high %v243_v15, %v243_v15 }
  0x2d   : > { %1843 = vmatprep.subr.bf16.mxu1 %v2054_v30  ;;  %v242_v30 = vld [vmem:[%s2329_s24 + $0x148] sm:$0xff] }
  0x2e   : > { %1792 = vmatpush3.bf16.msra.mxu0 %v2053_v29  ;;  %v241_v29 = vld [vmem:[%s2329_s24 + $0x140] sm:$0xff]  ;;  %v1644_v37 = vcombine.high %v242_v30, %v242_v30  ;;  %v1643_v45 = vcombine.low %v242_v30, %v242_v30 }
  0x2f   : > { %1881 = vmatprep.subr.bf16.mxu0 %v2056_v40  ;;  %v207_v40 = vld [vmem:[%s2329_s24 + $0x30] sm:$0xff]  ;;  %v1641_v44 = vcombine.low %v241_v29, %v241_v29 }
  0x30   : > { %1844 = vmatpush3.bf16.msra.mxu1 %v2055_v31  ;;  %v2083_v31 = vld [vmem:[%s2646_s1 + $0x100] sm:$0xff]  }
  0x31   : > { %1189 = vmatprep.subr.bf16.mxu1 %v2181_v41  ;;  %982 = vmatmul.mubr.bf16.vlgmr.msra.gmra.mxu0 %v1601_v35  ;;  %v1642_v35 = vcombine.high %v241_v29, %v241_v29 }
  0x32   : > { %1882 = vmatpush3.bf16.msra.mxu0 %v2057_v42  ;;  %989 = vmatprep.mubr.bf16.mxu0 %v1610_v46  ;;  %v204_v42 = vld [vmem:[%s2329_s24 + $0x18] sm:$0xff]  ;;  %v1606_v46 = vcombine.high %v203_v39, %v207_v40 }
  0x33   : > { %1062 = vmatmul.mubr.bf16.vlgmr.msra.gmra.mxu1 %v1603_v38  ;;  %1883 = vmatprep.subr.bf16.mxu0 %v2058_v43  ;;  %v947_v38 = vsel %vm945_vm0, %v2084_v36, 0  ;;  %v208_v43 = vld [vmem:[%s2329_s24 + $0x38] sm:$0xff] }
  0x34   : > { %1190 = vmatpush1.bf16.msra.mxu1 %v2060_v48  ;;  %1069 = vmatprep.mubr.bf16.mxu1 %v1612_v52  ;;  %v215_v48 = vld [vmem:[%s2329_s24 + $0x70] sm:$0xff]  ;;  %v1607_v52 = vcombine.low %v204_v42, %v208_v43 }
  0x35   : > { %1191 = vmatprep.subr.bf16.mxu1 %v2181_v41 }
  0x36   : > { %1884 = vmatpush3.bf16.msra.mxu0 %v2059_v47  ;;  %v1608_v47 = vcombine.high %v204_v42, %v208_v43 }
  0x37   : > { %1885 = vmatprep.subr.bf16.mxu0 %v2061_v53 }
  0x38   : > { %1192 = vmatpush1.bf16.msra.mxu1 %v2063_v56  ;;  %v223_v56 = vld [vmem:[%s2329_s24 + $0xb0] sm:$0xff] }
  0x39   : > { %990 = vmatmul.mubr.bf16.gmra.mxu0 %v1609_v51  ;;  %1193 = vmatprep.subr.bf16.mxu1 %v2181_v41  ;;  %v1605_v51 = vcombine.low %v203_v39, %v207_v40 }
  0x3a   : > { %1886 = vmatpush3.bf16.msra.mxu0 %v2062_v55  ;;  %997 = vmatprep.mubr.bf16.mxu0 %v1618_v61  ;;  %v219_v55 = vld [vmem:[%s2329_s24 + $0x90] sm:$0xff] }
  0x3b   : > { %1070 = vmatmul.mubr.bf16.gmra.mxu1 %v1611_v54  ;;  %1887 = vmatprep.subr.bf16.mxu0 %v2064_v63  ;;  %v1616_v54 = vcombine.high %v212_v49, %v216_v50  ;;  %v1622_v61 = vcombine.high %v219_v55, %v223_v56  ;;  %v227_v63 = vld [vmem:[%s2329_s24 + $0xd0] sm:$0xff]  ;;  %v1621_v3 = vcombine.low %v219_v55, %v223_v56 }
  0x3c   : > { %1077 = vmatprep.mubr.bf16.mxu1 %v1620_v62  ;;  %1194 = vmatpush1.bf16.msra.mxu1 %v2065_v0  ;;  %v1624_v62 = vcombine.high %v220_v57, %v224_v58  ;;  %v231_v0 = vld [vmem:[%s2329_s24 + $0xf0] sm:$0xff] }
  0x3d   : > { %1195 = vmatprep.subr.bf16.mxu1 %v2181_v41 }
  0x3e   : > { %1888 = vmatpush3.bf16.msra.mxu0 %v2066_v1  ;;  %v228_v1 = vld [vmem:[%s2329_s24 + $0xd8] sm:$0xff] }
  0x3f   : > { %1889 = vmatprep.subr.bf16.mxu0 %v2068_v11  ;;  %v1632_v6 = vcombine.high %v228_v1, %v232_v2  ;;  %v1629_v11 = vcombine.low %v227_v63, %v231_v0 }
  0x40   : > { %1196 = vmatpush1.bf16.msra.mxu1 %v2067_v5  ;;  %v1630_v5 = vcombine.high %v227_v63, %v231_v0 }
  0x41   : > { %998 = vmatmul.mubr.bf16.gmra.mxu0 %v1617_v4  ;;  %1197 = vmatprep.subr.bf16.mxu1 %v2181_v41  ;;  %v1623_v4 = vcombine.low %v220_v57, %v224_v58 }
  0x42   : > { %1005 = vmatprep.mubr.bf16.mxu0 %v1626_v8  ;;  %1890 = vmatpush3.bf16.msra.mxu0 %v2069_v12  ;;  %v239_v8 = vld [vmem:[%s2329_s24 + $0x130] sm:$0xff]  ;;  %v1631_v12 = vcombine.low %v228_v1, %v232_v2 }
  0x43   : > { %1078 = vmatmul.mubr.bf16.gmra.mxu1 %v1619_v7  ;;  %1891 = vmatprep.subr.bf16.mxu0 %v2071_v14  ;;  %v235_v7 = vld [vmem:[%s2329_s24 + $0x110] sm:$0xff] }
  0x44   : > { %1085 = vmatprep.mubr.bf16.mxu1 %v1628_v10  ;;  %1198 = vmatpush1.bf16.msra.mxu1 %v2070_v13  ;;  %v240_v10 = vld [vmem:[%s2329_s24 + $0x138] sm:$0xff]  ;;  %v1638_v13 = vcombine.high %v235_v7, %v239_v8 }
  0x45   : > { %1199 = vmatprep.subr.bf16.mxu1 %v2181_v41  ;;  %v1640_v14 = vcombine.high %v236_v9, %v240_v10  ;;  %v1639_v18 = vcombine.low %v236_v9, %v240_v10 }
  0x46   : > { %1892 = vmatpush3.bf16.msra.mxu0 %v2072_v17  ;;  %v1637_v17 = vcombine.low %v235_v7, %v239_v8 }
  0x47   : > { %1893 = vmatprep.subr.bf16.mxu0 %v2074_v25 }
  0x48   : > { %1200 = vmatpush1.bf16.msra.mxu1 %v2073_v21  ;;  %v1645_v21 = vcombine.low %v243_v15, %v243_v15 }
  0x49   : > { %1006 = vmatmul.mubr.bf16.gmra.mxu0 %v1625_v20  ;;  %1201 = vmatprep.subr.bf16.mxu1 %v2181_v41  ;;  %v1648_v20 = vcombine.high %v244_v16, %v244_v16 }
  0x4a   : > { %1013 = vmatprep.mubr.bf16.mxu0 %v1634_v23  ;;  %1894 = vmatpush3.bf16.msra.mxu0 %v2075_v26 }
  0x4b   : > { %1086 = vmatmul.mubr.bf16.gmra.mxu1 %v1627_v22  ;;  %1895 = vmatprep.subr.bf16.mxu0 %v2081_v28  ;;  %v1647_v22 = vcombine.low %v244_v16, %v244_v16 }
  0x4c   : > { %1093 = vmatprep.mubr.bf16.mxu1 %v1636_v24  ;;  %1202 = vmatpush1.bf16.msra.mxu1 %v2076_v27 }
  0x4d   : > { %1203 = vmatprep.subr.bf16.mxu1 %v2181_v41 }
  0x4e   : > { %1896 = vmatpush3.bf16.msra.mxu0 %v2083_v31 }
  0x50   : > { %1204 = vmatpush1.bf16.msra.mxu1 %v2082_v33 }
  0x51   : > { %1014 = vmatmul.mubr.bf16.gmra.mxu0 %v1633_v32  ;;  %1219 = vmatprep.subr.bf16.mxu1 %v2181_v41  ;;  %v211_v41 = vld [vmem:[%s2329_s24 + $0x50] sm:$0xff] }
  0x52   : > { %1021 = vmatprep.mubr.bf16.mxu0 %v1642_v35  ;;  %v1614_v53 = vcombine.high %v211_v41, %v215_v48  ;;  %v1613_v59 = vcombine.low %v211_v41, %v215_v48 }
  0x53   : > { %1094 = vmatmul.mubr.bf16.gmra.mxu1 %v1635_v34 }
  0x54   : > { %1101 = vmatprep.mubr.bf16.mxu1 %v1644_v37  ;;  %1220 = vmatpush2.bf16.msra.mxu1 %v947_v38 }
  0x59   : > { %1022 = vmatmul.mubr.bf16.gmra.mxu0 %v1641_v44 }
  0x5a   : > { %1141 = vmatprep.mubr.bf16.mxu0 %v1606_v46 }
  0x5b   : > { %1102 = vmatmul.mubr.bf16.gmra.mxu1 %v1643_v45 }
  0x5c   : > { %1706 = vmatprep.mubr.msk.bf16.mxu1 %vm926_vm1, %v1608_v47 }
  0x61   : > { %1142 = vmatmul.mubr.bf16.vlgmr.msra.gmra.mxu0 %v1605_v51 }
  0x62   : > { %1149 = vmatprep.mubr.bf16.mxu0 %v1614_v53 }
  0x63   : > { %1222 = vmatmul.mubr.bf16.vlgmr.msra.gmra.mxu1 %v1607_v52 }
  0x64   : > { %1707 = vmatprep.mubr.msk.bf16.mxu1 %vm926_vm1, %v1616_v54 }
  0x69   : > { %1150 = vmatmul.mubr.bf16.gmra.mxu0 %v1613_v59 }
  0x6a   : > { %1157 = vmatprep.mubr.bf16.mxu0 %v1622_v61 }
  0x6b   : > { %1230 = vmatmul.mubr.bf16.gmra.mxu1 %v1615_v60 }
  0x6c   : > { %1708 = vmatprep.mubr.msk.bf16.mxu1 %vm926_vm1, %v1624_v62 }
  0x71   : > { %1158 = vmatmul.mubr.bf16.gmra.mxu0 %v1621_v3 }
  0x72   : > { %1165 = vmatprep.mubr.bf16.mxu0 %v1630_v5 }
  0x73   : > { %1238 = vmatmul.mubr.bf16.gmra.mxu1 %v1623_v4  ;;  %v2534_v4 = vld [vmem:[%s2647_s2] ss:$0 sm:$0xff] }
  0x74   : > { %1709 = vmatprep.mubr.msk.bf16.mxu1 %vm926_vm1, %v1632_v6 }
  0x79   : > { %1166 = vmatmul.mubr.bf16.gmra.mxu0 %v1629_v11 }
  0x7a   : > { %1173 = vmatprep.mubr.bf16.mxu0 %v1638_v13 }
  0x7b   : > { %1246 = vmatmul.mubr.bf16.gmra.mxu1 %v1631_v12 }
  0x7c   : > { %1710 = vmatprep.mubr.msk.bf16.mxu1 %vm926_vm1, %v1640_v14 }
  0x81   : > { %1174 = vmatmul.mubr.bf16.gmra.mxu0 %v1637_v17 }
  0x82   : > { %1181 = vmatprep.mubr.bf16.mxu0 %v1646_v19 }
  0x83   : > { %1254 = vmatmul.mubr.bf16.gmra.mxu1 %v1639_v18 }
  0x84   : > { %1711 = vmatprep.mubr.msk.bf16.mxu1 %vm926_vm1, %v1648_v20 }
  0x89   : > { %1182 = vmatmul.mubr.bf16.gmra.mxu0 %v1645_v21 }
  0x8b   : > { %1262 = vmatmul.mubr.bf16.gmra.mxu1 %v1647_v22 }
  0xf1   : > { %v1793_v23 = vpop.f32.mrf.mxu0 }
  0xf3   : > { %v1845_v24 = vpop.f32.mrf.mxu1  ;;  %v1794_v25 = vpop.f32.mrf.mxu0 }
  0xf4   : > { %v1795_v2 = vadd.f32 %v1794_v25, %v1793_v23 }
  0xf5   : > { %v1846_v26 = vpop.f32.mrf.mxu1  ;;  %v1796_v27 = vpop.f32.mrf.mxu0 }
  0xf6   : > { %v984_v8 = vadd.f32 %v1795_v2, %v2534_v4  ;;  %v1847_v9 = vadd.f32 %v1846_v26, %v1845_v24 }
  0xf7   : > { %v1848_v28 = vpop.f32.mrf.mxu1  ;;  %v1797_v29 = vpop.f32.mrf.mxu0 }
  0xf8   : > { %v1798_v10 = vadd.f32 %v1797_v29, %v1796_v27  ;;  %v1064_v15 = vadd.f32 %v1847_v9, %v984_v8 }
  0xf9   : > { %v1849_v30 = vpop.f32.mrf.mxu1  ;;  %v1799_v31 = vpop.f32.mrf.mxu0 }
  0xfa   : > { %v987_v16 = vadd.f32 %v1798_v10, %v2534_v4  ;;  %v1850_v21 = vadd.f32 %v1849_v30, %v1848_v28 }
  0xfb   : > { %v1851_v32 = vpop.f32.mrf.mxu1  ;;  %v1800_v33 = vpop.f32.mrf.mxu0 }
  0xfc   : > { %v1801_v17 = vadd.f32 %v1800_v33, %v1799_v31  ;;  %v1067_v2 = vadd.f32 %v1850_v21, %v987_v16 }
  0xfd   : > { %v1852_v34 = vpop.f32.mrf.mxu1  ;;  %v1802_v35 = vpop.f32.mrf.mxu0 }
  0xfe   : > { %v992_v24 = vadd.f32 %v1801_v17, %v2534_v4  ;;  %v1853_v26 = vadd.f32 %v1852_v34, %v1851_v32 }
  0xff   : > { %v2471_v36 = vpop.f32.mrf.mxu1  ;;  %v1803_v37 = vpop.f32.mrf.mxu0 }
 0x100   : > { %v1804_v25 = vadd.f32 %v1803_v37, %v1802_v35  ;;  %v1072_v28 = vadd.f32 %v1853_v26, %v992_v24 }
 0x101   : > { %v2473_v38 = vpop.f32.mrf.mxu1  ;;  %v2475_v39 = vpop.f32.mrf.mxu0 }
 0x102   : > { %v995_v31 = vadd.f32 %v1804_v25, %v2534_v4  ;;  %v1856_v32 = vadd.f32 %v2473_v38, %v2471_v36 }
 0x103   : > { %v2477_v40 = vpop.f32.mrf.mxu1  ;;  %v2479_v42 = vpop.f32.mrf.mxu0 }
 0x104   : > { %v1807_v30 = vadd.f32 %v2479_v42, %v2475_v39 }
 0x105   : > { %v2481_v43 = vpop.f32.mrf.mxu1  ;;  %v2483_v44 = vpop.f32.mrf.mxu0 }
 0x106   : > { %v1859_v39 = vadd.f32 %v2481_v43, %v2477_v40 }
 0x107   : > { %v2485_v45 = vpop.f32.mrf.mxu1  ;;  %v2487_v46 = vpop.f32.mrf.mxu0 }
 0x108   : > { %v1810_v16 = vadd.f32 %v2487_v46, %v2483_v44 }
 0x109   : > { %v2489_v47 = vpop.f32.mrf.mxu1  ;;  %v2491_v41 = vpop.f32.mrf.mxu0 }
 0x10b   : > { %v2493_v48 = vpop.f32.mrf.mxu1  ;;  %v2495_v49 = vpop.f32.mrf.mxu0 }
 0x10c   : > { %v1813_v25 = vadd.f32 %v2495_v49, %v2491_v41 }
 0x10d   : > { %v2497_v50 = vpop.f32.mrf.mxu1  ;;  %v2499_v51 = vpop.f32.mrf.mxu0 }
 0x10e   : > { %v1865_v41 = vadd.f32 %v2497_v50, %v2493_v48 }
 0x10f   : > { %v2501_v52 = vpop.f32.mrf.mxu1  ;;  %v2503_v53 = vpop.f32.mrf.mxu0 }
 0x111   : > { %v2505_v54 = vpop.f32.mrf.mxu1  ;;  %v2507_v55 = vpop.f32.mrf.mxu0 }
 0x112   : > { %v1868_v48 = vadd.f32 %v2505_v54, %v2501_v52 }
 0x113   : > { %v2509_v56 = vpop.f32.mrf.mxu1  ;;  %v2511_v57 = vpop.f32.mrf.mxu0 }
 0x115   : > { %v2513_v58 = vpop.f32.mrf.mxu1  ;;  %v2515_v59 = vpop.f32.mrf.mxu0 }
 0x117   : > { %v2517_v60 = vpop.f32.mrf.mxu1  ;;  %v2519_v61 = vpop.f32.mrf.mxu0 }
 0x119   : > { %v2521_v62 = vpop.f32.mrf.mxu1  ;;  %v2523_v63 = vpop.f32.mrf.mxu0 }
 0x11b   : > { %v2525_v0 = vpop.f32.mrf.mxu1  ;;  %v2527_v1 = vpop.f32.mrf.mxu0 }
 0x11d   : > { %v2529_v3 = vpop.f32.mrf.mxu1  ;;  %v1826_v5 = vpop.f32.mrf.mxu0 }
 0x11f   : > { %v1878_v6 = vpop.f32.mrf.mxu1  ;;  %v1827_v7 = vpop.f32.mrf.mxu0 }
 0x121   : > { %v1879_v11 = vpop.f32.mrf.mxu1  ;;  %v1897_v12 = vpop.f32.mrf.mxu0 }
 0x123   : > { %v1223_v13 = vpop.f32.mrf.mxu1  ;;  %v1898_v14 = vpop.f32.mrf.mxu0 }
 0x124   : > { %v1899_v18 = vadd.f32 %v1898_v14, %v1897_v12 }
 0x125   : > { %v1225_v19 = vpop.f32.mrf.mxu1  ;;  %v1900_v20 = vpop.f32.mrf.mxu0 }
 0x126   : > { %v1144_v22 = vadd.f32 %v1899_v18, %v1064_v15  ;;  %v1075_v15 = vadd.f32 %v1856_v32, %v995_v31  ;;  %v1000_v18 = vadd.f32 %v1807_v30, %v2534_v4  ;;  %v1008_v31 = vadd.f32 %v1813_v25, %v2534_v4 }
 0x127   : > { %v1226_v23 = vpop.f32.mrf.mxu1  ;;  %v1901_v5 = vpop.f32.mrf.mxu0 }
 0x128   : > { %v1902_v27 = vadd.f32 %v1901_v5, %v1900_v20  ;;  %v1224_v7 = vadd.f32 %v1223_v13, %v1144_v22  ;;  %v1080_v46 = vadd.f32 %v1859_v39, %v1000_v18  ;;  %v1088_v32 = vadd.f32 %v1865_v41, %v1008_v31 }
 0x129   : > { %v1228_v29 = vpop.f32.mrf.mxu1  ;;  %v1903_v6 = vpop.f32.mrf.mxu0 }
 0x12a   : > { %v1147_v8 = vadd.f32 %v1902_v27, %v1067_v2  ;;  %v1269_v11 = vmax.f32 %v1224_v7, 0.0  ;;  %v1862_v2 = vadd.f32 %v2489_v47, %v2485_v45 }
 0x12b   : > { %v1231_v9 = vpop.f32.mrf.mxu1  ;;  %v1904_v33 = vpop.f32.mrf.mxu0 }
 0x12c   : > { %v1227_v35 = vadd.f32 %v1226_v23, %v1147_v8  ;;  %v1905_v37 = vadd.f32 %v1904_v33, %v1903_v6  ;;  %v1003_v23 = vadd.f32 %v1810_v16, %v2534_v4  ;;  %v1816_v8 = vadd.f32 %v2503_v53, %v2499_v51 }
 0x12d   : > { %v1233_v10 = vpop.f32.mrf.mxu1  ;;  %v1906_v34 = vpop.f32.mrf.mxu0  ;;  %v1819_v51 = vadd.f32 %v2511_v57, %v2507_v55  ;;  %v1871_v55 = vadd.f32 %v2513_v58, %v2509_v56  ;;  %v1874_v56 = vadd.f32 %v2521_v62, %v2517_v60 }
 0x12e   : > { %v1270_v12 = vmax.f32 %v1227_v35, 0.0  ;;  %v1152_v13 = vadd.f32 %v1905_v37, %v1072_v28  ;;  %v1083_v7 = vadd.f32 %v1862_v2, %v1003_v23  ;;  %v1011_v37 = vadd.f32 %v1816_v8, %v2534_v4 }
 0x12f   : > { %v1234_v14 = vpop.f32.mrf.mxu1  ;;  %v1907_v17 = vpop.f32.mrf.mxu0  ;;  %v1016_v39 = vadd.f32 %v1819_v51, %v2534_v4 }
 0x130   : > { %v1751_v42 = vpack.c.bf16 %v1270_v12, %v1269_v11  ;;  %v1908_v19 = vadd.f32 %v1907_v17, %v1906_v34  ;;  %v1232_v36 = vadd.f32 %v1231_v9, %v1152_v13  ;;  %v1091_v16 = vadd.f32 %v1868_v48, %v1011_v37 }
 0x131   : > { %v1236_v20 = vpop.f32.mrf.mxu1  ;;  %v1909_v21 = vpop.f32.mrf.mxu0  ;;  %v1822_v17 = vadd.f32 %v2519_v61, %v2515_v59  ;;  %v1825_v59 = vadd.f32 %v2527_v1, %v2523_v63 }
 0x132   : > { %1752 = vst [vmem:[%s2550_s12] sm:$0xff] %v1751_v42   ;;  %v1155_v38 = vadd.f32 %v1908_v19, %v1075_v15  ;;  %v1271_v26 = vmax.f32 %v1232_v36, 0.0 }
 0x133   : > { %v1239_v22 = vpop.f32.mrf.mxu1  ;;  %v1910_v44 = vpop.f32.mrf.mxu0  ;;  %v1019_v36 = vadd.f32 %v1822_v17, %v2534_v4 }
 0x134   : > { %v1235_v5 = vadd.f32 %v1234_v14, %v1155_v38  ;;  %v1911_v40 = vadd.f32 %v1910_v44, %v1909_v21 }
 0x135   : > { %v1241_v43 = vpop.f32.mrf.mxu1  ;;  %v1912_v24 = vpop.f32.mrf.mxu0 }
 0x136   : > { %v1272_v27 = vmax.f32 %v1235_v5, 0.0  ;;  %v1160_v29 = vadd.f32 %v1911_v40, %v1080_v46  ;;  %v1099_v43 = vadd.f32 %v1874_v56, %v1019_v36 }
 0x137   : > { %v1242_v6 = vpop.f32.mrf.mxu1  ;;  %v1913_v9 = vpop.f32.mrf.mxu0 }
 0x138   : > { %v1756_v49 = vpack.c.bf16 %v1272_v27, %v1271_v26  ;;  %v1914_v33 = vadd.f32 %v1913_v9, %v1912_v24  ;;  %v1240_v45 = vadd.f32 %v1239_v22, %v1160_v29  ;;  %v1096_v22 = vadd.f32 %v1871_v55, %v1016_v39 }
 0x139   : > { %v1244_v28 = vpop.f32.mrf.mxu1  ;;  %v1915_v30 = vpop.f32.mrf.mxu0  ;;  %v1024_v24 = vadd.f32 %v1825_v59, %v2534_v4  ;;  %v1877_v26 = vadd.f32 %v2529_v3, %v2525_v0 }
 0x13a   : > { %1773 = vst [vmem:[%s2550_s12 + $0x8] sm:$0xff] %v1756_v49   ;;  %v1163_v47 = vadd.f32 %v1914_v33, %v1083_v7  ;;  %v1273_v12 = vmax.f32 %v1240_v45, 0.0 }
 0x13b   : > { %v1247_v35 = vpop.f32.mrf.mxu1  ;;  %v1916_v10 = vpop.f32.mrf.mxu0  ;;  %v1104_v8 = vadd.f32 %v1877_v26, %v1024_v24 }
 0x13c   : > { %v1243_v53 = vadd.f32 %v1242_v6, %v1163_v47  ;;  %v1917_v34 = vadd.f32 %v1916_v10, %v1915_v30 }
 0x13d   : > { %v1249_v11 = vpop.f32.mrf.mxu1  ;;  %v1918_v50 = vpop.f32.mrf.mxu0 }
 0x13e   : > { %v1274_v13 = vmax.f32 %v1243_v53, 0.0  ;;  %v1168_v14 = vadd.f32 %v1917_v34, %v1088_v32 }
 0x13f   : > { %v1250_v15 = vpop.f32.mrf.mxu1  ;;  %v1919_v18 = vpop.f32.mrf.mxu0 }
 0x140   : > { %v1761_v57 = vpack.c.bf16 %v1274_v13, %v1273_v12  ;;  %v1920_v42 = vadd.f32 %v1919_v18, %v1918_v50  ;;  %v1248_v52 = vadd.f32 %v1247_v35, %v1168_v14 }
 0x141   : > { %v1252_v19 = vpop.f32.mrf.mxu1  ;;  %v1921_v20 = vpop.f32.mrf.mxu0 }
 0x142   : > { %1774 = vst [vmem:[%s2550_s12 + $0x10] sm:$0xff] %v1761_v57   ;;  %v1171_v54 = vadd.f32 %v1920_v42, %v1091_v16  ;;  %v1275_v46 = vmax.f32 %v1248_v52, 0.0 }
 0x143   : > { %v1255_v21 = vpop.f32.mrf.mxu1  ;;  %v1922_v38 = vpop.f32.mrf.mxu0 }
 0x144   : > { %v1251_v61 = vadd.f32 %v1250_v15, %v1171_v54  ;;  %v1923_v23 = vadd.f32 %v1922_v38, %v1921_v20 }
 0x145   : > { %v1257_v44 = vpop.f32.mrf.mxu1  ;;  %v1924_v58 = vpop.f32.mrf.mxu0 }
 0x146   : > { %v1276_v25 = vmax.f32 %v1251_v61, 0.0  ;;  %v1176_v5 = vadd.f32 %v1923_v23, %v1096_v22 }
 0x147   : > { %v1258_v40 = vpop.f32.mrf.mxu1  ;;  %v1925_v2 = vpop.f32.mrf.mxu0 }
 0x148   : > { %v1766_v63 = vpack.c.bf16 %v1276_v25, %v1275_v46  ;;  %v1926_v1 = vadd.f32 %v1925_v2, %v1924_v58  ;;  %v1256_v6 = vadd.f32 %v1255_v21, %v1176_v5 }
 0x149   : > { %v1260_v27 = vpop.f32.mrf.mxu1  ;;  %v1927_v29 = vpop.f32.mrf.mxu0 }
 0x14a   : > { %1775 = vst [vmem:[%s2550_s12 + $0x18] sm:$0xff] %v1766_v63   ;;  %v1179_v7 = vadd.f32 %v1926_v1, %v1099_v43  ;;  %v1277_v4 = vmax.f32 %v1256_v6, 0.0 }
 0x14b   : > { %v1263_v60 = vpop.f32.mrf.mxu1  ;;  %v1928_v62 = vpop.f32.mrf.mxu0 }
 0x14c   : > { %v1259_v9 = vadd.f32 %v1258_v40, %v1179_v7  ;;  %v1929_v31 = vadd.f32 %v1928_v62, %v1927_v29 }
 0x14d   : > { %v1265_v41 = vpop.f32.mrf.mxu1  ;;  %v1930_v49 = vpop.f32.mrf.mxu0 }
 0x14e   : > { %v1278_v33 = vmax.f32 %v1259_v9, 0.0  ;;  %v1184_v28 = vadd.f32 %v1929_v31, %v1104_v8 }
 0x14f   : > { %v1266_v0 = vpop.f32.mrf.mxu1  ;;  %v1931_v3 = vpop.f32.mrf.mxu0 }
 0x150   : > { %v1771_v30 = vpack.c.bf16 %v1278_v33, %v1277_v4  ;;  %v1264_v45 = vadd.f32 %v1263_v60, %v1184_v28 }
 0x151   : > { %v1267_v47 = vpop.f32.mrf.mxu1 }
 0x152   : > { %1776 = vst [vmem:[%s2550_s12 + $0x20] sm:$0xff] %v1771_v30   ;;  %v1279_v35 = vmax.f32 %v1264_v45, 0.0  ;;  %1342 = sbr.rel (!%p2227_p4) target bundleno = 404 (0x194), region = 36 }
 0x154   : > { %v1746_v37 = vpack.c.bf16 %v1279_v35, %v1279_v35 }
 0x156   : > { %1335 = vst [vmem:[%s2550_s12 + $0x28] sm:$0xf] %v1746_v37 }
 0x157   : > { %s2657_s25 = smov (!%p1345_p8, %s1344_s25), 11 }
 0x158   : > { %s1723_s4 = sshll.u32 %s2657_s25, 6 }
 0x159   : > { %p1726_p9 = scmp.eq.s32.totalorder %s1723_s4, 0 }
 0x15a   : > { %2089 = sdivrem.u32 (!%p1726_p9), %s2657_s25, 11 }
 0x15b   : > { %1353 = sbr.rel (%p1726_p9) target bundleno = 404 (0x194), region = 40 }
 0x163   : > { %s2599_s20 = spop.drf %2089 }
 0x164   : > { %p1727_p10 = scmp.le.s32.totalorder %s2599_s20, 0 }
 0x165   : > { %s2650_s15 = smov (!%p1727_p10), %s2593_s29  ;;  %s2651_s30 = smov (!%p1727_p10), %s2550_s12 }
 0x166   : > { %1550 = sbr.rel (%p1727_p10) target bundleno = 379 (0x17b), region = 112  ;;  %s2608_s5 = smov (!%p1727_p10), 0  }
 0x167   : > { %s2610_s6 = smov (!%p1727_p10), 0  }
 0x16b LB: >> { %v1371_v10 = vld [vmem:[%s2155_s30] sm:$0xf]  ;;  %v1373_v32 = vld [vmem:[%s2155_s30 + $0x4] sm:$0xf]  ;;  %v1375_v51 = vld [vmem:[%s2155_s30 + $0x8] sm:$0xf]  ;;  %s2163_s6 = sphi %s2610_s6, %s1365_s6   ;;  %s2159_s5 = sphi %s2608_s5, %s2652_s5   ;;  %s2155_s30 = sphi %s2651_s30, %s1398_s30   ;;  %s2151_s15 = sphi %s2650_s15, %s1399_s15  }
 0x16c   : >> { %1372 = vst [vmem:[%s2151_s15] sm:$0xf] %v1371_v10  ;;  %1374 = vst [vmem:[%s2151_s15 + $0x4] sm:$0xf] %v1373_v32  ;;  %v1377_v53 = vld [vmem:[%s2155_s30 + $0xc] sm:$0xf]  ;;  %s1393_s7 = sadd.s32 1, %s2159_s5 }
 0x16d   : >> { %1376 = vst [vmem:[%s2151_s15 + $0x8] sm:$0xf] %v1375_v51  ;;  %v1379_v34 = vld [vmem:[%s2155_s30 + $0x10] sm:$0xf]  ;;  %v1381_v11 = vld [vmem:[%s2155_s30 + $0x14] sm:$0xf]  ;;  %p1394_p11 = scmp.ge.s32.totalorder %s1393_s7, %s2599_s20 }
 0x16e   : >> { %1378 = vst [vmem:[%s2151_s15 + $0xc] sm:$0xf] %v1377_v53  ;;  %1380 = vst [vmem:[%s2151_s15 + $0x10] sm:$0xf] %v1379_v34  ;;  %v1383_v48 = vld [vmem:[%s2155_s30 + $0x18] sm:$0xf] }
 0x16f   : >> { %1382 = vst [vmem:[%s2151_s15 + $0x14] sm:$0xf] %v1381_v11  ;;  %v1385_v50 = vld [vmem:[%s2155_s30 + $0x1c] sm:$0xf]  ;;  %v1387_v12 = vld [vmem:[%s2155_s30 + $0x20] sm:$0xf] }
 0x170   : >> { %1384 = vst [vmem:[%s2151_s15 + $0x18] sm:$0xf] %v1383_v48  ;;  %1386 = vst [vmem:[%s2151_s15 + $0x1c] sm:$0xf] %v1385_v50  ;;  %v1389_v13 = vld [vmem:[%s2155_s30 + $0x24] sm:$0xf] }
 0x171   : >> { %1388 = vst [vmem:[%s2151_s15 + $0x20] sm:$0xf] %v1387_v12  ;;  %v1391_v14 = vld [vmem:[%s2155_s30 + $0x28] sm:$0xf]  ;;  %1390 = vst [vmem:[%s2151_s15 + $0x24] sm:$0xf] %v1389_v13 }
 0x172   : >> { %1392 = vst [vmem:[%s2151_s15 + $0x28] sm:$0xf] %v1391_v14  ;;  %s2659_s7 = smov (%p1394_p11, %s1393_s7), 0  ;;  %s1365_s6 = sadd.s32 1, %s2163_s6  }
 0x173   : >> { %s1396_s8 = smul.u32 44, %s2659_s7  ;;  %p1364_p12 = scmp.ge.s32.totalorder %s1365_s6, %s2599_s20 }
 0x174   : >> { %s2652_s5 = smov %s2659_s7 }
 0x175   : >> { %s1398_s30 = scalar_lea.vmem %s2550_s12, %s1396_s8 [#allocation2]   ;;  %s1399_s15 = scalar_lea.vmem %s2593_s29, %s1396_s8  }
 0x176   : > { %1367 = sbr.rel (!%p1364_p12) target bundleno = 363 (0x16b), region = 118 }
 0x17b PF: > { %2091 = sdivrem.u32 %s2657_s25, 11 }
 0x17c   : > { %s1728_s9 = smul.u32 44, %s2599_s20 }
 0x17e   : > { %s1404_s10 = scalar_lea.vmem %s2550_s12, %s1728_s9 [#allocation2]   ;;  %s1406_s11 = scalar_lea.vmem %s2593_s29, %s1728_s9  }
 0x184   : > { %s2092_s14 = spop.drf %2091 }
 0x185   : > { %p1730_p13 = scmp.le.s32.totalorder %s2092_s14, 0 }
 0x186   : > { %s2165_s17 = smov (!%p1730_p13), %s1406_s11   ;;  %s2169_s18 = smov (!%p1730_p13), %s1404_s10  }
 0x187   : > { %1564 = sbr.rel (%p1730_p13) target bundleno = 404 (0x194), region = 123  ;;  %s2173_s24 = smov (!%p1730_p13), 0  }
 0x188   : > { %s2177_s21 = smov (!%p1730_p13), 0  }
 0x18c LB: >> { %v1416_v15 = vld [vmem:[%s2171_s18] sm:$0xf]  ;;  %s1418_s22 = sadd.s32 1, %s2175_s24  ;;  %s1410_s21 = sadd.s32 1, %s2179_s21   ;;  %s2179_s21 = sphi %s2177_s21, %s1410_s21   ;;  %s2175_s24 = sphi %s2173_s24, %s2174_s24   ;;  %s2171_s18 = sphi %s2169_s18, %s1423_s18   ;;  %s2167_s17 = sphi %s2165_s17, %s1424_s17  }
 0x18d   : >> { %1417 = vst [vmem:[%s2167_s17] sm:$0xf] %v1416_v15  ;;  %p1419_p0 = scmp.ge.s32.totalorder %s1418_s22, %s2092_s14  ;;  %p1409_p1 = scmp.ge.s32.totalorder %s1410_s21, %s2092_s14 }
 0x18f   : >> { %s2661_s22 = smov (%p1419_p0, %s1418_s22), 0  ;;  %1412 = sbr.rel (!%p1409_p1) target bundleno = 396 (0x18c), region = 129 }
 0x190   : >> { %s1731_s23 = sshll.u32 %s2661_s22, 2  ;;  %s2174_s24 = smov %s2661_s22  }
 0x191   : >> { %s1423_s18 = scalar_lea.vmem %s1404_s10, %s1731_s23 [#allocation2]   ;;  %s1424_s17 = scalar_lea.vmem %s1406_s11, %s1731_s23  }
 0x194 PF: > { %p10_p2 = scmp.ge.s32.totalorder %s2217_s16, 4   ;;  %s2653_s12 = smov %s2143_s13 }
 0x195   : > { %s2654_s13 = smov %s2225_s19  ;;  %s2655_s14 = smov %s2217_s16 }
 0x196   :  { %12 = sbr.rel (!%p10_p2) target bundleno = 2 (0x2), region = 140 }

// kernel: network_forward.8
= control target key start
LH: loop header
LB: loop body
LE: loop exit
PB: predicated region body
PF: predicated region fallthrough
CT: control target
= control target key end

     0   :  { %s1326_s12 = smov 0   ;;  %s1328_s13 = smov 0   ;;  %s1541_s0 = inlined_call_operand.vmem [shape: bf16[98,432], index: 0, kind: input, shape index: {}]   ;;  %s1542_s1 = inlined_call_operand.vmem [shape: bf16[432,128], index: 1, kind: input, shape index: {}]   ;;  %s1543_s2 = inlined_call_operand.vmem [shape: f32[1,128], index: 2, kind: input, shape index: {}]   ;;  %s1544_s3 = inlined_call_operand.vmem [shape: bf16[98,128], index: 3, kind: output, shape index: {}]  }
   0x1   :  { %s1330_s14 = smov 0  }
   0x2 LB: > { %s1339_s15 = sadd.s32 4294967295, %s1271_s14   ;;  %s1341_s16 = sadd.s32 1, %s1271_s14   ;;  %s1271_s14 = sphi %s1330_s14, %s1551_s14   ;;  %s1267_s13 = sphi %s1328_s13, %s1550_s13   ;;  %s1263_s12 = sphi %s1326_s12, %s1549_s12  }
   0x3   : > { %s85_s17 = ssub.s32 %s1271_s14, %s1341_s16  ;;  %s88_s18 = sadd.s32 1, %s1267_s13 }
   0x4   : > { %p86_p0 = scmp.eq.s32.totalorder %s85_s17, 0  ;;  %p98_p1 = scmp.ne.s32.totalorder %s1267_s13, %s1263_s12 }
   0x5   : > { %p99_p2 = scmp.eq.s32.totalorder %s1339_s15, 1  ;;  %p937_p3 = scmp.ge.s32.totalorder %s1271_s14, 1 }
   0x6   : > { %s1349_s19 = scalar_select %p86_p0, %s1267_s13, %s88_s18  }
   0x7   : > { %p1351_p4 = por %p99_p2, %p98_p1  ;;  %p149_p5 = scmp.lt.s32.totalorder %s1271_s14, 3 }
   0x9   : > { %p150_p6 = pnand %p937_p3, %p149_p5 }
   0xa   : > { %s1382_s10 = smul.u32 (!%p150_p6), 7, %s1339_s15  ;;  %s175_s22 = sand.u32 (!%p150_p6), 1, %s1263_s12  }
   0xb   : > { %153 = sbr.rel (%p150_p6) target bundleno = 343 (0x157), region = 32 }
   0xc   : > { %p184_p7 = scmp.lt.s32.totalorder (!%p150_p6), %s1382_s10, 12  ;;  %s1073_s23 = smul.u32 (!%p150_p6), 28, %s175_s22 }
   0xe   : > { %s1479_s12 = scalar_lea.vmem (!%p150_p6), [#allocation2], %s1073_s23  }
  0x10   : > { %v1164_v0 = vld [vmem:[%s1542_s1 + $0x78] sm:$0xff]   ;;  %v1305_v1 = vmov 0   ;;  %v1167_v4 = vld [vmem:[%s1542_s1 + $0x70] sm:$0xff]   ;;  %v1170_v7 = vld [vmem:[%s1542_s1 + $0x68] sm:$0xff]   ;;  %s185_s29 = scalar_select %p184_p7, %s1382_s10, 12  ;;  %vm508_vm0 = vcmask 392192  }
  0x11   : > { %585 = vmatprep.subr.bf16.mxu1 %v1305_v1  ;;  %v1165_v2 = vld [vmem:[%s1542_s1 + $0xb8] sm:$0xff]   ;;  %1033 = vmatprep.subr.bf16.mxu0 %v1164_v0  ;;  %v1168_v5 = vld [vmem:[%s1542_s1 + $0xb0] sm:$0xff]   ;;  %v1171_v8 = vld [vmem:[%s1542_s1 + $0xa8] sm:$0xff]   ;;  %s700_s24 = ssub.s32 (%p1351_p4), 13, %s1382_s10 }
  0x12   : > { %v1166_v3 = vld [vmem:[%s1542_s1 + $0x38] sm:$0xff]   ;;  %586 = vmatpush1.bf16.msra.mxu1 %v1165_v2  ;;  %v1169_v6 = vld [vmem:[%s1542_s1 + $0x30] sm:$0xff]   ;;  %v1172_v9 = vld [vmem:[%s1542_s1 + $0x28] sm:$0xff]   ;;  %s1007_s9 = sshll.u32 %s185_s29, 4  ;;  %p701_p8 = scmp.lt.s32.totalorder (%p1351_p4), %s700_s24, 7 }
  0x13   : > { %1034 = vmatpush3.bf16.msra.mxu0 %v1166_v3  ;;  %587 = vmatprep.subr.bf16.mxu1 %v1305_v1  ;;  %v1173_v10 = vld [vmem:[%s1542_s1 + $0x60] sm:$0xff]   ;;  %v1176_v13 = vld [vmem:[%s1542_s1 + $0x58] sm:$0xff]   ;;  %v1179_v16 = vld [vmem:[%s1542_s1 + $0x50] sm:$0xff]   ;;  %s1429_s25 = scalar_lea.vmem %s1541_s0, %s1007_s9 }
  0x14   : > { %1035 = vmatprep.subr.bf16.mxu0 %v1167_v4  ;;  %v1174_v11 = vld [vmem:[%s1542_s1 + $0xa0] sm:$0xff]   ;;  %v1177_v14 = vld [vmem:[%s1542_s1 + $0x98] sm:$0xff]   ;;  %v1180_v17 = vld [vmem:[%s1542_s1 + $0x90] sm:$0xff]  }
  0x15   : > { %v1175_v12 = vld [vmem:[%s1542_s1 + $0x20] sm:$0xff]   ;;  %v1178_v15 = vld [vmem:[%s1542_s1 + $0x18] sm:$0xff]   ;;  %v1181_v18 = vld [vmem:[%s1542_s1 + $0x10] sm:$0xff]  }
  0x16   : > { %588 = vmatpush1.bf16.msra.mxu1 %v1168_v5  ;;  %v1182_v19 = vld [vmem:[%s1542_s1 + $0x48] sm:$0xff]   ;;  %v1185_v22 = vld [vmem:[%s1542_s1 + $0x40] sm:$0xff]   ;;  %v1191_v28 = vld [vmem:[%s1542_s1 + $0xd0] sm:$0xff]  }
  0x17   : > { %1036 = vmatpush3.bf16.msra.mxu0 %v1169_v6  ;;  %589 = vmatprep.subr.bf16.mxu1 %v1305_v1  ;;  %v1183_v20 = vld [vmem:[%s1542_s1 + $0x88] sm:$0xff]   ;;  %v1190_v23 = vld [vmem:[%s1429_s25 + $0x4] ss:$16 sps:$4 sm:$0xff]   ;;  %v1188_v26 = vld [vmem:[%s1429_s25] ss:$16 sps:$4 sm:$0xff]  }
  0x18   : > { %1037 = vmatprep.subr.bf16.mxu0 %v1170_v7  ;;  %v1184_v21 = vld [vmem:[%s1542_s1 + $0x8] sm:$0xff]   ;;  %v1186_v24 = vld [vmem:[%s1542_s1 + $0x80] sm:$0xff]   ;;  %553 = vmatprep.mubr.bf16.mxu0 %v1190_v23 }
  0x19   : > { %v1187_v25 = vld [vmem:[%s1542_s1] sm:$0xff]   ;;  %v1199_v27 = vld [vmem:[%s1429_s25 + $0xc] ss:$16 sps:$4 sm:$0xff]   ;;  %v1197_v34 = vld [vmem:[%s1429_s25 + $0x8] ss:$16 sps:$4 sm:$0xff]  }
  0x1a   : > { %590 = vmatpush1.bf16.msra.mxu1 %v1171_v8  ;;  %v1193_v29 = vld [vmem:[%s1429_s25 + $0x24] ss:$16 sps:$4 sm:$0xff]   ;;  %984 = vmatprep.mubr.msk.bf16.mxu1 %vm508_vm0, %v1199_v27  ;;  %v1192_v30 = vld [vmem:[%s1542_s1 + $0xc8] sm:$0xff]   ;;  %v1195_v31 = vld [vmem:[%s1429_s25 + $0x20] ss:$16 sps:$4 sm:$0xff]  }
  0x1b   : > { %1038 = vmatpush3.bf16.msra.mxu0 %v1172_v9  ;;  %591 = vmatprep.subr.bf16.mxu1 %v1305_v1  ;;  %v1196_v32 = vld [vmem:[%s1542_s1 + $0xc0] sm:$0xff]   ;;  %v1203_v35 = vld [vmem:[%s1429_s25 + $0x2c] ss:$16 sps:$4 sm:$0xff]   ;;  %v1205_v39 = vld [vmem:[%s1429_s25 + $0x28] ss:$16 sps:$4 sm:$0xff]  }
  0x1c   : > { %1039 = vmatprep.subr.bf16.mxu0 %v1173_v10  ;;  %v1200_v33 = vld [vmem:[%s1429_s25 + $0x44] ss:$16 sps:$4 sm:$0xff]   ;;  %v1202_v37 = vld [vmem:[%s1429_s25 + $0x40] ss:$16 sps:$4 sm:$0xff]   ;;  %v1208_v40 = vld [vmem:[%s1429_s25 + $0x4c] ss:$16 sps:$4 sm:$0xff]  }
  0x1d   : > { %v213_v36 = vld [vmem:[%s1429_s25 + $0x60] sm:$0xff]  ;;  %v214_v42 = vld [vmem:[%s1429_s25 + $0x68] sm:$0xff] }
  0x1e   : > { %592 = vmatpush1.bf16.msra.mxu1 %v1174_v11  ;;  %v954_v38 = vcombine.high %v213_v36, %v213_v36  ;;  %v953_v41 = vcombine.low %v213_v36, %v213_v36  ;;  %v1210_v43 = vld [vmem:[%s1429_s25 + $0x48] ss:$16 sps:$4 sm:$0xff]   ;;  %v956_v44 = vcombine.high %v214_v42, %v214_v42  ;;  %v955_v45 = vcombine.low %v214_v42, %v214_v42  ;;  %v940_v52 = vld [vmem:[%s1543_s2] ss:$0 sm:$0xff]  ;;  %s1015_s25 = smul.u32 (%p1351_p4), 28, %s1339_s15 }
  0x1f   : > { %1040 = vmatpush3.bf16.msra.mxu0 %v1175_v12  ;;  %593 = vmatprep.subr.bf16.mxu1 %v1305_v1 }
  0x20   : > { %1041 = vmatprep.subr.bf16.mxu0 %v1176_v13  ;;  %s1492_s28 = scalar_lea.vmem (%p1351_p4), %s1544_s3, %s1015_s25  }
  0x22   : > { %594 = vmatpush1.bf16.msra.mxu1 %v1177_v14 }
  0x23   : > { %1042 = vmatpush3.bf16.msra.mxu0 %v1178_v15  ;;  %595 = vmatprep.subr.bf16.mxu1 %v1305_v1 }
  0x24   : > { %1043 = vmatprep.subr.bf16.mxu0 %v1179_v16 }
  0x26   : > { %596 = vmatpush1.bf16.msra.mxu1 %v1180_v17 }
  0x27   : > { %1044 = vmatpush3.bf16.msra.mxu0 %v1181_v18  ;;  %597 = vmatprep.subr.bf16.mxu1 %v1305_v1 }
  0x28   : > { %1045 = vmatprep.subr.bf16.mxu0 %v1182_v19 }
  0x2a   : > { %598 = vmatpush1.bf16.msra.mxu1 %v1183_v20 }
  0x2b   : > { %1046 = vmatpush3.bf16.msra.mxu0 %v1184_v21  ;;  %599 = vmatprep.subr.bf16.mxu1 %v1305_v1 }
  0x2c   : > { %1047 = vmatprep.subr.bf16.mxu0 %v1185_v22 }
  0x2e   : > { %600 = vmatpush1.bf16.msra.mxu1 %v1186_v24 }
  0x2f   : > { %1048 = vmatpush3.bf16.msra.mxu0 %v1187_v25  ;;  %611 = vmatprep.subr.bf16.mxu1 %v1305_v1 }
  0x32   : > { %554 = vmatmul.mubr.bf16.vlgmr.msra.gmra.mxu0 %v1188_v26  ;;  %612 = vmatpush2.bf16.msra.mxu1 %v1191_v28 }
  0x33   : > { %613 = vmatprep.subr.bf16.mxu1 %v1305_v1  ;;  %561 = vmatprep.mubr.bf16.mxu0 %v1193_v29 }
  0x36   : > { %614 = vmatpush2.bf16.msra.mxu1 %v1192_v30 }
  0x37   : > { %615 = vmatprep.subr.bf16.mxu1 %v1305_v1 }
  0x3a   : > { %562 = vmatmul.mubr.bf16.gmra.mxu0 %v1195_v31  ;;  %616 = vmatpush2.bf16.msra.mxu1 %v1196_v32 }
  0x3b   : > { %569 = vmatprep.mubr.bf16.mxu0 %v1200_v33 }
  0x3d   : > { %618 = vmatmul.mubr.bf16.vlgmr.msra.gmra.mxu1 %v1197_v34 }
  0x3e   : > { %985 = vmatprep.mubr.msk.bf16.mxu1 %vm508_vm0, %v1203_v35 }
  0x42   : > { %570 = vmatmul.mubr.bf16.gmra.mxu0 %v1202_v37 }
  0x43   : > { %577 = vmatprep.mubr.bf16.mxu0 %v954_v38 }
  0x45   : > { %626 = vmatmul.mubr.bf16.gmra.mxu1 %v1205_v39 }
  0x46   : > { %986 = vmatprep.mubr.msk.bf16.mxu1 %vm508_vm0, %v1208_v40 }
  0x4a   : > { %578 = vmatmul.mubr.bf16.gmra.mxu0 %v953_v41 }
  0x4d   : > { %634 = vmatmul.mubr.bf16.gmra.mxu1 %v1210_v43 }
  0x4e   : > { %987 = vmatprep.mubr.msk.bf16.mxu1 %vm508_vm0, %v956_v44 }
  0x55   : > { %642 = vmatmul.mubr.bf16.gmra.mxu1 %v955_v45 }
  0xf2   : > { %v1049_v46 = vpop.f32.mrf.mxu0 }
  0xf4   : > { %v1050_v47 = vpop.f32.mrf.mxu0 }
  0xf5   : > { %v1051_v50 = vadd.f32 %v1050_v47, %v1049_v46 }
  0xf6   : > { %v1052_v48 = vpop.f32.mrf.mxu0 }
  0xf7   : > { %v556_v56 = vadd.f32 %v1051_v50, %v940_v52 }
  0xf8   : > { %v1053_v49 = vpop.f32.mrf.mxu0 }
  0xf9   : > { %v1054_v53 = vadd.f32 %v1053_v49, %v1052_v48 }
  0xfa   : > { %v1055_v51 = vpop.f32.mrf.mxu0 }
  0xfb   : > { %v559_v61 = vadd.f32 %v1054_v53, %v940_v52 }
  0xfc   : > { %v1056_v54 = vpop.f32.mrf.mxu0 }
  0xfd   : > { %v619_v55 = vpop.f32.mrf.mxu1  ;;  %v1057_v63 = vadd.f32 %v1056_v54, %v1055_v51 }
  0xfe   : > { %v1058_v57 = vpop.f32.mrf.mxu0  ;;  %v620_v59 = vadd.f32 %v619_v55, %v556_v56 }
  0xff   : > { %v621_v58 = vpop.f32.mrf.mxu1  ;;  %v564_v9 = vadd.f32 %v1057_v63, %v940_v52 }
 0x100   : > { %v1059_v60 = vpop.f32.mrf.mxu0  ;;  %v649_v3 = vmax.f32 %v620_v59, 0.0 }
 0x101   : > { %v622_v62 = vpop.f32.mrf.mxu1  ;;  %v1060_v4 = vadd.f32 %v1059_v60, %v1058_v57 }
 0x102   : > { %v623_v0 = vadd.f32 %v622_v62, %v559_v61  ;;  %v1061_v1 = vpop.f32.mrf.mxu0 }
 0x103   : > { %v624_v2 = vpop.f32.mrf.mxu1  ;;  %v567_v14 = vadd.f32 %v1060_v4, %v940_v52 }
 0x104   : > { %v650_v5 = vmax.f32 %v623_v0, 0.0  ;;  %v1062_v6 = vpop.f32.mrf.mxu0 }
 0x105   : > { %v627_v7 = vpop.f32.mrf.mxu1  ;;  %v1063_v16 = vadd.f32 %v1062_v6, %v1061_v1 }
 0x106   : > { %v1019_v8 = vpack.c.bf16 %v650_v5, %v649_v3  ;;  %v1064_v10 = vpop.f32.mrf.mxu0  ;;  %v628_v12 = vadd.f32 %v627_v7, %v564_v9 }
 0x107   : > { %v629_v11 = vpop.f32.mrf.mxu1  ;;  %v572_v26 = vadd.f32 %v1063_v16, %v940_v52 }
 0x108   : > { %1020 = vst [vmem:[%s1479_s12] sm:$0xff] %v1019_v8   ;;  %v1065_v13 = vpop.f32.mrf.mxu0  ;;  %v651_v20 = vmax.f32 %v628_v12, 0.0 }
 0x109   : > { %v630_v15 = vpop.f32.mrf.mxu1  ;;  %v1066_v21 = vadd.f32 %v1065_v13, %v1064_v10 }
 0x10a   : > { %v631_v17 = vadd.f32 %v630_v15, %v567_v14  ;;  %v1067_v18 = vpop.f32.mrf.mxu0 }
 0x10b   : > { %v632_v19 = vpop.f32.mrf.mxu1  ;;  %v575_v32 = vadd.f32 %v1066_v21, %v940_v52 }
 0x10c   : > { %v652_v22 = vmax.f32 %v631_v17, 0.0  ;;  %v1068_v23 = vpop.f32.mrf.mxu0 }
 0x10d   : > { %v635_v24 = vpop.f32.mrf.mxu1  ;;  %v1069_v29 = vadd.f32 %v1068_v23, %v1067_v18 }
 0x10e   : > { %v1024_v25 = vpack.c.bf16 %v652_v22, %v651_v20  ;;  %v1070_v27 = vpop.f32.mrf.mxu0  ;;  %v636_v30 = vadd.f32 %v635_v24, %v572_v26 }
 0x10f   : > { %v637_v28 = vpop.f32.mrf.mxu1  ;;  %v580_v38 = vadd.f32 %v1069_v29, %v940_v52 }
 0x110   : > { %1031 = vst [vmem:[%s1479_s12 + $0x8] sm:$0xff] %v1024_v25   ;;  %v1071_v31 = vpop.f32.mrf.mxu0  ;;  %v653_v36 = vmax.f32 %v636_v30, 0.0 }
 0x111   : > { %v638_v33 = vpop.f32.mrf.mxu1 }
 0x112   : > { %v639_v34 = vadd.f32 %v638_v33, %v575_v32 }
 0x113   : > { %v640_v35 = vpop.f32.mrf.mxu1 }
 0x114   : > { %v654_v37 = vmax.f32 %v639_v34, 0.0 }
 0x115   : > { %v643_v39 = vpop.f32.mrf.mxu1 }
 0x116   : > { %v1029_v40 = vpack.c.bf16 %v654_v37, %v653_v36  ;;  %v644_v41 = vadd.f32 %v643_v39, %v580_v38 }
 0x117   : > { %v645_v42 = vpop.f32.mrf.mxu1 }
 0x118   : > { %1032 = vst [vmem:[%s1479_s12 + $0x10] sm:$0xff] %v1029_v40   ;;  %v655_v43 = vmax.f32 %v644_v41, 0.0  ;;  %698 = sbr.rel (!%p1351_p4) target bundleno = 343 (0x157), region = 36 }
 0x119   : > { %v646_v44 = vpop.f32.mrf.mxu1 }
 0x11a   : > { %v1014_v45 = vpack.c.bf16 %v655_v43, %v655_v43 }
 0x11b   : > { %v647_v46 = vpop.f32.mrf.mxu1 }
 0x11c   : > { %691 = vst [vmem:[%s1479_s12 + $0x18] sm:$0xf] %v1014_v45 }
 0x11d   : > { %s1553_s24 = smov (!%p701_p8, %s700_s24), 7 }
 0x11e   : > { %s995_s29 = sshll.u32 %s1553_s24, 6 }
 0x11f   : > { %p998_p9 = scmp.eq.s32.totalorder %s995_s29, 0 }
 0x120   : > { %1213 = sdivrem.u32 (!%p998_p9), %s1553_s24, 7 }
 0x121   : > { %709 = sbr.rel (%p998_p9) target bundleno = 343 (0x157), region = 40 }
 0x129   : > { %s1498_s20 = spop.drf %1213 }
 0x12a   : > { %p999_p10 = scmp.le.s32.totalorder %s1498_s20, 0 }
 0x12b   : > { %s1546_s15 = smov (!%p999_p10), %s1492_s28  ;;  %s1547_s10 = smov (!%p999_p10), %s1479_s12 }
 0x12c   : > { %890 = sbr.rel (%p999_p10) target bundleno = 318 (0x13e), region = 112  ;;  %s1507_s30 = smov (!%p999_p10), 0  }
 0x12d   : > { %s1509_s4 = smov (!%p999_p10), 0  }
 0x131 LB: >> { %v727_v47 = vld [vmem:[%s1279_s10] sm:$0xf]  ;;  %v729_v48 = vld [vmem:[%s1279_s10 + $0x4] sm:$0xf]  ;;  %v731_v49 = vld [vmem:[%s1279_s10 + $0x8] sm:$0xf]  ;;  %s1287_s4 = sphi %s1509_s4, %s721_s4   ;;  %s1283_s30 = sphi %s1507_s30, %s1548_s30   ;;  %s1279_s10 = sphi %s1547_s10, %s746_s10   ;;  %s1275_s15 = sphi %s1546_s15, %s747_s15  }
 0x132   : >> { %728 = vst [vmem:[%s1275_s15] sm:$0xf] %v727_v47  ;;  %730 = vst [vmem:[%s1275_s15 + $0x4] sm:$0xf] %v729_v48  ;;  %v733_v50 = vld [vmem:[%s1279_s10 + $0xc] sm:$0xf]  ;;  %s741_s5 = sadd.s32 1, %s1283_s30 }
 0x133   : >> { %732 = vst [vmem:[%s1275_s15 + $0x8] sm:$0xf] %v731_v49  ;;  %v735_v51 = vld [vmem:[%s1279_s10 + $0x10] sm:$0xf]  ;;  %v737_v52 = vld [vmem:[%s1279_s10 + $0x14] sm:$0xf]  ;;  %p742_p11 = scmp.ge.s32.totalorder %s741_s5, %s1498_s20 }
 0x134   : >> { %734 = vst [vmem:[%s1275_s15 + $0xc] sm:$0xf] %v733_v50  ;;  %736 = vst [vmem:[%s1275_s15 + $0x10] sm:$0xf] %v735_v51  ;;  %v739_v53 = vld [vmem:[%s1279_s10 + $0x18] sm:$0xf] }
 0x135   : >> { %738 = vst [vmem:[%s1275_s15 + $0x14] sm:$0xf] %v737_v52  ;;  %740 = vst [vmem:[%s1275_s15 + $0x18] sm:$0xf] %v739_v53  ;;  %s1555_s5 = smov (%p742_p11, %s741_s5), 0  ;;  %s721_s4 = sadd.s32 1, %s1287_s4  }
 0x136   : >> { %s744_s6 = smul.u32 28, %s1555_s5  ;;  %p720_p12 = scmp.ge.s32.totalorder %s721_s4, %s1498_s20 }
 0x137   : >> { %s1548_s30 = smov %s1555_s5 }
 0x138   : >> { %s746_s10 = scalar_lea.vmem %s1479_s12, %s744_s6 [#allocation2]   ;;  %s747_s15 = scalar_lea.vmem %s1492_s28, %s744_s6  }
 0x139   : > { %723 = sbr.rel (!%p720_p12) target bundleno = 305 (0x131), region = 118 }
 0x13e PF: > { %1215 = sdivrem.u32 %s1553_s24, 7 }
 0x13f   : > { %s1000_s7 = smul.u32 28, %s1498_s20 }
 0x141   : > { %s752_s8 = scalar_lea.vmem %s1479_s12, %s1000_s7 [#allocation2]   ;;  %s754_s9 = scalar_lea.vmem %s1492_s28, %s1000_s7  }
 0x147   : > { %s1216_s11 = spop.drf %1215 }
 0x148   : > { %p1002_p13 = scmp.le.s32.totalorder %s1216_s11, 0 }
 0x149   : > { %s1289_s14 = smov (!%p1002_p13), %s754_s9   ;;  %s1293_s17 = smov (!%p1002_p13), %s752_s8  }
 0x14a   : > { %904 = sbr.rel (%p1002_p13) target bundleno = 343 (0x157), region = 123  ;;  %s1297_s18 = smov (!%p1002_p13), 0  }
 0x14b   : > { %s1301_s21 = smov (!%p1002_p13), 0  }
 0x14f LB: >> { %v764_v54 = vld [vmem:[%s1295_s17] sm:$0xf]  ;;  %s766_s22 = sadd.s32 1, %s1299_s18  ;;  %s758_s21 = sadd.s32 1, %s1303_s21   ;;  %s1303_s21 = sphi %s1301_s21, %s758_s21   ;;  %s1299_s18 = sphi %s1297_s18, %s1298_s18   ;;  %s1295_s17 = sphi %s1293_s17, %s771_s17   ;;  %s1291_s14 = sphi %s1289_s14, %s772_s14  }
 0x150   : >> { %765 = vst [vmem:[%s1291_s14] sm:$0xf] %v764_v54  ;;  %p767_p0 = scmp.ge.s32.totalorder %s766_s22, %s1216_s11  ;;  %p757_p1 = scmp.ge.s32.totalorder %s758_s21, %s1216_s11 }
 0x152   : >> { %s1557_s22 = smov (%p767_p0, %s766_s22), 0  ;;  %760 = sbr.rel (!%p757_p1) target bundleno = 335 (0x14f), region = 129 }
 0x153   : >> { %s1003_s23 = sshll.u32 %s1557_s22, 2  ;;  %s1298_s18 = smov %s1557_s22  }
 0x154   : >> { %s771_s17 = scalar_lea.vmem %s752_s8, %s1003_s23 [#allocation2]   ;;  %s772_s14 = scalar_lea.vmem %s754_s9, %s1003_s23  }
 0x157 PF: > { %p10_p2 = scmp.ge.s32.totalorder %s1341_s16, 4   ;;  %s1549_s12 = smov %s1267_s13 }
 0x158   : > { %s1550_s13 = smov %s1349_s19  ;;  %s1551_s14 = smov %s1341_s16 }
 0x159   :  { %12 = sbr.rel (!%p10_p2) target bundleno = 2 (0x2), region = 140 }

// kernel: network_forward.9
= control target key start
LH: loop header
LB: loop body
LE: loop exit
PB: predicated region body
PF: predicated region fallthrough
CT: control target
= control target key end

     0   :  { %v426_v35 = vlaneseq  ;;  %v4542_v36 = vmov 1966171168   ;;  %s5932_s0 = inlined_call_operand.vmem [shape: bf16[2,3136], index: 0, kind: input, shape index: {}]   ;;  %s5933_s1 = inlined_call_operand.vmem [shape: bf16[3136,256], index: 1, kind: input, shape index: {}]   ;;  %s5934_s2 = inlined_call_operand.vmem [shape: f32[1,256], index: 2, kind: input, shape index: {}]   ;;  %s5935_s3 = inlined_call_operand.vmem [shape: bf16[256,128], index: 3, kind: input, shape index: {}]   ;;  %s5936_s4 = inlined_call_operand.vmem [shape: f32[1,128], index: 4, kind: input, shape index: {}]   ;;  %s5937_s5 = inlined_call_operand.vmem [shape: bf16[128,128], index: 5, kind: input, shape index: {}]   ;;  %s5938_s6 = inlined_call_operand.vmem [shape: f32[1,128], index: 6, kind: input, shape index: {}]   ;;  %s5939_s7 = inlined_call_operand.hbm [shape: f32[2,128], index: 7, kind: output, shape index: {}]  }
   0x1   :  { %v3905_v0 = vld [vmem:[%s5933_s1 + $0x74] ss:$8 sps:$4 sm:$0xff]   ;;  %v3907_v1 = vld [vmem:[%s5933_s1 + $0x70] ss:$8 sps:$4 sm:$0xff]   ;;  %v3911_v4 = vld [vmem:[%s5933_s1 + $0x64] ss:$8 sps:$4 sm:$0xff]   ;;  %v442_v37 = vunpack.c.l.s4 %v4542_v36 }
   0x2   :  { %2589 = vmatprep.subr.bf16.mxu0 %v3905_v0  ;;  %v3908_v2 = vld [vmem:[%s5933_s1 + $0x174] ss:$8 sps:$4 sm:$0xff]   ;;  %v3910_v3 = vld [vmem:[%s5933_s1 + $0x170] ss:$8 sps:$4 sm:$0xff]   ;;  %v3913_v5 = vld [vmem:[%s5933_s1 + $0x60] ss:$8 sps:$4 sm:$0xff]  }
   0x3   :  { %2590 = vmatpush1.bf16.msra.mxu0 %v3907_v1  ;;  %2630 = vmatprep.subr.bf16.mxu1 %v3908_v2  ;;  %v3914_v6 = vld [vmem:[%s5933_s1 + $0x164] ss:$8 sps:$4 sm:$0xff]   ;;  %v3916_v7 = vld [vmem:[%s5933_s1 + $0x160] ss:$8 sps:$4 sm:$0xff]   ;;  %v3917_v8 = vld [vmem:[%s5933_s1 + $0x54] ss:$8 sps:$4 sm:$0xff]   ;;  %v443_v43 = vunpack.c.0.s8 %v442_v37 }
   0x4   :  { %2631 = vmatpush1.bf16.msra.mxu1 %v3910_v3  ;;  %2591 = vmatprep.subr.bf16.mxu0 %v3911_v4  ;;  %v3919_v9 = vld [vmem:[%s5933_s1 + $0x50] ss:$8 sps:$4 sm:$0xff]   ;;  %v3920_v10 = vld [vmem:[%s5933_s1 + $0x154] ss:$8 sps:$4 sm:$0xff]   ;;  %v3923_v11 = vld [vmem:[%s5933_s1 + $0x44] ss:$8 sps:$4 sm:$0xff]  }
   0x5   :  { %2632 = vmatprep.subr.bf16.mxu1 %v3914_v6  ;;  %v3922_v12 = vld [vmem:[%s5933_s1 + $0x150] ss:$8 sps:$4 sm:$0xff]   ;;  %v3926_v13 = vld [vmem:[%s5933_s1 + $0x144] ss:$8 sps:$4 sm:$0xff]   ;;  %v3925_v14 = vld [vmem:[%s5933_s1 + $0x40] ss:$8 sps:$4 sm:$0xff]  }
   0x6   :  { %v3929_v15 = vld [vmem:[%s5933_s1 + $0x34] ss:$8 sps:$4 sm:$0xff]   ;;  %v3928_v16 = vld [vmem:[%s5933_s1 + $0x140] ss:$8 sps:$4 sm:$0xff]   ;;  %v3931_v18 = vld [vmem:[%s5933_s1 + $0x30] ss:$8 sps:$4 sm:$0xff]  }
   0x7   :  { %2592 = vmatpush1.bf16.msra.mxu0 %v3913_v5  ;;  %v3932_v17 = vld [vmem:[%s5933_s1 + $0x134] ss:$8 sps:$4 sm:$0xff]   ;;  %v3935_v19 = vld [vmem:[%s5933_s1 + $0x24] ss:$8 sps:$4 sm:$0xff]   ;;  %v3934_v20 = vld [vmem:[%s5933_s1 + $0x130] ss:$8 sps:$4 sm:$0xff]  }
   0x8   :  { %2593 = vmatprep.subr.bf16.mxu0 %v3917_v8  ;;  %2633 = vmatpush1.bf16.msra.mxu1 %v3916_v7  ;;  %v3938_v21 = vld [vmem:[%s5933_s1 + $0x124] ss:$8 sps:$4 sm:$0xff]   ;;  %v3937_v22 = vld [vmem:[%s5933_s1 + $0x20] ss:$8 sps:$4 sm:$0xff]   ;;  %v3941_v23 = vld [vmem:[%s5933_s1 + $0x14] ss:$8 sps:$4 sm:$0xff]  }
   0x9   :  { %2634 = vmatprep.subr.bf16.mxu1 %v3920_v10  ;;  %v3940_v24 = vld [vmem:[%s5933_s1 + $0x120] ss:$8 sps:$4 sm:$0xff]   ;;  %v3944_v25 = vld [vmem:[%s5933_s1 + $0x114] ss:$8 sps:$4 sm:$0xff]   ;;  %v3943_v26 = vld [vmem:[%s5933_s1 + $0x10] ss:$8 sps:$4 sm:$0xff]  }
   0xa   :  { %v3947_v27 = vld [vmem:[%s5933_s1 + $0x4] ss:$8 sps:$4 sm:$0xff]   ;;  %v3946_v28 = vld [vmem:[%s5933_s1 + $0x110] ss:$8 sps:$4 sm:$0xff]   ;;  %v3949_v30 = vld [vmem:[%s5933_s1] ss:$8 sps:$4 sm:$0xff]  }
   0xb   :  { %2594 = vmatpush1.bf16.msra.mxu0 %v3919_v9  ;;  %v3950_v29 = vld [vmem:[%s5933_s1 + $0x104] ss:$8 sps:$4 sm:$0xff]   ;;  %v3953_v31 = vld [vmem:[%s5933_s1 + $0xf4] ss:$8 sps:$4 sm:$0xff]   ;;  %v3952_v32 = vld [vmem:[%s5933_s1 + $0x100] ss:$8 sps:$4 sm:$0xff]  }
   0xc   :  { %2595 = vmatprep.subr.bf16.mxu0 %v3923_v11  ;;  %2635 = vmatpush1.bf16.msra.mxu1 %v3922_v12  ;;  %v3956_v33 = vld [vmem:[%s5933_s1 + $0x1f4] ss:$8 sps:$4 sm:$0xff]   ;;  %v3955_v34 = vld [vmem:[%s5933_s1 + $0xf0] ss:$8 sps:$4 sm:$0xff]   ;;  %v3959_v38 = vld [vmem:[%s5933_s1 + $0xe4] ss:$8 sps:$4 sm:$0xff]  }
   0xd   :  { %2636 = vmatprep.subr.bf16.mxu1 %v3926_v13  ;;  %v3958_v39 = vld [vmem:[%s5933_s1 + $0x1f0] ss:$8 sps:$4 sm:$0xff]   ;;  %v3962_v40 = vld [vmem:[%s5933_s1 + $0x1e4] ss:$8 sps:$4 sm:$0xff]   ;;  %v3961_v41 = vld [vmem:[%s5933_s1 + $0xe0] ss:$8 sps:$4 sm:$0xff]  }
   0xe   :  { %v4704_v42 = vshrl.u32 %v426_v35, 7  ;;  %v3965_v44 = vld [vmem:[%s5933_s1 + $0xd4] ss:$8 sps:$4 sm:$0xff]   ;;  %v3964_v45 = vld [vmem:[%s5933_s1 + $0x1e0] ss:$8 sps:$4 sm:$0xff]  }
   0xf   :  { %2596 = vmatpush1.bf16.msra.mxu0 %v3925_v14  ;;  %v3968_v46 = vld [vmem:[%s5933_s1 + $0x1d4] ss:$8 sps:$4 sm:$0xff]   ;;  %v3967_v47 = vld [vmem:[%s5933_s1 + $0xd0] ss:$8 sps:$4 sm:$0xff]   ;;  %v3971_v49 = vld [vmem:[%s5933_s1 + $0xc4] ss:$8 sps:$4 sm:$0xff]  }
  0x10   :  { %2597 = vmatprep.subr.bf16.mxu0 %v3929_v15  ;;  %2637 = vmatpush1.bf16.msra.mxu1 %v3928_v16  ;;  %v4719_v48 = vsub.s32 %v443_v43, %v4704_v42  ;;  %v3970_v50 = vld [vmem:[%s5933_s1 + $0x1d0] ss:$8 sps:$4 sm:$0xff]   ;;  %v3974_v51 = vld [vmem:[%s5933_s1 + $0x1c4] ss:$8 sps:$4 sm:$0xff]   ;;  %v3973_v53 = vld [vmem:[%s5933_s1 + $0xc0] ss:$8 sps:$4 sm:$0xff]  }
  0x11   :  { %2638 = vmatprep.subr.bf16.mxu1 %v3932_v17  ;;  %v28_v52 = vld [vmem:[%s5932_s0] sm:$0xff]  ;;  %v3977_v55 = vld [vmem:[%s5933_s1 + $0xb4] ss:$8 sps:$4 sm:$0xff]   ;;  %v3979_v59 = vld [vmem:[%s5933_s1 + $0xb0] ss:$8 sps:$4 sm:$0xff]  }
  0x12   :  { %v447_v54 = vrot.slane %v28_v52, %v4719_v48  ;;  %v3976_v56 = vld [vmem:[%s5933_s1 + $0x1c0] ss:$8 sps:$4 sm:$0xff]   ;;  %v3980_v58 = vld [vmem:[%s5933_s1 + $0x1b4] ss:$8 sps:$4 sm:$0xff]   ;;  %v3983_v61 = vld [vmem:[%s5933_s1 + $0xa4] ss:$8 sps:$4 sm:$0xff]   ;;  %v440_v63 = vcombine.high %v28_v52, %v28_v52 }
  0x13   :  { %2598 = vmatpush1.bf16.msra.mxu0 %v3931_v18  ;;  %v3982_v62 = vld [vmem:[%s5933_s1 + $0x1b0] ss:$8 sps:$4 sm:$0xff]   ;;  %v3986_v1 = vld [vmem:[%s5933_s1 + $0x1a4] ss:$8 sps:$4 sm:$0xff]   ;;  %v3985_v2 = vld [vmem:[%s5933_s1 + $0xa0] ss:$8 sps:$4 sm:$0xff]  }
  0x14   :  { %2599 = vmatprep.subr.bf16.mxu0 %v3935_v19  ;;  %2639 = vmatpush1.bf16.msra.mxu1 %v3934_v20  ;;  %v455_v57 = vcombine.high %v447_v54, %v447_v54  ;;  %v3989_v3 = vld [vmem:[%s5933_s1 + $0x94] ss:$8 sps:$4 sm:$0xff]   ;;  %v3988_v4 = vld [vmem:[%s5933_s1 + $0x1a0] ss:$8 sps:$4 sm:$0xff]   ;;  %v4769_v5 = vrot.slane %v440_v63, %v4719_v48  ;;  %v3991_v7 = vld [vmem:[%s5933_s1 + $0x90] ss:$8 sps:$4 sm:$0xff]   ;;  %v463_v13 = vrot.slane %v447_v54, %v4719_v48 }
  0x15   :  { %2640 = vmatprep.subr.bf16.mxu1 %v3938_v21  ;;  %v3992_v6 = vld [vmem:[%s5933_s1 + $0x194] ss:$8 sps:$4 sm:$0xff]   ;;  %v3995_v8 = vld [vmem:[%s5933_s1 + $0x84] ss:$8 sps:$4 sm:$0xff]   ;;  %v3994_v9 = vld [vmem:[%s5933_s1 + $0x190] ss:$8 sps:$4 sm:$0xff]  }
  0x16   :  { %v477_v60 = vrot.slane %v455_v57, %v4719_v48  ;;  %v456_v10 = vcombine.high %v4769_v5, %v4769_v5  ;;  %v3998_v11 = vld [vmem:[%s5933_s1 + $0x184] ss:$8 sps:$4 sm:$0xff]   ;;  %v3997_v12 = vld [vmem:[%s5933_s1 + $0x80] ss:$8 sps:$4 sm:$0xff]   ;;  %v4004_v14 = vld [vmem:[%s5933_s1 + $0x274] ss:$8 sps:$4 sm:$0xff]   ;;  %v485_v19 = vcombine.high %v463_v13, %v463_v13 }
  0x17   :  { %2600 = vmatpush1.bf16.msra.mxu0 %v3937_v22  ;;  %v4001_v15 = vld [vmem:[%s5933_s1 + $0x180] ss:$8 sps:$4 sm:$0xff]   ;;  %v4007_v17 = vld [vmem:[%s5933_s1 + $0x374] ss:$8 sps:$4 sm:$0xff]   ;;  %v4002_v18 = vld [vmem:[%s5933_s1 + $0x270] ss:$8 sps:$4 sm:$0xff]  }
  0x18   :  { %2601 = vmatprep.subr.bf16.mxu0 %v3941_v23  ;;  %2641 = vmatpush1.bf16.msra.mxu1 %v3940_v24  ;;  %v487_v0 = vcombine.high %v477_v60, %v477_v60  ;;  %v484_v16 = vrot.slane %v456_v10, %v4719_v48  ;;  %v4010_v20 = vld [vmem:[%s5933_s1 + $0x264] ss:$8 sps:$4 sm:$0xff]   ;;  %v4005_v21 = vld [vmem:[%s5933_s1 + $0x370] ss:$8 sps:$4 sm:$0xff]   ;;  %v4008_v24 = vld [vmem:[%s5933_s1 + $0x260] ss:$8 sps:$4 sm:$0xff]  }
  0x19   :  { %2642 = vmatprep.subr.bf16.mxu1 %v3944_v25  ;;  %2621 = vmatprep.mubr.bf16.mxu0 %v477_v60  ;;  %v4013_v23 = vld [vmem:[%s5933_s1 + $0x364] ss:$8 sps:$4 sm:$0xff]   ;;  %v4016_v25 = vld [vmem:[%s5933_s1 + $0x254] ss:$8 sps:$4 sm:$0xff]   ;;  %v4026_v36 = vld [vmem:[%s5933_s1 + $0x230] ss:$8 sps:$4 sm:$0xff]  }
  0x1a   :  { %2662 = vmatprep.mubr.bf16.mxu1 %v487_v0  ;;  %v488_v22 = vcombine.high %v484_v16, %v484_v16  ;;  %v4031_v35 = vld [vmem:[%s5933_s1 + $0x334] ss:$8 sps:$4 sm:$0xff]   ;;  %v4034_v37 = vld [vmem:[%s5933_s1 + $0x224] ss:$8 sps:$4 sm:$0xff]   ;;  %v4035_v43 = vld [vmem:[%s5933_s1 + $0x320] ss:$8 sps:$4 sm:$0xff]  }
  0x1b   :  { %2602 = vmatpush1.bf16.msra.mxu0 %v3943_v26  ;;  %v4011_v26 = vld [vmem:[%s5933_s1 + $0x360] ss:$8 sps:$4 sm:$0xff]   ;;  %v4050_v54 = vld [vmem:[%s5933_s1 + $0x2f0] ss:$8 sps:$4 sm:$0xff]   ;;  %v4061_v57 = vld [vmem:[%s5933_s1 + $0x3e4] ss:$8 sps:$4 sm:$0xff]  }
  0x1c   :  { %2603 = vmatprep.subr.bf16.mxu0 %v3947_v27  ;;  %2643 = vmatpush1.bf16.msra.mxu1 %v3946_v28  ;;  %v4019_v27 = vld [vmem:[%s5933_s1 + $0x354] ss:$8 sps:$4 sm:$0xff]   ;;  %v4014_v28 = vld [vmem:[%s5933_s1 + $0x250] ss:$8 sps:$4 sm:$0xff]   ;;  %v4047_v52 = vld [vmem:[%s5933_s1 + $0x300] ss:$8 sps:$4 sm:$0xff]  }
  0x1d   :  { %2644 = vmatprep.subr.bf16.mxu1 %v3950_v29  ;;  %v4022_v29 = vld [vmem:[%s5933_s1 + $0x244] ss:$8 sps:$4 sm:$0xff]   ;;  %v4059_v60 = vld [vmem:[%s5933_s1 + $0x3e0] ss:$8 sps:$4 sm:$0xff]   ;;  %v4065_v0 = vld [vmem:[%s5933_s1 + $0x3d0] ss:$8 sps:$4 sm:$0xff]  }
  0x1e   :  { %v4070_v63 = vld [vmem:[%s5933_s1 + $0x2c4] ss:$8 sps:$4 sm:$0xff]  }
  0x1f   :  { %2604 = vmatpush1.bf16.msra.mxu0 %v3949_v30  ;;  %v4017_v30 = vld [vmem:[%s5933_s1 + $0x350] ss:$8 sps:$4 sm:$0xff]   ;;  %v4085_v10 = vld [vmem:[%s5933_s1 + $0x3a4] ss:$8 sps:$4 sm:$0xff]  }
  0x20   :  { %2605 = vmatprep.subr.bf16.mxu0 %v3953_v31  ;;  %2645 = vmatpush1.bf16.msra.mxu1 %v3952_v32  ;;  %v4025_v31 = vld [vmem:[%s5933_s1 + $0x344] ss:$8 sps:$4 sm:$0xff]   ;;  %v4020_v32 = vld [vmem:[%s5933_s1 + $0x240] ss:$8 sps:$4 sm:$0xff]  }
  0x21   :  { %2646 = vmatprep.subr.bf16.mxu1 %v3956_v33  ;;  %v4028_v33 = vld [vmem:[%s5933_s1 + $0x234] ss:$8 sps:$4 sm:$0xff]  }
  0x23   :  { %2606 = vmatpush2.bf16.msra.mxu0 %v3955_v34  ;;  %v4023_v34 = vld [vmem:[%s5933_s1 + $0x340] ss:$8 sps:$4 sm:$0xff]  }
  0x24   :  { %2607 = vmatprep.subr.bf16.mxu0 %v3959_v38  ;;  %2647 = vmatpush2.bf16.msra.mxu1 %v3958_v39  ;;  %v4029_v38 = vld [vmem:[%s5933_s1 + $0x330] ss:$8 sps:$4 sm:$0xff]   ;;  %v4037_v39 = vld [vmem:[%s5933_s1 + $0x324] ss:$8 sps:$4 sm:$0xff]  }
  0x25   :  { %2648 = vmatprep.subr.bf16.mxu1 %v3962_v40  ;;  %v4032_v40 = vld [vmem:[%s5933_s1 + $0x220] ss:$8 sps:$4 sm:$0xff]  }
  0x27   :  { %2608 = vmatpush2.bf16.msra.mxu0 %v3961_v41  ;;  %v4040_v41 = vld [vmem:[%s5933_s1 + $0x214] ss:$8 sps:$4 sm:$0xff]  }
  0x28   :  { %2609 = vmatprep.subr.bf16.mxu0 %v3965_v44  ;;  %2649 = vmatpush2.bf16.msra.mxu1 %v3964_v45  ;;  %v4043_v44 = vld [vmem:[%s5933_s1 + $0x314] ss:$8 sps:$4 sm:$0xff]   ;;  %v4038_v45 = vld [vmem:[%s5933_s1 + $0x210] ss:$8 sps:$4 sm:$0xff]  }
  0x29   :  { %2650 = vmatprep.subr.bf16.mxu1 %v3968_v46  ;;  %v4046_v46 = vld [vmem:[%s5933_s1 + $0x204] ss:$8 sps:$4 sm:$0xff]  }
  0x2b   :  { %2610 = vmatpush2.bf16.msra.mxu0 %v3967_v47  ;;  %v4041_v47 = vld [vmem:[%s5933_s1 + $0x310] ss:$8 sps:$4 sm:$0xff]  }
  0x2c   :  { %2611 = vmatprep.subr.bf16.mxu0 %v3971_v49  ;;  %2651 = vmatpush2.bf16.msra.mxu1 %v3970_v50  ;;  %v4049_v49 = vld [vmem:[%s5933_s1 + $0x304] ss:$8 sps:$4 sm:$0xff]   ;;  %v4044_v50 = vld [vmem:[%s5933_s1 + $0x200] ss:$8 sps:$4 sm:$0xff]  }
  0x2d   :  { %2652 = vmatprep.subr.bf16.mxu1 %v3974_v51  ;;  %v4052_v51 = vld [vmem:[%s5933_s1 + $0x2f4] ss:$8 sps:$4 sm:$0xff]  }
  0x2f   :  { %2612 = vmatpush2.bf16.msra.mxu0 %v3973_v53  ;;  %v4055_v53 = vld [vmem:[%s5933_s1 + $0x3f4] ss:$8 sps:$4 sm:$0xff]  }
  0x30   :  { %2613 = vmatprep.subr.bf16.mxu0 %v3977_v55  ;;  %2653 = vmatpush2.bf16.msra.mxu1 %v3976_v56  ;;  %v4058_v55 = vld [vmem:[%s5933_s1 + $0x2e4] ss:$8 sps:$4 sm:$0xff]   ;;  %v4053_v56 = vld [vmem:[%s5933_s1 + $0x3f0] ss:$8 sps:$4 sm:$0xff]  }
  0x31   :  { %2654 = vmatprep.subr.bf16.mxu1 %v3980_v58  ;;  %v4056_v58 = vld [vmem:[%s5933_s1 + $0x2e0] ss:$8 sps:$4 sm:$0xff]  }
  0x33   :  { %2614 = vmatpush2.bf16.msra.mxu0 %v3979_v59  ;;  %v4064_v59 = vld [vmem:[%s5933_s1 + $0x2d4] ss:$8 sps:$4 sm:$0xff]  }
  0x34   :  { %2615 = vmatprep.subr.bf16.mxu0 %v3983_v61  ;;  %2655 = vmatpush2.bf16.msra.mxu1 %v3982_v62  ;;  %v4067_v61 = vld [vmem:[%s5933_s1 + $0x3d4] ss:$8 sps:$4 sm:$0xff]   ;;  %v4062_v62 = vld [vmem:[%s5933_s1 + $0x2d0] ss:$8 sps:$4 sm:$0xff]  }
  0x35   :  { %2656 = vmatprep.subr.bf16.mxu1 %v3986_v1  ;;  %v4073_v1 = vld [vmem:[%s5933_s1 + $0x3c4] ss:$8 sps:$4 sm:$0xff]  }
  0x37   :  { %2616 = vmatpush2.bf16.msra.mxu0 %v3985_v2  ;;  %v4068_v2 = vld [vmem:[%s5933_s1 + $0x2c0] ss:$8 sps:$4 sm:$0xff]  }
  0x38   :  { %2617 = vmatprep.subr.bf16.mxu0 %v3989_v3  ;;  %2657 = vmatpush2.bf16.msra.mxu1 %v3988_v4  ;;  %v4076_v3 = vld [vmem:[%s5933_s1 + $0x2b4] ss:$8 sps:$4 sm:$0xff]   ;;  %v4071_v4 = vld [vmem:[%s5933_s1 + $0x3c0] ss:$8 sps:$4 sm:$0xff]  }
  0x39   :  { %2658 = vmatprep.subr.bf16.mxu1 %v3992_v6  ;;  %v4079_v6 = vld [vmem:[%s5933_s1 + $0x3b4] ss:$8 sps:$4 sm:$0xff]  }
  0x3b   :  { %2618 = vmatpush2.bf16.msra.mxu0 %v3991_v7  ;;  %v4074_v7 = vld [vmem:[%s5933_s1 + $0x2b0] ss:$8 sps:$4 sm:$0xff]  }
  0x3c   :  { %2619 = vmatprep.subr.bf16.mxu0 %v3995_v8  ;;  %2659 = vmatpush2.bf16.msra.mxu1 %v3994_v9  ;;  %v4082_v8 = vld [vmem:[%s5933_s1 + $0x2a4] ss:$8 sps:$4 sm:$0xff]   ;;  %v4077_v9 = vld [vmem:[%s5933_s1 + $0x3b0] ss:$8 sps:$4 sm:$0xff]  }
  0x3d   :  { %2660 = vmatprep.subr.bf16.mxu1 %v3998_v11  ;;  %v4080_v11 = vld [vmem:[%s5933_s1 + $0x2a0] ss:$8 sps:$4 sm:$0xff]  }
  0x3f   :  { %2620 = vmatpush2.bf16.msra.mxu0 %v3997_v12  ;;  %v4088_v12 = vld [vmem:[%s5933_s1 + $0x294] ss:$8 sps:$4 sm:$0xff]  }
  0x40   :  { %2671 = vmatprep.subr.bf16.mxu0 %v4004_v14  ;;  %2661 = vmatpush2.bf16.msra.mxu1 %v4001_v15  ;;  %v4091_v14 = vld [vmem:[%s5933_s1 + $0x394] ss:$8 sps:$4 sm:$0xff]   ;;  %v4086_v15 = vld [vmem:[%s5933_s1 + $0x290] ss:$8 sps:$4 sm:$0xff]  }
  0x41   :  { %2712 = vmatprep.subr.bf16.mxu1 %v4007_v17  ;;  %v4089_v17 = vld [vmem:[%s5933_s1 + $0x390] ss:$8 sps:$4 sm:$0xff]  }
  0x42   :  { %2622 = vmatmul.mubr.bf16.vlgmr.msra.gmra.mxu0 %v463_v13  ;;  %v4083_v13 = vld [vmem:[%s5933_s1 + $0x3a0] ss:$8 sps:$4 sm:$0xff]  }
  0x43   :  { %2672 = vmatpush1.bf16.msra.mxu0 %v4002_v18  ;;  %2703 = vmatprep.mubr.bf16.mxu0 %v484_v16  ;;  %v4094_v16 = vld [vmem:[%s5933_s1 + $0x284] ss:$8 sps:$4 sm:$0xff]  }
  0x44   :  { %2663 = vmatmul.mubr.bf16.vlgmr.msra.gmra.mxu1 %v485_v19  ;;  %2673 = vmatprep.subr.bf16.mxu0 %v4010_v20  ;;  %v4097_v18 = vld [vmem:[%s5933_s1 + $0x384] ss:$8 sps:$4 sm:$0xff]   ;;  %v4092_v19 = vld [vmem:[%s5933_s1 + $0x280] ss:$8 sps:$4 sm:$0xff]   ;;  %v470_v20 = vrot.slane %v4769_v5, %v4719_v48 }
  0x45   :  { %2713 = vmatpush1.bf16.msra.mxu1 %v4005_v21  ;;  %2744 = vmatprep.mubr.bf16.mxu1 %v488_v22  ;;  %v4100_v21 = vld [vmem:[%s5933_s1 + $0x474] ss:$8 sps:$4 sm:$0xff]   ;;  %v4095_v22 = vld [vmem:[%s5933_s1 + $0x380] ss:$8 sps:$4 sm:$0xff]  }
  0x46   :  { %2714 = vmatprep.subr.bf16.mxu1 %v4013_v23  ;;  %v4103_v23 = vld [vmem:[%s5933_s1 + $0x574] ss:$8 sps:$4 sm:$0xff]   ;;  %v486_v5 = vcombine.high %v470_v20, %v470_v20 }
  0x47   :  { %2674 = vmatpush1.bf16.msra.mxu0 %v4008_v24  ;;  %v4098_v24 = vld [vmem:[%s5933_s1 + $0x470] ss:$8 sps:$4 sm:$0xff]  }
  0x48   :  { %2675 = vmatprep.subr.bf16.mxu0 %v4016_v25  ;;  %v4106_v25 = vld [vmem:[%s5933_s1 + $0x464] ss:$8 sps:$4 sm:$0xff]  }
  0x49   :  { %2715 = vmatpush1.bf16.msra.mxu1 %v4011_v26  ;;  %v5005_v26 = vld [vmem:[%s5932_s0 + $0x8] sm:$0xff] }
  0x4a   :  { %2716 = vmatprep.subr.bf16.mxu1 %v4019_v27  ;;  %v4101_v27 = vld [vmem:[%s5933_s1 + $0x570] ss:$8 sps:$4 sm:$0xff]  }
  0x4b   :  { %2676 = vmatpush1.bf16.msra.mxu0 %v4014_v28  ;;  %v5012_v28 = vrot.slane %v5005_v26, %v4719_v48 }
  0x4c   :  { %2677 = vmatprep.subr.bf16.mxu0 %v4022_v29  ;;  %v4109_v29 = vld [vmem:[%s5933_s1 + $0x564] ss:$8 sps:$4 sm:$0xff]  }
  0x4d   :  { %2717 = vmatpush1.bf16.msra.mxu1 %v4017_v30  ;;  %v4104_v30 = vld [vmem:[%s5933_s1 + $0x460] ss:$8 sps:$4 sm:$0xff]  }
  0x4e   :  { %2718 = vmatprep.subr.bf16.mxu1 %v4025_v31  ;;  %v504_v31 = vcombine.high %v5012_v28, %v5012_v28 }
  0x4f   :  { %2678 = vmatpush1.bf16.msra.mxu0 %v4020_v32  ;;  %v4112_v32 = vld [vmem:[%s5933_s1 + $0x454] ss:$8 sps:$4 sm:$0xff]  }
  0x50   :  { %2679 = vmatprep.subr.bf16.mxu0 %v4028_v33  ;;  %v4107_v33 = vld [vmem:[%s5933_s1 + $0x560] ss:$8 sps:$4 sm:$0xff]  }
  0x51   :  { %2719 = vmatpush1.bf16.msra.mxu1 %v4023_v34  ;;  %v526_v34 = vrot.slane %v504_v31, %v4719_v48  ;;  %v4188_v31 = vld [vmem:[%s5933_s1 + $0x480] ss:$8 sps:$4 sm:$0xff]  }
  0x52   :  { %2720 = vmatprep.subr.bf16.mxu1 %v4031_v35  ;;  %v4115_v35 = vld [vmem:[%s5933_s1 + $0x554] ss:$8 sps:$4 sm:$0xff]  }
  0x53   :  { %2680 = vmatpush1.bf16.msra.mxu0 %v4026_v36  ;;  %v4110_v36 = vld [vmem:[%s5933_s1 + $0x450] ss:$8 sps:$4 sm:$0xff]  }
  0x54   :  { %2681 = vmatprep.subr.bf16.mxu0 %v4034_v37  ;;  %v536_v37 = vcombine.high %v526_v34, %v526_v34 }
  0x55   :  { %2721 = vmatpush1.bf16.msra.mxu1 %v4029_v38  ;;  %v4118_v38 = vld [vmem:[%s5933_s1 + $0x444] ss:$8 sps:$4 sm:$0xff]  }
  0x56   :  { %2722 = vmatprep.subr.bf16.mxu1 %v4037_v39  ;;  %v4113_v39 = vld [vmem:[%s5933_s1 + $0x550] ss:$8 sps:$4 sm:$0xff]  }
  0x57   :  { %2682 = vmatpush1.bf16.msra.mxu0 %v4032_v40  ;;  %v4121_v40 = vld [vmem:[%s5933_s1 + $0x544] ss:$8 sps:$4 sm:$0xff]  }
  0x58   :  { %2683 = vmatprep.subr.bf16.mxu0 %v4040_v41  ;;  %v4116_v41 = vld [vmem:[%s5933_s1 + $0x440] ss:$8 sps:$4 sm:$0xff]  }
  0x59   :  { %2723 = vmatpush1.bf16.msra.mxu1 %v4035_v43  ;;  %v4124_v43 = vld [vmem:[%s5933_s1 + $0x434] ss:$8 sps:$4 sm:$0xff]  }
  0x5a   :  { %2724 = vmatprep.subr.bf16.mxu1 %v4043_v44  ;;  %v4119_v44 = vld [vmem:[%s5933_s1 + $0x540] ss:$8 sps:$4 sm:$0xff]  }
  0x5b   :  { %2684 = vmatpush1.bf16.msra.mxu0 %v4038_v45  ;;  %v4127_v45 = vld [vmem:[%s5933_s1 + $0x534] ss:$8 sps:$4 sm:$0xff]  }
  0x5c   :  { %2685 = vmatprep.subr.bf16.mxu0 %v4046_v46  ;;  %v4122_v46 = vld [vmem:[%s5933_s1 + $0x430] ss:$8 sps:$4 sm:$0xff]  }
  0x5d   :  { %2725 = vmatpush1.bf16.msra.mxu1 %v4041_v47  ;;  %v4130_v47 = vld [vmem:[%s5933_s1 + $0x424] ss:$8 sps:$4 sm:$0xff]  }
  0x5e   :  { %2726 = vmatprep.subr.bf16.mxu1 %v4049_v49  ;;  %v4125_v49 = vld [vmem:[%s5933_s1 + $0x530] ss:$8 sps:$4 sm:$0xff]  }
  0x5f   :  { %2686 = vmatpush1.bf16.msra.mxu0 %v4044_v50  ;;  %v4133_v50 = vld [vmem:[%s5933_s1 + $0x524] ss:$8 sps:$4 sm:$0xff]  }
  0x60   :  { %2687 = vmatprep.subr.bf16.mxu0 %v4052_v51  ;;  %v4128_v51 = vld [vmem:[%s5933_s1 + $0x420] ss:$8 sps:$4 sm:$0xff]  }
  0x61   :  { %2727 = vmatpush1.bf16.msra.mxu1 %v4047_v52  ;;  %v4136_v52 = vld [vmem:[%s5933_s1 + $0x414] ss:$8 sps:$4 sm:$0xff]  }
  0x62   :  { %2728 = vmatprep.subr.bf16.mxu1 %v4055_v53  ;;  %v4131_v53 = vld [vmem:[%s5933_s1 + $0x520] ss:$8 sps:$4 sm:$0xff]  }
  0x63   :  { %2688 = vmatpush2.bf16.msra.mxu0 %v4050_v54  ;;  %v4139_v54 = vld [vmem:[%s5933_s1 + $0x514] ss:$8 sps:$4 sm:$0xff]  }
  0x64   :  { %2689 = vmatprep.subr.bf16.mxu0 %v4058_v55  ;;  %v4134_v55 = vld [vmem:[%s5933_s1 + $0x410] ss:$8 sps:$4 sm:$0xff]  }
  0x65   :  { %2729 = vmatpush2.bf16.msra.mxu1 %v4053_v56  ;;  %v4142_v56 = vld [vmem:[%s5933_s1 + $0x404] ss:$8 sps:$4 sm:$0xff]  }
  0x66   :  { %2730 = vmatprep.subr.bf16.mxu1 %v4061_v57  ;;  %v4137_v57 = vld [vmem:[%s5933_s1 + $0x510] ss:$8 sps:$4 sm:$0xff]  }
  0x67   :  { %2690 = vmatpush2.bf16.msra.mxu0 %v4056_v58  ;;  %v4145_v58 = vld [vmem:[%s5933_s1 + $0x504] ss:$8 sps:$4 sm:$0xff]  }
  0x68   :  { %2691 = vmatprep.subr.bf16.mxu0 %v4064_v59  ;;  %v4140_v59 = vld [vmem:[%s5933_s1 + $0x400] ss:$8 sps:$4 sm:$0xff]  }
  0x69   :  { %2731 = vmatpush2.bf16.msra.mxu1 %v4059_v60  ;;  %v4148_v60 = vld [vmem:[%s5933_s1 + $0x4f4] ss:$8 sps:$4 sm:$0xff]  }
  0x6a   :  { %2732 = vmatprep.subr.bf16.mxu1 %v4067_v61  ;;  %v4143_v61 = vld [vmem:[%s5933_s1 + $0x500] ss:$8 sps:$4 sm:$0xff]  }
  0x6b   :  { %2692 = vmatpush2.bf16.msra.mxu0 %v4062_v62  ;;  %v4151_v62 = vld [vmem:[%s5933_s1 + $0x5f4] ss:$8 sps:$4 sm:$0xff]  }
  0x6c   :  { %2693 = vmatprep.subr.bf16.mxu0 %v4070_v63  ;;  %v4146_v63 = vld [vmem:[%s5933_s1 + $0x4f0] ss:$8 sps:$4 sm:$0xff]  }
  0x6d   :  { %2733 = vmatpush2.bf16.msra.mxu1 %v4065_v0  ;;  %v4154_v0 = vld [vmem:[%s5933_s1 + $0x4e4] ss:$8 sps:$4 sm:$0xff]  }
  0x6e   :  { %2734 = vmatprep.subr.bf16.mxu1 %v4073_v1  ;;  %v4149_v1 = vld [vmem:[%s5933_s1 + $0x5f0] ss:$8 sps:$4 sm:$0xff]  }
  0x6f   :  { %2694 = vmatpush2.bf16.msra.mxu0 %v4068_v2  ;;  %v4157_v2 = vld [vmem:[%s5933_s1 + $0x5e4] ss:$8 sps:$4 sm:$0xff]  }
  0x70   :  { %2695 = vmatprep.subr.bf16.mxu0 %v4076_v3  ;;  %v4152_v3 = vld [vmem:[%s5933_s1 + $0x4e0] ss:$8 sps:$4 sm:$0xff]  }
  0x71   :  { %2735 = vmatpush2.bf16.msra.mxu1 %v4071_v4  ;;  %v4160_v4 = vld [vmem:[%s5933_s1 + $0x4d4] ss:$8 sps:$4 sm:$0xff]  }
  0x72   :  { %2736 = vmatprep.subr.bf16.mxu1 %v4079_v6  ;;  %v4155_v6 = vld [vmem:[%s5933_s1 + $0x5e0] ss:$8 sps:$4 sm:$0xff]  }
  0x73   :  { %2696 = vmatpush2.bf16.msra.mxu0 %v4074_v7  ;;  %v4163_v7 = vld [vmem:[%s5933_s1 + $0x5d4] ss:$8 sps:$4 sm:$0xff]  }
  0x74   :  { %2697 = vmatprep.subr.bf16.mxu0 %v4082_v8  ;;  %v4158_v8 = vld [vmem:[%s5933_s1 + $0x4d0] ss:$8 sps:$4 sm:$0xff]  }
  0x75   :  { %2737 = vmatpush2.bf16.msra.mxu1 %v4077_v9  ;;  %v4166_v9 = vld [vmem:[%s5933_s1 + $0x4c4] ss:$8 sps:$4 sm:$0xff]  }
  0x76   :  { %2738 = vmatprep.subr.bf16.mxu1 %v4085_v10  ;;  %v4161_v10 = vld [vmem:[%s5933_s1 + $0x5d0] ss:$8 sps:$4 sm:$0xff]  }
  0x77   :  { %2698 = vmatpush2.bf16.msra.mxu0 %v4080_v11  ;;  %v4169_v11 = vld [vmem:[%s5933_s1 + $0x5c4] ss:$8 sps:$4 sm:$0xff]  }
  0x78   :  { %2699 = vmatprep.subr.bf16.mxu0 %v4088_v12  ;;  %v4164_v12 = vld [vmem:[%s5933_s1 + $0x4c0] ss:$8 sps:$4 sm:$0xff]  }
  0x79   :  { %2739 = vmatpush2.bf16.msra.mxu1 %v4083_v13  ;;  %v4172_v13 = vld [vmem:[%s5933_s1 + $0x4b4] ss:$8 sps:$4 sm:$0xff]  }
  0x7a   :  { %2740 = vmatprep.subr.bf16.mxu1 %v4091_v14  ;;  %v4167_v14 = vld [vmem:[%s5933_s1 + $0x5c0] ss:$8 sps:$4 sm:$0xff]  }
  0x7b   :  { %2700 = vmatpush2.bf16.msra.mxu0 %v4086_v15  ;;  %v4175_v15 = vld [vmem:[%s5933_s1 + $0x5b4] ss:$8 sps:$4 sm:$0xff]  }
  0x7c   :  { %2701 = vmatprep.subr.bf16.mxu0 %v4094_v16  ;;  %v4170_v16 = vld [vmem:[%s5933_s1 + $0x4b0] ss:$8 sps:$4 sm:$0xff]  }
  0x7d   :  { %2741 = vmatpush2.bf16.msra.mxu1 %v4089_v17  ;;  %v4178_v17 = vld [vmem:[%s5933_s1 + $0x4a4] ss:$8 sps:$4 sm:$0xff]  }
  0x7e   :  { %2742 = vmatprep.subr.bf16.mxu1 %v4097_v18  ;;  %v4173_v18 = vld [vmem:[%s5933_s1 + $0x5b0] ss:$8 sps:$4 sm:$0xff]  }
  0x7f   :  { %2702 = vmatpush2.bf16.msra.mxu0 %v4092_v19  ;;  %v489_v19 = vcombine.high %v5005_v26, %v5005_v26  ;;  %v4190_v26 = vld [vmem:[%s5933_s1 + $0x484] ss:$8 sps:$4 sm:$0xff]  }
  0x80   :  { %2753 = vmatprep.subr.bf16.mxu0 %v4100_v21  ;;  %v4176_v21 = vld [vmem:[%s5933_s1 + $0x4a0] ss:$8 sps:$4 sm:$0xff]  }
  0x81   :  { %2743 = vmatpush2.bf16.msra.mxu1 %v4095_v22  ;;  %v4184_v22 = vld [vmem:[%s5933_s1 + $0x494] ss:$8 sps:$4 sm:$0xff]  }
  0x82   :  { %2704 = vmatmul.mubr.bf16.vlgmr.msra.gmra.mxu0 %v470_v20  ;;  %2794 = vmatprep.subr.bf16.mxu1 %v4103_v23  ;;  %v4181_v20 = vld [vmem:[%s5933_s1 + $0x5a4] ss:$8 sps:$4 sm:$0xff]   ;;  %v4179_v23 = vld [vmem:[%s5933_s1 + $0x5a0] ss:$8 sps:$4 sm:$0xff]  }
  0x83   :  { %2754 = vmatpush1.bf16.msra.mxu0 %v4098_v24  ;;  %2785 = vmatprep.mubr.bf16.mxu0 %v526_v34  ;;  %v5176_v24 = vrot.slane %v489_v19, %v4719_v48  ;;  %v4191_v34 = vld [vmem:[%s5933_s1 + $0x580] ss:$8 sps:$4 sm:$0xff]   ;;  %v4257_v19 = vld [vmem:[%s5933_s1 + $0x7d0] ss:$8 sps:$4 sm:$0xff]  }
  0x84   :  { %2745 = vmatmul.mubr.bf16.vlgmr.msra.gmra.mxu1 %v486_v5  ;;  %2755 = vmatprep.subr.bf16.mxu0 %v4106_v25  ;;  %v4187_v5 = vld [vmem:[%s5933_s1 + $0x594] ss:$8 sps:$4 sm:$0xff]   ;;  %v4182_v25 = vld [vmem:[%s5933_s1 + $0x490] ss:$8 sps:$4 sm:$0xff]  }
  0x85   :  { %2795 = vmatpush1.bf16.msra.mxu1 %v4101_v27  ;;  %2826 = vmatprep.mubr.bf16.mxu1 %v536_v37  ;;  %v4185_v27 = vld [vmem:[%s5933_s1 + $0x590] ss:$8 sps:$4 sm:$0xff]  }
  0x86   :  { %2796 = vmatprep.subr.bf16.mxu1 %v4109_v29  ;;  %v505_v29 = vcombine.high %v5176_v24, %v5176_v24 }
  0x87   :  { %2756 = vmatpush1.bf16.msra.mxu0 %v4104_v30  ;;  %v4193_v30 = vld [vmem:[%s5933_s1 + $0x584] ss:$8 sps:$4 sm:$0xff]  }
  0x88   :  { %2757 = vmatprep.subr.bf16.mxu0 %v4112_v32  ;;  %v512_v32 = vrot.slane %v5012_v28, %v4719_v48  ;;  %v4194_v28 = vld [vmem:[%s5933_s1 + $0x670] ss:$8 sps:$4 sm:$0xff]  }
  0x89   :  { %2797 = vmatpush1.bf16.msra.mxu1 %v4107_v33  ;;  %v4196_v33 = vld [vmem:[%s5933_s1 + $0x674] ss:$8 sps:$4 sm:$0xff]  }
  0x8a   :  { %2798 = vmatprep.subr.bf16.mxu1 %v4115_v35  ;;  %v533_v35 = vrot.slane %v505_v29, %v4719_v48  ;;  %v534_v37 = vcombine.high %v512_v32, %v512_v32  ;;  %v4277_v29 = vld [vmem:[%s5933_s1 + $0x7a4] ss:$8 sps:$4 sm:$0xff]  }
  0x8b   :  { %2758 = vmatpush1.bf16.msra.mxu0 %v4110_v36  ;;  %v4199_v36 = vld [vmem:[%s5933_s1 + $0x774] ss:$8 sps:$4 sm:$0xff]  }
  0x8c   :  { %2759 = vmatprep.subr.bf16.mxu0 %v4118_v38  ;;  %v4202_v38 = vld [vmem:[%s5933_s1 + $0x664] ss:$8 sps:$4 sm:$0xff]  }
  0x8d   :  { %2799 = vmatpush1.bf16.msra.mxu1 %v4113_v39  ;;  %v4197_v39 = vld [vmem:[%s5933_s1 + $0x770] ss:$8 sps:$4 sm:$0xff]  }
  0x8e   :  { %2800 = vmatprep.subr.bf16.mxu1 %v4121_v40  ;;  %v537_v40 = vcombine.high %v533_v35, %v533_v35 }
  0x8f   :  { %2760 = vmatpush1.bf16.msra.mxu0 %v4116_v41  ;;  %v4205_v41 = vld [vmem:[%s5933_s1 + $0x764] ss:$8 sps:$4 sm:$0xff]  }
  0x90   :  { %2761 = vmatprep.subr.bf16.mxu0 %v4124_v43  ;;  %v4200_v43 = vld [vmem:[%s5933_s1 + $0x660] ss:$8 sps:$4 sm:$0xff]  }
  0x91   :  { %2801 = vmatpush1.bf16.msra.mxu1 %v4119_v44  ;;  %v4208_v44 = vld [vmem:[%s5933_s1 + $0x654] ss:$8 sps:$4 sm:$0xff]  }
  0x92   :  { %2802 = vmatprep.subr.bf16.mxu1 %v4127_v45  ;;  %v4203_v45 = vld [vmem:[%s5933_s1 + $0x760] ss:$8 sps:$4 sm:$0xff]  }
  0x93   :  { %2762 = vmatpush1.bf16.msra.mxu0 %v4122_v46  ;;  %v4211_v46 = vld [vmem:[%s5933_s1 + $0x754] ss:$8 sps:$4 sm:$0xff]  }
  0x94   :  { %2763 = vmatprep.subr.bf16.mxu0 %v4130_v47  ;;  %v4206_v47 = vld [vmem:[%s5933_s1 + $0x650] ss:$8 sps:$4 sm:$0xff]  }
  0x95   :  { %2803 = vmatpush1.bf16.msra.mxu1 %v4125_v49  ;;  %v4214_v49 = vld [vmem:[%s5933_s1 + $0x644] ss:$8 sps:$4 sm:$0xff]  }
  0x96   :  { %2804 = vmatprep.subr.bf16.mxu1 %v4133_v50  ;;  %v4209_v50 = vld [vmem:[%s5933_s1 + $0x750] ss:$8 sps:$4 sm:$0xff]  }
  0x97   :  { %2764 = vmatpush1.bf16.msra.mxu0 %v4128_v51  ;;  %v4217_v51 = vld [vmem:[%s5933_s1 + $0x744] ss:$8 sps:$4 sm:$0xff]  }
  0x98   :  { %2765 = vmatprep.subr.bf16.mxu0 %v4136_v52  ;;  %v4212_v52 = vld [vmem:[%s5933_s1 + $0x640] ss:$8 sps:$4 sm:$0xff]  }
  0x99   :  { %2805 = vmatpush1.bf16.msra.mxu1 %v4131_v53  ;;  %v4220_v53 = vld [vmem:[%s5933_s1 + $0x634] ss:$8 sps:$4 sm:$0xff]  }
  0x9a   :  { %2806 = vmatprep.subr.bf16.mxu1 %v4139_v54  ;;  %v4215_v54 = vld [vmem:[%s5933_s1 + $0x740] ss:$8 sps:$4 sm:$0xff]  }
  0x9b   :  { %2766 = vmatpush1.bf16.msra.mxu0 %v4134_v55  ;;  %v4223_v55 = vld [vmem:[%s5933_s1 + $0x734] ss:$8 sps:$4 sm:$0xff]  }
  0x9c   :  { %2767 = vmatprep.subr.bf16.mxu0 %v4142_v56  ;;  %v4218_v56 = vld [vmem:[%s5933_s1 + $0x630] ss:$8 sps:$4 sm:$0xff]  }
  0x9d   :  { %2807 = vmatpush1.bf16.msra.mxu1 %v4137_v57  ;;  %v4226_v57 = vld [vmem:[%s5933_s1 + $0x624] ss:$8 sps:$4 sm:$0xff]  }
  0x9e   :  { %2808 = vmatprep.subr.bf16.mxu1 %v4145_v58  ;;  %v4221_v58 = vld [vmem:[%s5933_s1 + $0x730] ss:$8 sps:$4 sm:$0xff]  }
  0x9f   :  { %2768 = vmatpush1.bf16.msra.mxu0 %v4140_v59  ;;  %v4229_v59 = vld [vmem:[%s5933_s1 + $0x724] ss:$8 sps:$4 sm:$0xff]  }
  0xa0   :  { %2769 = vmatprep.subr.bf16.mxu0 %v4148_v60  ;;  %v4224_v60 = vld [vmem:[%s5933_s1 + $0x620] ss:$8 sps:$4 sm:$0xff]  }
  0xa1   :  { %2809 = vmatpush1.bf16.msra.mxu1 %v4143_v61  ;;  %v4232_v61 = vld [vmem:[%s5933_s1 + $0x614] ss:$8 sps:$4 sm:$0xff]  }
  0xa2   :  { %2810 = vmatprep.subr.bf16.mxu1 %v4151_v62  ;;  %v4227_v62 = vld [vmem:[%s5933_s1 + $0x720] ss:$8 sps:$4 sm:$0xff]  }
  0xa3   :  { %2770 = vmatpush2.bf16.msra.mxu0 %v4146_v63  ;;  %v4235_v63 = vld [vmem:[%s5933_s1 + $0x714] ss:$8 sps:$4 sm:$0xff]  }
  0xa4   :  { %2771 = vmatprep.subr.bf16.mxu0 %v4154_v0  ;;  %v4230_v0 = vld [vmem:[%s5933_s1 + $0x610] ss:$8 sps:$4 sm:$0xff]  }
  0xa5   :  { %2811 = vmatpush2.bf16.msra.mxu1 %v4149_v1  ;;  %v4238_v1 = vld [vmem:[%s5933_s1 + $0x604] ss:$8 sps:$4 sm:$0xff]  }
  0xa6   :  { %2812 = vmatprep.subr.bf16.mxu1 %v4157_v2  ;;  %v4233_v2 = vld [vmem:[%s5933_s1 + $0x710] ss:$8 sps:$4 sm:$0xff]  }
  0xa7   :  { %2772 = vmatpush2.bf16.msra.mxu0 %v4152_v3  ;;  %v4241_v3 = vld [vmem:[%s5933_s1 + $0x704] ss:$8 sps:$4 sm:$0xff]  }
  0xa8   :  { %2773 = vmatprep.subr.bf16.mxu0 %v4160_v4  ;;  %v4236_v4 = vld [vmem:[%s5933_s1 + $0x600] ss:$8 sps:$4 sm:$0xff]  }
  0xa9   :  { %2813 = vmatpush2.bf16.msra.mxu1 %v4155_v6  ;;  %v4244_v6 = vld [vmem:[%s5933_s1 + $0x6f4] ss:$8 sps:$4 sm:$0xff]  }
  0xaa   :  { %2814 = vmatprep.subr.bf16.mxu1 %v4163_v7  ;;  %v4239_v7 = vld [vmem:[%s5933_s1 + $0x700] ss:$8 sps:$4 sm:$0xff]  }
  0xab   :  { %2774 = vmatpush2.bf16.msra.mxu0 %v4158_v8  ;;  %v4247_v8 = vld [vmem:[%s5933_s1 + $0x7f4] ss:$8 sps:$4 sm:$0xff]  }
  0xac   :  { %2775 = vmatprep.subr.bf16.mxu0 %v4166_v9  ;;  %v4242_v9 = vld [vmem:[%s5933_s1 + $0x6f0] ss:$8 sps:$4 sm:$0xff]  }
  0xad   :  { %2815 = vmatpush2.bf16.msra.mxu1 %v4161_v10  ;;  %v4250_v10 = vld [vmem:[%s5933_s1 + $0x6e4] ss:$8 sps:$4 sm:$0xff]  }
  0xae   :  { %2816 = vmatprep.subr.bf16.mxu1 %v4169_v11  ;;  %v4245_v11 = vld [vmem:[%s5933_s1 + $0x7f0] ss:$8 sps:$4 sm:$0xff]  }
  0xaf   :  { %2776 = vmatpush2.bf16.msra.mxu0 %v4164_v12  ;;  %v4253_v12 = vld [vmem:[%s5933_s1 + $0x7e4] ss:$8 sps:$4 sm:$0xff]  }
  0xb0   :  { %2777 = vmatprep.subr.bf16.mxu0 %v4172_v13  ;;  %v4248_v13 = vld [vmem:[%s5933_s1 + $0x6e0] ss:$8 sps:$4 sm:$0xff]  }
  0xb1   :  { %2817 = vmatpush2.bf16.msra.mxu1 %v4167_v14  ;;  %v4256_v14 = vld [vmem:[%s5933_s1 + $0x6d4] ss:$8 sps:$4 sm:$0xff]  }
  0xb2   :  { %2818 = vmatprep.subr.bf16.mxu1 %v4175_v15  ;;  %v4251_v15 = vld [vmem:[%s5933_s1 + $0x7e0] ss:$8 sps:$4 sm:$0xff]  }
  0xb3   :  { %2778 = vmatpush2.bf16.msra.mxu0 %v4170_v16  ;;  %v4259_v16 = vld [vmem:[%s5933_s1 + $0x7d4] ss:$8 sps:$4 sm:$0xff]  }
  0xb4   :  { %2779 = vmatprep.subr.bf16.mxu0 %v4178_v17  ;;  %v4254_v17 = vld [vmem:[%s5933_s1 + $0x6d0] ss:$8 sps:$4 sm:$0xff]  }
  0xb5   :  { %2819 = vmatpush2.bf16.msra.mxu1 %v4173_v18  ;;  %v4262_v18 = vld [vmem:[%s5933_s1 + $0x6c4] ss:$8 sps:$4 sm:$0xff]  }
  0xb6   :  { %2820 = vmatprep.subr.bf16.mxu1 %v4181_v20  ;;  %v4265_v20 = vld [vmem:[%s5933_s1 + $0x7c4] ss:$8 sps:$4 sm:$0xff]  }
  0xb7   :  { %2780 = vmatpush2.bf16.msra.mxu0 %v4176_v21  ;;  %v4260_v21 = vld [vmem:[%s5933_s1 + $0x6c0] ss:$8 sps:$4 sm:$0xff]  }
  0xb8   :  { %2781 = vmatprep.subr.bf16.mxu0 %v4184_v22  ;;  %v4268_v22 = vld [vmem:[%s5933_s1 + $0x6b4] ss:$8 sps:$4 sm:$0xff]  }
  0xb9   :  { %2821 = vmatpush2.bf16.msra.mxu1 %v4179_v23  ;;  %v4263_v23 = vld [vmem:[%s5933_s1 + $0x7c0] ss:$8 sps:$4 sm:$0xff]  }
  0xba   :  { %2822 = vmatprep.subr.bf16.mxu1 %v4187_v5  ;;  %v4271_v5 = vld [vmem:[%s5933_s1 + $0x7b4] ss:$8 sps:$4 sm:$0xff]  }
  0xbb   :  { %2782 = vmatpush2.bf16.msra.mxu0 %v4182_v25  ;;  %v4266_v25 = vld [vmem:[%s5933_s1 + $0x6b0] ss:$8 sps:$4 sm:$0xff]  }
  0xbc   :  { %2783 = vmatprep.subr.bf16.mxu0 %v4190_v26  ;;  %v4274_v26 = vld [vmem:[%s5933_s1 + $0x6a4] ss:$8 sps:$4 sm:$0xff]  }
  0xbd   :  { %2823 = vmatpush2.bf16.msra.mxu1 %v4185_v27  ;;  %v4269_v27 = vld [vmem:[%s5933_s1 + $0x7b0] ss:$8 sps:$4 sm:$0xff]  }
  0xbe   :  { %2824 = vmatprep.subr.bf16.mxu1 %v4193_v30  ;;  %v5369_v30 = vld [vmem:[%s5932_s0 + $0x10] sm:$0xff] }
  0xbf   :  { %2784 = vmatpush2.bf16.msra.mxu0 %v4188_v31  ;;  %v4272_v31 = vld [vmem:[%s5933_s1 + $0x6a0] ss:$8 sps:$4 sm:$0xff]  }
  0xc0   :  { %2835 = vmatprep.subr.bf16.mxu0 %v4196_v33  ;;  %v4275_v33 = vld [vmem:[%s5933_s1 + $0x7a0] ss:$8 sps:$4 sm:$0xff]  }
  0xc1   :  { %2825 = vmatpush2.bf16.msra.mxu1 %v4191_v34  ;;  %v5382_v34 = vrot.slane %v5369_v30, %v4719_v48 }
  0xc2   :  { %2786 = vmatmul.mubr.bf16.vlgmr.msra.gmra.mxu0 %v512_v32  ;;  %2876 = vmatprep.subr.bf16.mxu1 %v4199_v36  ;;  %v4280_v32 = vld [vmem:[%s5933_s1 + $0x694] ss:$8 sps:$4 sm:$0xff]   ;;  %v4278_v36 = vld [vmem:[%s5933_s1 + $0x690] ss:$8 sps:$4 sm:$0xff]  }
  0xc3   :  { %2836 = vmatpush1.bf16.msra.mxu0 %v4194_v28  ;;  %2867 = vmatprep.mubr.bf16.mxu0 %v533_v35  ;;  %v4283_v35 = vld [vmem:[%s5933_s1 + $0x794] ss:$8 sps:$4 sm:$0xff]   ;;  %v4286_v28 = vld [vmem:[%s5933_s1 + $0x684] ss:$8 sps:$4 sm:$0xff]  }
  0xc4   :  { %2827 = vmatmul.mubr.bf16.vlgmr.msra.gmra.mxu1 %v534_v37  ;;  %2837 = vmatprep.subr.bf16.mxu0 %v4202_v38  ;;  %v4281_v37 = vld [vmem:[%s5933_s1 + $0x790] ss:$8 sps:$4 sm:$0xff]   ;;  %v553_v38 = vcombine.high %v5382_v34, %v5382_v34 }
  0xc5   :  { %2877 = vmatpush1.bf16.msra.mxu1 %v4197_v39  ;;  %2908 = vmatprep.mubr.bf16.mxu1 %v537_v40  ;;  %v4289_v39 = vld [vmem:[%s5933_s1 + $0x784] ss:$8 sps:$4 sm:$0xff]   ;;  %v4284_v40 = vld [vmem:[%s5933_s1 + $0x680] ss:$8 sps:$4 sm:$0xff]  }
  0xc6   :  { %2878 = vmatprep.subr.bf16.mxu1 %v4205_v41  ;;  %v424_v41 = vld [vmem:[%s5934_s2] sm:$0x3] }
  0xc7   :  { %2838 = vmatpush1.bf16.msra.mxu0 %v4200_v43  ;;  %v428_v43 = vsub.s32 0, %v4704_v42 }
  0xc8   :  { %2839 = vmatprep.subr.bf16.mxu0 %v4208_v44  ;;  %v519_v44 = vrot.slane %v5176_v24, %v4719_v48 }
  0xc9   :  { %2879 = vmatpush1.bf16.msra.mxu1 %v4203_v45  ;;  %v4293_v45 = vld [vmem:[%s5933_s1 + $0x874] ss:$8 sps:$4 sm:$0xff]   ;;  %v429_v24 = vrot.slane %v424_v41, %v428_v43 }
  0xca   :  { %2880 = vmatprep.subr.bf16.mxu1 %v4211_v46  ;;  %v4287_v46 = vld [vmem:[%s5933_s1 + $0x780] ss:$8 sps:$4 sm:$0xff]  }
  0xcb   :  { %2840 = vmatpush1.bf16.msra.mxu0 %v4206_v47  ;;  %v432_v47 = vsub.s32 1, %v4704_v42 }
  0xcc   :  { %2841 = vmatprep.subr.bf16.mxu0 %v4214_v49  ;;  %v575_v49 = vrot.slane %v553_v38, %v4719_v48 }
  0xcd   :  { %2881 = vmatpush1.bf16.msra.mxu1 %v4209_v50  ;;  %v4296_v50 = vld [vmem:[%s5933_s1 + $0x974] ss:$8 sps:$4 sm:$0xff]   ;;  %v433_v42 = vrot.slane %v424_v41, %v432_v47 }
  0xce   :  { %2882 = vmatprep.subr.bf16.mxu1 %v4217_v51  ;;  %v4291_v51 = vld [vmem:[%s5933_s1 + $0x870] ss:$8 sps:$4 sm:$0xff]  }
  0xcf   :  { %2842 = vmatpush1.bf16.msra.mxu0 %v4212_v52  ;;  %v535_v52 = vcombine.high %v519_v44, %v519_v44 }
  0xd0   :  { %2843 = vmatprep.subr.bf16.mxu0 %v4220_v53  ;;  %v4299_v53 = vld [vmem:[%s5933_s1 + $0x864] ss:$8 sps:$4 sm:$0xff]  }
  0xd1   :  { %2883 = vmatpush1.bf16.msra.mxu1 %v4215_v54  ;;  %v4294_v54 = vld [vmem:[%s5933_s1 + $0x970] ss:$8 sps:$4 sm:$0xff]  }
  0xd2   :  { %2884 = vmatprep.subr.bf16.mxu1 %v4223_v55  ;;  %v585_v55 = vcombine.high %v575_v49, %v575_v49 }
  0xd3   :  { %2844 = vmatpush1.bf16.msra.mxu0 %v4218_v56 }
  0xd4   :  { %2845 = vmatprep.subr.bf16.mxu0 %v4226_v57  ;;  %v4297_v57 = vld [vmem:[%s5933_s1 + $0x860] ss:$8 sps:$4 sm:$0xff]  }
  0xd5   :  { %2885 = vmatpush1.bf16.msra.mxu1 %v4221_v58  ;;  %v4302_v58 = vld [vmem:[%s5933_s1 + $0x964] ss:$8 sps:$4 sm:$0xff]  }
  0xd6   :  { %2886 = vmatprep.subr.bf16.mxu1 %v4229_v59 }
  0xd7   :  { %2846 = vmatpush1.bf16.msra.mxu0 %v4224_v60  ;;  %v4300_v60 = vld [vmem:[%s5933_s1 + $0x960] ss:$8 sps:$4 sm:$0xff]  }
  0xd8   :  { %2847 = vmatprep.subr.bf16.mxu0 %v4232_v61 }
  0xd9   :  { %2887 = vmatpush1.bf16.msra.mxu1 %v4227_v62 }
  0xda   :  { %2888 = vmatprep.subr.bf16.mxu1 %v4235_v63  ;;  %v4305_v63 = vld [vmem:[%s5933_s1 + $0x854] ss:$8 sps:$4 sm:$0xff]  }
  0xdb   :  { %2848 = vmatpush1.bf16.msra.mxu0 %v4230_v0 }
  0xdc   :  { %2849 = vmatprep.subr.bf16.mxu0 %v4238_v1 }
  0xdd   :  { %2889 = vmatpush1.bf16.msra.mxu1 %v4233_v2  ;;  %v4303_v2 = vld [vmem:[%s5933_s1 + $0x850] ss:$8 sps:$4 sm:$0xff]  }
  0xde   :  { %2890 = vmatprep.subr.bf16.mxu1 %v4241_v3  ;;  %v4308_v3 = vld [vmem:[%s5933_s1 + $0x954] ss:$8 sps:$4 sm:$0xff]  }
  0xdf   :  { %2850 = vmatpush1.bf16.msra.mxu0 %v4236_v4 }
  0xe0   :  { %2851 = vmatprep.subr.bf16.mxu0 %v4244_v6 }
  0xe1   :  { %2891 = vmatpush1.bf16.msra.mxu1 %v4239_v7 }
  0xe2   :  { %2892 = vmatprep.subr.bf16.mxu1 %v4247_v8  ;;  %v4306_v8 = vld [vmem:[%s5933_s1 + $0x950] ss:$8 sps:$4 sm:$0xff]  }
  0xe3   :  { %2852 = vmatpush2.bf16.msra.mxu0 %v4242_v9 }
  0xe4   :  { %2853 = vmatprep.subr.bf16.mxu0 %v4250_v10  ;;  %v4311_v10 = vld [vmem:[%s5933_s1 + $0x844] ss:$8 sps:$4 sm:$0xff]  }
  0xe5   :  { %2893 = vmatpush2.bf16.msra.mxu1 %v4245_v11 }
  0xe6   :  { %2894 = vmatprep.subr.bf16.mxu1 %v4253_v12  ;;  %v4314_v12 = vld [vmem:[%s5933_s1 + $0x944] ss:$8 sps:$4 sm:$0xff]  }
  0xe7   :  { %2854 = vmatpush2.bf16.msra.mxu0 %v4248_v13  ;;  %v4309_v13 = vld [vmem:[%s5933_s1 + $0x840] ss:$8 sps:$4 sm:$0xff]  }
  0xe8   :  { %2855 = vmatprep.subr.bf16.mxu0 %v4256_v14 }
  0xe9   :  { %2895 = vmatpush2.bf16.msra.mxu1 %v4251_v15  ;;  %v4312_v15 = vld [vmem:[%s5933_s1 + $0x940] ss:$8 sps:$4 sm:$0xff]  }
  0xea   :  { %2896 = vmatprep.subr.bf16.mxu1 %v4259_v16  ;;  %v4317_v16 = vld [vmem:[%s5933_s1 + $0x834] ss:$8 sps:$4 sm:$0xff]  }
  0xeb   :  { %2856 = vmatpush2.bf16.msra.mxu0 %v4254_v17  ;;  %v4320_v17 = vld [vmem:[%s5933_s1 + $0x934] ss:$8 sps:$4 sm:$0xff]  }
  0xec   :  { %2857 = vmatprep.subr.bf16.mxu0 %v4262_v18  ;;  %v4315_v18 = vld [vmem:[%s5933_s1 + $0x830] ss:$8 sps:$4 sm:$0xff]  }
  0xed   :  { %2897 = vmatpush2.bf16.msra.mxu1 %v4257_v19  ;;  %v4318_v19 = vld [vmem:[%s5933_s1 + $0x930] ss:$8 sps:$4 sm:$0xff]  }
  0xee   :  { %2898 = vmatprep.subr.bf16.mxu1 %v4265_v20  ;;  %v4323_v20 = vld [vmem:[%s5933_s1 + $0x824] ss:$8 sps:$4 sm:$0xff]  }
  0xef   :  { %2858 = vmatpush2.bf16.msra.mxu0 %v4260_v21  ;;  %v4326_v21 = vld [vmem:[%s5933_s1 + $0x924] ss:$8 sps:$4 sm:$0xff]  }
  0xf0   :  { %2859 = vmatprep.subr.bf16.mxu0 %v4268_v22  ;;  %v4321_v22 = vld [vmem:[%s5933_s1 + $0x820] ss:$8 sps:$4 sm:$0xff]  }
  0xf1   :  { %2899 = vmatpush2.bf16.msra.mxu1 %v4263_v23  ;;  %v4329_v23 = vld [vmem:[%s5933_s1 + $0x814] ss:$8 sps:$4 sm:$0xff]  }
  0xf2   :  { %2900 = vmatprep.subr.bf16.mxu1 %v4271_v5  ;;  %v4324_v5 = vld [vmem:[%s5933_s1 + $0x920] ss:$8 sps:$4 sm:$0xff]  }
  0xf3   :  { %2860 = vmatpush2.bf16.msra.mxu0 %v4266_v25  ;;  %v4332_v25 = vld [vmem:[%s5933_s1 + $0x914] ss:$8 sps:$4 sm:$0xff]  }
  0xf4   :  { %2861 = vmatprep.subr.bf16.mxu0 %v4274_v26  ;;  %v4327_v26 = vld [vmem:[%s5933_s1 + $0x810] ss:$8 sps:$4 sm:$0xff]  }
  0xf5   :  { %2901 = vmatpush2.bf16.msra.mxu1 %v4269_v27 }
  0xf6   :  { %2902 = vmatprep.subr.bf16.mxu1 %v4277_v29 }
  0xf7   :  { %2862 = vmatpush2.bf16.msra.mxu0 %v4272_v31 }
  0xf8   :  { %2863 = vmatprep.subr.bf16.mxu0 %v4280_v32 }
  0xf9   :  { %2903 = vmatpush2.bf16.msra.mxu1 %v4275_v33 }
  0xfa   :  { %2904 = vmatprep.subr.bf16.mxu1 %v4283_v35 }
  0xfb   :  { %2864 = vmatpush2.bf16.msra.mxu0 %v4278_v36 }
  0xfc   :  { %2865 = vmatprep.subr.bf16.mxu0 %v4286_v28 }
  0xfd   :  { %2905 = vmatpush2.bf16.msra.mxu1 %v4281_v37 }
  0xfe   :  { %2906 = vmatprep.subr.bf16.mxu1 %v4289_v39 }
  0xff   :  { %2866 = vmatpush2.bf16.msra.mxu0 %v4284_v40 }
 0x100   :  { %2917 = vmatprep.subr.bf16.mxu0 %v4293_v45 }
 0x101   :  { %2907 = vmatpush2.bf16.msra.mxu1 %v4287_v46 }
 0x102   :  { %v2623_v56 = vpop.f32.mrf.mxu0  ;;  %2868 = vmatmul.mubr.bf16.vlgmr.msra.gmra.mxu0 %v519_v44  ;;  %2958 = vmatprep.subr.bf16.mxu1 %v4296_v50 }
 0x103   :  { %v2624_v59 = vadd.f32 %v2623_v56, %v429_v24  ;;  %2918 = vmatpush1.bf16.msra.mxu0 %v4291_v51  ;;  %2949 = vmatprep.mubr.bf16.mxu0 %v575_v49 }
 0x104   :  { %v2625_v61 = vpop.f32.mrf.mxu0  ;;  %v2664_v62 = vpop.f32.mrf.mxu1  ;;  %2909 = vmatmul.mubr.bf16.vlgmr.msra.gmra.mxu1 %v535_v52  ;;  %2919 = vmatprep.subr.bf16.mxu0 %v4299_v53 }
 0x105   :  { %v2626_v0 = vadd.f32 %v2625_v61, %v433_v42  ;;  %v5442_v1 = vadd.f32 %v2664_v62, %v2624_v59  ;;  %2959 = vmatpush1.bf16.msra.mxu1 %v4294_v54  ;;  %2990 = vmatprep.mubr.bf16.mxu1 %v585_v55 }
 0x106   :  { %v2627_v4 = vpop.f32.mrf.mxu0  ;;  %v2666_v6 = vpop.f32.mrf.mxu1  ;;  %2960 = vmatprep.subr.bf16.mxu1 %v4302_v58 }
 0x107   :  { %v5450_v7 = vadd.f32 %v2666_v6, %v2626_v0  ;;  %2920 = vmatpush1.bf16.msra.mxu0 %v4297_v57 }
 0x108   :  { %v2628_v9 = vpop.f32.mrf.mxu0  ;;  %2921 = vmatprep.subr.bf16.mxu0 %v4305_v63  ;;  %v2668_v11 = vpop.f32.mrf.mxu1 }
 0x109   :  { %2961 = vmatpush1.bf16.msra.mxu1 %v4300_v60 }
 0x10a   :  { %2962 = vmatprep.subr.bf16.mxu1 %v4308_v3  ;;  %v2669_v14 = vpop.f32.mrf.mxu1 }
 0x10b   :  { %2922 = vmatpush1.bf16.msra.mxu0 %v4303_v2 }
 0x10c   :  { %2923 = vmatprep.subr.bf16.mxu0 %v4311_v10 }
 0x10d   :  { %2963 = vmatpush1.bf16.msra.mxu1 %v4306_v8 }
 0x10e   :  { %2964 = vmatprep.subr.bf16.mxu1 %v4314_v12 }
 0x10f   :  { %2924 = vmatpush1.bf16.msra.mxu0 %v4309_v13 }
 0x110   :  { %2925 = vmatprep.subr.bf16.mxu0 %v4317_v16 }
 0x111   :  { %2965 = vmatpush1.bf16.msra.mxu1 %v4312_v15 }
 0x112   :  { %2966 = vmatprep.subr.bf16.mxu1 %v4320_v17 }
 0x113   :  { %2926 = vmatpush1.bf16.msra.mxu0 %v4315_v18 }
 0x114   :  { %2927 = vmatprep.subr.bf16.mxu0 %v4323_v20 }
 0x115   :  { %2967 = vmatpush1.bf16.msra.mxu1 %v4318_v19 }
 0x116   :  { %2968 = vmatprep.subr.bf16.mxu1 %v4326_v21 }
 0x117   :  { %2928 = vmatpush1.bf16.msra.mxu0 %v4321_v22 }
 0x118   :  { %12 = vsyncpa [#allocation3], 0  ;;  %2929 = vmatprep.subr.bf16.mxu0 %v4329_v23  ;;  %v4335_v27 = vld [vmem:[%s5933_s1 + $0x804] ss:$8 sps:$4 sm:$0xff]   ;;  %v4330_v29 = vld [vmem:[%s5933_s1 + $0x910] ss:$8 sps:$4 sm:$0xff]   ;;  %v538_v55 = vcombine.high %v5369_v30, %v5369_v30  ;;  %v561_v4 = vrot.slane %v5382_v34, %v4719_v48 }
 0x119   :  { %2969 = vmatpush1.bf16.msra.mxu1 %v4324_v5  ;;  %v4338_v31 = vld [vmem:[%s5933_s1 + $0x904] ss:$8 sps:$4 sm:$0xff]   ;;  %v4333_v32 = vld [vmem:[%s5933_s1 + $0x800] ss:$8 sps:$4 sm:$0xff]   ;;  %v4341_v33 = vld [vmem:[%s5933_s1 + $0x8f4] ss:$8 sps:$4 sm:$0xff]  }
 0x11a   :  { %2970 = vmatprep.subr.bf16.mxu1 %v4332_v25  ;;  %v4336_v35 = vld [vmem:[%s5933_s1 + $0x900] ss:$8 sps:$4 sm:$0xff]   ;;  %v4344_v36 = vld [vmem:[%s5933_s1 + $0x9f4] ss:$8 sps:$4 sm:$0xff]   ;;  %v4339_v28 = vld [vmem:[%s5933_s1 + $0x8f0] ss:$8 sps:$4 sm:$0xff]   ;;  %v5593_v59 = vrot.slane %v538_v55, %v4719_v48  ;;  %v583_v11 = vcombine.high %v561_v4, %v561_v4 }
 0x11b   :  { %2930 = vmatpush1.bf16.msra.mxu0 %v4327_v26  ;;  %v4347_v37 = vld [vmem:[%s5933_s1 + $0x8e4] ss:$8 sps:$4 sm:$0xff]   ;;  %v4342_v38 = vld [vmem:[%s5933_s1 + $0x9f0] ss:$8 sps:$4 sm:$0xff]   ;;  %v4345_v40 = vld [vmem:[%s5933_s1 + $0x8e0] ss:$8 sps:$4 sm:$0xff]  }
 0x11c   :  { %2931 = vmatprep.subr.bf16.mxu0 %v4335_v27  ;;  %v4350_v39 = vld [vmem:[%s5933_s1 + $0x9e4] ss:$8 sps:$4 sm:$0xff]   ;;  %v4353_v41 = vld [vmem:[%s5933_s1 + $0x8d4] ss:$8 sps:$4 sm:$0xff]   ;;  %v4348_v43 = vld [vmem:[%s5933_s1 + $0x9e0] ss:$8 sps:$4 sm:$0xff]   ;;  %v554_v0 = vcombine.high %v5593_v59, %v5593_v59 }
 0x11d   :  { %2971 = vmatpush1.bf16.msra.mxu1 %v4330_v29  ;;  %v4356_v44 = vld [vmem:[%s5933_s1 + $0x9d4] ss:$8 sps:$4 sm:$0xff]   ;;  %v4351_v45 = vld [vmem:[%s5933_s1 + $0x8d0] ss:$8 sps:$4 sm:$0xff]   ;;  %v4359_v46 = vld [vmem:[%s5933_s1 + $0x8c4] ss:$8 sps:$4 sm:$0xff]  }
 0x11e   :  { %2972 = vmatprep.subr.bf16.mxu1 %v4338_v31  ;;  %v4354_v47 = vld [vmem:[%s5933_s1 + $0x9d0] ss:$8 sps:$4 sm:$0xff]   ;;  %v4362_v49 = vld [vmem:[%s5933_s1 + $0x9c4] ss:$8 sps:$4 sm:$0xff]   ;;  %v4357_v50 = vld [vmem:[%s5933_s1 + $0x8c0] ss:$8 sps:$4 sm:$0xff]   ;;  %v582_v9 = vrot.slane %v554_v0, %v4719_v48 }
 0x11f   :  { %2932 = vmatpush1.bf16.msra.mxu0 %v4333_v32  ;;  %v4365_v24 = vld [vmem:[%s5933_s1 + $0x8b4] ss:$8 sps:$4 sm:$0xff]   ;;  %v4360_v51 = vld [vmem:[%s5933_s1 + $0x9c0] ss:$8 sps:$4 sm:$0xff]   ;;  %v4363_v53 = vld [vmem:[%s5933_s1 + $0x8b0] ss:$8 sps:$4 sm:$0xff]  }
 0x120   :  { %2933 = vmatprep.subr.bf16.mxu0 %v4341_v33  ;;  %v4368_v52 = vld [vmem:[%s5933_s1 + $0x9b4] ss:$8 sps:$4 sm:$0xff]   ;;  %v4371_v42 = vld [vmem:[%s5933_s1 + $0x8a4] ss:$8 sps:$4 sm:$0xff]   ;;  %v4366_v54 = vld [vmem:[%s5933_s1 + $0x9b0] ss:$8 sps:$4 sm:$0xff]   ;;  %v586_v14 = vcombine.high %v582_v9, %v582_v9 }
 0x121   :  { %2973 = vmatpush1.bf16.msra.mxu1 %v4336_v35  ;;  %v4374_v56 = vld [vmem:[%s5933_s1 + $0x9a4] ss:$8 sps:$4 sm:$0xff]   ;;  %v4369_v57 = vld [vmem:[%s5933_s1 + $0x8a0] ss:$8 sps:$4 sm:$0xff]   ;;  %v4377_v58 = vld [vmem:[%s5933_s1 + $0x894] ss:$8 sps:$4 sm:$0xff]  }
 0x122   :  { %2974 = vmatprep.subr.bf16.mxu1 %v4344_v36  ;;  %v4372_v30 = vld [vmem:[%s5933_s1 + $0x9a0] ss:$8 sps:$4 sm:$0xff]   ;;  %v4380_v60 = vld [vmem:[%s5933_s1 + $0x994] ss:$8 sps:$4 sm:$0xff]   ;;  %v4375_v61 = vld [vmem:[%s5933_s1 + $0x890] ss:$8 sps:$4 sm:$0xff]  }
 0x123   :  { %2934 = vmatpush2.bf16.msra.mxu0 %v4339_v28  ;;  %v4383_v62 = vld [vmem:[%s5933_s1 + $0x884] ss:$8 sps:$4 sm:$0xff]   ;;  %v4378_v63 = vld [vmem:[%s5933_s1 + $0x990] ss:$8 sps:$4 sm:$0xff]   ;;  %v4381_v3 = vld [vmem:[%s5933_s1 + $0x880] ss:$8 sps:$4 sm:$0xff]  }
 0x124   :  { %2935 = vmatprep.subr.bf16.mxu0 %v4347_v37  ;;  %v4386_v2 = vld [vmem:[%s5933_s1 + $0x984] ss:$8 sps:$4 sm:$0xff]   ;;  %v4389_v6 = vld [vmem:[%s5933_s1 + $0xa74] ss:$8 sps:$4 sm:$0xff]   ;;  %v4384_v8 = vld [vmem:[%s5933_s1 + $0x980] ss:$8 sps:$4 sm:$0xff]  }
 0x125   :  { %2975 = vmatpush2.bf16.msra.mxu1 %v4342_v38  ;;  %v4392_v10 = vld [vmem:[%s5933_s1 + $0xb74] ss:$8 sps:$4 sm:$0xff]   ;;  %v4387_v34 = vld [vmem:[%s5933_s1 + $0xa70] ss:$8 sps:$4 sm:$0xff]   ;;  %v4395_v12 = vld [vmem:[%s5933_s1 + $0xa64] ss:$8 sps:$4 sm:$0xff]  }
 0x126   :  { %2976 = vmatprep.subr.bf16.mxu1 %v4350_v39  ;;  %v4390_v13 = vld [vmem:[%s5933_s1 + $0xb70] ss:$8 sps:$4 sm:$0xff]   ;;  %v4398_v16 = vld [vmem:[%s5933_s1 + $0xb64] ss:$8 sps:$4 sm:$0xff]   ;;  %v4393_v18 = vld [vmem:[%s5933_s1 + $0xa60] ss:$8 sps:$4 sm:$0xff]  }
 0x127   :  { %2936 = vmatpush2.bf16.msra.mxu0 %v4345_v40  ;;  %v4401_v21 = vld [vmem:[%s5933_s1 + $0xa54] ss:$8 sps:$4 sm:$0xff]   ;;  %v4407_v31 = vld [vmem:[%s5933_s1 + $0xa44] ss:$8 sps:$4 sm:$0xff]   ;;  %v4402_v33 = vld [vmem:[%s5933_s1 + $0xb50] ss:$8 sps:$4 sm:$0xff]  }
 0x128   :  { %2937 = vmatprep.subr.bf16.mxu0 %v4353_v41  ;;  %v4404_v26 = vld [vmem:[%s5933_s1 + $0xb54] ss:$8 sps:$4 sm:$0xff]   ;;  %v4410_v35 = vld [vmem:[%s5933_s1 + $0xb44] ss:$8 sps:$4 sm:$0xff]   ;;  %v4405_v28 = vld [vmem:[%s5933_s1 + $0xa40] ss:$8 sps:$4 sm:$0xff]  }
 0x129   :  { %2977 = vmatpush2.bf16.msra.mxu1 %v4348_v43  ;;  %v4413_v37 = vld [vmem:[%s5933_s1 + $0xa34] ss:$8 sps:$4 sm:$0xff]   ;;  %v4408_v38 = vld [vmem:[%s5933_s1 + $0xb40] ss:$8 sps:$4 sm:$0xff]   ;;  %v4411_v40 = vld [vmem:[%s5933_s1 + $0xa30] ss:$8 sps:$4 sm:$0xff]  }
 0x12a   :  { %2978 = vmatprep.subr.bf16.mxu1 %v4356_v44  ;;  %v4416_v39 = vld [vmem:[%s5933_s1 + $0xb34] ss:$8 sps:$4 sm:$0xff]   ;;  %v4419_v41 = vld [vmem:[%s5933_s1 + $0xa24] ss:$8 sps:$4 sm:$0xff]   ;;  %v4414_v43 = vld [vmem:[%s5933_s1 + $0xb30] ss:$8 sps:$4 sm:$0xff]  }
 0x12b   :  { %2938 = vmatpush2.bf16.msra.mxu0 %v4351_v45  ;;  %v4422_v44 = vld [vmem:[%s5933_s1 + $0xb24] ss:$8 sps:$4 sm:$0xff]   ;;  %v4417_v45 = vld [vmem:[%s5933_s1 + $0xa20] ss:$8 sps:$4 sm:$0xff]   ;;  %v4440_v55 = vld [vmem:[%s5933_s1 + $0xbf4] ss:$8 sps:$4 sm:$0xff]  }
 0x12c   :  { %2939 = vmatprep.subr.bf16.mxu0 %v4359_v46  ;;  %v4425_v46 = vld [vmem:[%s5933_s1 + $0xa14] ss:$8 sps:$4 sm:$0xff]   ;;  %v4447_v0 = vld [vmem:[%s5933_s1 + $0xad0] ss:$8 sps:$4 sm:$0xff]   ;;  %vm2585_vm0 = vcmask 523264   ;;  %vm4545_vm1 = vmmov 0  }
 0x12d   :  { %2979 = vmatpush2.bf16.msra.mxu1 %v4354_v47  ;;  %v4420_v47 = vld [vmem:[%s5933_s1 + $0xb20] ss:$8 sps:$4 sm:$0xff]  }
 0x12e   :  { %2980 = vmatprep.subr.bf16.mxu1 %v4362_v49  ;;  %v4428_v49 = vld [vmem:[%s5933_s1 + $0xb14] ss:$8 sps:$4 sm:$0xff]  }
 0x12f   :  { %2940 = vmatpush2.bf16.msra.mxu0 %v4357_v50  ;;  %v4423_v50 = vld [vmem:[%s5933_s1 + $0xa10] ss:$8 sps:$4 sm:$0xff]  }
 0x130   :  { %2941 = vmatprep.subr.bf16.mxu0 %v4365_v24  ;;  %v4431_v24 = vld [vmem:[%s5933_s1 + $0xa04] ss:$8 sps:$4 sm:$0xff]  }
 0x131   :  { %2981 = vmatpush2.bf16.msra.mxu1 %v4360_v51  ;;  %v4426_v51 = vld [vmem:[%s5933_s1 + $0xb10] ss:$8 sps:$4 sm:$0xff]  }
 0x132   :  { %2982 = vmatprep.subr.bf16.mxu1 %v4368_v52  ;;  %v4434_v52 = vld [vmem:[%s5933_s1 + $0xb04] ss:$8 sps:$4 sm:$0xff]  }
 0x133   :  { %2942 = vmatpush2.bf16.msra.mxu0 %v4363_v53  ;;  %v4429_v53 = vld [vmem:[%s5933_s1 + $0xa00] ss:$8 sps:$4 sm:$0xff]  }
 0x134   :  { %2943 = vmatprep.subr.bf16.mxu0 %v4371_v42  ;;  %v4437_v42 = vld [vmem:[%s5933_s1 + $0xaf4] ss:$8 sps:$4 sm:$0xff]  }
 0x135   :  { %2983 = vmatpush2.bf16.msra.mxu1 %v4366_v54  ;;  %v4432_v54 = vld [vmem:[%s5933_s1 + $0xb00] ss:$8 sps:$4 sm:$0xff]  }
 0x136   :  { %2984 = vmatprep.subr.bf16.mxu1 %v4374_v56  ;;  %v4435_v56 = vld [vmem:[%s5933_s1 + $0xaf0] ss:$8 sps:$4 sm:$0xff]  }
 0x137   :  { %2944 = vmatpush2.bf16.msra.mxu0 %v4369_v57  ;;  %v4443_v57 = vld [vmem:[%s5933_s1 + $0xae4] ss:$8 sps:$4 sm:$0xff]  }
 0x138   :  { %2945 = vmatprep.subr.bf16.mxu0 %v4377_v58  ;;  %v4438_v58 = vld [vmem:[%s5933_s1 + $0xbf0] ss:$8 sps:$4 sm:$0xff]  }
 0x139   :  { %2985 = vmatpush2.bf16.msra.mxu1 %v4372_v30  ;;  %v4446_v30 = vld [vmem:[%s5933_s1 + $0xbe4] ss:$8 sps:$4 sm:$0xff]  }
 0x13a   :  { %2986 = vmatprep.subr.bf16.mxu1 %v4380_v60  ;;  %v4441_v60 = vld [vmem:[%s5933_s1 + $0xae0] ss:$8 sps:$4 sm:$0xff]  }
 0x13b   :  { %2946 = vmatpush2.bf16.msra.mxu0 %v4375_v61  ;;  %v4449_v61 = vld [vmem:[%s5933_s1 + $0xad4] ss:$8 sps:$4 sm:$0xff]  }
 0x13c   :  { %2947 = vmatprep.subr.bf16.mxu0 %v4383_v62  ;;  %v4444_v62 = vld [vmem:[%s5933_s1 + $0xbe0] ss:$8 sps:$4 sm:$0xff]  }
 0x13d   :  { %2987 = vmatpush2.bf16.msra.mxu1 %v4378_v63  ;;  %v4452_v63 = vld [vmem:[%s5933_s1 + $0xbd4] ss:$8 sps:$4 sm:$0xff]  }
 0x13e   :  { %2988 = vmatprep.subr.bf16.mxu1 %v4386_v2  ;;  %v4455_v2 = vld [vmem:[%s5933_s1 + $0xac4] ss:$8 sps:$4 sm:$0xff]  }
 0x13f   :  { %2948 = vmatpush2.bf16.msra.mxu0 %v4381_v3  ;;  %v4450_v3 = vld [vmem:[%s5933_s1 + $0xbd0] ss:$8 sps:$4 sm:$0xff]  }
 0x140   :  { %2999 = vmatprep.subr.bf16.mxu0 %v4389_v6  ;;  %v4453_v6 = vld [vmem:[%s5933_s1 + $0xac0] ss:$8 sps:$4 sm:$0xff]  }
 0x141   :  { %2989 = vmatpush2.bf16.msra.mxu1 %v4384_v8  ;;  %v4461_v8 = vld [vmem:[%s5933_s1 + $0xab4] ss:$8 sps:$4 sm:$0xff]  }
 0x142   :  { %v2705_v15 = vpop.f32.mrf.mxu0  ;;  %2950 = vmatmul.mubr.bf16.vlgmr.msra.gmra.mxu0 %v561_v4  ;;  %3040 = vmatprep.subr.bf16.mxu1 %v4392_v10  ;;  %v4458_v4 = vld [vmem:[%s5933_s1 + $0xbc4] ss:$8 sps:$4 sm:$0xff]   ;;  %v4464_v10 = vld [vmem:[%s5933_s1 + $0xbb4] ss:$8 sps:$4 sm:$0xff]  }
 0x143   :  { %v2706_v17 = vadd.f32 %v2705_v15, %v5442_v1  ;;  %3000 = vmatpush1.bf16.msra.mxu0 %v4387_v34  ;;  %3031 = vmatprep.mubr.bf16.mxu0 %v582_v9  ;;  %v4396_v1 = vld [vmem:[%s5933_s1 + $0xb60] ss:$8 sps:$4 sm:$0xff]   ;;  %v4459_v34 = vld [vmem:[%s5933_s1 + $0xab0] ss:$8 sps:$4 sm:$0xff]   ;;  %v4473_v15 = vld [vmem:[%s5933_s1 + $0xa94] ss:$8 sps:$4 sm:$0xff]  }
 0x144   :  { %v2707_v19 = vpop.f32.mrf.mxu0  ;;  %v2746_v20 = vpop.f32.mrf.mxu1  ;;  %2991 = vmatmul.mubr.bf16.vlgmr.msra.gmra.mxu1 %v583_v11  ;;  %3001 = vmatprep.subr.bf16.mxu0 %v4395_v12  ;;  %v4456_v9 = vld [vmem:[%s5933_s1 + $0xbc0] ss:$8 sps:$4 sm:$0xff]   ;;  %v4467_v11 = vld [vmem:[%s5933_s1 + $0xaa4] ss:$8 sps:$4 sm:$0xff]   ;;  %v4462_v12 = vld [vmem:[%s5933_s1 + $0xbb0] ss:$8 sps:$4 sm:$0xff]  }
 0x145   :  { %v2708_v22 = vadd.f32 %v2707_v19, %v5450_v7  ;;  %v5647_v23 = vadd.f32 %v2746_v20, %v2706_v17  ;;  %3041 = vmatpush1.bf16.msra.mxu1 %v4390_v13  ;;  %3072 = vmatprep.mubr.bf16.mxu1 %v586_v14  ;;  %v4399_v7 = vld [vmem:[%s5933_s1 + $0xa50] ss:$8 sps:$4 sm:$0xff]   ;;  %v4470_v13 = vld [vmem:[%s5933_s1 + $0xba4] ss:$8 sps:$4 sm:$0xff]   ;;  %v4465_v14 = vld [vmem:[%s5933_s1 + $0xaa0] ss:$8 sps:$4 sm:$0xff]  }
 0x146   :  { %v2709_v5 = vpop.f32.mrf.mxu0  ;;  %v2748_v25 = vpop.f32.mrf.mxu1  ;;  %3042 = vmatprep.subr.bf16.mxu1 %v4398_v16  ;;  %v4468_v16 = vld [vmem:[%s5933_s1 + $0xba0] ss:$8 sps:$4 sm:$0xff]   ;;  %v4476_v17 = vld [vmem:[%s5933_s1 + $0xb94] ss:$8 sps:$4 sm:$0xff]   ;;  %v4479_v19 = vld [vmem:[%s5933_s1 + $0xa84] ss:$8 sps:$4 sm:$0xff]  }
 0x147   :  { %v5655_v27 = vadd.f32 %v2748_v25, %v2708_v22  ;;  %3002 = vmatpush1.bf16.msra.mxu0 %v4393_v18  ;;  %v4471_v18 = vld [vmem:[%s5933_s1 + $0xa90] ss:$8 sps:$4 sm:$0xff]   ;;  %v4477_v22 = vld [vmem:[%s5933_s1 + $0xa80] ss:$8 sps:$4 sm:$0xff]   ;;  %v4486_v5 = vld [vmem:[%s5933_s1 + $0xc34] ss:$8 sps:$4 sm:$0xff]  }
 0x148   :  { %v2710_v29 = vpop.f32.mrf.mxu0  ;;  %3003 = vmatprep.subr.bf16.mxu0 %v4401_v21  ;;  %v2750_v32 = vpop.f32.mrf.mxu1  ;;  %v4474_v20 = vld [vmem:[%s5933_s1 + $0xb90] ss:$8 sps:$4 sm:$0xff]   ;;  %v4482_v21 = vld [vmem:[%s5933_s1 + $0xb84] ss:$8 sps:$4 sm:$0xff]   ;;  %v4480_v25 = vld [vmem:[%s5933_s1 + $0xb80] ss:$8 sps:$4 sm:$0xff]  }
 0x149   :  { %3043 = vmatpush1.bf16.msra.mxu1 %v4396_v1  ;;  %v568_v1 = vrot.slane %v5593_v59, %v4719_v48  ;;  %v4489_v59 = vld [vmem:[%s5933_s1 + $0xc24] ss:$8 sps:$4 sm:$0xff]   ;;  %v4487_v32 = vld [vmem:[%s5933_s1 + $0xc20] ss:$8 sps:$4 sm:$0xff]  }
 0x14a   :  { %3044 = vmatprep.subr.bf16.mxu1 %v4404_v26  ;;  %v2751_v36 = vpop.f32.mrf.mxu1  ;;  %v4484_v26 = vld [vmem:[%s5933_s1 + $0xc30] ss:$8 sps:$4 sm:$0xff]  }
 0x14b   :  { %3004 = vmatpush1.bf16.msra.mxu0 %v4399_v7  ;;  %v584_v7 = vcombine.high %v568_v1, %v568_v1 }
 0x14c   :  { %3005 = vmatprep.subr.bf16.mxu0 %v4407_v31 }
 0x14d   :  { %3045 = vmatpush1.bf16.msra.mxu1 %v4402_v33  ;;  %v4543_v33 = vmov 0  }
 0x14e   :  { %3046 = vmatprep.subr.bf16.mxu1 %v4410_v35 }
 0x14f   :  { %3006 = vmatpush1.bf16.msra.mxu0 %v4405_v28  ;;  %v4492_v28 = vld [vmem:[%s5933_s1 + $0xc14] ss:$8 sps:$4 sm:$0xff]  }
 0x150   :  { %3007 = vmatprep.subr.bf16.mxu0 %v4413_v37 }
 0x151   :  { %3047 = vmatpush1.bf16.msra.mxu1 %v4408_v38 }
 0x152   :  { %3048 = vmatprep.subr.bf16.mxu1 %v4416_v39 }
 0x153   :  { %3008 = vmatpush1.bf16.msra.mxu0 %v4411_v40 }
 0x154   :  { %3009 = vmatprep.subr.bf16.mxu0 %v4419_v41  ;;  %v4490_v41 = vld [vmem:[%s5933_s1 + $0xc10] ss:$8 sps:$4 sm:$0xff]  }
 0x155   :  { %3049 = vmatpush1.bf16.msra.mxu1 %v4414_v43 }
 0x156   :  { %3050 = vmatprep.subr.bf16.mxu1 %v4422_v44  ;;  %v4495_v44 = vld [vmem:[%s5933_s1 + $0xc04] ss:$8 sps:$4 sm:$0xff]  }
 0x157   :  { %3010 = vmatpush1.bf16.msra.mxu0 %v4417_v45 }
 0x158   :  { %3011 = vmatprep.subr.bf16.mxu0 %v4425_v46 }
 0x159   :  { %3051 = vmatpush1.bf16.msra.mxu1 %v4420_v47  ;;  %v4497_v47 = vld [vmem:[%s5935_s3 + $0x38] sm:$0xff]  }
 0x15a   :  { %3052 = vmatprep.subr.bf16.mxu1 %v4428_v49  ;;  %v4498_v49 = vld [vmem:[%s5935_s3 + $0x70] sm:$0xff]  }
 0x15b   :  { %3012 = vmatpush1.bf16.msra.mxu0 %v4423_v50  ;;  %v4493_v50 = vld [vmem:[%s5933_s1 + $0xc00] ss:$8 sps:$4 sm:$0xff]  }
 0x15c   :  { %3013 = vmatprep.subr.bf16.mxu0 %v4431_v24  ;;  %v3429_v24 = vld.sshfl [vmem:[%s5932_s0 + $0x18] sm:$0x1 pattern:$0x75316420] }
 0x15d   :  { %3053 = vmatpush1.bf16.msra.mxu1 %v4426_v51  ;;  %v4499_v51 = vld [vmem:[%s5935_s3 + $0x30] sm:$0xff]  }
 0x15e   :  { %3054 = vmatprep.subr.bf16.mxu1 %v4434_v52  ;;  %v600_v52 = vrot.slane %v3429_v24, %v4719_v48 }
 0x15f   :  { %3014 = vmatpush1.bf16.msra.mxu0 %v4429_v53 }
 0x160   :  { %3015 = vmatprep.subr.bf16.mxu0 %v4437_v42  ;;  %v4500_v42 = vld [vmem:[%s5935_s3 + $0x68] sm:$0xff]  }
 0x161   :  { %3055 = vmatpush1.bf16.msra.mxu1 %v4432_v54 }
 0x162   :  { %3056 = vmatprep.subr.bf16.mxu1 %v4440_v55  ;;  %v4501_v55 = vld [vmem:[%s5935_s3 + $0x28] sm:$0xff]  }
 0x163   :  { %3016 = vmatpush2.bf16.msra.mxu0 %v4435_v56 }
 0x164   :  { %3017 = vmatprep.subr.bf16.mxu0 %v4443_v57 }
 0x165   :  { %3057 = vmatpush2.bf16.msra.mxu1 %v4438_v58 }
 0x166   :  { %3058 = vmatprep.subr.bf16.mxu1 %v4446_v30 }
 0x167   :  { %3018 = vmatpush2.bf16.msra.mxu0 %v4441_v60 }
 0x168   :  { %3019 = vmatprep.subr.bf16.mxu0 %v4449_v61  ;;  %v4502_v61 = vld [vmem:[%s5935_s3 + $0x60] sm:$0xff]  }
 0x169   :  { %3059 = vmatpush2.bf16.msra.mxu1 %v4444_v62 }
 0x16a   :  { %3060 = vmatprep.subr.bf16.mxu1 %v4452_v63  ;;  %v4503_v63 = vld [vmem:[%s5935_s3 + $0x20] sm:$0xff]  }
 0x16b   :  { %3020 = vmatpush2.bf16.msra.mxu0 %v4447_v0 }
 0x16c   :  { %3021 = vmatprep.subr.bf16.mxu0 %v4455_v2 }
 0x16d   :  { %3061 = vmatpush2.bf16.msra.mxu1 %v4450_v3  ;;  %v4504_v3 = vld [vmem:[%s5935_s3 + $0x58] sm:$0xff]  }
 0x16e   :  { %3062 = vmatprep.subr.bf16.mxu1 %v4458_v4  ;;  %v4505_v4 = vld [vmem:[%s5935_s3 + $0x18] sm:$0xff]  }
 0x16f   :  { %3022 = vmatpush2.bf16.msra.mxu0 %v4453_v6 }
 0x170   :  { %3023 = vmatprep.subr.bf16.mxu0 %v4461_v8  ;;  %v4506_v8 = vld [vmem:[%s5935_s3 + $0x50] sm:$0xff]  }
 0x171   :  { %3063 = vmatpush2.bf16.msra.mxu1 %v4456_v9  ;;  %v4507_v9 = vld [vmem:[%s5935_s3 + $0x10] sm:$0xff]  }
 0x172   :  { %3064 = vmatprep.subr.bf16.mxu1 %v4464_v10  ;;  %v4508_v10 = vld [vmem:[%s5935_s3 + $0x48] sm:$0xff]  }
 0x173   :  { %3024 = vmatpush2.bf16.msra.mxu0 %v4459_v34  ;;  %v4509_v34 = vld [vmem:[%s5935_s3 + $0x8] sm:$0xff]  }
 0x174   :  { %3025 = vmatprep.subr.bf16.mxu0 %v4467_v11  ;;  %v4510_v11 = vld [vmem:[%s5935_s3 + $0x40] sm:$0xff]  }
 0x175   :  { %3065 = vmatpush2.bf16.msra.mxu1 %v4462_v12  ;;  %v4511_v12 = vld [vmem:[%s5935_s3] sm:$0xff]  }
 0x176   :  { %3066 = vmatprep.subr.bf16.mxu1 %v4470_v13  ;;  %v4512_v13 = vld [vmem:[%s5937_s5 + $0x38] sm:$0xff]  }
 0x177   :  { %3026 = vmatpush2.bf16.msra.mxu0 %v4465_v14  ;;  %v4544_v14 = vmov 0.0  }
 0x178   :  { %3027 = vmatprep.subr.bf16.mxu0 %v4473_v15  ;;  %v4513_v15 = vld [vmem:[%s5937_s5 + $0x30] sm:$0xff]  }
 0x179   :  { %3067 = vmatpush2.bf16.msra.mxu1 %v4468_v16  ;;  %v4514_v16 = vld [vmem:[%s5937_s5 + $0x28] sm:$0xff]  }
 0x17a   :  { %3068 = vmatprep.subr.bf16.mxu1 %v4476_v17  ;;  %v4515_v17 = vld [vmem:[%s5937_s5 + $0x20] sm:$0xff]  }
 0x17b   :  { %3028 = vmatpush2.bf16.msra.mxu0 %v4471_v18  ;;  %v4516_v18 = vld [vmem:[%s5937_s5 + $0x18] sm:$0xff]  }
 0x17c   :  { %3029 = vmatprep.subr.bf16.mxu0 %v4479_v19 }
 0x17d   :  { %3069 = vmatpush2.bf16.msra.mxu1 %v4474_v20 }
 0x17e   :  { %3070 = vmatprep.subr.bf16.mxu1 %v4482_v21 }
 0x17f   :  { %3030 = vmatpush2.bf16.msra.mxu0 %v4477_v22 }
 0x180   :  { %3089 = vmatprep.subr.bf16.mxu0 %v4486_v5 }
 0x181   :  { %3071 = vmatpush2.bf16.msra.mxu1 %v4480_v25 }
 0x182   :  { %v2787_v29 = vpop.f32.mrf.mxu0  ;;  %3032 = vmatmul.mubr.bf16.vlgmr.msra.gmra.mxu0 %v568_v1 }
 0x183   :  { %v2788_v31 = vadd.f32 %v2787_v29, %v5647_v23  ;;  %3090 = vmatpush1.bf16.msra.mxu0 %v4484_v26  ;;  %3113 = vmatprep.mubr.bf16.mxu0 %v4543_v33 }
 0x184   :  { %v2789_v35 = vpop.f32.mrf.mxu0  ;;  %v2828_v36 = vpop.f32.mrf.mxu1  ;;  %3073 = vmatmul.mubr.bf16.vlgmr.msra.gmra.mxu1 %v584_v7  ;;  %3091 = vmatprep.subr.bf16.mxu0 %v4489_v59 }
 0x185   :  { %v2790_v37 = vadd.f32 %v2789_v35, %v5655_v27  ;;  %v2829_v38 = vadd.f32 %v2828_v36, %v2788_v31  ;;  %v4496_v27 = vld [vmem:[%s5935_s3 + $0x78] sm:$0xff]  }
 0x186   :  { %v2791_v39 = vpop.f32.mrf.mxu0  ;;  %v2830_v23 = vpop.f32.mrf.mxu1  ;;  %3849 = vmatprep.subr.bf16.mxu1 %v4496_v27 }
 0x187   :  { %v2831_v40 = vadd.f32 %v2830_v23, %v2790_v37  ;;  %3092 = vmatpush1.bf16.msra.mxu0 %v4487_v32  ;;  %3850 = vmatpush3.bf16.msra.mxu1 %v4497_v47 }
 0x188   :  { %v2792_v43 = vpop.f32.mrf.mxu0  ;;  %3093 = vmatprep.subr.bf16.mxu0 %v4492_v28  ;;  %v2832_v45 = vpop.f32.mrf.mxu1  ;;  %3851 = vmatprep.subr.bf16.mxu1 %v4498_v49 }
 0x18a   :  { %v2833_v46 = vpop.f32.mrf.mxu1 }
 0x18b   :  { %3094 = vmatpush1.bf16.msra.mxu0 %v4490_v41  ;;  %3852 = vmatpush3.bf16.msra.mxu1 %v4499_v51 }
 0x18c   :  { %3095 = vmatprep.subr.bf16.mxu0 %v4495_v44  ;;  %3853 = vmatprep.subr.bf16.mxu1 %v4500_v42  ;;  %v4518_v42 = vld [vmem:[%s5937_s5 + $0x8] sm:$0xff]  }
 0x18f   :  { %3096 = vmatpush1.bf16.msra.mxu0 %v4493_v50  ;;  %3854 = vmatpush3.bf16.msra.mxu1 %v4501_v55 }
 0x190   :  { %3855 = vmatprep.subr.bf16.mxu1 %v4502_v61  ;;  %3880 = vmatprep.subr.bf16.mxu0 %v4544_v14 }
 0x192   :  { %3822 = vmatmul.mubr.msk.bf16.vlgmr.msra.gmra.mxu0 %vm2585_vm0, %v600_v52 }
 0x193   :  { %3856 = vmatpush3.bf16.msra.mxu1 %v4503_v63  ;;  %3881 = vmatpush3.bf16.msra.mxu0 %v4512_v13  ;;  %v3840_v63 = vld [vmem:[%s5938_s6] ss:$0 sm:$0xff] }
 0x194   :  { %3857 = vmatprep.subr.bf16.mxu1 %v4504_v3  ;;  %3882 = vmatprep.subr.bf16.mxu0 %v4544_v14 }
 0x195   :  { %3896 = vmatprep.mubr.msk.bf16.mxu0 %vm4545_vm1, %v4544_v14 }
 0x197   :  { %3858 = vmatpush3.bf16.msra.mxu1 %v4505_v4  ;;  %3883 = vmatpush3.bf16.msra.mxu0 %v4513_v15 }
 0x198   :  { %3859 = vmatprep.subr.bf16.mxu1 %v4506_v8  ;;  %3884 = vmatprep.subr.bf16.mxu0 %v4544_v14 }
 0x19b   :  { %3860 = vmatpush3.bf16.msra.mxu1 %v4507_v9  ;;  %3885 = vmatpush3.bf16.msra.mxu0 %v4514_v16 }
 0x19c   :  { %3861 = vmatprep.subr.bf16.mxu1 %v4508_v10  ;;  %3886 = vmatprep.subr.bf16.mxu0 %v4544_v14 }
 0x19f   :  { %3862 = vmatpush3.bf16.msra.mxu1 %v4509_v34  ;;  %3887 = vmatpush3.bf16.msra.mxu0 %v4515_v17 }
 0x1a0   :  { %3863 = vmatprep.subr.bf16.mxu1 %v4510_v11  ;;  %3888 = vmatprep.subr.bf16.mxu0 %v4544_v14 }
 0x1a3   :  { %3864 = vmatpush3.bf16.msra.mxu1 %v4511_v12  ;;  %3889 = vmatpush3.bf16.msra.mxu0 %v4516_v18 }
 0x1a4   :  { %3890 = vmatprep.subr.bf16.mxu0 %v4544_v14 }
 0x1c2   :  { %v2869_v53 = vpop.f32.mrf.mxu0 }
 0x1c3   :  { %v2870_v54 = vadd.f32 %v2869_v53, %v2829_v38  ;;  %v4517_v53 = vld [vmem:[%s5937_s5 + $0x10] sm:$0xff]  }
 0x1c4   :  { %v2871_v56 = vpop.f32.mrf.mxu0  ;;  %v2910_v57 = vpop.f32.mrf.mxu1  ;;  %3891 = vmatpush3.bf16.msra.mxu0 %v4517_v53 }
 0x1c5   :  { %v2872_v58 = vadd.f32 %v2871_v56, %v2831_v40  ;;  %v2911_v48 = vadd.f32 %v2910_v57, %v2870_v54  ;;  %3892 = vmatprep.subr.bf16.mxu0 %v4544_v14  ;;  %v4519_v54 = vld [vmem:[%s5937_s5] sm:$0xff]   ;;  %s4546_s5 = smov [#allocation2]  }
 0x1c6   :  { %v2873_v30 = vpop.f32.mrf.mxu0  ;;  %v2912_v60 = vpop.f32.mrf.mxu1  ;;  %v3823_v56 = vld [vmem:[%s5936_s4] ss:$0 sm:$0xff]  ;;  %s3421_s23 = sshll.u32 %s4546_s5, 4  ;;  %s3422_s23 = int_to_ptr.vmem [resolvable:$true] %s3421_s23 }
 0x1c7   :  { %v2913_v62 = vadd.f32 %v2912_v60, %v2872_v58  ;;  %s4520_s4 = scalar_lea.vmem %s3422_s23, 32  ;;  %p4525_p1 = scmp.lt.s32.totalorder %s3422_s23, %s3422_s23 }
 0x1c8   :  { %v2874_v0 = vpop.f32.mrf.mxu0  ;;  %v2914_v2 = vpop.f32.mrf.mxu1  ;;  %3893 = vmatpush3.bf16.msra.mxu0 %v4518_v42  ;;  %p4521_p0 = scmp.ne.s32.totalorder %s3422_s23, %s4520_s4  ;;  %p4526_p2 = scmp.lt.s32.totalorder %s4520_s4, %s4520_s4 }
 0x1c9   :  { %3894 = vmatprep.subr.bf16.mxu0 %v4544_v14 }
 0x1ca   :  { %v2915_v6 = vpop.f32.mrf.mxu1  ;;  %p4527_p3 = por %p4526_p2, %p4525_p1 }
 0x1cc   :  { %3895 = vmatpush3.bf16.msra.mxu0 %v4519_v54  ;;  %p4528_p4 = pnand %p4527_p3, %p4521_p0 }
 0x202   :  { %v2951_v19 = vpop.f32.mrf.mxu0 }
 0x203   :  { %v2952_v20 = vadd.f32 %v2951_v19, %v2911_v48 }
 0x204   :  { %v2953_v21 = vpop.f32.mrf.mxu0  ;;  %v2992_v22 = vpop.f32.mrf.mxu1 }
 0x205   :  { %v2954_v1 = vadd.f32 %v2953_v21, %v2913_v62  ;;  %v2993_v5 = vadd.f32 %v2992_v22, %v2952_v20 }
 0x206   :  { %v2955_v25 = vpop.f32.mrf.mxu0  ;;  %v2994_v26 = vpop.f32.mrf.mxu1 }
 0x207   :  { %v2995_v7 = vadd.f32 %v2994_v26, %v2954_v1 }
 0x208   :  { %v2956_v59 = vpop.f32.mrf.mxu0  ;;  %v2996_v29 = vpop.f32.mrf.mxu1 }
 0x20a   :  { %v2997_v31 = vpop.f32.mrf.mxu1 }
 0x242   :  { %v3033_v32 = vpop.f32.mrf.mxu0 }
 0x243   :  { %v3034_v23 = vadd.f32 %v3033_v32, %v2993_v5 }
 0x244   :  { %v3035_v33 = vpop.f32.mrf.mxu0  ;;  %v3074_v35 = vpop.f32.mrf.mxu1 }
 0x245   :  { %v3036_v40 = vadd.f32 %v3035_v33, %v2995_v7  ;;  %v3075_v41 = vadd.f32 %v3074_v35, %v3034_v23 }
 0x246   :  { %v3037_v36 = vpop.f32.mrf.mxu0  ;;  %v3076_v28 = vpop.f32.mrf.mxu1 }
 0x247   :  { %v3077_v44 = vadd.f32 %v3076_v28, %v3036_v40 }
 0x248   :  { %v3038_v37 = vpop.f32.mrf.mxu0  ;;  %v3078_v38 = vpop.f32.mrf.mxu1 }
 0x24a   :  { %v3079_v39 = vpop.f32.mrf.mxu1 }
 0x252   :  { %v3115_v43 = vpop.f32.mrf.mxu0 }
 0x253   :  { %v3116_v45 = vadd.f32 %v3115_v43, %v3075_v41 }
 0x254   :  { %v3117_v46 = vpop.f32.mrf.mxu0 }
 0x255   :  { %v3118_v27 = vadd.f32 %v3117_v46, %v3077_v44  ;;  %v3122_v47 = vmax.f32 %v3116_v45, 0.0 }
 0x256   :  { %v3119_v49 = vpop.f32.mrf.mxu0 }
 0x257   :  { %v3123_v50 = vmax.f32 %v3118_v27, 0.0  ;;  %v3124_v52 = vpack.c.bf16 %v3122_v47, %v3122_v47 }
 0x258   :  { %v3120_v24 = vpop.f32.mrf.mxu0 }
 0x259   :  { %v3125_v51 = vpack.c.bf16 %v3123_v50, %v3123_v50 }
 0x25b   :  { %3293 = vmatprep.mubr.bf16.mxu1 %v3125_v51 }
 0x25c   :  { %3294 = vmatmul.mubr.bf16.vlgmr.msra.gmra.mxu1 %v3124_v52 }
 0x31c   :  { %v3865_v55 = vpop.f32.mrf.mxu1 }
 0x31e   :  { %v3866_v57 = vpop.f32.mrf.mxu1 }
 0x31f   :  { %v3867_v58 = vadd.f32 %v3866_v57, %v3865_v55 }
 0x320   :  { %v3868_v48 = vpop.f32.mrf.mxu1 }
 0x321   :  { %v3296_v30 = vadd.f32 %v3867_v58, %v3823_v56 }
 0x322   :  { %v3869_v60 = vpop.f32.mrf.mxu1 }
 0x323   :  { %v3301_v61 = vmax.f32 %v3296_v30, 0.0 }
 0x325   :  { %v3302_v62 = vpack.c.bf16 %v3301_v61, %v3301_v61 }
 0x327   :  { %3897 = vmatmul.mubr.bf16.vlgmr.msra.gmra.mxu0 %v3302_v62 }
 0x3e7   :  { %v3408_v0 = vpop.f32.mrf.mxu0 }
 0x3e8   :  { %v3409_v2 = vadd.f32 %v3840_v63, %v3408_v0 }
 0x3e9   :  { %v3898_v3 = vpop.f32.mrf.mxu0 }
 0x3ea   :  { %3414 = vst [vmem:[#allocation2] sm:$0x3] %v3409_v2 }
 0x3eb   :  { %v3411_v4 = vpop.f32.mrf.mxu0 }
 0x3ec   :  { %4531 = shalt.err (!%p4528_p4)
}
 0x3ed   :  { %3424 = dma.vmem_to_hbm [thread:$0]  %s3422_s23, 32, %s5939_s7, [#allocation3]   ;;  %v3899_v6 = vpop.f32.mrf.mxu0 }
 0x3ee   :  { %4540 = dma.done.wait [#allocation3], 32  }
 0x3ef   :  { %4541 = vsyncadd [#allocation3], 4294967264 }
 0x3f0   :  { %3428 = vsyncpa [#allocation3], 1 }

</bundles_post_ra>
